<compile_context>
chip_gen: v7x
topology: tpu7x:2x2x1
jax: 0.10.0
libtpu: 0.0.40
codegen_flags: <defaults>
</compile_context>

<pallas_src>
import functools

import jax
import jax.numpy as jnp
from jax.experimental import pallas as pl
from jax.experimental.pallas import tpu as pltpu

BN_EPS = 1e-5
LANE = 128                      # channel padding granularity (lane width)
CO_TILE = 128                   # output-channel tile (second grid axis)
VMEM_LIMIT = 32 * 1024 * 1024   # well under v7x's 64 MiB physical VMEM


def _round_up(x, m):
    return (x + m - 1) // m * m


# ======================================================================================
# in-kernel helpers
# ======================================================================================
def _fill_padded(xp_ref, act, *, H, W, Wp):
    """Write act (H, W, C) f32 into a zero-framed (H+2, Wp, C) VMEM scratch.

    Rows 0 / H+1 and columns [W, Wp) form the zero halo; the *left* halo column is
    obtained for free from the roll wrap-around in _accum_taps (it reads the previous
    row's right padding), so every store here is (8,128)-aligned.
    """
    C = xp_ref.shape[-1]
    zrow = jnp.zeros((1, Wp, C), jnp.float32)
    xp_ref[0:1] = zrow
    xp_ref[H + 1:H + 2] = zrow
    xp_ref[1:H + 1, W:, :] = jnp.zeros((H, Wp - W, C), jnp.float32)
    xp_ref[1:H + 1, :W, :] = act


def _accum_taps(xp_ref, w_ref, acc, *, H, Wp):
    """acc (H*Wp, Co_t) += 3x3 conv of the padded scratch with w_ref (9, Cin, Co_t).

    Per kh we take a contiguous row slab and flatten it (layout-clean: Wp % 8 == 0); the
    kw shift is a pltpu.roll on the flattened sublane axis (no misaligned slices).  Valid
    outputs live at flat row i*Wp + j with j < W; the rest is discarded in _finish_conv.
    """
    M = H * Wp
    for kh in range(3):
        slab = xp_ref[kh:kh + H].reshape(M, -1)               # f32 (M, Cin)
        for kw in range(3):
            shift = (1 - kw) % M                              # shifted[r] = slab[r + kw - 1]
            s = slab if shift == 0 else pltpu.roll(slab, shift, axis=0)
            acc = acc + jnp.dot(s.astype(jnp.bfloat16), w_ref[kh * 3 + kw],
                                preferred_element_type=jnp.float32)
    return acc


def _finish_conv(acc, b_ref, y_ref, stat_ref, *, H, W, Wp):
    """Bias add, extract the valid window, store bf16 output + per-channel sum/sum_sq."""
    acc = acc + b_ref[...]                                    # (1, Co_t) broadcast
    y = acc.reshape(H, Wp, -1)[:, :W, :]                      # aligned slice (W % 8 == 0)
    y16 = y.astype(jnp.bfloat16)
    y_ref[0] = y16
    yf = y16.astype(jnp.float32).reshape(H * W, -1)
    ssum = jnp.sum(yf, axis=0, keepdims=True)
    ssq = jnp.sum(yf * yf, axis=0, keepdims=True)
    stat_ref[0] = jnp.concatenate([ssum, ssq], axis=0)        # (2, Co_t)


# ======================================================================================
# kernels
# ======================================================================================
def _upsample_kernel(x_ref, w_ref, b_ref, o_ref, *, Hs, Ws):
    """ConvTranspose2d(k=2, s=2) as one lane-dense matmul; output is phase-major
    (Hs, Ws, 4*CoutP) with columns ordered (di, dj, cout)."""
    x = x_ref[0].reshape(Hs * Ws, -1)                         # bf16 (Hs*Ws, CinP)
    y = jnp.dot(x, w_ref[...], preferred_element_type=jnp.float32) + b_ref[...]
    o_ref[0] = y.reshape(Hs, Ws, -1).astype(o_ref.dtype)


def _conv1_kernel(up_ref, dn_ref, wu_ref, wd_ref, b_ref, y_ref, stat_ref,
                  xpa_ref, xpb_ref, *, H, W, Wp):
    """Conv3x3 over the fused channel-concat([upsampled, skip]) + bias; emits BN1 stats."""
    co_t = y_ref.shape[-1]
    acc = jnp.zeros((H * Wp, co_t), jnp.float32)
    _fill_padded(xpa_ref, up_ref[0].astype(jnp.float32), H=H, W=W, Wp=Wp)
    acc = _accum_taps(xpa_ref, wu_ref, acc, H=H, Wp=Wp)
    _fill_padded(xpb_ref, dn_ref[0].astype(jnp.float32), H=H, W=W, Wp=Wp)
    acc = _accum_taps(xpb_ref, wd_ref, acc, H=H, Wp=Wp)
    _finish_conv(acc, b_ref, y_ref, stat_ref, H=H, W=W, Wp=Wp)


def _conv2_kernel(x_ref, a_ref, c_ref, w_ref, b_ref, y_ref, stat_ref, xp_ref,
                  *, H, W, Wp):
    """[fused BN1-apply + ReLU] -> Conv3x3 -> bias; emits BN2 stats."""
    co_t = y_ref.shape[-1]
    act = jnp.maximum(x_ref[0].astype(jnp.float32) * a_ref[...] + c_ref[...], 0.0)
    _fill_padded(xp_ref, act, H=H, W=W, Wp=Wp)
    acc = jnp.zeros((H * Wp, co_t), jnp.float32)
    acc = _accum_taps(xp_ref, w_ref, acc, H=H, Wp=Wp)
    _finish_conv(acc, b_ref, y_ref, stat_ref, H=H, W=W, Wp=Wp)


def _bn_relu_kernel(x_ref, a_ref, c_ref, o_ref):
    """Final BN2-apply + ReLU, tiled over (batch, C_out tiles), lane-dense."""
    x = x_ref[0].astype(jnp.float32)
    o_ref[0] = jnp.maximum(x * a_ref[...] + c_ref[...], 0.0).astype(o_ref.dtype)


# ======================================================================================
# pallas_call wrappers
# ======================================================================================
def upsample_2x_phase_major(x, w, b):
    N, Hs, Ws, cin_p = x.shape
    cout4 = w.shape[-1]
    return pl.pallas_call(
        functools.partial(_upsample_kernel, Hs=Hs, Ws=Ws),
        out_shape=jax.ShapeDtypeStruct((N, Hs, Ws, cout4), jnp.bfloat16),
        grid=(N,),
        in_specs=[
            pl.BlockSpec((1, Hs, Ws, cin_p), lambda n: (n, 0, 0, 0)),
            pl.BlockSpec((cin_p, cout4), lambda n: (0, 0)),
            pl.BlockSpec((1, cout4), lambda n: (0, 0)),
        ],
        out_specs=pl.BlockSpec((1, Hs, Ws, cout4), lambda n: (n, 0, 0, 0)),
        compiler_params=pltpu.CompilerParams(
            dimension_semantics=("parallel",),
            vmem_limit_bytes=VMEM_LIMIT),
        cost_estimate=pl.CostEstimate(
            flops=2 * N * Hs * Ws * cin_p * cout4,
            transcendentals=0,
            bytes_accessed=x.size * 2 + w.size * 2 + N * Hs * Ws * cout4 * 2),
    )(x, w, b)


def conv3x3_concat_stats(up, dn, w_up, w_dn, bias):
    N, H, W, cup = up.shape
    cdn = dn.shape[-1]
    cout_p = w_up.shape[-1]
    Wp = _round_up(W + 1, 8)
    n_co = cout_p // CO_TILE
    return pl.pallas_call(
        functools.partial(_conv1_kernel, H=H, W=W, Wp=Wp),
        out_shape=(jax.ShapeDtypeStruct((N, H, W, cout_p), jnp.bfloat16),
                   jax.ShapeDtypeStruct((N, 2, cout_p), jnp.float32)),
        grid=(N, n_co),
        in_specs=[
            pl.BlockSpec((1, H, W, cup), lambda n, co: (n, 0, 0, 0)),
            pl.BlockSpec((1, H, W, cdn), lambda n, co: (n, 0, 0, 0)),
            pl.BlockSpec((9, cup, CO_TILE), lambda n, co: (0, 0, co)),
            pl.BlockSpec((9, cdn, CO_TILE), lambda n, co: (0, 0, co)),
            pl.BlockSpec((1, CO_TILE), lambda n, co: (0, co)),
        ],
        out_specs=[
            pl.BlockSpec((1, H, W, CO_TILE), lambda n, co: (n, 0, 0, co)),
            pl.BlockSpec((1, 2, CO_TILE), lambda n, co: (n, 0, co)),
        ],
        scratch_shapes=[pltpu.VMEM((H + 2, Wp, cup), jnp.float32),
                        pltpu.VMEM((H + 2, Wp, cdn), jnp.float32)],
        compiler_params=pltpu.CompilerParams(
            dimension_semantics=("parallel", "parallel"),
            vmem_limit_bytes=VMEM_LIMIT),
        cost_estimate=pl.CostEstimate(
            flops=2 * N * H * Wp * 9 * (cup + cdn) * cout_p,
            transcendentals=0,
            bytes_accessed=(up.size + dn.size) * 2 + (w_up.size + w_dn.size) * 2
                           + N * H * W * cout_p * 2),
    )(up, dn, w_up, w_dn, bias)


def conv3x3_bn_stats(x, a, c, w, bias):
    N, H, W, cin_p = x.shape
    cout_p = w.shape[-1]
    Wp = _round_up(W + 1, 8)
    n_co = cout_p // CO_TILE
    return pl.pallas_call(
        functools.partial(_conv2_kernel, H=H, W=W, Wp=Wp),
        out_shape=(jax.ShapeDtypeStruct((N, H, W, cout_p), jnp.bfloat16),
                   jax.ShapeDtypeStruct((N, 2, cout_p), jnp.float32)),
        grid=(N, n_co),
        in_specs=[
            pl.BlockSpec((1, H, W, cin_p), lambda n, co: (n, 0, 0, 0)),
            pl.BlockSpec((1, cin_p), lambda n, co: (0, 0)),
            pl.BlockSpec((1, cin_p), lambda n, co: (0, 0)),
            pl.BlockSpec((9, cin_p, CO_TILE), lambda n, co: (0, 0, co)),
            pl.BlockSpec((1, CO_TILE), lambda n, co: (0, co)),
        ],
        out_specs=[
            pl.BlockSpec((1, H, W, CO_TILE), lambda n, co: (n, 0, 0, co)),
            pl.BlockSpec((1, 2, CO_TILE), lambda n, co: (n, 0, co)),
        ],
        scratch_shapes=[pltpu.VMEM((H + 2, Wp, cin_p), jnp.float32)],
        compiler_params=pltpu.CompilerParams(
            dimension_semantics=("parallel", "parallel"),
            vmem_limit_bytes=VMEM_LIMIT),
        cost_estimate=pl.CostEstimate(
            flops=2 * N * H * Wp * 9 * cin_p * cout_p,
            transcendentals=0,
            bytes_accessed=x.size * 2 + w.size * 2 + N * H * W * cout_p * 2),
    )(x, a, c, w, bias)


def bn_relu_apply(y, a, c):
    N, H, W, cp = y.shape
    n_co = cp // CO_TILE
    return pl.pallas_call(
        _bn_relu_kernel,
        out_shape=jax.ShapeDtypeStruct((N, H, W, cp), jnp.float32),
        grid=(N, n_co),
        in_specs=[
            pl.BlockSpec((1, H, W, CO_TILE), lambda n, co: (n, 0, 0, co)),
            pl.BlockSpec((1, CO_TILE), lambda n, co: (0, co)),
            pl.BlockSpec((1, CO_TILE), lambda n, co: (0, co)),
        ],
        out_specs=pl.BlockSpec((1, H, W, CO_TILE), lambda n, co: (n, 0, 0, co)),
        compiler_params=pltpu.CompilerParams(
            dimension_semantics=("parallel", "parallel"),
            vmem_limit_bytes=VMEM_LIMIT),
    )(y, a, c)


def _bn_scale_shift(stats, gamma, beta, count):
    """Fold training-mode batch stats + (gamma, beta) into a per-channel scale/shift."""
    s = jnp.sum(stats, axis=0)                                # (2, CP)
    mean = s[0] / count
    var = jnp.maximum(s[1] / count - mean * mean, 0.0)        # biased variance
    a = gamma * jax.lax.rsqrt(var + BN_EPS)
    c = beta - mean * a
    return a.reshape(1, -1), c.reshape(1, -1)


# ======================================================================================
# parameters (generated directly in the padded TPU layout)
# ======================================================================================
def init_upblock_params(key, in_channels, out_channels, down_channels):
    keys = jax.random.split(key, 6)
    cin_p = _round_up(in_channels, LANE)
    cout_p = _round_up(out_channels, LANE)
    cdn_p = _round_up(down_channels, LANE)

    def pad_conv(w, cin_pad, cout_pad):
        # (3, 3, cin, cout) -> zero-padded (9, cin_pad, cout_pad) bf16
        w = jnp.pad(w, ((0, 0), (0, 0), (0, cin_pad - w.shape[2]),
                        (0, cout_pad - w.shape[3])))
        return w.reshape(9, cin_pad, cout_pad).astype(jnp.bfloat16)

    def pad_vec(v, cpad):
        return jnp.pad(v, (0, cpad - v.shape[0]))

    # ConvTranspose2d(in_channels, out_channels, kernel_size=2, stride=2)
    wt = 0.1 * jax.random.normal(keys[0], (2, 2, in_channels, out_channels), jnp.float32)
    bt = 0.1 * jax.random.normal(keys[1], (out_channels,), jnp.float32)
    wt_p = jnp.zeros((cin_p, 2, 2, cout_p), jnp.float32)
    wt_p = wt_p.at[:in_channels, :, :, :out_channels].set(jnp.transpose(wt, (2, 0, 1, 3)))
    wt_p = wt_p.reshape(cin_p, 4 * cout_p).astype(jnp.bfloat16)
    bt4 = jnp.tile(pad_vec(bt, cout_p), 4).reshape(1, 4 * cout_p)

    # ConvBlock 1 (input = concat([upsampled, skip])) and ConvBlock 2
    w1 = 0.1 * jax.random.normal(keys[2], (3, 3, in_channels, out_channels), jnp.float32)
    b1 = 0.1 * jax.random.normal(keys[3], (out_channels,), jnp.float32)
    w2 = 0.1 * jax.random.normal(keys[4], (3, 3, out_channels, out_channels), jnp.float32)
    b2 = 0.1 * jax.random.normal(keys[5], (out_channels,), jnp.float32)

    return {
        "wt": wt_p, "bt": bt4,
        # concat fusion: split conv1's input channels into the upsample / skip halves
        "w1_up": pad_conv(w1[:, :, :out_channels, :], cout_p, cout_p),
        "w1_dn": pad_conv(w1[:, :, out_channels:, :], cdn_p, cout_p),
        "b1": pad_vec(b1, cout_p).reshape(1, cout_p),
        "g1": jnp.ones((cout_p,), jnp.float32),
        "be1": jnp.zeros((cout_p,), jnp.float32),
        "w2": pad_conv(w2, cout_p, cout_p),
        "b2": pad_vec(b2, cout_p).reshape(1, cout_p),
        "g2": jnp.ones((cout_p,), jnp.float32),
        "be2": jnp.zeros((cout_p,), jnp.float32),
    }


# ======================================================================================
# forward
# ======================================================================================
@functools.partial(jax.jit, static_argnames=("out_channels",))
def upblock_forward(up_x, down_x, params, out_channels):
    """UpBlockForUNetWithResNet50.forward — NCHW in / NCHW out (PyTorch convention)."""
    N, cin, Hs, Ws = up_x.shape
    cdn = down_x.shape[1]
    H, W = 2 * Hs, 2 * Ws
    if W % 8 != 0 or Ws % 8 != 0:
        raise ValueError("spatial width must be a multiple of 16 for this kernel")
    cin_p = _round_up(cin, LANE)
    cdn_p = _round_up(cdn, LANE)
    cout_p = params["b1"].shape[-1]
    count = float(N * H * W)

    # Boundary layout conversion (single fused XLA pass each): NCHW -> NHWC, channel pad
    # to the lane width, bf16.  At production channel counts the pad is a no-op.
    up = jnp.transpose(up_x, (0, 2, 3, 1)).astype(jnp.bfloat16)
    up = jnp.pad(up, ((0, 0), (0, 0), (0, 0), (0, cin_p - cin)))
    dn = jnp.transpose(down_x, (0, 2, 3, 1)).astype(jnp.bfloat16)
    dn = jnp.pad(dn, ((0, 0), (0, 0), (0, 0), (0, cdn_p - cdn)))

    # Upsample: ConvTranspose2d(k=2, s=2) as a lane-dense matmul, then a tiny phase
    # de-interleave (2x2 sub-pixel phases -> doubled spatial map).
    # TODO(synk): fold this phase de-interleave into conv1's scratch fill to save one
    # small HBM round trip of the upsampled activation.
    x4 = upsample_2x_phase_major(up, params["wt"], params["bt"])
    x_up = x4.reshape(N, Hs, Ws, 2, 2, cout_p)
    x_up = jnp.transpose(x_up, (0, 1, 3, 2, 4, 5)).reshape(N, H, W, cout_p)

    # ConvBlock 1: conv over the fused concat; BN1 batch stats come out of the same pass.
    y1, st1 = conv3x3_concat_stats(x_up, dn, params["w1_up"], params["w1_dn"], params["b1"])
    a1, c1 = _bn_scale_shift(st1, params["g1"], params["be1"], count)

    # ConvBlock 2: BN1 + ReLU applied on the fly inside the conv kernel; emits BN2 stats.
    y2, st2 = conv3x3_bn_stats(y1, a1, c1, params["w2"], params["b2"])
    a2, c2 = _bn_scale_shift(st2, params["g2"], params["be2"], count)

    # Final BN2 + ReLU (tiled, lane-dense elementwise kernel), then back to NCHW.
    out = bn_relu_apply(y2, a2, c2)
    return jnp.transpose(out[..., :out_channels], (0, 3, 1, 2))


if __name__ == "__main__":
    key = jax.random.PRNGKey(0)
    k_up, k_dn, k_p = jax.random.split(key, 3)

    # Small shapes consistent with the module: the up path is upsampled 2x and the skip
    # connection supplies (in_channels - out_channels) channels at the doubled resolution.
    N, in_ch, out_ch = 2, 8, 4
    down_ch = in_ch - out_ch
    Hs = Ws = 8                                   # up_x spatial; output spatial is 16 x 16

    up_x = jax.random.normal(k_up, (N, in_ch, Hs, Ws), jnp.float32)
    down_x = jax.random.normal(k_dn, (N, down_ch, 2 * Hs, 2 * Ws), jnp.float32)
    params = init_upblock_params(k_p, in_ch, out_ch, down_ch)

    out = upblock_forward(up_x, down_x, params, out_channels=out_ch)
    out = jax.block_until_ready(out)

    assert out.shape == (N, out_ch, 2 * Hs, 2 * Ws), out.shape
    assert bool(jnp.all(jnp.isfinite(out)))
    assert bool(jnp.all(out >= 0.0))              # ReLU output

    print("KERNEL_OK")
</pallas_src>

<mosaic_0001>
module attributes {stable_mosaic.version = 11 : i64} {
  func.func @_upsample_kernel(%arg0: i32, %arg1: memref<1x8x8x128xbf16, #tpu.memory_space<vmem>>, %arg2: memref<128x512xbf16, #tpu.memory_space<vmem>>, %arg3: memref<1x512xf32, #tpu.memory_space<vmem>>, %arg4: memref<1x8x8x512xbf16, #tpu.memory_space<vmem>>) attributes {dimension_semantics = [#tpu.dimension_semantics<parallel>], iteration_bounds = array<i64: 2>, scalar_prefetch = 0 : i64, scratch_operands = 0 : i64, tpu.core_type = #tpu.core_type<tc>, window_params = [{transform_indices = @transform_0, window_bounds = array<i64: 1, 8, 8, 128>}, {pipeline_mode = #tpu.pipeline_mode<synchronous>, transform_indices = @transform_1, window_bounds = array<i64: 128, 512>}, {pipeline_mode = #tpu.pipeline_mode<synchronous>, transform_indices = @transform_2, window_bounds = array<i64: 1, 512>}, {transform_indices = @transform_3, window_bounds = array<i64: 1, 8, 8, 512>}]} {
    %c0 = arith.constant 0 : index
    %c0_0 = arith.constant 0 : index
    %c0_1 = arith.constant 0 : index
    %c0_2 = arith.constant 0 : index
    %0 = vector.load %arg1[%c0, %c0_0, %c0_1, %c0_2] : memref<1x8x8x128xbf16, #tpu.memory_space<vmem>>, vector<1x8x8x128xbf16>
    %1 = vector.shape_cast %0 : vector<1x8x8x128xbf16> to vector<8x8x128xbf16>
    %2 = vector.shape_cast %1 : vector<8x8x128xbf16> to vector<64x128xbf16>
    %c0_3 = arith.constant 0 : index
    %c0_4 = arith.constant 0 : index
    %3 = vector.load %arg2[%c0_3, %c0_4] : memref<128x512xbf16, #tpu.memory_space<vmem>>, vector<128x512xbf16>
    %cst = arith.constant dense<0.000000e+00> : vector<64x512xf32>
    %4 = tpu.matmul %2, %3, %cst {dimension_numbers = #tpu.dot_dimension_numbers<[1], [0], [0], [1], [0, 0, 1, 1], [], []>} : vector<64x128xbf16>, vector<128x512xbf16>, vector<64x512xf32> -> vector<64x512xf32>
    %c0_5 = arith.constant 0 : index
    %c0_6 = arith.constant 0 : index
    %5 = vector.load %arg3[%c0_5, %c0_6] : memref<1x512xf32, #tpu.memory_space<vmem>>, vector<1x512xf32>
    %6 = vector.broadcast %5 : vector<1x512xf32> to vector<64x512xf32>
    %7 = arith.addf %4, %6 : vector<64x512xf32>
    %8 = vector.shape_cast %7 : vector<64x512xf32> to vector<8x8x512xf32>
    %9 = arith.truncf %8 : vector<8x8x512xf32> to vector<8x8x512xbf16>
    %c0_7 = arith.constant 0 : index
    %c0_8 = arith.constant 0 : index
    %c0_9 = arith.constant 0 : index
    %c0_10 = arith.constant 0 : index
    %10 = vector.load %arg4[%c0_7, %c0_8, %c0_9, %c0_10] : memref<1x8x8x512xbf16, #tpu.memory_space<vmem>>, vector<1x8x8x512xbf16>
    %11 = vector.shape_cast %10 : vector<1x8x8x512xbf16> to vector<8x8x512xbf16>
    %12 = vector.shape_cast %9 : vector<8x8x512xbf16> to vector<1x8x8x512xbf16>
    tpu.vector_store %arg4[%c0_7, %c0_8, %c0_9, %c0_10], %12 {strides = array<i32>} : memref<1x8x8x512xbf16, #tpu.memory_space<vmem>>, vector<1x8x8x512xbf16>,
    return
  }
  func.func @transform_0(%arg0: i32) -> (i32, i32, i32, i32) {
    %c0_i32 = arith.constant 0 : i32
    %c0_i32_0 = arith.constant 0 : i32
    %c0_i32_1 = arith.constant 0 : i32
    %c0_i32_2 = arith.constant 0 : i32
    return %arg0, %c0_i32, %c0_i32_0, %c0_i32_1 : i32, i32, i32, i32
  }
  func.func @transform_1(%arg0: i32) -> (i32, i32) {
    %c0_i32 = arith.constant 0 : i32
    %c0_i32_0 = arith.constant 0 : i32
    %c0_i32_1 = arith.constant 0 : i32
    return %c0_i32, %c0_i32_0 : i32, i32
  }
  func.func @transform_2(%arg0: i32) -> (i32, i32) {
    %c0_i32 = arith.constant 0 : i32
    %c0_i32_0 = arith.constant 0 : i32
    %c0_i32_1 = arith.constant 0 : i32
    return %c0_i32, %c0_i32_0 : i32, i32
  }
  func.func @transform_3(%arg0: i32) -> (i32, i32, i32, i32) {
    %c0_i32 = arith.constant 0 : i32
    %c0_i32_0 = arith.constant 0 : i32
    %c0_i32_1 = arith.constant 0 : i32
    %c0_i32_2 = arith.constant 0 : i32
    return %arg0, %c0_i32, %c0_i32_0, %c0_i32_1 : i32, i32, i32, i32
  }
}

module attributes {stable_mosaic.version = 11 : i64} {
  func.func @_conv1_kernel(%arg0: i32, %arg1: i32, %arg2: memref<1x16x16x128xbf16, #tpu.memory_space<vmem>>, %arg3: memref<1x16x16x128xbf16, #tpu.memory_space<vmem>>, %arg4: memref<9x128x128xbf16, #tpu.memory_space<vmem>>, %arg5: memref<9x128x128xbf16, #tpu.memory_space<vmem>>, %arg6: memref<1x128xf32, #tpu.memory_space<vmem>>, %arg7: memref<1x16x16x128xbf16, #tpu.memory_space<vmem>>, %arg8: memref<1x2x128xf32, #tpu.memory_space<vmem>>, %arg9: memref<18x24x128xf32, #tpu.memory_space<vmem>>, %arg10: memref<18x24x128xf32, #tpu.memory_space<vmem>>) attributes {dimension_semantics = [#tpu.dimension_semantics<parallel>, #tpu.dimension_semantics<parallel>], iteration_bounds = array<i64: 2, 1>, scalar_prefetch = 0 : i64, scratch_operands = 2 : i64, tpu.core_type = #tpu.core_type<tc>, window_params = [{transform_indices = @transform_0, window_bounds = array<i64: 1, 16, 16, 128>}, {transform_indices = @transform_1, window_bounds = array<i64: 1, 16, 16, 128>}, {transform_indices = @transform_2, window_bounds = array<i64: 9, 128, 128>}, {transform_indices = @transform_3, window_bounds = array<i64: 9, 128, 128>}, {transform_indices = @transform_4, window_bounds = array<i64: 1, 128>}, {transform_indices = @transform_5, window_bounds = array<i64: 1, 16, 16, 128>}, {transform_indices = @transform_6, window_bounds = array<i64: 1, 2, 128>}]} {
    %cst = arith.constant 0.000000e+00 : f32
    %0 = vector.broadcast %cst : f32 to vector<384x128xf32>
    %c0 = arith.constant 0 : index
    %c0_0 = arith.constant 0 : index
    %c0_1 = arith.constant 0 : index
    %c0_2 = arith.constant 0 : index
    %1 = vector.load %arg2[%c0, %c0_0, %c0_1, %c0_2] : memref<1x16x16x128xbf16, #tpu.memory_space<vmem>>, vector<1x16x16x128xbf16>
    %2 = vector.shape_cast %1 : vector<1x16x16x128xbf16> to vector<16x16x128xbf16>
    %3 = arith.extf %2 : vector<16x16x128xbf16> to vector<16x16x128xf32>
    %cst_3 = arith.constant 0.000000e+00 : f32
    %4 = vector.broadcast %cst_3 : f32 to vector<1x24x128xf32>
    %c0_4 = arith.constant 0 : index
    %c0_5 = arith.constant 0 : index
    %c0_6 = arith.constant 0 : index
    %5 = vector.load %arg9[%c0_4, %c0_5, %c0_6] : memref<18x24x128xf32, #tpu.memory_space<vmem>>, vector<1x24x128xf32>
    tpu.vector_store %arg9[%c0_4, %c0_5, %c0_6], %4 {strides = array<i32>} : memref<18x24x128xf32, #tpu.memory_space<vmem>>, vector<1x24x128xf32>,
    %c17 = arith.constant 17 : index
    %c0_7 = arith.constant 0 : index
    %c0_8 = arith.constant 0 : index
    %6 = vector.load %arg9[%c17, %c0_7, %c0_8] : memref<18x24x128xf32, #tpu.memory_space<vmem>>, vector<1x24x128xf32>
    tpu.vector_store %arg9[%c17, %c0_7, %c0_8], %4 {strides = array<i32>} : memref<18x24x128xf32, #tpu.memory_space<vmem>>, vector<1x24x128xf32>,
    %cst_9 = arith.constant 0.000000e+00 : f32
    %7 = vector.broadcast %cst_9 : f32 to vector<16x8x128xf32>
    %c1 = arith.constant 1 : index
    %c16 = arith.constant 16 : index
    %c0_10 = arith.constant 0 : index
    %8 = vector.load %arg9[%c1, %c16, %c0_10] : memref<18x24x128xf32, #tpu.memory_space<vmem>>, vector<16x8x128xf32>
    tpu.vector_store %arg9[%c1, %c16, %c0_10], %7 {strides = array<i32>} : memref<18x24x128xf32, #tpu.memory_space<vmem>>, vector<16x8x128xf32>,
    %c1_11 = arith.constant 1 : index
    %c0_12 = arith.constant 0 : index
    %c0_13 = arith.constant 0 : index
    %9 = vector.load %arg9[%c1_11, %c0_12, %c0_13] : memref<18x24x128xf32, #tpu.memory_space<vmem>>, vector<16x16x128xf32>
    tpu.vector_store %arg9[%c1_11, %c0_12, %c0_13], %3 {strides = array<i32>} : memref<18x24x128xf32, #tpu.memory_space<vmem>>, vector<16x16x128xf32>,
    %c0_14 = arith.constant 0 : index
    %c0_15 = arith.constant 0 : index
    %c0_16 = arith.constant 0 : index
    %10 = vector.load %arg9[%c0_14, %c0_15, %c0_16] : memref<18x24x128xf32, #tpu.memory_space<vmem>>, vector<16x24x128xf32>
    %11 = vector.shape_cast %10 : vector<16x24x128xf32> to vector<384x128xf32>
    %c1_i32 = arith.constant 1 : i32
    %12 = tpu.dynamic_rotate %11 by %c1_i32 dim 0 : vector<384x128xf32>, i32 -> vector<384x128xf32>
    %13 = arith.truncf %12 : vector<384x128xf32> to vector<384x128xbf16>
    %c0_17 = arith.constant 0 : index
    %c0_18 = arith.constant 0 : index
    %c0_19 = arith.constant 0 : index
    %14 = vector.load %arg4[%c0_17, %c0_18, %c0_19] : memref<9x128x128xbf16, #tpu.memory_space<vmem>>, vector<1x128x128xbf16>
    %15 = vector.shape_cast %14 : vector<1x128x128xbf16> to vector<128x128xbf16>
    %cst_20 = arith.constant dense<0.000000e+00> : vector<384x128xf32>
    %16 = tpu.matmul %13, %15, %cst_20 {dimension_numbers = #tpu.dot_dimension_numbers<[1], [0], [0], [1], [0, 0, 1, 1], [], []>} : vector<384x128xbf16>, vector<128x128xbf16>, vector<384x128xf32> -> vector<384x128xf32>
    %17 = arith.addf %0, %16 : vector<384x128xf32>
    %18 = arith.truncf %11 : vector<384x128xf32> to vector<384x128xbf16>
    %c1_21 = arith.constant 1 : index
    %c0_22 = arith.constant 0 : index
    %c0_23 = arith.constant 0 : index
    %19 = vector.load %arg4[%c1_21, %c0_22, %c0_23] : memref<9x128x128xbf16, #tpu.memory_space<vmem>>, vector<1x128x128xbf16>
    %20 = vector.shape_cast %19 : vector<1x128x128xbf16> to vector<128x128xbf16>
    %cst_24 = arith.constant dense<0.000000e+00> : vector<384x128xf32>
    %21 = tpu.matmul %18, %20, %cst_24 {dimension_numbers = #tpu.dot_dimension_numbers<[1], [0], [0], [1], [0, 0, 1, 1], [], []>} : vector<384x128xbf16>, vector<128x128xbf16>, vector<384x128xf32> -> vector<384x128xf32>
    %22 = arith.addf %17, %21 : vector<384x128xf32>
    %c383_i32 = arith.constant 383 : i32
    %23 = tpu.dynamic_rotate %11 by %c383_i32 dim 0 : vector<384x128xf32>, i32 -> vector<384x128xf32>
    %24 = arith.truncf %23 : vector<384x128xf32> to vector<384x128xbf16>
    %c2 = arith.constant 2 : index
    %c0_25 = arith.constant 0 : index
    %c0_26 = arith.constant 0 : index
    %25 = vector.load %arg4[%c2, %c0_25, %c0_26] : memref<9x128x128xbf16, #tpu.memory_space<vmem>>, vector<1x128x128xbf16>
    %26 = vector.shape_cast %25 : vector<1x128x128xbf16> to vector<128x128xbf16>
    %cst_27 = arith.constant dense<0.000000e+00> : vector<384x128xf32>
    %27 = tpu.matmul %24, %26, %cst_27 {dimension_numbers = #tpu.dot_dimension_numbers<[1], [0], [0], [1], [0, 0, 1, 1], [], []>} : vector<384x128xbf16>, vector<128x128xbf16>, vector<384x128xf32> -> vector<384x128xf32>
    %28 = arith.addf %22, %27 : vector<384x128xf32>
    %c1_28 = arith.constant 1 : index
    %c0_29 = arith.constant 0 : index
    %c0_30 = arith.constant 0 : index
    %29 = vector.load %arg9[%c1_28, %c0_29, %c0_30] : memref<18x24x128xf32, #tpu.memory_space<vmem>>, vector<16x24x128xf32>
    %30 = vector.shape_cast %29 : vector<16x24x128xf32> to vector<384x128xf32>
    %c1_i32_31 = arith.constant 1 : i32
    %31 = tpu.dynamic_rotate %30 by %c1_i32_31 dim 0 : vector<384x128xf32>, i32 -> vector<384x128xf32>
    %32 = arith.truncf %31 : vector<384x128xf32> to vector<384x128xbf16>
    %c3 = arith.constant 3 : index
    %c0_32 = arith.constant 0 : index
    %c0_33 = arith.constant 0 : index
    %33 = vector.load %arg4[%c3, %c0_32, %c0_33] : memref<9x128x128xbf16, #tpu.memory_space<vmem>>, vector<1x128x128xbf16>
    %34 = vector.shape_cast %33 : vector<1x128x128xbf16> to vector<128x128xbf16>
    %cst_34 = arith.constant dense<0.000000e+00> : vector<384x128xf32>
    %35 = tpu.matmul %32, %34, %cst_34 {dimension_numbers = #tpu.dot_dimension_numbers<[1], [0], [0], [1], [0, 0, 1, 1], [], []>} : vector<384x128xbf16>, vector<128x128xbf16>, vector<384x128xf32> -> vector<384x128xf32>
    %36 = arith.addf %28, %35 : vector<384x128xf32>
    %37 = arith.truncf %30 : vector<384x128xf32> to vector<384x128xbf16>
    %c4 = arith.constant 4 : index
    %c0_35 = arith.constant 0 : index
    %c0_36 = arith.constant 0 : index
    %38 = vector.load %arg4[%c4, %c0_35, %c0_36] : memref<9x128x128xbf16, #tpu.memory_space<vmem>>, vector<1x128x128xbf16>
    %39 = vector.shape_cast %38 : vector<1x128x128xbf16> to vector<128x128xbf16>
    %cst_37 = arith.constant dense<0.000000e+00> : vector<384x128xf32>
    %40 = tpu.matmul %37, %39, %cst_37 {dimension_numbers = #tpu.dot_dimension_numbers<[1], [0], [0], [1], [0, 0, 1, 1], [], []>} : vector<384x128xbf16>, vector<128x128xbf16>, vector<384x128xf32> -> vector<384x128xf32>
    %41 = arith.addf %36, %40 : vector<384x128xf32>
    %c383_i32_38 = arith.constant 383 : i32
    %42 = tpu.dynamic_rotate %30 by %c383_i32_38 dim 0 : vector<384x128xf32>, i32 -> vector<384x128xf32>
    %43 = arith.truncf %42 : vector<384x128xf32> to vector<384x128xbf16>
    %c5 = arith.constant 5 : index
    %c0_39 = arith.constant 0 : index
    %c0_40 = arith.constant 0 : index
    %44 = vector.load %arg4[%c5, %c0_39, %c0_40] : memref<9x128x128xbf16, #tpu.memory_space<vmem>>, vector<1x128x128xbf16>
    %45 = vector.shape_cast %44 : vector<1x128x128xbf16> to vector<128x128xbf16>
    %cst_41 = arith.constant dense<0.000000e+00> : vector<384x128xf32>
    %46 = tpu.matmul %43, %45, %cst_41 {dimension_numbers = #tpu.dot_dimension_numbers<[1], [0], [0], [1], [0, 0, 1, 1], [], []>} : vector<384x128xbf16>, vector<128x128xbf16>, vector<384x128xf32> -> vector<384x128xf32>
    %47 = arith.addf %41, %46 : vector<384x128xf32>
    %c2_42 = arith.constant 2 : index
    %c0_43 = arith.constant 0 : index
    %c0_44 = arith.constant 0 : index
    %48 = vector.load %arg9[%c2_42, %c0_43, %c0_44] : memref<18x24x128xf32, #tpu.memory_space<vmem>>, vector<16x24x128xf32>
    %49 = vector.shape_cast %48 : vector<16x24x128xf32> to vector<384x128xf32>
    %c1_i32_45 = arith.constant 1 : i32
    %50 = tpu.dynamic_rotate %49 by %c1_i32_45 dim 0 : vector<384x128xf32>, i32 -> vector<384x128xf32>
    %51 = arith.truncf %50 : vector<384x128xf32> to vector<384x128xbf16>
    %c6 = arith.constant 6 : index
    %c0_46 = arith.constant 0 : index
    %c0_47 = arith.constant 0 : index
    %52 = vector.load %arg4[%c6, %c0_46, %c0_47] : memref<9x128x128xbf16, #tpu.memory_space<vmem>>, vector<1x128x128xbf16>
    %53 = vector.shape_cast %52 : vector<1x128x128xbf16> to vector<128x128xbf16>
    %cst_48 = arith.constant dense<0.000000e+00> : vector<384x128xf32>
    %54 = tpu.matmul %51, %53, %cst_48 {dimension_numbers = #tpu.dot_dimension_numbers<[1], [0], [0], [1], [0, 0, 1, 1], [], []>} : vector<384x128xbf16>, vector<128x128xbf16>, vector<384x128xf32> -> vector<384x128xf32>
    %55 = arith.addf %47, %54 : vector<384x128xf32>
    %56 = arith.truncf %49 : vector<384x128xf32> to vector<384x128xbf16>
    %c7 = arith.constant 7 : index
    %c0_49 = arith.constant 0 : index
    %c0_50 = arith.constant 0 : index
    %57 = vector.load %arg4[%c7, %c0_49, %c0_50] : memref<9x128x128xbf16, #tpu.memory_space<vmem>>, vector<1x128x128xbf16>
    %58 = vector.shape_cast %57 : vector<1x128x128xbf16> to vector<128x128xbf16>
    %cst_51 = arith.constant dense<0.000000e+00> : vector<384x128xf32>
    %59 = tpu.matmul %56, %58, %cst_51 {dimension_numbers = #tpu.dot_dimension_numbers<[1], [0], [0], [1], [0, 0, 1, 1], [], []>} : vector<384x128xbf16>, vector<128x128xbf16>, vector<384x128xf32> -> vector<384x128xf32>
    %60 = arith.addf %55, %59 : vector<384x128xf32>
    %c383_i32_52 = arith.constant 383 : i32
    %61 = tpu.dynamic_rotate %49 by %c383_i32_52 dim 0 : vector<384x128xf32>, i32 -> vector<384x128xf32>
    %62 = arith.truncf %61 : vector<384x128xf32> to vector<384x128xbf16>
    %c8 = arith.constant 8 : index
    %c0_53 = arith.constant 0 : index
    %c0_54 = arith.constant 0 : index
    %63 = vector.load %arg4[%c8, %c0_53, %c0_54] : memref<9x128x128xbf16, #tpu.memory_space<vmem>>, vector<1x128x128xbf16>
    %64 = vector.shape_cast %63 : vector<1x128x128xbf16> to vector<128x128xbf16>
    %cst_55 = arith.constant dense<0.000000e+00> : vector<384x128xf32>
    %65 = tpu.matmul %62, %64, %cst_55 {dimension_numbers = #tpu.dot_dimension_numbers<[1], [0], [0], [1], [0, 0, 1, 1], [], []>} : vector<384x128xbf16>, vector<128x128xbf16>, vector<384x128xf32> -> vector<384x128xf32>
    %66 = arith.addf %60, %65 : vector<384x128xf32>
    %c0_56 = arith.constant 0 : index
    %c0_57 = arith.constant 0 : index
    %c0_58 = arith.constant 0 : index
    %c0_59 = arith.constant 0 : index
    %67 = vector.load %arg3[%c0_56, %c0_57, %c0_58, %c0_59] : memref<1x16x16x128xbf16, #tpu.memory_space<vmem>>, vector<1x16x16x128xbf16>
    %68 = vector.shape_cast %67 : vector<1x16x16x128xbf16> to vector<16x16x128xbf16>
    %69 = arith.extf %68 : vector<16x16x128xbf16> to vector<16x16x128xf32>
    %cst_60 = arith.constant 0.000000e+00 : f32
    %70 = vector.broadcast %cst_60 : f32 to vector<1x24x128xf32>
    %c0_61 = arith.constant 0 : index
    %c0_62 = arith.constant 0 : index
    %c0_63 = arith.constant 0 : index
    %71 = vector.load %arg10[%c0_61, %c0_62, %c0_63] : memref<18x24x128xf32, #tpu.memory_space<vmem>>, vector<1x24x128xf32>
    tpu.vector_store %arg10[%c0_61, %c0_62, %c0_63], %70 {strides = array<i32>} : memref<18x24x128xf32, #tpu.memory_space<vmem>>, vector<1x24x128xf32>,
    %c17_64 = arith.constant 17 : index
    %c0_65 = arith.constant 0 : index
    %c0_66 = arith.constant 0 : index
    %72 = vector.load %arg10[%c17_64, %c0_65, %c0_66] : memref<18x24x128xf32, #tpu.memory_space<vmem>>, vector<1x24x128xf32>
    tpu.vector_store %arg10[%c17_64, %c0_65, %c0_66], %70 {strides = array<i32>} : memref<18x24x128xf32, #tpu.memory_space<vmem>>, vector<1x24x128xf32>,
    %cst_67 = arith.constant 0.000000e+00 : f32
    %73 = vector.broadcast %cst_67 : f32 to vector<16x8x128xf32>
    %c1_68 = arith.constant 1 : index
    %c16_69 = arith.constant 16 : index
    %c0_70 = arith.constant 0 : index
    %74 = vector.load %arg10[%c1_68, %c16_69, %c0_70] : memref<18x24x128xf32, #tpu.memory_space<vmem>>, vector<16x8x128xf32>
    tpu.vector_store %arg10[%c1_68, %c16_69, %c0_70], %73 {strides = array<i32>} : memref<18x24x128xf32, #tpu.memory_space<vmem>>, vector<16x8x128xf32>,
    %c1_71 = arith.constant 1 : index
    %c0_72 = arith.constant 0 : index
    %c0_73 = arith.constant 0 : index
    %75 = vector.load %arg10[%c1_71, %c0_72, %c0_73] : memref<18x24x128xf32, #tpu.memory_space<vmem>>, vector<16x16x128xf32>
    tpu.vector_store %arg10[%c1_71, %c0_72, %c0_73], %69 {strides = array<i32>} : memref<18x24x128xf32, #tpu.memory_space<vmem>>, vector<16x16x128xf32>,
    %c0_74 = arith.constant 0 : index
    %c0_75 = arith.constant 0 : index
    %c0_76 = arith.constant 0 : index
    %76 = vector.load %arg10[%c0_74, %c0_75, %c0_76] : memref<18x24x128xf32, #tpu.memory_space<vmem>>, vector<16x24x128xf32>
    %77 = vector.shape_cast %76 : vector<16x24x128xf32> to vector<384x128xf32>
    %c1_i32_77 = arith.constant 1 : i32
    %78 = tpu.dynamic_rotate %77 by %c1_i32_77 dim 0 : vector<384x128xf32>, i32 -> vector<384x128xf32>
    %79 = arith.truncf %78 : vector<384x128xf32> to vector<384x128xbf16>
    %c0_78 = arith.constant 0 : index
    %c0_79 = arith.constant 0 : index
    %c0_80 = arith.constant 0 : index
    %80 = vector.load %arg5[%c0_78, %c0_79, %c0_80] : memref<9x128x128xbf16, #tpu.memory_space<vmem>>, vector<1x128x128xbf16>
    %81 = vector.shape_cast %80 : vector<1x128x128xbf16> to vector<128x128xbf16>
    %cst_81 = arith.constant dense<0.000000e+00> : vector<384x128xf32>
    %82 = tpu.matmul %79, %81, %cst_81 {dimension_numbers = #tpu.dot_dimension_numbers<[1], [0], [0], [1], [0, 0, 1, 1], [], []>} : vector<384x128xbf16>, vector<128x128xbf16>, vector<384x128xf32> -> vector<384x128xf32>
    %83 = arith.addf %66, %82 : vector<384x128xf32>
    %84 = arith.truncf %77 : vector<384x128xf32> to vector<384x128xbf16>
    %c1_82 = arith.constant 1 : index
    %c0_83 = arith.constant 0 : index
    %c0_84 = arith.constant 0 : index
    %85 = vector.load %arg5[%c1_82, %c0_83, %c0_84] : memref<9x128x128xbf16, #tpu.memory_space<vmem>>, vector<1x128x128xbf16>
    %86 = vector.shape_cast %85 : vector<1x128x128xbf16> to vector<128x128xbf16>
    %cst_85 = arith.constant dense<0.000000e+00> : vector<384x128xf32>
    %87 = tpu.matmul %84, %86, %cst_85 {dimension_numbers = #tpu.dot_dimension_numbers<[1], [0], [0], [1], [0, 0, 1, 1], [], []>} : vector<384x128xbf16>, vector<128x128xbf16>, vector<384x128xf32> -> vector<384x128xf32>
    %88 = arith.addf %83, %87 : vector<384x128xf32>
    %c383_i32_86 = arith.constant 383 : i32
    %89 = tpu.dynamic_rotate %77 by %c383_i32_86 dim 0 : vector<384x128xf32>, i32 -> vector<384x128xf32>
    %90 = arith.truncf %89 : vector<384x128xf32> to vector<384x128xbf16>
    %c2_87 = arith.constant 2 : index
    %c0_88 = arith.constant 0 : index
    %c0_89 = arith.constant 0 : index
    %91 = vector.load %arg5[%c2_87, %c0_88, %c0_89] : memref<9x128x128xbf16, #tpu.memory_space<vmem>>, vector<1x128x128xbf16>
    %92 = vector.shape_cast %91 : vector<1x128x128xbf16> to vector<128x128xbf16>
    %cst_90 = arith.constant dense<0.000000e+00> : vector<384x128xf32>
    %93 = tpu.matmul %90, %92, %cst_90 {dimension_numbers = #tpu.dot_dimension_numbers<[1], [0], [0], [1], [0, 0, 1, 1], [], []>} : vector<384x128xbf16>, vector<128x128xbf16>, vector<384x128xf32> -> vector<384x128xf32>
    %94 = arith.addf %88, %93 : vector<384x128xf32>
    %c1_91 = arith.constant 1 : index
    %c0_92 = arith.constant 0 : index
    %c0_93 = arith.constant 0 : index
    %95 = vector.load %arg10[%c1_91, %c0_92, %c0_93] : memref<18x24x128xf32, #tpu.memory_space<vmem>>, vector<16x24x128xf32>
    %96 = vector.shape_cast %95 : vector<16x24x128xf32> to vector<384x128xf32>
    %c1_i32_94 = arith.constant 1 : i32
    %97 = tpu.dynamic_rotate %96 by %c1_i32_94 dim 0 : vector<384x128xf32>, i32 -> vector<384x128xf32>
    %98 = arith.truncf %97 : vector<384x128xf32> to vector<384x128xbf16>
    %c3_95 = arith.constant 3 : index
    %c0_96 = arith.constant 0 : index
    %c0_97 = arith.constant 0 : index
    %99 = vector.load %arg5[%c3_95, %c0_96, %c0_97] : memref<9x128x128xbf16, #tpu.memory_space<vmem>>, vector<1x128x128xbf16>
    %100 = vector.shape_cast %99 : vector<1x128x128xbf16> to vector<128x128xbf16>
    %cst_98 = arith.constant dense<0.000000e+00> : vector<384x128xf32>
    %101 = tpu.matmul %98, %100, %cst_98 {dimension_numbers = #tpu.dot_dimension_numbers<[1], [0], [0], [1], [0, 0, 1, 1], [], []>} : vector<384x128xbf16>, vector<128x128xbf16>, vector<384x128xf32> -> vector<384x128xf32>
    %102 = arith.addf %94, %101 : vector<384x128xf32>
    %103 = arith.truncf %96 : vector<384x128xf32> to vector<384x128xbf16>
    %c4_99 = arith.constant 4 : index
    %c0_100 = arith.constant 0 : index
    %c0_101 = arith.constant 0 : index
    %104 = vector.load %arg5[%c4_99, %c0_100, %c0_101] : memref<9x128x128xbf16, #tpu.memory_space<vmem>>, vector<1x128x128xbf16>
    %105 = vector.shape_cast %104 : vector<1x128x128xbf16> to vector<128x128xbf16>
    %cst_102 = arith.constant dense<0.000000e+00> : vector<384x128xf32>
    %106 = tpu.matmul %103, %105, %cst_102 {dimension_numbers = #tpu.dot_dimension_numbers<[1], [0], [0], [1], [0, 0, 1, 1], [], []>} : vector<384x128xbf16>, vector<128x128xbf16>, vector<384x128xf32> -> vector<384x128xf32>
    %107 = arith.addf %102, %106 : vector<384x128xf32>
    %c383_i32_103 = arith.constant 383 : i32
    %108 = tpu.dynamic_rotate %96 by %c383_i32_103 dim 0 : vector<384x128xf32>, i32 -> vector<384x128xf32>
    %109 = arith.truncf %108 : vector<384x128xf32> to vector<384x128xbf16>
    %c5_104 = arith.constant 5 : index
    %c0_105 = arith.constant 0 : index
    %c0_106 = arith.constant 0 : index
    %110 = vector.load %arg5[%c5_104, %c0_105, %c0_106] : memref<9x128x128xbf16, #tpu.memory_space<vmem>>, vector<1x128x128xbf16>
    %111 = vector.shape_cast %110 : vector<1x128x128xbf16> to vector<128x128xbf16>
    %cst_107 = arith.constant dense<0.000000e+00> : vector<384x128xf32>
    %112 = tpu.matmul %109, %111, %cst_107 {dimension_numbers = #tpu.dot_dimension_numbers<[1], [0], [0], [1], [0, 0, 1, 1], [], []>} : vector<384x128xbf16>, vector<128x128xbf16>, vector<384x128xf32> -> vector<384x128xf32>
    %113 = arith.addf %107, %112 : vector<384x128xf32>
    %c2_108 = arith.constant 2 : index
    %c0_109 = arith.constant 0 : index
    %c0_110 = arith.constant 0 : index
    %114 = vector.load %arg10[%c2_108, %c0_109, %c0_110] : memref<18x24x128xf32, #tpu.memory_space<vmem>>, vector<16x24x128xf32>
    %115 = vector.shape_cast %114 : vector<16x24x128xf32> to vector<384x128xf32>
    %c1_i32_111 = arith.constant 1 : i32
    %116 = tpu.dynamic_rotate %115 by %c1_i32_111 dim 0 : vector<384x128xf32>, i32 -> vector<384x128xf32>
    %117 = arith.truncf %116 : vector<384x128xf32> to vector<384x128xbf16>
    %c6_112 = arith.constant 6 : index
    %c0_113 = arith.constant 0 : index
    %c0_114 = arith.constant 0 : index
    %118 = vector.load %arg5[%c6_112, %c0_113, %c0_114] : memref<9x128x128xbf16, #tpu.memory_space<vmem>>, vector<1x128x128xbf16>
    %119 = vector.shape_cast %118 : vector<1x128x128xbf16> to vector<128x128xbf16>
    %cst_115 = arith.constant dense<0.000000e+00> : vector<384x128xf32>
    %120 = tpu.matmul %117, %119, %cst_115 {dimension_numbers = #tpu.dot_dimension_numbers<[1], [0], [0], [1], [0, 0, 1, 1], [], []>} : vector<384x128xbf16>, vector<128x128xbf16>, vector<384x128xf32> -> vector<384x128xf32>
    %121 = arith.addf %113, %120 : vector<384x128xf32>
    %122 = arith.truncf %115 : vector<384x128xf32> to vector<384x128xbf16>
    %c7_116 = arith.constant 7 : index
    %c0_117 = arith.constant 0 : index
    %c0_118 = arith.constant 0 : index
    %123 = vector.load %arg5[%c7_116, %c0_117, %c0_118] : memref<9x128x128xbf16, #tpu.memory_space<vmem>>, vector<1x128x128xbf16>
    %124 = vector.shape_cast %123 : vector<1x128x128xbf16> to vector<128x128xbf16>
    %cst_119 = arith.constant dense<0.000000e+00> : vector<384x128xf32>
    %125 = tpu.matmul %122, %124, %cst_119 {dimension_numbers = #tpu.dot_dimension_numbers<[1], [0], [0], [1], [0, 0, 1, 1], [], []>} : vector<384x128xbf16>, vector<128x128xbf16>, vector<384x128xf32> -> vector<384x128xf32>
    %126 = arith.addf %121, %125 : vector<384x128xf32>
    %c383_i32_120 = arith.constant 383 : i32
    %127 = tpu.dynamic_rotate %115 by %c383_i32_120 dim 0 : vector<384x128xf32>, i32 -> vector<384x128xf32>
    %128 = arith.truncf %127 : vector<384x128xf32> to vector<384x128xbf16>
    %c8_121 = arith.constant 8 : index
    %c0_122 = arith.constant 0 : index
    %c0_123 = arith.constant 0 : index
    %129 = vector.load %arg5[%c8_121, %c0_122, %c0_123] : memref<9x128x128xbf16, #tpu.memory_space<vmem>>, vector<1x128x128xbf16>
    %130 = vector.shape_cast %129 : vector<1x128x128xbf16> to vector<128x128xbf16>
    %cst_124 = arith.constant dense<0.000000e+00> : vector<384x128xf32>
    %131 = tpu.matmul %128, %130, %cst_124 {dimension_numbers = #tpu.dot_dimension_numbers<[1], [0], [0], [1], [0, 0, 1, 1], [], []>} : vector<384x128xbf16>, vector<128x128xbf16>, vector<384x128xf32> -> vector<384x128xf32>
    %132 = arith.addf %126, %131 : vector<384x128xf32>
    %c0_125 = arith.constant 0 : index
    %c0_126 = arith.constant 0 : index
    %133 = vector.load %arg6[%c0_125, %c0_126] : memref<1x128xf32, #tpu.memory_space<vmem>>, vector<1x128xf32>
    %134 = vector.broadcast %133 : vector<1x128xf32> to vector<384x128xf32>
    %135 = arith.addf %132, %134 : vector<384x128xf32>
    %136 = vector.shape_cast %135 : vector<384x128xf32> to vector<16x24x128xf32>
    %137 = vector.extract_strided_slice %136 {offsets = [0, 0, 0], sizes = [16, 16, 128], strides = [1, 1, 1]} : vector<16x24x128xf32> to vector<16x16x128xf32>
    %138 = arith.truncf %137 : vector<16x16x128xf32> to vector<16x16x128xbf16>
    %c0_127 = arith.constant 0 : index
    %c0_128 = arith.constant 0 : index
    %c0_129 = arith.constant 0 : index
    %c0_130 = arith.constant 0 : index
    %139 = vector.load %arg7[%c0_127, %c0_128, %c0_129, %c0_130] : memref<1x16x16x128xbf16, #tpu.memory_space<vmem>>, vector<1x16x16x128xbf16>
    %140 = vector.shape_cast %139 : vector<1x16x16x128xbf16> to vector<16x16x128xbf16>
    %141 = vector.shape_cast %138 : vector<16x16x128xbf16> to vector<1x16x16x128xbf16>
    tpu.vector_store %arg7[%c0_127, %c0_128, %c0_129, %c0_130], %141 {strides = array<i32>} : memref<1x16x16x128xbf16, #tpu.memory_space<vmem>>, vector<1x16x16x128xbf16>,
    %142 = arith.extf %138 : vector<16x16x128xbf16> to vector<16x16x128xf32>
    %143 = vector.shape_cast %142 : vector<16x16x128xf32> to vector<256x128xf32>
    %cst_131 = arith.constant dense<0.000000e+00> : vector<128xf32>
    %144 = vector.multi_reduction <add>, %143, %cst_131 [0] : vector<256x128xf32> to vector<128xf32>
    %145 = vector.shape_cast %144 : vector<128xf32> to vector<1x128xf32>
    %146 = arith.mulf %143, %143 : vector<256x128xf32>
    %cst_132 = arith.constant dense<0.000000e+00> : vector<128xf32>
    %147 = vector.multi_reduction <add>, %146, %cst_132 [0] : vector<256x128xf32> to vector<128xf32>
    %148 = vector.shape_cast %147 : vector<128xf32> to vector<1x128xf32>
    %149 = tpu.concatenate %145, %148 in 0 : vector<1x128xf32>, vector<1x128xf32> -> vector<2x128xf32>
    %c0_133 = arith.constant 0 : index
    %c0_134 = arith.constant 0 : index
    %c0_135 = arith.constant 0 : index
    %150 = vector.load %arg8[%c0_133, %c0_134, %c0_135] : memref<1x2x128xf32, #tpu.memory_space<vmem>>, vector<1x2x128xf32>
    %151 = vector.shape_cast %150 : vector<1x2x128xf32> to vector<2x128xf32>
    %152 = vector.shape_cast %149 : vector<2x128xf32> to vector<1x2x128xf32>
    tpu.vector_store %arg8[%c0_133, %c0_134, %c0_135], %152 {strides = array<i32>} : memref<1x2x128xf32, #tpu.memory_space<vmem>>, vector<1x2x128xf32>,
    return
  }
  func.func @transform_0(%arg0: i32, %arg1: i32) -> (i32, i32, i32, i32) {
    %c0_i32 = arith.constant 0 : i32
    %c0_i32_0 = arith.constant 0 : i32
    %c0_i32_1 = arith.constant 0 : i32
    %c0_i32_2 = arith.constant 0 : i32
    return %arg0, %c0_i32, %c0_i32_0, %c0_i32_1 : i32, i32, i32, i32
  }
  func.func @transform_1(%arg0: i32, %arg1: i32) -> (i32, i32, i32, i32) {
    %c0_i32 = arith.constant 0 : i32
    %c0_i32_0 = arith.constant 0 : i32
    %c0_i32_1 = arith.constant 0 : i32
    %c0_i32_2 = arith.constant 0 : i32
    return %arg0, %c0_i32, %c0_i32_0, %c0_i32_1 : i32, i32, i32, i32
  }
  func.func @transform_2(%arg0: i32, %arg1: i32) -> (i32, i32, i32) {
    %c0_i32 = arith.constant 0 : i32
    %c0_i32_0 = arith.constant 0 : i32
    %c0_i32_1 = arith.constant 0 : i32
    return %c0_i32, %c0_i32_0, %arg1 : i32, i32, i32
  }
  func.func @transform_3(%arg0: i32, %arg1: i32) -> (i32, i32, i32) {
    %c0_i32 = arith.constant 0 : i32
    %c0_i32_0 = arith.constant 0 : i32
    %c0_i32_1 = arith.constant 0 : i32
    return %c0_i32, %c0_i32_0, %arg1 : i32, i32, i32
  }
  func.func @transform_4(%arg0: i32, %arg1: i32) -> (i32, i32) {
    %c0_i32 = arith.constant 0 : i32
    %c0_i32_0 = arith.constant 0 : i32
    return %c0_i32, %arg1 : i32, i32
  }
  func.func @transform_5(%arg0: i32, %arg1: i32) -> (i32, i32, i32, i32) {
    %c0_i32 = arith.constant 0 : i32
    %c0_i32_0 = arith.constant 0 : i32
    %c0_i32_1 = arith.constant 0 : i32
    return %arg0, %c0_i32, %c0_i32_0, %arg1 : i32, i32, i32, i32
  }
  func.func @transform_6(%arg0: i32, %arg1: i32) -> (i32, i32, i32) {
    %c0_i32 = arith.constant 0 : i32
    %c0_i32_0 = arith.constant 0 : i32
    return %arg0, %c0_i32, %arg1 : i32, i32, i32
  }
}

module attributes {stable_mosaic.version = 11 : i64} {
  func.func @_conv2_kernel(%arg0: i32, %arg1: i32, %arg2: memref<1x16x16x128xbf16, #tpu.memory_space<vmem>>, %arg3: memref<1x128xf32, #tpu.memory_space<vmem>>, %arg4: memref<1x128xf32, #tpu.memory_space<vmem>>, %arg5: memref<9x128x128xbf16, #tpu.memory_space<vmem>>, %arg6: memref<1x128xf32, #tpu.memory_space<vmem>>, %arg7: memref<1x16x16x128xbf16, #tpu.memory_space<vmem>>, %arg8: memref<1x2x128xf32, #tpu.memory_space<vmem>>, %arg9: memref<18x24x128xf32, #tpu.memory_space<vmem>>) attributes {dimension_semantics = [#tpu.dimension_semantics<parallel>, #tpu.dimension_semantics<parallel>], iteration_bounds = array<i64: 2, 1>, scalar_prefetch = 0 : i64, scratch_operands = 1 : i64, tpu.core_type = #tpu.core_type<tc>, window_params = [{transform_indices = @transform_0, window_bounds = array<i64: 1, 16, 16, 128>}, {pipeline_mode = #tpu.pipeline_mode<synchronous>, transform_indices = @transform_1, window_bounds = array<i64: 1, 128>}, {pipeline_mode = #tpu.pipeline_mode<synchronous>, transform_indices = @transform_2, window_bounds = array<i64: 1, 128>}, {transform_indices = @transform_3, window_bounds = array<i64: 9, 128, 128>}, {transform_indices = @transform_4, window_bounds = array<i64: 1, 128>}, {transform_indices = @transform_5, window_bounds = array<i64: 1, 16, 16, 128>}, {transform_indices = @transform_6, window_bounds = array<i64: 1, 2, 128>}]} {
    %c0 = arith.constant 0 : index
    %c0_0 = arith.constant 0 : index
    %c0_1 = arith.constant 0 : index
    %c0_2 = arith.constant 0 : index
    %0 = vector.load %arg2[%c0, %c0_0, %c0_1, %c0_2] : memref<1x16x16x128xbf16, #tpu.memory_space<vmem>>, vector<1x16x16x128xbf16>
    %1 = vector.shape_cast %0 : vector<1x16x16x128xbf16> to vector<16x16x128xbf16>
    %2 = arith.extf %1 : vector<16x16x128xbf16> to vector<16x16x128xf32>
    %c0_3 = arith.constant 0 : index
    %c0_4 = arith.constant 0 : index
    %3 = vector.load %arg3[%c0_3, %c0_4] : memref<1x128xf32, #tpu.memory_space<vmem>>, vector<1x128xf32>
    %4 = vector.shape_cast %3 : vector<1x128xf32> to vector<1x1x128xf32>
    %5 = vector.broadcast %4 : vector<1x1x128xf32> to vector<16x16x128xf32>
    %6 = arith.mulf %2, %5 : vector<16x16x128xf32>
    %c0_5 = arith.constant 0 : index
    %c0_6 = arith.constant 0 : index
    %7 = vector.load %arg4[%c0_5, %c0_6] : memref<1x128xf32, #tpu.memory_space<vmem>>, vector<1x128xf32>
    %8 = vector.shape_cast %7 : vector<1x128xf32> to vector<1x1x128xf32>
    %9 = vector.broadcast %8 : vector<1x1x128xf32> to vector<16x16x128xf32>
    %10 = arith.addf %6, %9 : vector<16x16x128xf32>
    %cst = arith.constant 0.000000e+00 : f32
    %11 = vector.broadcast %cst : f32 to vector<16x16x128xf32>
    %12 = arith.maximumf %10, %11 : vector<16x16x128xf32>
    %cst_7 = arith.constant 0.000000e+00 : f32
    %13 = vector.broadcast %cst_7 : f32 to vector<1x24x128xf32>
    %c0_8 = arith.constant 0 : index
    %c0_9 = arith.constant 0 : index
    %c0_10 = arith.constant 0 : index
    %14 = vector.load %arg9[%c0_8, %c0_9, %c0_10] : memref<18x24x128xf32, #tpu.memory_space<vmem>>, vector<1x24x128xf32>
    tpu.vector_store %arg9[%c0_8, %c0_9, %c0_10], %13 {strides = array<i32>} : memref<18x24x128xf32, #tpu.memory_space<vmem>>, vector<1x24x128xf32>,
    %c17 = arith.constant 17 : index
    %c0_11 = arith.constant 0 : index
    %c0_12 = arith.constant 0 : index
    %15 = vector.load %arg9[%c17, %c0_11, %c0_12] : memref<18x24x128xf32, #tpu.memory_space<vmem>>, vector<1x24x128xf32>
    tpu.vector_store %arg9[%c17, %c0_11, %c0_12], %13 {strides = array<i32>} : memref<18x24x128xf32, #tpu.memory_space<vmem>>, vector<1x24x128xf32>,
    %cst_13 = arith.constant 0.000000e+00 : f32
    %16 = vector.broadcast %cst_13 : f32 to vector<16x8x128xf32>
    %c1 = arith.constant 1 : index
    %c16 = arith.constant 16 : index
    %c0_14 = arith.constant 0 : index
    %17 = vector.load %arg9[%c1, %c16, %c0_14] : memref<18x24x128xf32, #tpu.memory_space<vmem>>, vector<16x8x128xf32>
    tpu.vector_store %arg9[%c1, %c16, %c0_14], %16 {strides = array<i32>} : memref<18x24x128xf32, #tpu.memory_space<vmem>>, vector<16x8x128xf32>,
    %c1_15 = arith.constant 1 : index
    %c0_16 = arith.constant 0 : index
    %c0_17 = arith.constant 0 : index
    %18 = vector.load %arg9[%c1_15, %c0_16, %c0_17] : memref<18x24x128xf32, #tpu.memory_space<vmem>>, vector<16x16x128xf32>
    tpu.vector_store %arg9[%c1_15, %c0_16, %c0_17], %12 {strides = array<i32>} : memref<18x24x128xf32, #tpu.memory_space<vmem>>, vector<16x16x128xf32>,
    %cst_18 = arith.constant 0.000000e+00 : f32
    %19 = vector.broadcast %cst_18 : f32 to vector<384x128xf32>
    %c0_19 = arith.constant 0 : index
    %c0_20 = arith.constant 0 : index
    %c0_21 = arith.constant 0 : index
    %20 = vector.load %arg9[%c0_19, %c0_20, %c0_21] : memref<18x24x128xf32, #tpu.memory_space<vmem>>, vector<16x24x128xf32>
    %21 = vector.shape_cast %20 : vector<16x24x128xf32> to vector<384x128xf32>
    %c1_i32 = arith.constant 1 : i32
    %22 = tpu.dynamic_rotate %21 by %c1_i32 dim 0 : vector<384x128xf32>, i32 -> vector<384x128xf32>
    %23 = arith.truncf %22 : vector<384x128xf32> to vector<384x128xbf16>
    %c0_22 = arith.constant 0 : index
    %c0_23 = arith.constant 0 : index
    %c0_24 = arith.constant 0 : index
    %24 = vector.load %arg5[%c0_22, %c0_23, %c0_24] : memref<9x128x128xbf16, #tpu.memory_space<vmem>>, vector<1x128x128xbf16>
    %25 = vector.shape_cast %24 : vector<1x128x128xbf16> to vector<128x128xbf16>
    %cst_25 = arith.constant dense<0.000000e+00> : vector<384x128xf32>
    %26 = tpu.matmul %23, %25, %cst_25 {dimension_numbers = #tpu.dot_dimension_numbers<[1], [0], [0], [1], [0, 0, 1, 1], [], []>} : vector<384x128xbf16>, vector<128x128xbf16>, vector<384x128xf32> -> vector<384x128xf32>
    %27 = arith.addf %19, %26 : vector<384x128xf32>
    %28 = arith.truncf %21 : vector<384x128xf32> to vector<384x128xbf16>
    %c1_26 = arith.constant 1 : index
    %c0_27 = arith.constant 0 : index
    %c0_28 = arith.constant 0 : index
    %29 = vector.load %arg5[%c1_26, %c0_27, %c0_28] : memref<9x128x128xbf16, #tpu.memory_space<vmem>>, vector<1x128x128xbf16>
    %30 = vector.shape_cast %29 : vector<1x128x128xbf16> to vector<128x128xbf16>
    %cst_29 = arith.constant dense<0.000000e+00> : vector<384x128xf32>
    %31 = tpu.matmul %28, %30, %cst_29 {dimension_numbers = #tpu.dot_dimension_numbers<[1], [0], [0], [1], [0, 0, 1, 1], [], []>} : vector<384x128xbf16>, vector<128x128xbf16>, vector<384x128xf32> -> vector<384x128xf32>
    %32 = arith.addf %27, %31 : vector<384x128xf32>
    %c383_i32 = arith.constant 383 : i32
    %33 = tpu.dynamic_rotate %21 by %c383_i32 dim 0 : vector<384x128xf32>, i32 -> vector<384x128xf32>
    %34 = arith.truncf %33 : vector<384x128xf32> to vector<384x128xbf16>
    %c2 = arith.constant 2 : index
    %c0_30 = arith.constant 0 : index
    %c0_31 = arith.constant 0 : index
    %35 = vector.load %arg5[%c2, %c0_30, %c0_31] : memref<9x128x128xbf16, #tpu.memory_space<vmem>>, vector<1x128x128xbf16>
    %36 = vector.shape_cast %35 : vector<1x128x128xbf16> to vector<128x128xbf16>
    %cst_32 = arith.constant dense<0.000000e+00> : vector<384x128xf32>
    %37 = tpu.matmul %34, %36, %cst_32 {dimension_numbers = #tpu.dot_dimension_numbers<[1], [0], [0], [1], [0, 0, 1, 1], [], []>} : vector<384x128xbf16>, vector<128x128xbf16>, vector<384x128xf32> -> vector<384x128xf32>
    %38 = arith.addf %32, %37 : vector<384x128xf32>
    %c1_33 = arith.constant 1 : index
    %c0_34 = arith.constant 0 : index
    %c0_35 = arith.constant 0 : index
    %39 = vector.load %arg9[%c1_33, %c0_34, %c0_35] : memref<18x24x128xf32, #tpu.memory_space<vmem>>, vector<16x24x128xf32>
    %40 = vector.shape_cast %39 : vector<16x24x128xf32> to vector<384x128xf32>
    %c1_i32_36 = arith.constant 1 : i32
    %41 = tpu.dynamic_rotate %40 by %c1_i32_36 dim 0 : vector<384x128xf32>, i32 -> vector<384x128xf32>
    %42 = arith.truncf %41 : vector<384x128xf32> to vector<384x128xbf16>
    %c3 = arith.constant 3 : index
    %c0_37 = arith.constant 0 : index
    %c0_38 = arith.constant 0 : index
    %43 = vector.load %arg5[%c3, %c0_37, %c0_38] : memref<9x128x128xbf16, #tpu.memory_space<vmem>>, vector<1x128x128xbf16>
    %44 = vector.shape_cast %43 : vector<1x128x128xbf16> to vector<128x128xbf16>
    %cst_39 = arith.constant dense<0.000000e+00> : vector<384x128xf32>
    %45 = tpu.matmul %42, %44, %cst_39 {dimension_numbers = #tpu.dot_dimension_numbers<[1], [0], [0], [1], [0, 0, 1, 1], [], []>} : vector<384x128xbf16>, vector<128x128xbf16>, vector<384x128xf32> -> vector<384x128xf32>
    %46 = arith.addf %38, %45 : vector<384x128xf32>
    %47 = arith.truncf %40 : vector<384x128xf32> to vector<384x128xbf16>
    %c4 = arith.constant 4 : index
    %c0_40 = arith.constant 0 : index
    %c0_41 = arith.constant 0 : index
    %48 = vector.load %arg5[%c4, %c0_40, %c0_41] : memref<9x128x128xbf16, #tpu.memory_space<vmem>>, vector<1x128x128xbf16>
    %49 = vector.shape_cast %48 : vector<1x128x128xbf16> to vector<128x128xbf16>
    %cst_42 = arith.constant dense<0.000000e+00> : vector<384x128xf32>
    %50 = tpu.matmul %47, %49, %cst_42 {dimension_numbers = #tpu.dot_dimension_numbers<[1], [0], [0], [1], [0, 0, 1, 1], [], []>} : vector<384x128xbf16>, vector<128x128xbf16>, vector<384x128xf32> -> vector<384x128xf32>
    %51 = arith.addf %46, %50 : vector<384x128xf32>
    %c383_i32_43 = arith.constant 383 : i32
    %52 = tpu.dynamic_rotate %40 by %c383_i32_43 dim 0 : vector<384x128xf32>, i32 -> vector<384x128xf32>
    %53 = arith.truncf %52 : vector<384x128xf32> to vector<384x128xbf16>
    %c5 = arith.constant 5 : index
    %c0_44 = arith.constant 0 : index
    %c0_45 = arith.constant 0 : index
    %54 = vector.load %arg5[%c5, %c0_44, %c0_45] : memref<9x128x128xbf16, #tpu.memory_space<vmem>>, vector<1x128x128xbf16>
    %55 = vector.shape_cast %54 : vector<1x128x128xbf16> to vector<128x128xbf16>
    %cst_46 = arith.constant dense<0.000000e+00> : vector<384x128xf32>
    %56 = tpu.matmul %53, %55, %cst_46 {dimension_numbers = #tpu.dot_dimension_numbers<[1], [0], [0], [1], [0, 0, 1, 1], [], []>} : vector<384x128xbf16>, vector<128x128xbf16>, vector<384x128xf32> -> vector<384x128xf32>
    %57 = arith.addf %51, %56 : vector<384x128xf32>
    %c2_47 = arith.constant 2 : index
    %c0_48 = arith.constant 0 : index
    %c0_49 = arith.constant 0 : index
    %58 = vector.load %arg9[%c2_47, %c0_48, %c0_49] : memref<18x24x128xf32, #tpu.memory_space<vmem>>, vector<16x24x128xf32>
    %59 = vector.shape_cast %58 : vector<16x24x128xf32> to vector<384x128xf32>
    %c1_i32_50 = arith.constant 1 : i32
    %60 = tpu.dynamic_rotate %59 by %c1_i32_50 dim 0 : vector<384x128xf32>, i32 -> vector<384x128xf32>
    %61 = arith.truncf %60 : vector<384x128xf32> to vector<384x128xbf16>
    %c6 = arith.constant 6 : index
    %c0_51 = arith.constant 0 : index
    %c0_52 = arith.constant 0 : index
    %62 = vector.load %arg5[%c6, %c0_51, %c0_52] : memref<9x128x128xbf16, #tpu.memory_space<vmem>>, vector<1x128x128xbf16>
    %63 = vector.shape_cast %62 : vector<1x128x128xbf16> to vector<128x128xbf16>
    %cst_53 = arith.constant dense<0.000000e+00> : vector<384x128xf32>
    %64 = tpu.matmul %61, %63, %cst_53 {dimension_numbers = #tpu.dot_dimension_numbers<[1], [0], [0], [1], [0, 0, 1, 1], [], []>} : vector<384x128xbf16>, vector<128x128xbf16>, vector<384x128xf32> -> vector<384x128xf32>
    %65 = arith.addf %57, %64 : vector<384x128xf32>
    %66 = arith.truncf %59 : vector<384x128xf32> to vector<384x128xbf16>
    %c7 = arith.constant 7 : index
    %c0_54 = arith.constant 0 : index
    %c0_55 = arith.constant 0 : index
    %67 = vector.load %arg5[%c7, %c0_54, %c0_55] : memref<9x128x128xbf16, #tpu.memory_space<vmem>>, vector<1x128x128xbf16>
    %68 = vector.shape_cast %67 : vector<1x128x128xbf16> to vector<128x128xbf16>
    %cst_56 = arith.constant dense<0.000000e+00> : vector<384x128xf32>
    %69 = tpu.matmul %66, %68, %cst_56 {dimension_numbers = #tpu.dot_dimension_numbers<[1], [0], [0], [1], [0, 0, 1, 1], [], []>} : vector<384x128xbf16>, vector<128x128xbf16>, vector<384x128xf32> -> vector<384x128xf32>
    %70 = arith.addf %65, %69 : vector<384x128xf32>
    %c383_i32_57 = arith.constant 383 : i32
    %71 = tpu.dynamic_rotate %59 by %c383_i32_57 dim 0 : vector<384x128xf32>, i32 -> vector<384x128xf32>
    %72 = arith.truncf %71 : vector<384x128xf32> to vector<384x128xbf16>
    %c8 = arith.constant 8 : index
    %c0_58 = arith.constant 0 : index
    %c0_59 = arith.constant 0 : index
    %73 = vector.load %arg5[%c8, %c0_58, %c0_59] : memref<9x128x128xbf16, #tpu.memory_space<vmem>>, vector<1x128x128xbf16>
    %74 = vector.shape_cast %73 : vector<1x128x128xbf16> to vector<128x128xbf16>
    %cst_60 = arith.constant dense<0.000000e+00> : vector<384x128xf32>
    %75 = tpu.matmul %72, %74, %cst_60 {dimension_numbers = #tpu.dot_dimension_numbers<[1], [0], [0], [1], [0, 0, 1, 1], [], []>} : vector<384x128xbf16>, vector<128x128xbf16>, vector<384x128xf32> -> vector<384x128xf32>
    %76 = arith.addf %70, %75 : vector<384x128xf32>
    %c0_61 = arith.constant 0 : index
    %c0_62 = arith.constant 0 : index
    %77 = vector.load %arg6[%c0_61, %c0_62] : memref<1x128xf32, #tpu.memory_space<vmem>>, vector<1x128xf32>
    %78 = vector.broadcast %77 : vector<1x128xf32> to vector<384x128xf32>
    %79 = arith.addf %76, %78 : vector<384x128xf32>
    %80 = vector.shape_cast %79 : vector<384x128xf32> to vector<16x24x128xf32>
    %81 = vector.extract_strided_slice %80 {offsets = [0, 0, 0], sizes = [16, 16, 128], strides = [1, 1, 1]} : vector<16x24x128xf32> to vector<16x16x128xf32>
    %82 = arith.truncf %81 : vector<16x16x128xf32> to vector<16x16x128xbf16>
    %c0_63 = arith.constant 0 : index
    %c0_64 = arith.constant 0 : index
    %c0_65 = arith.constant 0 : index
    %c0_66 = arith.constant 0 : index
    %83 = vector.load %arg7[%c0_63, %c0_64, %c0_65, %c0_66] : memref<1x16x16x128xbf16, #tpu.memory_space<vmem>>, vector<1x16x16x128xbf16>
    %84 = vector.shape_cast %83 : vector<1x16x16x128xbf16> to vector<16x16x128xbf16>
    %85 = vector.shape_cast %82 : vector<16x16x128xbf16> to vector<1x16x16x128xbf16>
    tpu.vector_store %arg7[%c0_63, %c0_64, %c0_65, %c0_66], %85 {strides = array<i32>} : memref<1x16x16x128xbf16, #tpu.memory_space<vmem>>, vector<1x16x16x128xbf16>,
    %86 = arith.extf %82 : vector<16x16x128xbf16> to vector<16x16x128xf32>
    %87 = vector.shape_cast %86 : vector<16x16x128xf32> to vector<256x128xf32>
    %cst_67 = arith.constant dense<0.000000e+00> : vector<128xf32>
    %88 = vector.multi_reduction <add>, %87, %cst_67 [0] : vector<256x128xf32> to vector<128xf32>
    %89 = vector.shape_cast %88 : vector<128xf32> to vector<1x128xf32>
    %90 = arith.mulf %87, %87 : vector<256x128xf32>
    %cst_68 = arith.constant dense<0.000000e+00> : vector<128xf32>
    %91 = vector.multi_reduction <add>, %90, %cst_68 [0] : vector<256x128xf32> to vector<128xf32>
    %92 = vector.shape_cast %91 : vector<128xf32> to vector<1x128xf32>
    %93 = tpu.concatenate %89, %92 in 0 : vector<1x128xf32>, vector<1x128xf32> -> vector<2x128xf32>
    %c0_69 = arith.constant 0 : index
    %c0_70 = arith.constant 0 : index
    %c0_71 = arith.constant 0 : index
    %94 = vector.load %arg8[%c0_69, %c0_70, %c0_71] : memref<1x2x128xf32, #tpu.memory_space<vmem>>, vector<1x2x128xf32>
    %95 = vector.shape_cast %94 : vector<1x2x128xf32> to vector<2x128xf32>
    %96 = vector.shape_cast %93 : vector<2x128xf32> to vector<1x2x128xf32>
    tpu.vector_store %arg8[%c0_69, %c0_70, %c0_71], %96 {strides = array<i32>} : memref<1x2x128xf32, #tpu.memory_space<vmem>>, vector<1x2x128xf32>,
    return
  }
  func.func @transform_0(%arg0: i32, %arg1: i32) -> (i32, i32, i32, i32) {
    %c0_i32 = arith.constant 0 : i32
    %c0_i32_0 = arith.constant 0 : i32
    %c0_i32_1 = arith.constant 0 : i32
    %c0_i32_2 = arith.constant 0 : i32
    return %arg0, %c0_i32, %c0_i32_0, %c0_i32_1 : i32, i32, i32, i32
  }
  func.func @transform_1(%arg0: i32, %arg1: i32) -> (i32, i32) {
    %c0_i32 = arith.constant 0 : i32
    %c0_i32_0 = arith.constant 0 : i32
    %c0_i32_1 = arith.constant 0 : i32
    return %c0_i32, %c0_i32_0 : i32, i32
  }
  func.func @transform_2(%arg0: i32, %arg1: i32) -> (i32, i32) {
    %c0_i32 = arith.constant 0 : i32
    %c0_i32_0 = arith.constant 0 : i32
    %c0_i32_1 = arith.constant 0 : i32
    return %c0_i32, %c0_i32_0 : i32, i32
  }
  func.func @transform_3(%arg0: i32, %arg1: i32) -> (i32, i32, i32) {
    %c0_i32 = arith.constant 0 : i32
    %c0_i32_0 = arith.constant 0 : i32
    %c0_i32_1 = arith.constant 0 : i32
    return %c0_i32, %c0_i32_0, %arg1 : i32, i32, i32
  }
  func.func @transform_4(%arg0: i32, %arg1: i32) -> (i32, i32) {
    %c0_i32 = arith.constant 0 : i32
    %c0_i32_0 = arith.constant 0 : i32
    return %c0_i32, %arg1 : i32, i32
  }
  func.func @transform_5(%arg0: i32, %arg1: i32) -> (i32, i32, i32, i32) {
    %c0_i32 = arith.constant 0 : i32
    %c0_i32_0 = arith.constant 0 : i32
    %c0_i32_1 = arith.constant 0 : i32
    return %arg0, %c0_i32, %c0_i32_0, %arg1 : i32, i32, i32, i32
  }
  func.func @transform_6(%arg0: i32, %arg1: i32) -> (i32, i32, i32) {
    %c0_i32 = arith.constant 0 : i32
    %c0_i32_0 = arith.constant 0 : i32
    return %arg0, %c0_i32, %arg1 : i32, i32, i32
  }
}

module attributes {stable_mosaic.version = 11 : i64} {
  func.func @_bn_relu_kernel(%arg0: i32, %arg1: i32, %arg2: memref<1x16x16x128xbf16, #tpu.memory_space<vmem>>, %arg3: memref<1x128xf32, #tpu.memory_space<vmem>>, %arg4: memref<1x128xf32, #tpu.memory_space<vmem>>, %arg5: memref<1x16x16x128xf32, #tpu.memory_space<vmem>>) attributes {dimension_semantics = [#tpu.dimension_semantics<parallel>, #tpu.dimension_semantics<parallel>], iteration_bounds = array<i64: 2, 1>, scalar_prefetch = 0 : i64, scratch_operands = 0 : i64, tpu.core_type = #tpu.core_type<tc>, window_params = [{transform_indices = @transform_0, window_bounds = array<i64: 1, 16, 16, 128>}, {transform_indices = @transform_1, window_bounds = array<i64: 1, 128>}, {transform_indices = @transform_2, window_bounds = array<i64: 1, 128>}, {transform_indices = @transform_3, window_bounds = array<i64: 1, 16, 16, 128>}]} {
    %c0 = arith.constant 0 : index
    %c0_0 = arith.constant 0 : index
    %c0_1 = arith.constant 0 : index
    %c0_2 = arith.constant 0 : index
    %0 = vector.load %arg2[%c0, %c0_0, %c0_1, %c0_2] : memref<1x16x16x128xbf16, #tpu.memory_space<vmem>>, vector<1x16x16x128xbf16>
    %1 = vector.shape_cast %0 : vector<1x16x16x128xbf16> to vector<16x16x128xbf16>
    %2 = arith.extf %1 : vector<16x16x128xbf16> to vector<16x16x128xf32>
    %c0_3 = arith.constant 0 : index
    %c0_4 = arith.constant 0 : index
    %3 = vector.load %arg3[%c0_3, %c0_4] : memref<1x128xf32, #tpu.memory_space<vmem>>, vector<1x128xf32>
    %4 = vector.shape_cast %3 : vector<1x128xf32> to vector<1x1x128xf32>
    %5 = vector.broadcast %4 : vector<1x1x128xf32> to vector<16x16x128xf32>
    %6 = arith.mulf %2, %5 : vector<16x16x128xf32>
    %c0_5 = arith.constant 0 : index
    %c0_6 = arith.constant 0 : index
    %7 = vector.load %arg4[%c0_5, %c0_6] : memref<1x128xf32, #tpu.memory_space<vmem>>, vector<1x128xf32>
    %8 = vector.shape_cast %7 : vector<1x128xf32> to vector<1x1x128xf32>
    %9 = vector.broadcast %8 : vector<1x1x128xf32> to vector<16x16x128xf32>
    %10 = arith.addf %6, %9 : vector<16x16x128xf32>
    %cst = arith.constant 0.000000e+00 : f32
    %11 = vector.broadcast %cst : f32 to vector<16x16x128xf32>
    %12 = arith.maximumf %10, %11 : vector<16x16x128xf32>
    %c0_7 = arith.constant 0 : index
    %c0_8 = arith.constant 0 : index
    %c0_9 = arith.constant 0 : index
    %c0_10 = arith.constant 0 : index
    %13 = vector.load %arg5[%c0_7, %c0_8, %c0_9, %c0_10] : memref<1x16x16x128xf32, #tpu.memory_space<vmem>>, vector<1x16x16x128xf32>
    %14 = vector.shape_cast %13 : vector<1x16x16x128xf32> to vector<16x16x128xf32>
    %15 = vector.shape_cast %12 : vector<16x16x128xf32> to vector<1x16x16x128xf32>
    tpu.vector_store %arg5[%c0_7, %c0_8, %c0_9, %c0_10], %15 {strides = array<i32>} : memref<1x16x16x128xf32, #tpu.memory_space<vmem>>, vector<1x16x16x128xf32>,
    return
  }
  func.func @transform_0(%arg0: i32, %arg1: i32) -> (i32, i32, i32, i32) {
    %c0_i32 = arith.constant 0 : i32
    %c0_i32_0 = arith.constant 0 : i32
    %c0_i32_1 = arith.constant 0 : i32
    return %arg0, %c0_i32, %c0_i32_0, %arg1 : i32, i32, i32, i32
  }
  func.func @transform_1(%arg0: i32, %arg1: i32) -> (i32, i32) {
    %c0_i32 = arith.constant 0 : i32
    %c0_i32_0 = arith.constant 0 : i32
    return %c0_i32, %arg1 : i32, i32
  }
  func.func @transform_2(%arg0: i32, %arg1: i32) -> (i32, i32) {
    %c0_i32 = arith.constant 0 : i32
    %c0_i32_0 = arith.constant 0 : i32
    return %c0_i32, %arg1 : i32, i32
  }
  func.func @transform_3(%arg0: i32, %arg1: i32) -> (i32, i32, i32, i32) {
    %c0_i32 = arith.constant 0 : i32
    %c0_i32_0 = arith.constant 0 : i32
    %c0_i32_1 = arith.constant 0 : i32
    return %arg0, %c0_i32, %c0_i32_0, %arg1 : i32, i32, i32, i32
  }
}

</mosaic_0001>

<bundles_post_ra>
// kernel: upblock_forward.4
= control target key start
LH: loop header
LB: loop body
LE: loop exit
PB: predicated region body
PF: predicated region fallthrough
CT: control target
= control target key end

     0   :  { %s934_s12 = smov 0   ;;  %s1130_s0 = inlined_call_operand.vmem [shape: bf16[2,8,8,128], index: 0, kind: input, shape index: {}]   ;;  %s1131_s1 = inlined_call_operand.vmem [shape: bf16[128,512], index: 1, kind: input, shape index: {}]   ;;  %s1132_s2 = inlined_call_operand.vmem [shape: f32[1,512], index: 2, kind: input, shape index: {}]   ;;  %s1133_s3 = inlined_call_operand.vmem [shape: bf16[2,8,8,512], index: 3, kind: output, shape index: {}]  }
   0x1 LB: > { %s763_s13 = sadd.s32 4294967295, %s911_s12   ;;  %p767_p0 = scmp.ge.s32.totalorder %s911_s12, 1  ;;  %s911_s12 = sphi %s934_s12, %s13_s12  }
   0x2   : > { %p137_p1 = scmp.lt.s32.totalorder %s911_s12, 3 }
   0x4   : > { %p138_p2 = pnand %p767_p0, %p137_p1 }
   0x5   : > { %v853_v0 = vld [vmem:[%s1131_s1 + $0x4] ss:$16 sps:$4 sm:$0xff] (!%p138_p2)   ;;  %v855_v1 = vld [vmem:[%s1131_s1 + $0xc] ss:$16 sps:$4 sm:$0xff] (!%p138_p2)   ;;  %v913_v2 = vmov (!%p138_p2), 0   ;;  %p161_p3 = scmp.lt.s32.totalorder (!%p138_p2), %s763_s13, 1  ;;  %v214_v37 = vlaneseq (!%p138_p2) }
   0x6   : > { %141 = sbr.rel (%p138_p2) target bundleno = 283 (0x11b), region = 32  ;;  %450 = vmatprep.mubr.bf16.mxu0 (!%p138_p2), %v913_v2  ;;  %523 = vmatprep.mubr.bf16.mxu1 (!%p138_p2), %v913_v2  ;;  %v857_v3 = vld [vmem:[%s1131_s1] ss:$16 sps:$4 sm:$0xff] (!%p138_p2)   ;;  %v858_v4 = vld [vmem:[%s1131_s1 + $0x8] ss:$16 sps:$4 sm:$0xff] (!%p138_p2)  }
   0x7   : > { %418 = vmatprep.subr.bf16.mxu0 (!%p138_p2), %v853_v0  ;;  %491 = vmatprep.subr.bf16.mxu1 (!%p138_p2), %v855_v1  ;;  %v859_v5 = vld [vmem:[%s1131_s1 + $0x24] ss:$16 sps:$4 sm:$0xff] (!%p138_p2)   ;;  %v861_v6 = vld [vmem:[%s1131_s1 + $0x2c] ss:$16 sps:$4 sm:$0xff] (!%p138_p2)   ;;  %v863_v7 = vld [vmem:[%s1131_s1 + $0x20] ss:$16 sps:$4 sm:$0xff] (!%p138_p2)  }
   0x8   : > { %419 = vmatpush1.bf16.msra.mxu0 (!%p138_p2), %v857_v3  ;;  %492 = vmatpush1.bf16.msra.mxu1 (!%p138_p2), %v858_v4  ;;  %v864_v8 = vld [vmem:[%s1131_s1 + $0x28] ss:$16 sps:$4 sm:$0xff] (!%p138_p2)   ;;  %v865_v9 = vld [vmem:[%s1131_s1 + $0x44] ss:$16 sps:$4 sm:$0xff] (!%p138_p2)   ;;  %v867_v10 = vld [vmem:[%s1131_s1 + $0x4c] ss:$16 sps:$4 sm:$0xff] (!%p138_p2)  }
   0x9   : > { %420 = vmatprep.subr.bf16.mxu0 (!%p138_p2), %v859_v5  ;;  %493 = vmatprep.subr.bf16.mxu1 (!%p138_p2), %v861_v6  ;;  %v869_v11 = vld [vmem:[%s1131_s1 + $0x40] ss:$16 sps:$4 sm:$0xff] (!%p138_p2)   ;;  %v870_v12 = vld [vmem:[%s1131_s1 + $0x48] ss:$16 sps:$4 sm:$0xff] (!%p138_p2)   ;;  %v871_v13 = vld [vmem:[%s1131_s1 + $0x64] ss:$16 sps:$4 sm:$0xff] (!%p138_p2)  }
   0xa   : > { %v873_v14 = vld [vmem:[%s1131_s1 + $0x6c] ss:$16 sps:$4 sm:$0xff] (!%p138_p2)   ;;  %v875_v15 = vld [vmem:[%s1131_s1 + $0x60] ss:$16 sps:$4 sm:$0xff] (!%p138_p2)   ;;  %v876_v16 = vld [vmem:[%s1131_s1 + $0x68] ss:$16 sps:$4 sm:$0xff] (!%p138_p2)  }
   0xb   : > { %v877_v17 = vld [vmem:[%s1131_s1 + $0x84] ss:$16 sps:$4 sm:$0xff] (!%p138_p2)   ;;  %v879_v18 = vld [vmem:[%s1131_s1 + $0x8c] ss:$16 sps:$4 sm:$0xff] (!%p138_p2)   ;;  %v881_v19 = vld [vmem:[%s1131_s1 + $0x80] ss:$16 sps:$4 sm:$0xff] (!%p138_p2)  }
   0xc   : > { %421 = vmatpush1.bf16.msra.mxu0 (!%p138_p2), %v863_v7  ;;  %494 = vmatpush1.bf16.msra.mxu1 (!%p138_p2), %v864_v8  ;;  %v882_v20 = vld [vmem:[%s1131_s1 + $0x88] ss:$16 sps:$4 sm:$0xff] (!%p138_p2)   ;;  %v883_v21 = vld [vmem:[%s1131_s1 + $0xa4] ss:$16 sps:$4 sm:$0xff] (!%p138_p2)   ;;  %v885_v22 = vld [vmem:[%s1131_s1 + $0xac] ss:$16 sps:$4 sm:$0xff] (!%p138_p2)  }
   0xd   : > { %422 = vmatprep.subr.bf16.mxu0 %v865_v9  ;;  %495 = vmatprep.subr.bf16.mxu1 %v867_v10  ;;  %s1135_s13 = smov (!%p161_p3, %s763_s13), 1  ;;  %v887_v23 = vld [vmem:[%s1131_s1 + $0xa0] ss:$16 sps:$4 sm:$0xff]   ;;  %v888_v24 = vld [vmem:[%s1131_s1 + $0xa8] ss:$16 sps:$4 sm:$0xff]   ;;  %v215_v38 = vshrl.u32 %v214_v37, 7 }
   0xe   : > { %s826_s6 = sshll.u32 %s1135_s13, 5  ;;  %v889_v25 = vld [vmem:[%s1131_s1 + $0xc4] ss:$16 sps:$4 sm:$0xff]   ;;  %v891_v26 = vld [vmem:[%s1131_s1 + $0xcc] ss:$16 sps:$4 sm:$0xff]   ;;  %s827_s7 = sshll.u32 %s1135_s13, 7 }
   0xf   : > { %s1029_s17 = scalar_lea.vmem %s1130_s0, %s826_s6  ;;  %v893_v27 = vld [vmem:[%s1131_s1 + $0xc0] ss:$16 sps:$4 sm:$0xff]   ;;  %v894_v28 = vld [vmem:[%s1131_s1 + $0xc8] ss:$16 sps:$4 sm:$0xff]   ;;  %v895_v29 = vld [vmem:[%s1131_s1 + $0xe4] ss:$16 sps:$4 sm:$0xff]   ;;  %s1081_s10 = scalar_lea.vmem %s1133_s3, %s827_s7 }
  0x10   : > { %423 = vmatpush1.bf16.msra.mxu0 %v869_v11  ;;  %496 = vmatpush1.bf16.msra.mxu1 %v870_v12  ;;  %v897_v30 = vld [vmem:[%s1131_s1 + $0xec] ss:$16 sps:$4 sm:$0xff]   ;;  %v899_v31 = vld [vmem:[%s1131_s1 + $0xe0] ss:$16 sps:$4 sm:$0xff]   ;;  %v900_v32 = vld [vmem:[%s1131_s1 + $0xe8] ss:$16 sps:$4 sm:$0xff]  }
  0x11   : > { %424 = vmatprep.subr.bf16.mxu0 %v871_v13  ;;  %497 = vmatprep.subr.bf16.mxu1 %v873_v14  ;;  %v901_v33 = vld [vmem:[%s1029_s17] sm:$0xff]   ;;  %v902_v34 = vld [vmem:[%s1029_s17 + $0x8] sm:$0xff]   ;;  %v903_v35 = vld [vmem:[%s1029_s17 + $0x10] sm:$0xff]   ;;  %v216_v39 = vsub.s32 0, %v215_v38  ;;  %v224_v40 = vsub.s32 2, %v215_v38  ;;  %v220_v42 = vsub.s32 1, %v215_v38 }
  0x12   : > { %v904_v36 = vld [vmem:[%s1029_s17 + $0x18] sm:$0xff]   ;;  %v212_v41 = vld [vmem:[%s1132_s2] sm:$0xf]  ;;  %v228_v43 = vsub.s32 3, %v215_v38 }
  0x13   : > { %v1065_v44 = vrot.slane %v212_v41, %v216_v39  ;;  %v1067_v45 = vrot.slane %v212_v41, %v224_v40  ;;  %v1069_v46 = vrot.slane %v212_v41, %v220_v42 }
  0x14   : > { %425 = vmatpush1.bf16.msra.mxu0 %v875_v15  ;;  %498 = vmatpush1.bf16.msra.mxu1 %v876_v16  ;;  %v1071_v47 = vrot.slane %v212_v41, %v228_v43 }
  0x15   : > { %426 = vmatprep.subr.bf16.mxu0 %v877_v17  ;;  %499 = vmatprep.subr.bf16.mxu1 %v879_v18 }
  0x18   : > { %427 = vmatpush1.bf16.msra.mxu0 %v881_v19  ;;  %500 = vmatpush1.bf16.msra.mxu1 %v882_v20 }
  0x19   : > { %428 = vmatprep.subr.bf16.mxu0 %v883_v21  ;;  %501 = vmatprep.subr.bf16.mxu1 %v885_v22 }
  0x1c   : > { %429 = vmatpush1.bf16.msra.mxu0 %v887_v23  ;;  %502 = vmatpush1.bf16.msra.mxu1 %v888_v24 }
  0x1d   : > { %430 = vmatprep.subr.bf16.mxu0 %v889_v25  ;;  %503 = vmatprep.subr.bf16.mxu1 %v891_v26 }
  0x20   : > { %431 = vmatpush1.bf16.msra.mxu0 %v893_v27  ;;  %504 = vmatpush1.bf16.msra.mxu1 %v894_v28 }
  0x21   : > { %432 = vmatprep.subr.bf16.mxu0 %v895_v29  ;;  %505 = vmatprep.subr.bf16.mxu1 %v897_v30 }
  0x24   : > { %433 = vmatpush1.bf16.msra.mxu0 %v899_v31  ;;  %506 = vmatpush1.bf16.msra.mxu1 %v900_v32 }
  0x27   : > { %451 = vmatmul.mubr.bf16.vlgmr.msra.gmra.mrb[0].mxu0 %v901_v33  ;;  %524 = vmatmul.mubr.bf16.vlgmr.msra.gmra.mrb[0].mxu1 %v901_v33 }
  0x28   : > { %460 = vmatprep.mubr.bf16.mxu0 %v913_v2  ;;  %533 = vmatprep.mubr.bf16.mxu1 %v913_v2 }
  0x2f   : > { %461 = vmatmul.mubr.bf16.gmra.mrb[4].mxu0 %v902_v34  ;;  %534 = vmatmul.mubr.bf16.gmra.mrb[4].mxu1 %v902_v34 }
  0x30   : > { %470 = vmatprep.mubr.bf16.mxu0 %v913_v2  ;;  %543 = vmatprep.mubr.bf16.mxu1 %v913_v2 }
  0x37   : > { %471 = vmatmul.mubr.bf16.gmra.mrb[8].mxu0 %v903_v35  ;;  %544 = vmatmul.mubr.bf16.gmra.mrb[8].mxu1 %v903_v35 }
  0x38   : > { %480 = vmatprep.mubr.bf16.mxu0 %v913_v2  ;;  %553 = vmatprep.mubr.bf16.mxu1 %v913_v2 }
  0x3f   : > { %481 = vmatmul.mubr.bf16.gmra.mrb[12].mxu0 %v904_v36  ;;  %554 = vmatmul.mubr.bf16.gmra.mrb[12].mxu1 %v904_v36 }
  0xfa   : > { %v452_v48 = vpop.f32.mrb[0].mxu0  ;;  %v525_v49 = vpop.f32.mrb[0].mxu1 }
  0xfb   : > { %v453_v50 = vadd.f32 %v452_v48, %v1065_v44  ;;  %v526_v51 = vadd.f32 %v525_v49, %v1067_v45  ;;  %v454_v52 = vpop.f32.mrb[1].mxu0  ;;  %v527_v53 = vpop.f32.mrb[1].mxu1 }
  0xfc   : > { %v455_v54 = vadd.f32 %v454_v52, %v1069_v46  ;;  %v528_v55 = vadd.f32 %v527_v53, %v1071_v47  ;;  %v456_v56 = vpop.f32.mrb[2].mxu0  ;;  %v529_v57 = vpop.f32.mrb[2].mxu1 }
  0xfd   : > { %v457_v58 = vadd.f32 %v456_v56, %v1065_v44  ;;  %v530_v59 = vadd.f32 %v529_v57, %v1067_v45  ;;  %v458_v60 = vpop.f32.mrb[3].mxu0  ;;  %v531_v61 = vpop.f32.mrb[3].mxu1 }
  0xfe   : > { %v828_v62 = vpack.c.bf16 %v455_v54, %v453_v50  ;;  %v829_v63 = vpack.c.bf16 %v528_v55, %v526_v51  ;;  %v459_v0 = vadd.f32 %v458_v60, %v1069_v46  ;;  %v532_v1 = vadd.f32 %v531_v61, %v1071_v47 }
 0x100   : > { %692 = vst [vmem:[%s1081_s10] sm:$0xff] %v828_v62  ;;  %693 = vst [vmem:[%s1081_s10 + $0x8] sm:$0xff] %v829_v63  ;;  %v830_v2 = vpack.c.bf16 %v459_v0, %v457_v58  ;;  %v831_v3 = vpack.c.bf16 %v532_v1, %v530_v59 }
 0x102   : > { %694 = vst [vmem:[%s1081_s10 + $0x10] sm:$0xff] %v830_v2  ;;  %695 = vst [vmem:[%s1081_s10 + $0x18] sm:$0xff] %v831_v3  ;;  %v462_v4 = vpop.f32.mrb[4].mxu0  ;;  %v535_v5 = vpop.f32.mrb[4].mxu1 }
 0x103   : > { %v463_v6 = vadd.f32 %v462_v4, %v1065_v44  ;;  %v536_v7 = vadd.f32 %v535_v5, %v1067_v45  ;;  %v464_v8 = vpop.f32.mrb[5].mxu0  ;;  %v537_v9 = vpop.f32.mrb[5].mxu1 }
 0x104   : > { %v465_v10 = vadd.f32 %v464_v8, %v1069_v46  ;;  %v538_v11 = vadd.f32 %v537_v9, %v1071_v47  ;;  %v466_v12 = vpop.f32.mrb[6].mxu0  ;;  %v539_v13 = vpop.f32.mrb[6].mxu1 }
 0x105   : > { %v467_v14 = vadd.f32 %v466_v12, %v1065_v44  ;;  %v540_v15 = vadd.f32 %v539_v13, %v1067_v45  ;;  %v468_v16 = vpop.f32.mrb[7].mxu0  ;;  %v541_v17 = vpop.f32.mrb[7].mxu1 }
 0x106   : > { %v832_v18 = vpack.c.bf16 %v465_v10, %v463_v6  ;;  %v833_v19 = vpack.c.bf16 %v538_v11, %v536_v7  ;;  %v469_v20 = vadd.f32 %v468_v16, %v1069_v46  ;;  %v542_v21 = vadd.f32 %v541_v17, %v1071_v47 }
 0x108   : > { %696 = vst [vmem:[%s1081_s10 + $0x20] sm:$0xff] %v832_v18  ;;  %697 = vst [vmem:[%s1081_s10 + $0x28] sm:$0xff] %v833_v19  ;;  %v834_v22 = vpack.c.bf16 %v469_v20, %v467_v14  ;;  %v835_v23 = vpack.c.bf16 %v542_v21, %v540_v15 }
 0x10a   : > { %698 = vst [vmem:[%s1081_s10 + $0x30] sm:$0xff] %v834_v22  ;;  %699 = vst [vmem:[%s1081_s10 + $0x38] sm:$0xff] %v835_v23  ;;  %v472_v24 = vpop.f32.mrb[8].mxu0  ;;  %v545_v25 = vpop.f32.mrb[8].mxu1 }
 0x10b   : > { %v473_v26 = vadd.f32 %v472_v24, %v1065_v44  ;;  %v546_v27 = vadd.f32 %v545_v25, %v1067_v45  ;;  %v474_v28 = vpop.f32.mrb[9].mxu0  ;;  %v547_v29 = vpop.f32.mrb[9].mxu1 }
 0x10c   : > { %v475_v30 = vadd.f32 %v474_v28, %v1069_v46  ;;  %v548_v31 = vadd.f32 %v547_v29, %v1071_v47  ;;  %v476_v32 = vpop.f32.mrb[10].mxu0  ;;  %v549_v33 = vpop.f32.mrb[10].mxu1 }
 0x10d   : > { %v477_v34 = vadd.f32 %v476_v32, %v1065_v44  ;;  %v550_v35 = vadd.f32 %v549_v33, %v1067_v45  ;;  %v478_v36 = vpop.f32.mrb[11].mxu0  ;;  %v551_v37 = vpop.f32.mrb[11].mxu1 }
 0x10e   : > { %v836_v38 = vpack.c.bf16 %v475_v30, %v473_v26  ;;  %v837_v39 = vpack.c.bf16 %v548_v31, %v546_v27  ;;  %v479_v40 = vadd.f32 %v478_v36, %v1069_v46  ;;  %v552_v41 = vadd.f32 %v551_v37, %v1071_v47 }
 0x110   : > { %700 = vst [vmem:[%s1081_s10 + $0x40] sm:$0xff] %v836_v38  ;;  %701 = vst [vmem:[%s1081_s10 + $0x48] sm:$0xff] %v837_v39  ;;  %v838_v42 = vpack.c.bf16 %v479_v40, %v477_v34  ;;  %v839_v43 = vpack.c.bf16 %v552_v41, %v550_v35 }
 0x112   : > { %702 = vst [vmem:[%s1081_s10 + $0x50] sm:$0xff] %v838_v42  ;;  %703 = vst [vmem:[%s1081_s10 + $0x58] sm:$0xff] %v839_v43  ;;  %v482_v48 = vpop.f32.mrb[12].mxu0  ;;  %v555_v49 = vpop.f32.mrb[12].mxu1 }
 0x113   : > { %v483_v50 = vadd.f32 %v482_v48, %v1065_v44  ;;  %v556_v51 = vadd.f32 %v555_v49, %v1067_v45  ;;  %v484_v52 = vpop.f32.mrb[13].mxu0  ;;  %v557_v53 = vpop.f32.mrb[13].mxu1 }
 0x114   : > { %v485_v54 = vadd.f32 %v484_v52, %v1069_v46  ;;  %v558_v55 = vadd.f32 %v557_v53, %v1071_v47  ;;  %v486_v56 = vpop.f32.mrb[14].mxu0  ;;  %v559_v57 = vpop.f32.mrb[14].mxu1 }
 0x115   : > { %v487_v58 = vadd.f32 %v486_v56, %v1065_v44  ;;  %v560_v59 = vadd.f32 %v559_v57, %v1067_v45  ;;  %v488_v60 = vpop.f32.mrb[15].mxu0  ;;  %v561_v61 = vpop.f32.mrb[15].mxu1 }
 0x116   : > { %v840_v62 = vpack.c.bf16 %v485_v54, %v483_v50  ;;  %v841_v63 = vpack.c.bf16 %v558_v55, %v556_v51  ;;  %v489_v0 = vadd.f32 %v488_v60, %v1069_v46  ;;  %v562_v1 = vadd.f32 %v561_v61, %v1071_v47 }
 0x118   : > { %704 = vst [vmem:[%s1081_s10 + $0x60] sm:$0xff] %v840_v62  ;;  %705 = vst [vmem:[%s1081_s10 + $0x68] sm:$0xff] %v841_v63  ;;  %v842_v2 = vpack.c.bf16 %v489_v0, %v487_v58  ;;  %v843_v3 = vpack.c.bf16 %v562_v1, %v560_v59 }
 0x11a   : > { %706 = vst [vmem:[%s1081_s10 + $0x70] sm:$0xff] %v842_v2  ;;  %707 = vst [vmem:[%s1081_s10 + $0x78] sm:$0xff] %v843_v3 }
 0x11b PF: > { %s13_s12 = sadd.s32 1, %s911_s12  }
 0x11c   : > { %p10_p4 = scmp.ge.s32.totalorder %s13_s12, 4  }
 0x11e   :  { %12 = sbr.rel (!%p10_p4) target bundleno = 1 (0x1), region = 62 }

// kernel: upblock_forward.7
= control target key start
LH: loop header
LB: loop body
LE: loop exit
PB: predicated region body
PF: predicated region fallthrough
CT: control target
= control target key end

     0   :  { %s708_s12 = smov 0   ;;  %s710_s13 = smov 0   ;;  %s871_s0 = inlined_call_operand.vmem [shape: bf16[2,16,16,128], index: 0, kind: input, shape index: {}]   ;;  %s872_s1 = inlined_call_operand.vmem [shape: f32[1,128], index: 1, kind: input, shape index: {}]   ;;  %s873_s2 = inlined_call_operand.vmem [shape: f32[1,128], index: 2, kind: input, shape index: {}]   ;;  %s874_s3 = inlined_call_operand.vmem [shape: f32[2,16,16,128], index: 3, kind: output, shape index: {}]  }
   0x1   :  { %s712_s14 = smov 0  }
   0x2 LB: > { %s25_s15 = sadd.s32 1, %s682_s13  ;;  %p550_p0 = scmp.ge.s32.totalorder %s686_s14, 1  ;;  %s686_s14 = sphi %s712_s14, %s13_s14   ;;  %s682_s13 = sphi %s710_s13, %s876_s13   ;;  %s678_s12 = sphi %s708_s12, %s875_s12  }
   0x3   : > { %p27_p1 = scmp.ge.s32.totalorder %s25_s15, 2  ;;  %p172_p2 = scmp.lt.s32.totalorder %s686_s14, 3 }
   0x5   : > { %s878_s15 = smov (%p27_p1, %s25_s15), 0  ;;  %p173_p3 = pnand %p550_p0, %p172_p2 }
   0x6   : > { %p208_p4 = scmp.lt.s32.totalorder (!%p173_p3), %s678_s12, 1  ;;  %v737_v0 = vld [vmem:[%s872_s1] ss:$0 sm:$0xff] (!%p173_p3) }
   0x7   : > { %176 = sbr.rel (%p173_p3) target bundleno = 54 (0x36), region = 32  ;;  %v746_v9 = vld [vmem:[%s873_s2] ss:$0 sm:$0xff] (!%p173_p3) }
   0xe   : > { %s880_s12 = smov (!%p208_p4, %s678_s12), 1 }
   0xf   : > { %s559_s16 = sshll.u32 %s880_s12, 7  ;;  %s560_s24 = sshll.u32 %s880_s12, 8 }
  0x10   : > { %s732_s19 = scalar_lea.vmem %s871_s0, %s559_s16  ;;  %s764_s27 = scalar_lea.vmem %s874_s3, %s560_s24 }
  0x11   : > { %v562_v1 = vld [vmem:[%s732_s19] sm:$0xff]   ;;  %v625_v2 = vld [vmem:[%s732_s19 + $0x8] sm:$0xff]   ;;  %v626_v3 = vld [vmem:[%s732_s19 + $0x10] sm:$0xff]  }
  0x12   : > { %v563_v4 = vunpack.c.l.bf16 %v562_v1  ;;  %v564_v5 = vunpack.c.h.bf16 %v562_v1  ;;  %v567_v6 = vunpack.c.l.bf16 %v625_v2  ;;  %v568_v7 = vunpack.c.h.bf16 %v625_v2  ;;  %v627_v8 = vld [vmem:[%s732_s19 + $0x18] sm:$0xff]   ;;  %v628_v30 = vld [vmem:[%s732_s19 + $0x20] sm:$0xff]   ;;  %v629_v31 = vld [vmem:[%s732_s19 + $0x28] sm:$0xff]  }
  0x13   : > { %v571_v10 = vunpack.c.l.bf16 %v626_v3  ;;  %v572_v11 = vunpack.c.h.bf16 %v626_v3  ;;  %v575_v12 = vunpack.c.l.bf16 %v627_v8  ;;  %v576_v13 = vunpack.c.h.bf16 %v627_v8  ;;  %v630_v36 = vld [vmem:[%s732_s19 + $0x30] sm:$0xff]   ;;  %v631_v37 = vld [vmem:[%s732_s19 + $0x38] sm:$0xff]   ;;  %v632_v3 = vld [vmem:[%s732_s19 + $0x40] sm:$0xff]  }
  0x14   : > { %v301_v14 = vmul.f32 %v563_v4, %v737_v0  ;;  %v302_v15 = vmul.f32 %v564_v5, %v737_v0  ;;  %v303_v16 = vmul.f32 %v567_v6, %v737_v0  ;;  %v304_v17 = vmul.f32 %v568_v7, %v737_v0  ;;  %v633_v4 = vld [vmem:[%s732_s19 + $0x48] sm:$0xff]  }
  0x15   : > { %v305_v18 = vmul.f32 %v571_v10, %v737_v0  ;;  %v306_v19 = vmul.f32 %v572_v11, %v737_v0  ;;  %v307_v20 = vmul.f32 %v575_v12, %v737_v0  ;;  %v308_v21 = vmul.f32 %v576_v13, %v737_v0  ;;  %v634_v10 = vld [vmem:[%s732_s19 + $0x50] sm:$0xff]   ;;  %v635_v11 = vld [vmem:[%s732_s19 + $0x58] sm:$0xff]  }
  0x16   : > { %v340_v22 = vadd.f32 %v746_v9, %v301_v14  ;;  %v341_v23 = vadd.f32 %v746_v9, %v302_v15  ;;  %v342_v24 = vadd.f32 %v746_v9, %v303_v16  ;;  %v343_v25 = vadd.f32 %v746_v9, %v304_v17 }
  0x17   : > { %v344_v26 = vadd.f32 %v746_v9, %v305_v18  ;;  %v345_v27 = vadd.f32 %v746_v9, %v306_v19  ;;  %v346_v28 = vadd.f32 %v746_v9, %v307_v20  ;;  %v347_v29 = vadd.f32 %v746_v9, %v308_v21 }
  0x18   : > { %v372_v32 = vmax.f32 %v340_v22, 0.0  ;;  %v373_v33 = vmax.f32 %v341_v23, 0.0  ;;  %v374_v34 = vmax.f32 %v342_v24, 0.0  ;;  %v375_v35 = vmax.f32 %v343_v25, 0.0 }
  0x19   : > { %v376_v38 = vmax.f32 %v344_v26, 0.0  ;;  %v377_v39 = vmax.f32 %v345_v27, 0.0  ;;  %v378_v40 = vmax.f32 %v346_v28, 0.0  ;;  %v379_v41 = vmax.f32 %v347_v29, 0.0 }
  0x1a   : > { %404 = vst [vmem:[%s764_s27] sm:$0xff] %v372_v32  ;;  %405 = vst [vmem:[%s764_s27 + $0x8] sm:$0xff] %v373_v33  ;;  %v579_v42 = vunpack.c.l.bf16 %v628_v30  ;;  %v580_v43 = vunpack.c.h.bf16 %v628_v30  ;;  %v583_v44 = vunpack.c.l.bf16 %v629_v31  ;;  %v584_v45 = vunpack.c.h.bf16 %v629_v31 }
  0x1b   : > { %406 = vst [vmem:[%s764_s27 + $0x10] sm:$0xff] %v374_v34  ;;  %407 = vst [vmem:[%s764_s27 + $0x18] sm:$0xff] %v375_v35  ;;  %v587_v46 = vunpack.c.l.bf16 %v630_v36  ;;  %v588_v47 = vunpack.c.h.bf16 %v630_v36  ;;  %v591_v48 = vunpack.c.l.bf16 %v631_v37  ;;  %v592_v49 = vunpack.c.h.bf16 %v631_v37 }
  0x1c   : > { %408 = vst [vmem:[%s764_s27 + $0x20] sm:$0xff] %v376_v38  ;;  %409 = vst [vmem:[%s764_s27 + $0x28] sm:$0xff] %v377_v39  ;;  %v309_v50 = vmul.f32 %v579_v42, %v737_v0  ;;  %v310_v51 = vmul.f32 %v580_v43, %v737_v0  ;;  %v311_v52 = vmul.f32 %v583_v44, %v737_v0  ;;  %v595_v16 = vunpack.c.l.bf16 %v632_v3 }
  0x1d   : > { %410 = vst [vmem:[%s764_s27 + $0x30] sm:$0xff] %v378_v40  ;;  %411 = vst [vmem:[%s764_s27 + $0x38] sm:$0xff] %v379_v41  ;;  %v312_v53 = vmul.f32 %v584_v45, %v737_v0  ;;  %v313_v54 = vmul.f32 %v587_v46, %v737_v0  ;;  %v314_v55 = vmul.f32 %v588_v47, %v737_v0  ;;  %v596_v17 = vunpack.c.h.bf16 %v632_v3  ;;  %v636_v40 = vld [vmem:[%s732_s19 + $0x60] sm:$0xff]   ;;  %v637_v41 = vld [vmem:[%s732_s19 + $0x68] sm:$0xff]  }
  0x1e   : > { %v315_v56 = vmul.f32 %v591_v48, %v737_v0  ;;  %v316_v57 = vmul.f32 %v592_v49, %v737_v0  ;;  %v348_v58 = vadd.f32 %v746_v9, %v309_v50  ;;  %v349_v59 = vadd.f32 %v746_v9, %v310_v51  ;;  %v638_v46 = vld [vmem:[%s732_s19 + $0x70] sm:$0xff]   ;;  %v639_v47 = vld [vmem:[%s732_s19 + $0x78] sm:$0xff]  }
  0x1f   : > { %v350_v60 = vadd.f32 %v746_v9, %v311_v52  ;;  %v351_v61 = vadd.f32 %v746_v9, %v312_v53  ;;  %v352_v62 = vadd.f32 %v746_v9, %v313_v54  ;;  %v353_v63 = vadd.f32 %v746_v9, %v314_v55 }
  0x20   : > { %v354_v1 = vadd.f32 %v746_v9, %v315_v56  ;;  %v355_v2 = vadd.f32 %v746_v9, %v316_v57  ;;  %v380_v5 = vmax.f32 %v348_v58, 0.0  ;;  %v381_v6 = vmax.f32 %v349_v59, 0.0 }
  0x21   : > { %v382_v7 = vmax.f32 %v350_v60, 0.0  ;;  %v383_v8 = vmax.f32 %v351_v61, 0.0  ;;  %v384_v12 = vmax.f32 %v352_v62, 0.0  ;;  %v385_v13 = vmax.f32 %v353_v63, 0.0 }
  0x22   : > { %v386_v14 = vmax.f32 %v354_v1, 0.0  ;;  %v387_v15 = vmax.f32 %v355_v2, 0.0  ;;  %412 = vst [vmem:[%s764_s27 + $0x40] sm:$0xff] %v380_v5  ;;  %413 = vst [vmem:[%s764_s27 + $0x48] sm:$0xff] %v381_v6  ;;  %v599_v18 = vunpack.c.l.bf16 %v633_v4  ;;  %v600_v19 = vunpack.c.h.bf16 %v633_v4 }
  0x23   : > { %414 = vst [vmem:[%s764_s27 + $0x50] sm:$0xff] %v382_v7  ;;  %415 = vst [vmem:[%s764_s27 + $0x58] sm:$0xff] %v383_v8  ;;  %v603_v20 = vunpack.c.l.bf16 %v634_v10  ;;  %v604_v21 = vunpack.c.h.bf16 %v634_v10  ;;  %v607_v22 = vunpack.c.l.bf16 %v635_v11  ;;  %v608_v23 = vunpack.c.h.bf16 %v635_v11 }
  0x24   : > { %416 = vst [vmem:[%s764_s27 + $0x60] sm:$0xff] %v384_v12  ;;  %417 = vst [vmem:[%s764_s27 + $0x68] sm:$0xff] %v385_v13  ;;  %v317_v24 = vmul.f32 %v595_v16, %v737_v0  ;;  %v318_v25 = vmul.f32 %v596_v17, %v737_v0  ;;  %v319_v26 = vmul.f32 %v599_v18, %v737_v0  ;;  %v611_v52 = vunpack.c.l.bf16 %v636_v40 }
  0x25   : > { %418 = vst [vmem:[%s764_s27 + $0x70] sm:$0xff] %v386_v14  ;;  %419 = vst [vmem:[%s764_s27 + $0x78] sm:$0xff] %v387_v15  ;;  %v320_v27 = vmul.f32 %v600_v19, %v737_v0  ;;  %v321_v28 = vmul.f32 %v603_v20, %v737_v0  ;;  %v322_v29 = vmul.f32 %v604_v21, %v737_v0  ;;  %v612_v53 = vunpack.c.h.bf16 %v636_v40 }
  0x26   : > { %v323_v30 = vmul.f32 %v607_v22, %v737_v0  ;;  %v324_v31 = vmul.f32 %v608_v23, %v737_v0  ;;  %v356_v32 = vadd.f32 %v746_v9, %v317_v24  ;;  %v357_v33 = vadd.f32 %v746_v9, %v318_v25 }
  0x27   : > { %v358_v34 = vadd.f32 %v746_v9, %v319_v26  ;;  %v359_v35 = vadd.f32 %v746_v9, %v320_v27  ;;  %v360_v36 = vadd.f32 %v746_v9, %v321_v28  ;;  %v361_v37 = vadd.f32 %v746_v9, %v322_v29 }
  0x28   : > { %v362_v38 = vadd.f32 %v746_v9, %v323_v30  ;;  %v363_v39 = vadd.f32 %v746_v9, %v324_v31  ;;  %v388_v42 = vmax.f32 %v356_v32, 0.0  ;;  %v389_v43 = vmax.f32 %v357_v33, 0.0 }
  0x29   : > { %v390_v44 = vmax.f32 %v358_v34, 0.0  ;;  %v391_v45 = vmax.f32 %v359_v35, 0.0  ;;  %v392_v48 = vmax.f32 %v360_v36, 0.0  ;;  %v393_v49 = vmax.f32 %v361_v37, 0.0 }
  0x2a   : > { %v394_v50 = vmax.f32 %v362_v38, 0.0  ;;  %v395_v51 = vmax.f32 %v363_v39, 0.0  ;;  %420 = vst [vmem:[%s764_s27 + $0x80] sm:$0xff] %v388_v42  ;;  %421 = vst [vmem:[%s764_s27 + $0x88] sm:$0xff] %v389_v43  ;;  %v615_v54 = vunpack.c.l.bf16 %v637_v41  ;;  %v616_v55 = vunpack.c.h.bf16 %v637_v41 }
  0x2b   : > { %422 = vst [vmem:[%s764_s27 + $0x90] sm:$0xff] %v390_v44  ;;  %423 = vst [vmem:[%s764_s27 + $0x98] sm:$0xff] %v391_v45  ;;  %v619_v56 = vunpack.c.l.bf16 %v638_v46  ;;  %v620_v57 = vunpack.c.h.bf16 %v638_v46  ;;  %v623_v58 = vunpack.c.l.bf16 %v639_v47  ;;  %v624_v59 = vunpack.c.h.bf16 %v639_v47 }
  0x2c   : > { %424 = vst [vmem:[%s764_s27 + $0xa0] sm:$0xff] %v392_v48  ;;  %425 = vst [vmem:[%s764_s27 + $0xa8] sm:$0xff] %v393_v49  ;;  %v325_v60 = vmul.f32 %v611_v52, %v737_v0  ;;  %v326_v61 = vmul.f32 %v612_v53, %v737_v0  ;;  %v327_v62 = vmul.f32 %v615_v54, %v737_v0 }
  0x2d   : > { %426 = vst [vmem:[%s764_s27 + $0xb0] sm:$0xff] %v394_v50  ;;  %427 = vst [vmem:[%s764_s27 + $0xb8] sm:$0xff] %v395_v51  ;;  %v328_v63 = vmul.f32 %v616_v55, %v737_v0  ;;  %v329_v1 = vmul.f32 %v619_v56, %v737_v0  ;;  %v330_v2 = vmul.f32 %v620_v57, %v737_v0 }
  0x2e   : > { %v331_v3 = vmul.f32 %v623_v58, %v737_v0  ;;  %v332_v4 = vmul.f32 %v624_v59, %v737_v0  ;;  %v364_v5 = vadd.f32 %v746_v9, %v325_v60  ;;  %v365_v6 = vadd.f32 %v746_v9, %v326_v61 }
  0x2f   : > { %v366_v7 = vadd.f32 %v746_v9, %v327_v62  ;;  %v367_v8 = vadd.f32 %v746_v9, %v328_v63  ;;  %v368_v10 = vadd.f32 %v746_v9, %v329_v1  ;;  %v369_v11 = vadd.f32 %v746_v9, %v330_v2 }
  0x30   : > { %v370_v0 = vadd.f32 %v746_v9, %v331_v3  ;;  %v371_v12 = vadd.f32 %v746_v9, %v332_v4  ;;  %v396_v13 = vmax.f32 %v364_v5, 0.0  ;;  %v397_v14 = vmax.f32 %v365_v6, 0.0 }
  0x31   : > { %v398_v15 = vmax.f32 %v366_v7, 0.0  ;;  %v399_v16 = vmax.f32 %v367_v8, 0.0  ;;  %v400_v17 = vmax.f32 %v368_v10, 0.0  ;;  %v401_v18 = vmax.f32 %v369_v11, 0.0 }
  0x32   : > { %v402_v19 = vmax.f32 %v370_v0, 0.0  ;;  %v403_v20 = vmax.f32 %v371_v12, 0.0  ;;  %428 = vst [vmem:[%s764_s27 + $0xc0] sm:$0xff] %v396_v13  ;;  %429 = vst [vmem:[%s764_s27 + $0xc8] sm:$0xff] %v397_v14 }
  0x33   : > { %430 = vst [vmem:[%s764_s27 + $0xd0] sm:$0xff] %v398_v15  ;;  %431 = vst [vmem:[%s764_s27 + $0xd8] sm:$0xff] %v399_v16 }
  0x34   : > { %432 = vst [vmem:[%s764_s27 + $0xe0] sm:$0xff] %v400_v17  ;;  %433 = vst [vmem:[%s764_s27 + $0xe8] sm:$0xff] %v401_v18 }
  0x35   : > { %434 = vst [vmem:[%s764_s27 + $0xf0] sm:$0xff] %v402_v19  ;;  %435 = vst [vmem:[%s764_s27 + $0xf8] sm:$0xff] %v403_v20 }
  0x36 PF: > { %s13_s14 = sadd.s32 1, %s686_s14   ;;  %s875_s12 = smov %s682_s13 }
  0x37   : > { %p10_p5 = scmp.ge.s32.totalorder %s13_s14, 4   ;;  %s876_s13 = smov %s878_s15 }
  0x39   :  { %12 = sbr.rel (!%p10_p5) target bundleno = 2 (0x2), region = 68 }

// kernel: upblock_forward.6
= control target key start
LH: loop header
LB: loop body
LE: loop exit
PB: predicated region body
PF: predicated region fallthrough
CT: control target
= control target key end

     0   :  { %s6167_s21 = smov 0   ;;  %s6169_s22 = smov 0   ;;  %s8227_s0 = inlined_call_operand.vmem [shape: bf16[2,16,16,128], index: 0, kind: input, shape index: {}]   ;;  %s8228_s1 = inlined_call_operand.vmem [shape: f32[1,128], index: 1, kind: input, shape index: {}]   ;;  %s8229_s2 = inlined_call_operand.vmem [shape: f32[1,128], index: 2, kind: input, shape index: {}]   ;;  %s8230_s3 = inlined_call_operand.vmem [shape: bf16[9,128,128], index: 3, kind: input, shape index: {}]   ;;  %s8231_s4 = inlined_call_operand.vmem [shape: f32[1,128], index: 4, kind: input, shape index: {}]   ;;  %s8232_s5 = inlined_call_operand.vmem [shape: bf16[2,16,16,128], index: 5, kind: output, shape index: {0}]   ;;  %s8233_s6 = inlined_call_operand.vmem [shape: f32[2,2,128], index: 6, kind: output, shape index: {1}]  }
   0x1   :  { %s6171_s23 = smov 0  }
   0x2 LB: > { %s29_s24 = sadd.s32 1, %s6124_s22  ;;  %p4675_p0 = scmp.ge.s32.totalorder %s6128_s23, 1  ;;  %s6128_s23 = sphi %s6171_s23, %s17_s23   ;;  %s6124_s22 = sphi %s6169_s22, %s8698_s22   ;;  %s6120_s21 = sphi %s6167_s21, %s8697_s21  }
   0x3   : > { %p31_p1 = scmp.ge.s32.totalorder %s29_s24, 2  ;;  %p248_p2 = scmp.lt.s32.totalorder %s6128_s23, 3 }
   0x5   : > { %s8700_s24 = smov (%p31_p1, %s29_s24), 0  ;;  %p249_p3 = pnand %p4675_p0, %p248_p2 }
   0x7   : > { %252 = sbr.rel (%p249_p3) target bundleno = 717 (0x2cd), region = 40 }
   0xe   : > { %v6032_v0 = vld [vmem:[%s8230_s3 + $0x40] sm:$0xff]   ;;  %v6033_v1 = vld [vmem:[%s8230_s3 + $0x48] sm:$0xff]   ;;  %v8234_v2 = vmov 0.0|0.0   ;;  %p295_p4 = scmp.lt.s32.totalorder %s6120_s21, 1  ;;  %v6034_v3 = vld [vmem:[%s8230_s3 + $0x50] sm:$0xff]   ;;  %v8239_v62 = vmov 0.0  }
   0xf   : > { %5430 = vmatprep.mubr.bf16.mxu0 %v8234_v2  ;;  %5414 = vmatprep.subr.bf16.mxu0 %v6032_v0  ;;  %v6035_v4 = vld [vmem:[%s8230_s3 + $0x58] sm:$0xff]   ;;  %v6212_v6 = vld [vmem:[%s8228_s1] ss:$0 sm:$0xff]  ;;  %v6037_v23 = vld [vmem:[%s8230_s3 + $0x68] sm:$0xff]   ;;  %vm4520_vm2 = vcmask 1040384  }
  0x10   : > { %5990 = vmatprep.subr.bf16.mxu1 %v6032_v0  ;;  %5415 = vmatpush3.bf16.msra.mxu0 %v6032_v0  ;;  %s8702_s21 = smov (!%p295_p4, %s6120_s21), 1  ;;  %v6217_v9 = vld [vmem:[%s8229_s2] ss:$0 sm:$0xff]  ;;  %v6038_v32 = vld [vmem:[%s8230_s3 + $0x70] sm:$0xff]   ;;  %v6039_v43 = vld [vmem:[%s8230_s3 + $0x78] sm:$0xff]  }
  0x11   : > { %5998 = vmatpush3.bf16.msra.mxu1 %v6032_v0  ;;  %5416 = vmatprep.subr.bf16.mxu0 %v6033_v1  ;;  %s4918_s7 = sshll.u32 %s8702_s21, 7  ;;  %v6036_v14 = vld [vmem:[%s8230_s3 + $0x60] sm:$0xff]  }
  0x12   : > { %5991 = vmatprep.subr.bf16.mxu1 %v6033_v1  ;;  %s6203_s10 = scalar_lea.vmem %s8227_s0, %s4918_s7  ;;  %v6040_v53 = vld [vmem:[%s8230_s3] sm:$0xff]   ;;  %s8137_s15 = scalar_lea.vmem %s8232_s5, %s4918_s7 }
  0x13   : > { %v5102_v5 = vld [vmem:[%s6203_s10 + $0x38] sm:$0xff]   ;;  %v4953_v10 = vld [vmem:[%s6203_s10] sm:$0xff]   ;;  %v5096_v26 = vld [vmem:[%s6203_s10 + $0x8] sm:$0xff]   ;;  %s4680_s7 = sshll.u32 %s8702_s21, 1 }
  0x14   : > { %5417 = vmatpush3.bf16.msra.mxu0 %v6033_v1  ;;  %v4982_v7 = vunpack.c.l.bf16 %v5102_v5  ;;  %v4983_v8 = vunpack.c.h.bf16 %v5102_v5  ;;  %v5103_v13 = vld [vmem:[%s6203_s10 + $0x40] sm:$0xff]   ;;  %v4954_v17 = vunpack.c.l.bf16 %v4953_v10  ;;  %v4955_v21 = vunpack.c.h.bf16 %v4953_v10  ;;  %v5104_v30 = vld [vmem:[%s6203_s10 + $0x48] sm:$0xff]   ;;  %v6246_v31 = vld [vmem:[%s6203_s10 + $0x10] sm:$0xff]   ;;  %s321_s18 = scalar_lea.vmem %s8233_s6, %s4680_s7 }
  0x15   : > { %5999 = vmatpush3.bf16.msra.mxu1 %v6033_v1  ;;  %5418 = vmatprep.subr.bf16.mxu0 %v6034_v3  ;;  %v4986_v18 = vunpack.c.l.bf16 %v5103_v13  ;;  %v4987_v22 = vunpack.c.h.bf16 %v5103_v13  ;;  %v4958_v33 = vunpack.c.l.bf16 %v5096_v26  ;;  %v4959_v35 = vunpack.c.h.bf16 %v5096_v26  ;;  %v5105_v36 = vld [vmem:[%s6203_s10 + $0x50] sm:$0xff]   ;;  %v5098_v52 = vld [vmem:[%s6203_s10 + $0x18] sm:$0xff]   ;;  %v6041_v54 = vld [vmem:[%s8230_s3 + $0x80] sm:$0xff]  }
  0x16   : > { %5992 = vmatprep.subr.bf16.mxu1 %v6034_v3  ;;  %v408_v11 = vmul.f32 %v4982_v7, %v6212_v6  ;;  %v409_v12 = vmul.f32 %v4983_v8, %v6212_v6  ;;  %v394_v25 = vmul.f32 %v4954_v17, %v6212_v6  ;;  %v395_v28 = vmul.f32 %v4955_v21, %v6212_v6  ;;  %v5106_v61 = vld [vmem:[%s6203_s10 + $0x58] sm:$0xff]   ;;  %v6042_v5 = vld [vmem:[%s8230_s3 + $0x8] sm:$0xff]  }
  0x17   : > { %v410_v27 = vmul.f32 %v4986_v18, %v6212_v6  ;;  %v411_v29 = vmul.f32 %v4987_v22, %v6212_v6  ;;  %v4990_v38 = vunpack.c.l.bf16 %v5104_v30  ;;  %v4991_v39 = vunpack.c.h.bf16 %v5104_v30  ;;  %v6043_v17 = vld [vmem:[%s8230_s3 + $0x88] sm:$0xff]  }
  0x18   : > { %5419 = vmatpush3.bf16.msra.mxu0 %v6034_v3  ;;  %v447_v15 = vadd.f32 %v6217_v9, %v408_v11  ;;  %v448_v16 = vadd.f32 %v6217_v9, %v409_v12  ;;  %v433_v34 = vadd.f32 %v6217_v9, %v394_v25  ;;  %v4962_v40 = vunpack.c.l.bf16 %v6246_v31 }
  0x19   : > { %6000 = vmatpush3.bf16.msra.mxu1 %v6034_v3  ;;  %5420 = vmatprep.subr.bf16.mxu0 %v6035_v4  ;;  %v449_v37 = vadd.f32 %v6217_v9, %v410_v27  ;;  %v434_v41 = vadd.f32 %v6217_v9, %v395_v28  ;;  %v450_v42 = vadd.f32 %v6217_v9, %v411_v29  ;;  %v4994_v45 = vunpack.c.l.bf16 %v5105_v36  ;;  %v5107_v28 = vld [vmem:[%s6203_s10 + $0x60] sm:$0xff]  }
  0x1a   : > { %5993 = vmatprep.subr.bf16.mxu1 %v6035_v4  ;;  %v6228_v19 = vmax.f32 %v447_v15, 0.0  ;;  %v6230_v20 = vmax.f32 %v448_v16, 0.0  ;;  %v396_v44 = vmul.f32 %v4958_v33, %v6212_v6  ;;  %v6262_v46 = vmax.f32 %v433_v34, 0.0 }
  0x1b   : > { %v397_v47 = vmul.f32 %v4959_v35, %v6212_v6  ;;  %v6265_v48 = vmax.f32 %v449_v37, 0.0  ;;  %v412_v49 = vmul.f32 %v4990_v38, %v6212_v6  ;;  %v413_v50 = vmul.f32 %v4991_v39, %v6212_v6 }
  0x1c   : > { %5421 = vmatpush3.bf16.msra.mxu0 %v6035_v4  ;;  %8385 = vst [vmem:[#allocation3_spill] sm:$0xff] %v6230_v20  ;;  %v6237_v24 = vpack.c.bf16 %v6230_v20, %v6228_v19  ;;  %8387 = vst [vmem:[#allocation5_spill] sm:$0xff] %v6262_v46  ;;  %v398_v51 = vmul.f32 %v4962_v40, %v6212_v6  ;;  %v6277_v55 = vmax.f32 %v434_v41, 0.0  ;;  %v6279_v56 = vmax.f32 %v450_v42, 0.0 }
  0x1d   : > { %6001 = vmatpush3.bf16.msra.mxu1 %v6035_v4  ;;  %5422 = vmatprep.subr.bf16.mxu0 %v6036_v14  ;;  %8388 = vst [vmem:[#allocation6_spill] sm:$0xff] %v6265_v48  ;;  %v435_v57 = vadd.f32 %v6217_v9, %v396_v44  ;;  %v414_v58 = vmul.f32 %v4994_v45, %v6212_v6  ;;  %v4963_v59 = vunpack.c.h.bf16 %v6246_v31  ;;  %v4995_v60 = vunpack.c.h.bf16 %v5105_v36  ;;  %v6044_v31 = vld [vmem:[%s8230_s3 + $0x10] sm:$0xff]  }
  0x1e   : > { %5994 = vmatprep.subr.bf16.mxu1 %v6036_v14  ;;  %8386 = vst [vmem:[#allocation4_spill] sm:$0xff] %v6237_v24  ;;  %5454 = vmatprep.mubr.bf16.mxu1 %v6237_v24  ;;  %8389 = vst [vmem:[#allocation7_spill] sm:$0xff] %v6277_v55  ;;  %v741_v63 = vpack.c.bf16 %v6262_v46, %v8239_v62  ;;  %v436_v0 = vadd.f32 %v6217_v9, %v397_v47  ;;  %v4966_v1 = vunpack.c.l.bf16 %v5098_v52  ;;  %v649_v15 = vlaneseq  ;;  %v6045_v36 = vld [vmem:[%s8230_s3 + $0x90] sm:$0xff]  }
  0x1f   : > { %8390 = vst [vmem:[#allocation8_spill] sm:$0xff] %v6279_v56  ;;  %v4967_v3 = vunpack.c.h.bf16 %v5098_v52  ;;  %v6290_v4 = vpack.c.bf16 %v6265_v48, %v8239_v62  ;;  %v451_v7 = vadd.f32 %v6217_v9, %v412_v49  ;;  %v452_v8 = vadd.f32 %v6217_v9, %v413_v50  ;;  %v6047_v52 = vld [vmem:[%s8230_s3 + $0x98] sm:$0xff]  }
  0x20   : > { %5423 = vmatpush3.bf16.msra.mxu0 %v6036_v14  ;;  %v437_v10 = vadd.f32 %v6217_v9, %v398_v51  ;;  %v742_v11 = vpack.c.bf16 %v8239_v62, %v6277_v55  ;;  %v4998_v12 = vunpack.c.l.bf16 %v5106_v61  ;;  %v4999_v13 = vunpack.c.h.bf16 %v5106_v61  ;;  %v6046_v51 = vld [vmem:[%s8230_s3 + $0x18] sm:$0xff]  }
  0x21   : > { %6002 = vmatpush3.bf16.msra.mxu1 %v6036_v14  ;;  %5424 = vmatprep.subr.bf16.mxu0 %v6037_v23  ;;  %8391 = vst [vmem:[#allocation9_spill] sm:$0xff] %v6290_v4  ;;  %v6301_v14 = vld [vmem:[%s6203_s10 + $0x20] sm:$0xff]   ;;  %v6303_v16 = vmax.f32 %v435_v57, 0.0  ;;  %v453_v18 = vadd.f32 %v6217_v9, %v414_v58  ;;  %v399_v21 = vmul.f32 %v4963_v59, %v6212_v6  ;;  %v6315_v25 = vmax.f32 %v436_v0, 0.0  ;;  %v5100_v58 = vld [vmem:[%s6203_s10 + $0x28] sm:$0xff]  }
  0x22   : > { %5995 = vmatprep.subr.bf16.mxu1 %v6037_v23  ;;  %v415_v22 = vmul.f32 %v4995_v60, %v6212_v6  ;;  %v400_v26 = vmul.f32 %v4966_v1, %v6212_v6  ;;  %v401_v27 = vmul.f32 %v4967_v3, %v6212_v6  ;;  %v6321_v29 = vmax.f32 %v451_v7, 0.0 }
  0x23   : > { %8392 = vst [vmem:[#allocation10_spill] sm:$0xff] %v6303_v16  ;;  %8394 = vst [vmem:[#allocation12_spill] sm:$0xff] %v6315_v25  ;;  %v6323_v30 = vmax.f32 %v452_v8, 0.0  ;;  %v4970_v33 = vunpack.c.l.bf16 %v6301_v14  ;;  %v416_v34 = vmul.f32 %v4998_v12, %v6212_v6  ;;  %v417_v35 = vmul.f32 %v4999_v13, %v6212_v6  ;;  %v5108_v8 = vld [vmem:[%s6203_s10 + $0x68] sm:$0xff]  }
  0x24   : > { %5425 = vmatpush3.bf16.msra.mxu0 %v6037_v23  ;;  %8395 = vst [vmem:[#allocation13_spill] sm:$0xff] %v6321_v29  ;;  %v6336_v37 = vmax.f32 %v453_v18, 0.0  ;;  %v438_v38 = vadd.f32 %v6217_v9, %v399_v21  ;;  %v454_v39 = vadd.f32 %v6217_v9, %v415_v22  ;;  %v5002_v40 = vunpack.c.l.bf16 %v5107_v28  ;;  %v6408_v21 = vld [vmem:[%s6203_s10 + $0x70] sm:$0xff]  }
  0x25   : > { %6003 = vmatpush3.bf16.msra.mxu1 %v6037_v23  ;;  %5426 = vmatprep.subr.bf16.mxu0 %v6038_v32  ;;  %v6313_v23 = vpack.c.bf16 %v8239_v62, %v6279_v56  ;;  %8396 = vst [vmem:[#allocation14_spill] sm:$0xff] %v6323_v30  ;;  %v439_v41 = vadd.f32 %v6217_v9, %v400_v26  ;;  %v4971_v49 = vunpack.c.h.bf16 %v6301_v14  ;;  %v5003_v57 = vunpack.c.h.bf16 %v5107_v28 }
  0x26   : > { %5996 = vmatprep.subr.bf16.mxu1 %v6038_v32  ;;  %v440_v42 = vadd.f32 %v6217_v9, %v401_v27  ;;  %v6347_v44 = vpack.c.bf16 %v6315_v25, %v6303_v16  ;;  %v6351_v45 = vpack.c.bf16 %v6323_v30, %v6321_v29  ;;  %v402_v47 = vmul.f32 %v4970_v33, %v6212_v6  ;;  %v6049_v27 = vld [vmem:[%s8230_s3 + $0xa0] sm:$0xff]  }
  0x27   : > { %8393 = vst [vmem:[#allocation11_spill] sm:$0xff] %v6313_v23  ;;  %v6370_v59 = vpack.c.bf16 %v6336_v37, %v8239_v62  ;;  %v6372_v60 = vmax.f32 %v438_v38, 0.0  ;;  %v6374_v61 = vmax.f32 %v454_v39, 0.0  ;;  %v6377_v0 = vmax.f32 %v439_v41, 0.0  ;;  %v6050_v39 = vld [vmem:[%s8230_s3 + $0x28] sm:$0xff]  }
  0x28   : > { %5427 = vmatpush3.bf16.msra.mxu0 %v6038_v32  ;;  %8398 = vst [vmem:[#allocation16_spill] sm:$0xff] %v6347_v44  ;;  %8399 = vst [vmem:[#allocation17_spill] sm:$0xff] %v6351_v45  ;;  %v6379_v1 = vmax.f32 %v440_v42, 0.0  ;;  %v441_v3 = vadd.f32 %v6217_v9, %v402_v47  ;;  %v403_v7 = vmul.f32 %v4971_v49, %v6212_v6  ;;  %v4974_v18 = vunpack.c.l.bf16 %v5100_v58  ;;  %v6051_v41 = vld [vmem:[%s8230_s3 + $0xa8] sm:$0xff]  }
  0x29   : > { %6004 = vmatpush3.bf16.msra.mxu1 %v6038_v32  ;;  %5428 = vmatprep.subr.bf16.mxu0 %v6039_v43  ;;  %v6328_v32 = vmax.f32 %v437_v10, 0.0  ;;  %8401 = vst [vmem:[#allocation19_spill] sm:$0xff] %v6370_v59  ;;  %8402 = vst [vmem:[#allocation20_spill] sm:$0xff] %v6372_v60  ;;  %v6390_v10 = vld [vmem:[%s6203_s10 + $0x30] sm:$0xff]   ;;  %v419_v14 = vmul.f32 %v5003_v57, %v6212_v6  ;;  %v6413_v22 = vpack.c.bf16 %v8239_v62, %v6374_v61 }
  0x2a   : > { %5997 = vmatprep.subr.bf16.mxu1 %v6039_v43  ;;  %8403 = vst [vmem:[#allocation21_spill] sm:$0xff] %v6377_v0  ;;  %8404 = vst [vmem:[#allocation22_spill] sm:$0xff] %v6379_v1  ;;  %v6417_v26 = vpack.c.bf16 %v6379_v1, %v6377_v0  ;;  %v4975_v28 = vunpack.c.h.bf16 %v5100_v58  ;;  %v6422_v33 = vmax.f32 %v441_v3, 0.0  ;;  %v4978_v42 = vunpack.c.l.bf16 %v6390_v10 }
  0x2b   : > { %8397 = vst [vmem:[#allocation15_spill] sm:$0xff] %v6328_v32  ;;  %v6357_v50 = vpack.c.bf16 %v6328_v32, %v8239_v62  ;;  %8406 = vst [vmem:[#allocation24_spill] sm:$0xff] %v6413_v22  ;;  %v5010_v47 = vunpack.c.l.bf16 %v6408_v21  ;;  %v611_v24 = vrot.slane %v6372_v60, 7 }
  0x2c   : > { %5429 = vmatpush3.bf16.msra.mxu0 %v6039_v43  ;;  %8407 = vst [vmem:[#allocation25_spill] sm:$0xff] %v6417_v26  ;;  %8408 = vst [vmem:[#allocation26_spill] sm:$0xff] %v6422_v33 }
  0x2d   : > { %6005 = vmatpush3.bf16.msra.mxu1 %v6039_v43  ;;  %5542 = vmatprep.subr.bf16.mxu0 %v6041_v54  ;;  %v6343_v43 = vshrl.u32 %v649_v15, 7  ;;  %8400 = vst [vmem:[#allocation18_spill] sm:$0xff] %v6357_v50  ;;  %v6404_v15 = vpack.c.bf16 %v8239_v62, %v6372_v60 }
  0x2e   : > { %5478 = vmatprep.subr.bf16.mxu1 %v6040_v53 }
  0x2f   : > { %5431 = vmatmul.mubr.bf16.vlgmr.msra.gmra.mrb[0].mxu0 %v741_v63  ;;  %v418_v63 = vmul.f32 %v5002_v40, %v6212_v6  ;;  %8405 = vst [vmem:[#allocation23_spill] sm:$0xff] %v6404_v15  ;;  %vm651_vm0 = vcmp.lt.s32.totalorder %v6343_v43, 1  ;;  %v458_v40 = vadd.f32 %v6217_v9, %v419_v14  ;;  %v422_v14 = vmul.f32 %v5010_v47, %v6212_v6 }
  0x30   : > { %5455 = vmatmul.mubr.bf16.vlgmr.msra.gmra.mrb[0].mxu1 %v6290_v4  ;;  %5543 = vmatpush3.bf16.msra.mxu0 %v6041_v54  ;;  %v456_v54 = vadd.f32 %v6217_v9, %v417_v35  ;;  %v5007_v35 = vunpack.c.h.bf16 %v5108_v8  ;;  %v5011_v47 = vunpack.c.h.bf16 %v6408_v21  ;;  %v6055_v21 = vld [vmem:[%s8230_s3 + $0xb8] sm:$0xff]   ;;  %vm1343_vm1 = vcmp.lt.s32.totalorder %v6343_v43, 7 }
  0x31   : > { %5479 = vmatpush3.bf16.msra.mxu1 %v6040_v53  ;;  %5434 = vmatprep.mubr.bf16.mxu0 %v742_v11  ;;  %v455_v53 = vadd.f32 %v6217_v9, %v416_v34  ;;  %v6393_v11 = vrot.slane %v8239_v62, 7  ;;  %v442_v34 = vadd.f32 %v6217_v9, %v403_v7  ;;  %v6466_v7 = vmax.f32 %v458_v40, 0.0 }
  0x32   : > { %5480 = vmatprep.subr.bf16.mxu1 %v6042_v5  ;;  %5458 = vmatprep.mubr.bf16.mxu1 %v6313_v23  ;;  %v6398_v13 = vmax.f32 %v456_v54, 0.0  ;;  %v405_v54 = vmul.f32 %v4975_v28, %v6212_v6  ;;  %v6052_v28 = vld [vmem:[%s8230_s3 + $0x30] sm:$0xff]   ;;  %v1304_v4 = vrot.slane %v6328_v32, 1 }
  0x33   : > { %5544 = vmatprep.subr.bf16.mxu0 %v6043_v17  ;;  %v6396_v12 = vmax.f32 %v455_v53, 0.0  ;;  %v8236_v53 = vrot.slane %v6303_v16, 7  ;;  %v6447_v58 = vmax.f32 %v442_v34, 0.0 }
  0x34   : > { %5545 = vmatpush3.bf16.msra.mxu0 %v6043_v17  ;;  %v457_v17 = vadd.f32 %v6217_v9, %v418_v63 }
  0x35   : > { %5481 = vmatpush3.bf16.msra.mxu1 %v6042_v5  ;;  %5546 = vmatprep.subr.bf16.mxu0 %v6045_v36  ;;  %v6048_v5 = vld [vmem:[%s8230_s3 + $0x20] sm:$0xff]   ;;  %v6428_v38 = vpack.c.bf16 %v6398_v13, %v6396_v12  ;;  %8410 = vst [vmem:[#allocation28_spill] sm:$0xff] %v6447_v58  ;;  %v6462_v3 = vsel %vm651_vm0, %v6393_v11, %v8236_v53  ;;  %v1298_v53 = vrot.slane %v6262_v46, 1 }
  0x36   : > { %5482 = vmatprep.subr.bf16.mxu1 %v6044_v31  ;;  %v6439_v49 = vmax.f32 %v457_v17, 0.0  ;;  %8412 = vst [vmem:[#allocation30_spill] sm:$0xff] %v6462_v3  ;;  %v461_v17 = vadd.f32 %v6217_v9, %v422_v14  ;;  %v423_v14 = vmul.f32 %v5011_v47, %v6212_v6  ;;  %v6553_v47 = vrot.slane %v8239_v62, 1 }
  0x37   : > { %5435 = vmatmul.mubr.bf16.gmra.mrb[4].mxu0 %v6347_v44  ;;  %8409 = vst [vmem:[#allocation27_spill] sm:$0xff] %v6428_v38 }
  0x38   : > { %5459 = vmatmul.mubr.bf16.gmra.mrb[4].mxu1 %v6351_v45  ;;  %5438 = vmatprep.mubr.bf16.mxu0 %v6357_v50  ;;  %v6482_v34 = vpack.c.bf16 %v6439_v49, %v8239_v62  ;;  %8423 = vst [vmem:[#allocation41_spill] sm:$0xff] %v6553_v47  ;;  %v614_v50 = vrot.slane %v6379_v1, 7 }
  0x39   : > { %5483 = vmatpush3.bf16.msra.mxu1 %v6044_v31  ;;  %5462 = vmatprep.mubr.bf16.mxu1 %v6370_v59  ;;  %v5006_v31 = vunpack.c.l.bf16 %v5108_v8  ;;  %v406_v8 = vmul.f32 %v4978_v42, %v6212_v6  ;;  %v4979_v42 = vunpack.c.h.bf16 %v6390_v10  ;;  %v6054_v10 = vld [vmem:[%s8230_s3 + $0x38] sm:$0xff]   ;;  %v610_v59 = vrot.slane %v6328_v32, 7 }
  0x3a   : > { %5547 = vmatpush3.bf16.msra.mxu0 %v6045_v36  ;;  %5484 = vmatprep.subr.bf16.mxu1 %v6046_v51  ;;  %v8237_v36 = vrot.slane %v6277_v55, 7  ;;  %8414 = vst [vmem:[#allocation32_spill] sm:$0xff] %v6482_v34 }
  0x3b   : > { %5548 = vmatprep.subr.bf16.mxu0 %v6047_v52  ;;  %v420_v57 = vmul.f32 %v5006_v31, %v6212_v6  ;;  %v6478_v31 = vpack.c.bf16 %v6422_v33, %v8239_v62  ;;  %v445_v2 = vadd.f32 %v6217_v9, %v406_v8  ;;  %v407_v8 = vmul.f32 %v4979_v42, %v6212_v6 }
  0x3c   : > { %v6455_v63 = vsel %vm651_vm0, %v8237_v36, %v6393_v11  ;;  %v1299_v36 = vrot.slane %v6277_v55, 1 }
  0x3d   : > { %5485 = vmatpush3.bf16.msra.mxu1 %v6046_v51  ;;  %v404_v51 = vmul.f32 %v4974_v18, %v6212_v6  ;;  %8411 = vst [vmem:[#allocation29_spill] sm:$0xff] %v6455_v63  ;;  %8413 = vst [vmem:[#allocation31_spill] sm:$0xff] %v6478_v31 }
  0x3e   : > { %5549 = vmatpush3.bf16.msra.mxu0 %v6047_v52  ;;  %5486 = vmatprep.subr.bf16.mxu1 %v6048_v5  ;;  %v421_v52 = vmul.f32 %v5007_v35, %v6212_v6  ;;  %v444_v35 = vadd.f32 %v6217_v9, %v405_v54  ;;  %v6498_v54 = vpack.c.bf16 %v8239_v62, %v6466_v7  ;;  %v6057_v6 = vld [vmem:[%s8230_s3 + $0x100] sm:$0xff]  }
  0x3f   : > { %5550 = vmatprep.subr.bf16.mxu0 %v6049_v27  ;;  %5439 = vmatmul.mubr.bf16.gmra.mrb[8].mxu0 %v6404_v15  ;;  %v443_v18 = vadd.f32 %v6217_v9, %v404_v51  ;;  %v6494_v51 = vpack.c.bf16 %v8239_v62, %v6447_v58  ;;  %v613_v15 = vrot.slane %v6377_v0, 7 }
  0x40   : > { %5463 = vmatmul.mubr.bf16.gmra.mrb[8].mxu1 %v6413_v22  ;;  %5442 = vmatprep.mubr.bf16.mxu0 %v6417_v26  ;;  %v460_v40 = vadd.f32 %v6217_v9, %v421_v52  ;;  %8416 = vst [vmem:[#allocation34_spill] sm:$0xff] %v6498_v54  ;;  %v6504_v52 = vmax.f32 %v444_v35, 0.0  ;;  %v6524_v35 = vmax.f32 %v461_v17, 0.0  ;;  %v446_v17 = vadd.f32 %v6217_v9, %v407_v8  ;;  %v6059_v26 = vld [vmem:[%s8230_s3 + $0x108] sm:$0xff]  }
  0x41   : > { %5466 = vmatprep.mubr.bf16.mxu1 %v6428_v38  ;;  %5487 = vmatpush3.bf16.msra.mxu1 %v6048_v5  ;;  %v6053_v5 = vld [vmem:[%s8230_s3 + $0xb0] sm:$0xff]   ;;  %8415 = vst [vmem:[#allocation33_spill] sm:$0xff] %v6494_v51  ;;  %v6618_v22 = vsel %vm1343_vm1, %v1299_v36, %v6553_v47 }
  0x42   : > { %5551 = vmatpush3.bf16.msra.mxu0 %v6049_v27  ;;  %5488 = vmatprep.subr.bf16.mxu1 %v6050_v39  ;;  %v459_v27 = vadd.f32 %v6217_v9, %v420_v57  ;;  %v6502_v57 = vmax.f32 %v443_v18, 0.0  ;;  %8417 = vst [vmem:[#allocation35_spill] sm:$0xff] %v6504_v52  ;;  %v6522_v18 = vmax.f32 %v445_v2, 0.0  ;;  %8418 = vst [vmem:[#allocation36_spill] sm:$0xff] %v6524_v35 }
  0x43   : > { %5552 = vmatprep.subr.bf16.mxu0 %v6051_v41  ;;  %v6550_v42 = vpack.c.bf16 %v6524_v35, %v8239_v62  ;;  %8434 = vst [vmem:[#allocation51_spill] sm:$0xff] %v6618_v22 }
  0x45   : > { %5489 = vmatpush3.bf16.msra.mxu1 %v6050_v39  ;;  %v6514_v39 = vmax.f32 %v459_v27, 0.0  ;;  %v6529_v27 = vld [vmem:[%s8230_s3 + $0xc0] sm:$0xff]   ;;  %8422 = vst [vmem:[#allocation40_spill] sm:$0xff] %v6550_v42 }
  0x46   : > { %5553 = vmatpush3.bf16.msra.mxu0 %v6051_v41  ;;  %5490 = vmatprep.subr.bf16.mxu1 %v6052_v28  ;;  %v6516_v41 = vmax.f32 %v460_v40, 0.0  ;;  %v6536_v40 = vpack.c.bf16 %v6504_v52, %v6502_v57 }
  0x47   : > { %5554 = vmatprep.subr.bf16.mxu0 %v6053_v5  ;;  %5443 = vmatmul.mubr.bf16.gmra.mrb[12].mxu0 %v6478_v31  ;;  %v6058_v31 = vld [vmem:[%s8230_s3 + $0xc8] sm:$0xff]  }
  0x48   : > { %5467 = vmatmul.mubr.bf16.gmra.mrb[12].mxu1 %v6482_v34  ;;  %5446 = vmatprep.mubr.bf16.mxu0 %v6494_v51  ;;  %8419 = vst [vmem:[#allocation37_spill] sm:$0xff] %v6536_v40  ;;  %v6540_v2 = vpack.c.bf16 %v6516_v41, %v6514_v39  ;;  %v8432_v34 = vrot.slane %v6277_v55, 7 }
  0x49   : > { %5470 = vmatprep.mubr.bf16.mxu1 %v6498_v54  ;;  %5491 = vmatpush3.bf16.msra.mxu1 %v6052_v28  ;;  %v462_v28 = vadd.f32 %v6217_v9, %v423_v14  ;;  %v6558_v9 = vmax.f32 %v446_v17, 0.0  ;;  %v6578_v17 = vpack.c.bf16 %v6553_v47, %v6553_v47  ;;  %v6601_v54 = vsel %vm1343_vm1, %v6553_v47, %v1298_v53 }
  0x4a   : > { %5555 = vmatpush3.bf16.msra.mxu0 %v6053_v5  ;;  %5492 = vmatprep.subr.bf16.mxu1 %v6054_v10  ;;  %8420 = vst [vmem:[#allocation38_spill] sm:$0xff] %v6540_v2  ;;  %v6546_v5 = vpack.c.bf16 %v6522_v18, %v8239_v62  ;;  %8431 = vst [vmem:[#allocation49_spill] sm:$0xff] %v6601_v54 }
  0x4b   : > { %5556 = vmatprep.subr.bf16.mxu0 %v6055_v21  ;;  %v6560_v8 = vmax.f32 %v462_v28, 0.0  ;;  %8428 = vst [vmem:[#allocation46_spill] sm:$0xff] %v6578_v17  ;;  %v604_v28 = vrot.slane %v6262_v46, 7 }
  0x4c   : > { %8421 = vst [vmem:[#allocation39_spill] sm:$0xff] %v6546_v5 }
  0x4d   : > { %5493 = vmatpush3.bf16.msra.mxu1 %v6054_v10  ;;  %8424 = vst [vmem:[#allocation42_spill] sm:$0xff] %v6560_v8  ;;  %v6566_v10 = vpack.c.bf16 %v6393_v11, %v6393_v11  ;;  %v6574_v14 = vpack.c.bf16 %v8239_v62, %v6560_v8 }
  0x4e   : > { %5557 = vmatpush3.bf16.msra.mxu0 %v6055_v21  ;;  %5606 = vmatprep.subr.bf16.mxu1 %v6529_v27  ;;  %v6570_v21 = vpack.c.bf16 %v8239_v62, %v6558_v9  ;;  %v6592_v62 = vsel %vm651_vm0, %v6393_v11, %v604_v28 }
  0x4f   : > { %5670 = vmatprep.subr.bf16.mxu0 %v6057_v6  ;;  %5447 = vmatmul.mubr.bf16.gmra.mrb[16].mxu0 %v6536_v40  ;;  %8425 = vst [vmem:[#allocation43_spill] sm:$0xff] %v6566_v10  ;;  %8427 = vst [vmem:[#allocation45_spill] sm:$0xff] %v6574_v14  ;;  %v701_v45 = vpack.c.bf16 %v6592_v62, %v6393_v11  ;;  %v1307_v40 = vrot.slane %v6377_v0, 1  ;;  %v617_v0 = vrot.slane %v6447_v58, 7 }
  0x50   : > { %5471 = vmatmul.mubr.bf16.gmra.mrb[16].mxu1 %v6540_v2  ;;  %5450 = vmatprep.mubr.bf16.mxu0 %v6546_v5  ;;  %8426 = vst [vmem:[#allocation44_spill] sm:$0xff] %v6570_v21  ;;  %8429 = vst [vmem:[#allocation47_spill] sm:$0xff] %v6592_v62  ;;  %v6596_v2 = vsel %vm1343_vm1, %v1298_v53, %v1299_v36  ;;  %v1302_v53 = vrot.slane %v6315_v25, 1  ;;  %v1305_v36 = vrot.slane %v6372_v60, 1  ;;  %v6063_v60 = vld [vmem:[%s8230_s3 + $0x118] sm:$0xff]  }
  0x51   : > { %5474 = vmatprep.mubr.bf16.mxu1 %v6550_v42  ;;  %v1301_v42 = vrot.slane %v6303_v16, 1  ;;  %8430 = vst [vmem:[#allocation48_spill] sm:$0xff] %v6596_v2  ;;  %v6786_v32 = vsel %vm651_vm0, %v617_v0, %v6393_v11 }
  0x52   : > { %v6643_v51 = vsel %vm1343_vm1, %v1302_v53, %v6553_v47  ;;  %8456 = vst [vmem:[#allocation72_spill] sm:$0xff] %v6786_v32 }
  0x53   : > { %v6613_v38 = vsel %vm1343_vm1, %v6553_v47, %v1301_v42  ;;  %8437 = vst [vmem:[#allocation53_spill] sm:$0xff] %v6643_v51 }
  0x54   : > { %8433 = vst [vmem:[#allocation50_spill] sm:$0xff] %v6613_v38  ;;  %v1394_v5 = vpack.c.bf16 %v6613_v38, %v6618_v22  ;;  %v1311_v38 = vrot.slane %v6447_v58, 1  ;;  %v1317_v58 = vrot.slane %v6558_v9, 1 }
  0x56   : > { %v8653_v43 = vld [vmem:[#allocation43_spill] sm:$0xff] }
  0x57   : > { %5451 = vmatmul.mubr.bf16.gmra.mrb[20].mxu0 %v6570_v21 }
  0x58   : > { %5475 = vmatmul.mubr.bf16.gmra.mrb[20].mxu1 %v6574_v14  ;;  %5558 = vmatprep.mubr.bf16.mxu0 %v6578_v17  ;;  %v608_v14 = vrot.slane %v6315_v25, 7  ;;  %v6608_v17 = vsel %vm651_vm0, %v604_v28, %v8432_v34  ;;  %v1393_v34 = vpack.c.bf16 %v6596_v2, %v6601_v54  ;;  %v8435_v28 = vrot.slane %v6303_v16, 7 }
  0x59   : > { %5494 = vmatprep.mubr.bf16.mxu1 %v6566_v10  ;;  %v702_v21 = vpack.c.bf16 %v6455_v63, %v6608_v17  ;;  %v6684_v10 = vsel %vm651_vm0, %v611_v24, %v6393_v11  ;;  %v616_v54 = vrot.slane %v6422_v33, 7  ;;  %v628_v25 = vrot.slane %v6265_v48, 7 }
  0x5a   : > { %v6630_v23 = vsel %vm651_vm0, %v8435_v28, %v608_v14  ;;  %v6647_v28 = vsel %vm1343_vm1, %v1301_v42, %v1302_v53  ;;  %v6664_v42 = vsel %vm651_vm0, %v6393_v11, %v610_v59  ;;  %v6669_v53 = vsel %vm651_vm0, %v608_v14, %v6393_v11 }
  0x5b   : > { %8436 = vst [vmem:[#allocation52_spill] sm:$0xff] %v6630_v23  ;;  %8438 = vst [vmem:[#allocation54_spill] sm:$0xff] %v6647_v28  ;;  %v6659_v44 = vpack.c.bf16 %v6630_v23, %v6462_v3  ;;  %v1308_v14 = vrot.slane %v6379_v1, 1  ;;  %v6721_v22 = vpack.c.bf16 %v6643_v51, %v6647_v28  ;;  %v6725_v2 = vpack.c.bf16 %v6664_v42, %v6669_v53 }
  0x5c   : > { %8440 = vst [vmem:[#allocation56_spill] sm:$0xff] %v6669_v53  ;;  %v6790_v63 = vsel %vm651_vm0, %v616_v54, %v617_v0  ;;  %v622_v3 = vrot.slane %v6522_v18, 7  ;;  %v623_v0 = vrot.slane %v6558_v9, 7  ;;  %v6880_v35 = vsel %vm651_vm0, %v6393_v11, %v628_v25 }
  0x5d   : > { %8439 = vst [vmem:[#allocation55_spill] sm:$0xff] %v6659_v44  ;;  %8445 = vst [vmem:[#allocation61_spill] sm:$0xff] %v6721_v22  ;;  %v6743_v28 = vsel %vm1343_vm1, %v1308_v14, %v6553_v47  ;;  %v6825_v16 = vpack.c.bf16 %v6786_v32, %v6790_v63  ;;  %v1316_v32 = vrot.slane %v6522_v18, 1 }
  0x5e   : > { %8446 = vst [vmem:[#allocation62_spill] sm:$0xff] %v6725_v2  ;;  %8450 = vst [vmem:[#allocation66_spill] sm:$0xff] %v6743_v28  ;;  %v6850_v55 = vsel %vm651_vm0, %v6393_v11, %v622_v3 }
  0x5f   : > { %5559 = vmatmul.mubr.bf16.vlgmr.msra.gmra.mrb[24].mxu0 %v1393_v34  ;;  %v6679_v34 = vsel %vm1343_vm1, %v6553_v47, %v1304_v4  ;;  %8463 = vst [vmem:[#allocation78_spill] sm:$0xff] %v6825_v16  ;;  %8468 = vst [vmem:[#allocation83_spill] sm:$0xff] %v6880_v35 }
  0x60   : > { %5495 = vmatmul.mubr.bf16.vlgmr.msra.gmra.mrb[24].mxu1 %v701_v45  ;;  %5671 = vmatpush3.bf16.msra.mxu0 %v6057_v6  ;;  %v6674_v45 = vsel %vm1343_vm1, %v1304_v4, %v1305_v36  ;;  %8442 = vst [vmem:[#allocation58_spill] sm:$0xff] %v6679_v34  ;;  %v6694_v6 = vsel %vm1343_vm1, %v6553_v47, %v1307_v40 }
  0x61   : > { %5607 = vmatpush3.bf16.msra.mxu1 %v6529_v27  ;;  %8441 = vst [vmem:[#allocation57_spill] sm:$0xff] %v6674_v45  ;;  %5498 = vmatprep.mubr.bf16.mxu1 %v702_v21  ;;  %v6689_v27 = vsel %vm651_vm0, %v610_v59, %v611_v24  ;;  %8443 = vst [vmem:[#allocation59_spill] sm:$0xff] %v6694_v6  ;;  %v6699_v4 = vsel %vm1343_vm1, %v1305_v36, %v6553_v47  ;;  %v6061_v24 = vld [vmem:[%s8230_s3 + $0x110] sm:$0xff]   ;;  %v1310_v36 = vrot.slane %v6422_v33, 1 }
  0x62   : > { %5562 = vmatprep.mubr.bf16.mxu0 %v1394_v5  ;;  %8444 = vst [vmem:[#allocation60_spill] sm:$0xff] %v6699_v4  ;;  %v6060_v5 = vld [vmem:[%s8230_s3 + $0xd0] sm:$0xff]   ;;  %5608 = vmatprep.subr.bf16.mxu1 %v6058_v31  ;;  %v6710_v59 = vsel %vm651_vm0, %v613_v15, %v614_v50  ;;  %v6715_v21 = vsel %vm651_vm0, %v6393_v11, %v613_v15 }
  0x63   : > { %5672 = vmatprep.subr.bf16.mxu0 %v6059_v26  ;;  %v6729_v1 = vpack.c.bf16 %v6674_v45, %v6679_v34  ;;  %v6734_v15 = vpack.c.bf16 %v6684_v10, %v6689_v27  ;;  %v6738_v51 = vpack.c.bf16 %v6694_v6, %v6699_v4  ;;  %v6748_v34 = vpack.c.bf16 %v6710_v59, %v6715_v21 }
  0x64   : > { %5673 = vmatpush3.bf16.msra.mxu0 %v6059_v26  ;;  %v6752_v26 = vsel %vm1343_vm1, %v1307_v40, %v1308_v14  ;;  %v6762_v6 = vsel %vm651_vm0, %v614_v50, %v6393_v11  ;;  %v6766_v45 = vsel %vm1343_vm1, %v1310_v36, %v1311_v38  ;;  %v619_v4 = vrot.slane %v6502_v57, 7  ;;  %v6062_v14 = vld [vmem:[%s8230_s3 + $0xd8] sm:$0xff]  }
  0x65   : > { %8447 = vst [vmem:[#allocation63_spill] sm:$0xff] %v6729_v1  ;;  %5609 = vmatpush3.bf16.msra.mxu1 %v6058_v31  ;;  %8448 = vst [vmem:[#allocation64_spill] sm:$0xff] %v6734_v15  ;;  %v6757_v31 = vsel %vm651_vm0, %v6393_v11, %v616_v54  ;;  %5674 = vmatprep.subr.bf16.mxu0 %v6061_v24  ;;  %v620_v40 = vrot.slane %v6504_v52, 7  ;;  %v6781_v50 = vsel %vm1343_vm1, %v6553_v47, %v1310_v36 }
  0x66   : > { %8449 = vst [vmem:[#allocation65_spill] sm:$0xff] %v6738_v51  ;;  %8451 = vst [vmem:[#allocation67_spill] sm:$0xff] %v6748_v34  ;;  %5610 = vmatprep.subr.bf16.mxu1 %v6060_v5  ;;  %v625_v54 = vrot.slane %v6228_v19, 7 }
  0x67   : > { %8452 = vst [vmem:[#allocation68_spill] sm:$0xff] %v6752_v26  ;;  %8453 = vst [vmem:[#allocation69_spill] sm:$0xff] %v6757_v31  ;;  %5563 = vmatmul.mubr.bf16.gmra.mrb[28].mxu0 %v6721_v22  ;;  %v8457_v22 = vrot.slane %v6502_v57, 1  ;;  %v6855_v46 = vsel %vm651_vm0, %v620_v40, %v6393_v11 }
  0x68   : > { %8454 = vst [vmem:[#allocation70_spill] sm:$0xff] %v6766_v45  ;;  %5499 = vmatmul.mubr.bf16.gmra.mrb[28].mxu1 %v6659_v44  ;;  %8455 = vst [vmem:[#allocation71_spill] sm:$0xff] %v6781_v50  ;;  %5566 = vmatprep.mubr.bf16.mxu0 %v6729_v1  ;;  %v6805_v44 = vsel %vm1343_vm1, %v1311_v38, %v6553_v47  ;;  %v6815_v1 = vpack.c.bf16 %v6757_v31, %v6762_v6 }
  0x69   : > { %5502 = vmatprep.mubr.bf16.mxu1 %v6725_v2  ;;  %v6800_v36 = vsel %vm1343_vm1, %v6553_v47, %v8457_v22  ;;  %8459 = vst [vmem:[#allocation74_spill] sm:$0xff] %v6805_v44  ;;  %v6811_v2 = vpack.c.bf16 %v6743_v28, %v6752_v26  ;;  %5611 = vmatpush3.bf16.msra.mxu1 %v6060_v5  ;;  %v626_v22 = vrot.slane %v6230_v20, 7  ;;  %v6064_v5 = vld [vmem:[%s8230_s3 + $0xe0] sm:$0xff]  }
  0x6a   : > { %8458 = vst [vmem:[#allocation73_spill] sm:$0xff] %v6800_v36  ;;  %8461 = vst [vmem:[#allocation76_spill] sm:$0xff] %v6815_v1  ;;  %5675 = vmatpush3.bf16.msra.mxu0 %v6061_v24  ;;  %v6821_v38 = vpack.c.bf16 %v6766_v45, %v6781_v50  ;;  %v6829_v28 = vsel %vm651_vm0, %v619_v4, %v620_v40  ;;  %5612 = vmatprep.subr.bf16.mxu1 %v6062_v14  ;;  %v6065_v24 = vld [vmem:[%s8230_s3 + $0x120] sm:$0xff]   ;;  %v629_v45 = vrot.slane %v6279_v56, 7 }
  0x6b   : > { %8460 = vst [vmem:[#allocation75_spill] sm:$0xff] %v6811_v2  ;;  %5676 = vmatprep.subr.bf16.mxu0 %v6063_v60  ;;  %v6840_v50 = vpack.c.bf16 %v6800_v36, %v6805_v44  ;;  %v6845_v26 = vsel %vm651_vm0, %v6393_v11, %v619_v4  ;;  %v6860_v36 = vsel %vm651_vm0, %v623_v0, %v6393_v11 }
  0x6c   : > { %8462 = vst [vmem:[#allocation77_spill] sm:$0xff] %v6821_v38  ;;  %8465 = vst [vmem:[#allocation80_spill] sm:$0xff] %v6860_v36  ;;  %v6864_v44 = vsel %vm651_vm0, %v622_v3, %v623_v0  ;;  %v6869_v4 = vsel %vm651_vm0, %v6393_v11, %v625_v54  ;;  %v6875_v40 = vsel %vm651_vm0, %v625_v54, %v626_v22  ;;  %v631_v3 = vrot.slane %v6321_v29, 7  ;;  %v6066_v54 = vld [vmem:[%s8230_s3 + $0xe8] sm:$0xff]  }
  0x6d   : > { %8464 = vst [vmem:[#allocation79_spill] sm:$0xff] %v6840_v50  ;;  %8466 = vst [vmem:[#allocation81_spill] sm:$0xff] %v6869_v4  ;;  %5613 = vmatpush3.bf16.msra.mxu1 %v6062_v14  ;;  %v6888_v8 = vsel %vm651_vm0, %v626_v22, %v6393_v11  ;;  %v632_v14 = vrot.slane %v6323_v30, 7  ;;  %v6067_v0 = vld [vmem:[%s8230_s3 + $0x128] sm:$0xff]   ;;  %v6908_v23 = vsel %vm651_vm0, %v628_v25, %v629_v45  ;;  %v634_v22 = vrot.slane %v6336_v37, 7  ;;  %v6069_v25 = vld [vmem:[%s8230_s3 + $0x130] sm:$0xff]  }
  0x6e   : > { %5677 = vmatpush3.bf16.msra.mxu0 %v6063_v60  ;;  %8467 = vst [vmem:[#allocation82_spill] sm:$0xff] %v6875_v40  ;;  %5614 = vmatprep.subr.bf16.mxu1 %v6064_v5  ;;  %v6893_v60 = vsel %vm651_vm0, %v629_v45, %v6393_v11  ;;  %v1314_v45 = vrot.slane %v6504_v52, 1  ;;  %v6926_v62 = vsel %vm651_vm0, %v6393_v11, %v631_v3 }
  0x6f   : > { %5678 = vmatprep.subr.bf16.mxu0 %v6065_v24  ;;  %8469 = vst [vmem:[#allocation84_spill] sm:$0xff] %v6893_v60  ;;  %5567 = vmatmul.mubr.bf16.gmra.mrb[32].mxu0 %v6738_v51  ;;  %v6934_v51 = vsel %vm651_vm0, %v631_v3, %v632_v14  ;;  %v6950_v3 = vsel %vm651_vm0, %v632_v14, %v6393_v11 }
  0x70   : > { %5503 = vmatmul.mubr.bf16.gmra.mrb[32].mxu1 %v6734_v15  ;;  %5570 = vmatprep.mubr.bf16.mxu0 %v6811_v2  ;;  %v635_v15 = vrot.slane %v6374_v61, 7  ;;  %v6960_v53 = vsel %vm651_vm0, %v6393_v11, %v634_v22  ;;  %v7010_v14 = vsel %vm1343_vm1, %v1314_v45, %v6553_v47  ;;  %v7022_v52 = vsel %vm1343_vm1, %v1316_v32, %v1317_v58 }
  0x71   : > { %5506 = vmatprep.mubr.bf16.mxu1 %v6748_v34  ;;  %5615 = vmatpush3.bf16.msra.mxu1 %v6064_v5  ;;  %v637_v5 = vrot.slane %v6396_v12, 7  ;;  %v638_v34 = vrot.slane %v6398_v13, 7  ;;  %8470 = vst [vmem:[#allocation85_spill] sm:$0xff] %v7010_v14  ;;  %8473 = vst [vmem:[#allocation87_spill] sm:$0xff] %v7022_v52 }
  0x72   : > { %5679 = vmatpush3.bf16.msra.mxu0 %v6065_v24  ;;  %5616 = vmatprep.subr.bf16.mxu1 %v6066_v54  ;;  %v6068_v24 = vld [vmem:[%s8230_s3 + $0xf0] sm:$0xff]   ;;  %v6964_v2 = vsel %vm651_vm0, %v634_v22, %v635_v15  ;;  %v6979_v22 = vsel %vm651_vm0, %v635_v15, %v6393_v11 }
  0x73   : > { %5680 = vmatprep.subr.bf16.mxu0 %v6067_v0  ;;  %v6984_v33 = vsel %vm651_vm0, %v6393_v11, %v637_v5  ;;  %v6996_v15 = vsel %vm651_vm0, %v637_v5, %v638_v34  ;;  %v7001_v31 = vsel %vm651_vm0, %v638_v34, %v6393_v11  ;;  %v8471_v5 = vrot.slane %v6502_v57, 1 }
  0x74   : > { %v7041_v34 = vpack.c.bf16 %v6829_v28, %v6845_v26 }
  0x75   : > { %5617 = vmatpush3.bf16.msra.mxu1 %v6066_v54  ;;  %v6071_v54 = vld [vmem:[%s8230_s3 + $0x138] sm:$0xff]  }
  0x76   : > { %5681 = vmatpush3.bf16.msra.mxu0 %v6067_v0  ;;  %5618 = vmatprep.subr.bf16.mxu1 %v6068_v24  ;;  %v6070_v0 = vld [vmem:[%s8230_s3 + $0xf8] sm:$0xff]   ;;  %8475 = vst [vmem:[#allocation89_spill] sm:$0xff] %v7041_v34 }
  0x77   : > { %5682 = vmatprep.subr.bf16.mxu0 %v6069_v25  ;;  %5571 = vmatmul.mubr.bf16.gmra.mrb[36].mxu0 %v6821_v38  ;;  %v7016_v38 = vsel %vm1343_vm1, %v8471_v5, %v1314_v45  ;;  %v7032_v45 = vld [vmem:[%s8230_s3 + $0x140] sm:$0xff]  }
  0x78   : > { %5507 = vmatmul.mubr.bf16.gmra.mrb[36].mxu1 %v6815_v1  ;;  %5574 = vmatprep.mubr.bf16.mxu0 %v6840_v50  ;;  %8472 = vst [vmem:[#allocation86_spill] sm:$0xff] %v7016_v38  ;;  %v7027_v50 = vsel %vm1343_vm1, %v6553_v47, %v1316_v32  ;;  %v7037_v5 = vld [vmem:[%s8230_s3 + $0x180] sm:$0xff]   ;;  %v7045_v32 = vpack.c.bf16 %v7010_v14, %v7016_v38  ;;  %v1320_v1 = vrot.slane %v6230_v20, 1  ;;  %v1323_v20 = vrot.slane %v6279_v56, 1 }
  0x79   : > { %5510 = vmatprep.mubr.bf16.mxu1 %v6825_v16  ;;  %8474 = vst [vmem:[#allocation88_spill] sm:$0xff] %v7027_v50  ;;  %5619 = vmatpush3.bf16.msra.mxu1 %v6068_v24  ;;  %v7050_v24 = vpack.c.bf16 %v6850_v55, %v6855_v46  ;;  %v7054_v16 = vpack.c.bf16 %v7022_v52, %v7027_v50  ;;  %v644_v56 = vrot.slane %v6516_v41, 7 }
  0x7a   : > { %5683 = vmatpush3.bf16.msra.mxu0 %v6069_v25  ;;  %5620 = vmatprep.subr.bf16.mxu1 %v6070_v0  ;;  %8476 = vst [vmem:[#allocation90_spill] sm:$0xff] %v7045_v32  ;;  %v1319_v25 = vrot.slane %v6228_v19, 1  ;;  %v7069_v52 = vsel %vm1343_vm1, %v1317_v58, %v6553_v47  ;;  %v7079_v50 = vsel %vm1343_vm1, %v1320_v1, %v6553_v47 }
  0x7b   : > { %5684 = vmatprep.subr.bf16.mxu0 %v6071_v54  ;;  %8477 = vst [vmem:[#allocation91_spill] sm:$0xff] %v7050_v24  ;;  %8478 = vst [vmem:[#allocation92_spill] sm:$0xff] %v7054_v16  ;;  %v7087_v58 = vpack.c.bf16 %v6860_v36, %v6864_v44  ;;  %v7155_v36 = vpack.c.bf16 %v6880_v35, %v6888_v8 }
  0x7c   : > { %v7064_v14 = vsel %vm1343_vm1, %v6553_v47, %v1319_v25  ;;  %8480 = vst [vmem:[#allocation94_spill] sm:$0xff] %v7069_v52  ;;  %8481 = vst [vmem:[#allocation95_spill] sm:$0xff] %v7079_v50  ;;  %v7083_v38 = vsel %vm1343_vm1, %v1319_v25, %v1320_v1 }
  0x7d   : > { %5621 = vmatpush3.bf16.msra.mxu1 %v6070_v0  ;;  %8479 = vst [vmem:[#allocation93_spill] sm:$0xff] %v7064_v14  ;;  %v640_v0 = vrot.slane %v6439_v49, 7  ;;  %8482 = vst [vmem:[#allocation96_spill] sm:$0xff] %v7083_v38 }
  0x7e   : > { %5685 = vmatpush3.bf16.msra.mxu0 %v6071_v54  ;;  %5734 = vmatprep.subr.bf16.mxu1 %v7032_v45  ;;  %v641_v54 = vrot.slane %v6466_v7, 7  ;;  %8483 = vst [vmem:[#allocation97_spill] sm:$0xff] %v7087_v58  ;;  %8493 = vst [vmem:[#allocation103_spill] sm:$0xff] %v7155_v36 }
  0x7f   : > { %5798 = vmatprep.subr.bf16.mxu0 %v7037_v5  ;;  %5575 = vmatmul.mubr.bf16.gmra.mrb[40].mxu0 %v7045_v32  ;;  %v643_v32 = vrot.slane %v6514_v39, 7  ;;  %v7102_v1 = vsel %vm651_vm0, %v6393_v11, %v640_v0 }
  0x80   : > { %5511 = vmatmul.mubr.bf16.gmra.mrb[40].mxu1 %v7041_v34  ;;  %5578 = vmatprep.mubr.bf16.mxu0 %v7054_v16  ;;  %v1322_v16 = vrot.slane %v6265_v48, 1  ;;  %v7096_v34 = vpack.c.bf16 %v6875_v40, %v6869_v4  ;;  %v7106_v25 = vsel %vm651_vm0, %v640_v0, %v641_v54  ;;  %v1325_v0 = vrot.slane %v6321_v29, 1  ;;  %v8489_v48 = vld [vmem:[#allocation36_spill] sm:$0xff] }
  0x81   : > { %5514 = vmatprep.mubr.bf16.mxu1 %v7050_v24  ;;  %v7091_v24 = vpack.c.bf16 %v7064_v14, %v7069_v52  ;;  %v7110_v14 = vpack.c.bf16 %v7079_v50, %v7083_v38  ;;  %v7115_v52 = vsel %vm651_vm0, %v641_v54, %v6393_v11  ;;  %v7120_v40 = vsel %vm651_vm0, %v6393_v11, %v643_v32 }
  0x82   : > { %8485 = vst [vmem:[#allocation99_spill] sm:$0xff] %v7096_v34  ;;  %v7131_v54 = vsel %vm1343_vm1, %v1322_v16, %v1323_v20  ;;  %v7136_v50 = vsel %vm1343_vm1, %v6553_v47, %v1322_v16  ;;  %v646_v38 = vrot.slane %v8489_v48, 7  ;;  %v7151_v16 = vsel %vm1343_vm1, %v1323_v20, %v6553_v47 }
  0x83   : > { %8484 = vst [vmem:[#allocation98_spill] sm:$0xff] %v7091_v24  ;;  %8486 = vst [vmem:[#allocation100_spill] sm:$0xff] %v7110_v14  ;;  %v7163_v29 = vpack.c.bf16 %v6893_v60, %v6908_v23  ;;  %v7168_v4 = vsel %vm651_vm0, %v643_v32, %v644_v56  ;;  %v7173_v20 = vsel %vm651_vm0, %v644_v56, %v6393_v11  ;;  %v1328_v56 = vrot.slane %v6336_v37, 1 }
  0x84   : > { %8487 = vst [vmem:[#allocation101_spill] sm:$0xff] %v7131_v54  ;;  %8488 = vst [vmem:[#allocation102_spill] sm:$0xff] %v7136_v50 }
  0x85   : > { %8495 = vst [vmem:[#allocation105_spill] sm:$0xff] %v7163_v29  ;;  %v7216_v60 = vsel %vm1343_vm1, %v6553_v47, %v1328_v56 }
  0x86   : > { %8502 = vst [vmem:[#allocation111_spill] sm:$0xff] %v7216_v60 }
  0x87   : > { %5579 = vmatmul.mubr.bf16.gmra.mrb[44].mxu0 %v7091_v24  ;;  %v7146_v24 = vsel %vm1343_vm1, %v6553_v47, %v1325_v0 }
  0x88   : > { %5515 = vmatmul.mubr.bf16.gmra.mrb[44].mxu1 %v7087_v58  ;;  %5582 = vmatprep.mubr.bf16.mxu0 %v7110_v14  ;;  %v8490_v58 = vld [vmem:[#allocation42_spill] sm:$0xff]  ;;  %8491 = vst [vmem:[#allocation36_spill] sm:$0xff] %v7146_v24  ;;  %v7159_v14 = vpack.c.bf16 %v7131_v54, %v7136_v50  ;;  %v7177_v35 = vpack.c.bf16 %v7146_v24, %v7151_v16 }
  0x89   : > { %5518 = vmatprep.mubr.bf16.mxu1 %v7096_v34  ;;  %8492 = vst [vmem:[#allocation42_spill] sm:$0xff] %v7151_v16  ;;  %v1326_v34 = vrot.slane %v6323_v30, 1  ;;  %v7182_v54 = vsel %vm651_vm0, %v6393_v11, %v646_v38  ;;  %v8498_v50 = vrot.slane %v8490_v58, 7  ;;  %v1329_v30 = vrot.slane %v6374_v61, 1 }
  0x8a   : > { %8494 = vst [vmem:[#allocation104_spill] sm:$0xff] %v7159_v14  ;;  %8496 = vst [vmem:[#allocation106_spill] sm:$0xff] %v7177_v35  ;;  %v1341_v16 = vrot.slane %v8490_v58, 1 }
  0x8b   : > { %8497 = vst [vmem:[#allocation107_spill] sm:$0xff] %v7182_v54  ;;  %v7188_v32 = vsel %vm651_vm0, %v646_v38, %v8498_v50  ;;  %v7203_v50 = vsel %vm1343_vm1, %v1326_v34, %v6553_v47  ;;  %v7207_v38 = vsel %vm1343_vm1, %v1325_v0, %v1326_v34  ;;  %v7211_v24 = vsel %vm1343_vm1, %v1328_v56, %v1329_v30 }
  0x8c   : > { %8499 = vst [vmem:[#allocation108_spill] sm:$0xff] %v7203_v50  ;;  %8500 = vst [vmem:[#allocation109_spill] sm:$0xff] %v7207_v38  ;;  %v7228_v34 = vpack.c.bf16 %v6960_v53, %v6950_v3  ;;  %v7232_v0 = vpack.c.bf16 %v7211_v24, %v7216_v60  ;;  %v1332_v56 = vrot.slane %v6398_v13, 1 }
  0x8d   : > { %8501 = vst [vmem:[#allocation110_spill] sm:$0xff] %v7211_v24  ;;  %v7248_v24 = vsel %vm1343_vm1, %v1329_v30, %v6553_v47  ;;  %v7269_v30 = vpack.c.bf16 %v6996_v15, %v6984_v33 }
  0x8e   : > { %8505 = vst [vmem:[#allocation114_spill] sm:$0xff] %v7228_v34  ;;  %8506 = vst [vmem:[#allocation115_spill] sm:$0xff] %v7232_v0  ;;  %v7253_v60 = vsel %vm1343_vm1, %v1332_v56, %v6553_v47 }
  0x8f   : > { %5583 = vmatmul.mubr.bf16.gmra.mrb[48].mxu0 %v7159_v14  ;;  %v7224_v14 = vpack.c.bf16 %v7203_v50, %v7207_v38  ;;  %8508 = vst [vmem:[#allocation117_spill] sm:$0xff] %v7248_v24  ;;  %8509 = vst [vmem:[#allocation118_spill] sm:$0xff] %v7253_v60 }
  0x90   : > { %5519 = vmatmul.mubr.bf16.gmra.mrb[48].mxu1 %v7155_v36  ;;  %5586 = vmatprep.mubr.bf16.mxu0 %v7177_v35  ;;  %v7220_v35 = vpack.c.bf16 %v6934_v51, %v6926_v62  ;;  %8513 = vst [vmem:[#allocation122_spill] sm:$0xff] %v7269_v30  ;;  %v8539_v36 = vld [vmem:[#allocation12_spill] sm:$0xff] }
  0x91   : > { %5522 = vmatprep.mubr.bf16.mxu1 %v7163_v29  ;;  %8504 = vst [vmem:[#allocation113_spill] sm:$0xff] %v7224_v14  ;;  %v1331_v29 = vrot.slane %v6396_v12, 1 }
  0x92   : > { %8503 = vst [vmem:[#allocation112_spill] sm:$0xff] %v7220_v35 }
  0x93   : > { %v7243_v50 = vsel %vm1343_vm1, %v6553_v47, %v1331_v29 }
  0x94   : > { %8507 = vst [vmem:[#allocation116_spill] sm:$0xff] %v7243_v50 }
  0x97   : > { %5587 = vmatmul.mubr.bf16.gmra.mrb[52].mxu0 %v7224_v14  ;;  %v7257_v14 = vsel %vm1343_vm1, %v1331_v29, %v1332_v56  ;;  %v1335_v29 = vrot.slane %v6466_v7, 1  ;;  %v1337_v56 = vrot.slane %v6514_v39, 1 }
  0x98   : > { %5523 = vmatmul.mubr.bf16.gmra.mrb[52].mxu1 %v7220_v35  ;;  %5590 = vmatprep.mubr.bf16.mxu0 %v7232_v0  ;;  %8510 = vst [vmem:[#allocation119_spill] sm:$0xff] %v7257_v14  ;;  %v7261_v0 = vpack.c.bf16 %v6979_v22, %v6964_v2  ;;  %v7273_v38 = vpack.c.bf16 %v7253_v60, %v7257_v14  ;;  %v1334_v35 = vrot.slane %v6439_v49, 1 }
  0x99   : > { %5526 = vmatprep.mubr.bf16.mxu1 %v7228_v34  ;;  %v7265_v34 = vpack.c.bf16 %v7243_v50, %v7248_v24  ;;  %v7294_v14 = vsel %vm1343_vm1, %v6553_v47, %v1337_v56 }
  0x9a   : > { %8511 = vst [vmem:[#allocation120_spill] sm:$0xff] %v7261_v0  ;;  %8514 = vst [vmem:[#allocation123_spill] sm:$0xff] %v7273_v38  ;;  %v7284_v50 = vsel %vm1343_vm1, %v1334_v35, %v1335_v29  ;;  %v7289_v60 = vsel %vm1343_vm1, %v6553_v47, %v1334_v35  ;;  %v7311_v35 = vpack.c.bf16 %v7115_v52, %v7106_v25 }
  0x9b   : > { %8512 = vst [vmem:[#allocation121_spill] sm:$0xff] %v7265_v34  ;;  %8515 = vst [vmem:[#allocation124_spill] sm:$0xff] %v7284_v50 }
  0x9c   : > { %8516 = vst [vmem:[#allocation125_spill] sm:$0xff] %v7289_v60  ;;  %8517 = vst [vmem:[#allocation126_spill] sm:$0xff] %v7294_v14 }
  0x9d   : > { %8521 = vst [vmem:[#allocation130_spill] sm:$0xff] %v7311_v35 }
  0x9f   : > { %5591 = vmatmul.mubr.bf16.gmra.mrb[56].mxu0 %v7265_v34  ;;  %v7299_v34 = vsel %vm1343_vm1, %v1335_v29, %v6553_v47  ;;  %v1340_v29 = vrot.slane %v8489_v48, 1 }
  0xa0   : > { %5527 = vmatmul.mubr.bf16.gmra.mrb[56].mxu1 %v7261_v0  ;;  %5594 = vmatprep.mubr.bf16.mxu0 %v7273_v38  ;;  %8518 = vst [vmem:[#allocation127_spill] sm:$0xff] %v7299_v34  ;;  %v7303_v38 = vpack.c.bf16 %v7102_v1, %v7001_v31  ;;  %v7315_v24 = vpack.c.bf16 %v7294_v14, %v7299_v34  ;;  %v1338_v0 = vrot.slane %v6516_v41, 1 }
  0xa1   : > { %5530 = vmatprep.mubr.bf16.mxu1 %v7269_v30  ;;  %v7307_v30 = vpack.c.bf16 %v7284_v50, %v7289_v60  ;;  %v7335_v34 = vsel %vm1343_vm1, %v1340_v29, %v1341_v16  ;;  %v8538_v60 = vld [vmem:[#allocation10_spill] sm:$0xff] }
  0xa2   : > { %8519 = vst [vmem:[#allocation128_spill] sm:$0xff] %v7303_v38  ;;  %8522 = vst [vmem:[#allocation131_spill] sm:$0xff] %v7315_v24  ;;  %v7327_v50 = vsel %vm1343_vm1, %v1338_v0, %v6553_v47  ;;  %v7331_v14 = vsel %vm1343_vm1, %v1337_v56, %v1338_v0  ;;  %v7352_v0 = vpack.c.bf16 %v7182_v54, %v7173_v20 }
  0xa3   : > { %8520 = vst [vmem:[#allocation129_spill] sm:$0xff] %v7307_v30  ;;  %8523 = vst [vmem:[#allocation132_spill] sm:$0xff] %v7327_v50 }
  0xa4   : > { %8524 = vst [vmem:[#allocation133_spill] sm:$0xff] %v7331_v14  ;;  %8525 = vst [vmem:[#allocation134_spill] sm:$0xff] %v7335_v34 }
  0xa5   : > { %8529 = vst [vmem:[#allocation138_spill] sm:$0xff] %v7352_v0 }
  0xa7   : > { %5595 = vmatmul.mubr.bf16.gmra.mrb[60].mxu0 %v7307_v30  ;;  %v7340_v30 = vsel %vm1343_vm1, %v6553_v47, %v1340_v29  ;;  %v8531_v29 = vrot.slane %v8490_v58, 7 }
  0xa8   : > { %5531 = vmatmul.mubr.bf16.gmra.mrb[60].mxu1 %v7303_v38  ;;  %5598 = vmatprep.mubr.bf16.mxu0 %v7315_v24  ;;  %8526 = vst [vmem:[#allocation135_spill] sm:$0xff] %v7340_v30  ;;  %v7344_v24 = vpack.c.bf16 %v7168_v4, %v7120_v40  ;;  %v7356_v56 = vpack.c.bf16 %v7335_v34, %v7340_v30 }
  0xa9   : > { %5534 = vmatprep.mubr.bf16.mxu1 %v7311_v35  ;;  %v7348_v35 = vpack.c.bf16 %v7327_v50, %v7331_v14  ;;  %v7367_v50 = vsel %vm651_vm0, %v8531_v29, %v6393_v11  ;;  %v7372_v34 = vsel %vm1343_vm1, %v1341_v16, %v6553_v47  ;;  %v8535_v29 = vld [vmem:[#allocation47_spill] sm:$0xff]  ;;  %v8537_v16 = vmov 0.0  }
  0xaa   : > { %8527 = vst [vmem:[#allocation136_spill] sm:$0xff] %v7344_v24  ;;  %8530 = vst [vmem:[#allocation139_spill] sm:$0xff] %v7356_v56  ;;  %v7376_v30 = vpack.c.bf16 %v7367_v50, %v7188_v32  ;;  %v2197_v38 = vpack.c.bf16 %v8538_v60, %v8537_v16  ;;  %v2198_v54 = vpack.c.bf16 %v8537_v16, %v8539_v36  ;;  %v8544_v60 = vld [vmem:[#allocation52_spill] sm:$0xff] }
  0xab   : > { %8528 = vst [vmem:[#allocation137_spill] sm:$0xff] %v7348_v35  ;;  %8532 = vst [vmem:[#allocation140_spill] sm:$0xff] %v7372_v34 }
  0xaf   : > { %5599 = vmatmul.mubr.bf16.gmra.mrb[64].mxu0 %v7348_v35  ;;  %v1415_v35 = vpack.c.bf16 %v6553_v47, %v7372_v34  ;;  %v6074_v34 = vld [vmem:[%s8230_s3 + $0x148] sm:$0xff]  }
  0xb0   : > { %5535 = vmatmul.mubr.bf16.gmra.mrb[64].mxu1 %v7344_v24  ;;  %5602 = vmatprep.mubr.bf16.mxu0 %v7356_v56  ;;  %v8533_v56 = vld [vmem:[#allocation5_spill] sm:$0xff]  ;;  %v8536_v24 = vpack.c.bf16 %v6608_v17, %v8535_v29  ;;  %v8543_v17 = vld [vmem:[#allocation56_spill] sm:$0xff] }
  0xb1   : > { %5538 = vmatprep.mubr.bf16.mxu1 %v7352_v0  ;;  %v8534_v0 = vld [vmem:[#allocation7_spill] sm:$0xff]  ;;  %v8545_v36 = vpack.c.bf16 %v8543_v17, %v8544_v60  ;;  %v8552_v60 = vpack.c.bf16 %v6762_v6, %v6710_v59  ;;  %v6085_v6 = vld [vmem:[%s8230_s3 + $0x1b0] sm:$0xff]  }
  0xb2   : > { %v2196_v14 = vpack.c.bf16 %v8534_v0, %v8533_v56  ;;  %v6075_v0 = vld [vmem:[%s8230_s3 + $0x188] sm:$0xff]   ;;  %v8541_v56 = vld [vmem:[#allocation29_spill] sm:$0xff]  ;;  %v6081_v17 = vld [vmem:[%s8230_s3 + $0x1a0] sm:$0xff]  }
  0xb3   : > { %v8558_v59 = vld [vmem:[#allocation35_spill] sm:$0xff] }
  0xb7   : > { %5603 = vmatmul.mubr.bf16.gmra.mrb[68].mxu0 %v1415_v35  ;;  %v8540_v35 = vld [vmem:[#allocation30_spill] sm:$0xff] }
  0xb8   : > { %5539 = vmatmul.mubr.bf16.gmra.mrb[68].mxu1 %v7376_v30  ;;  %5686 = vmatprep.mubr.bf16.mxu0 %v2196_v14  ;;  %v8542_v47 = vpack.c.bf16 %v8540_v35, %v8541_v56  ;;  %v6076_v14 = vld [vmem:[%s8230_s3 + $0x150] sm:$0xff]   ;;  %v6079_v35 = vld [vmem:[%s8230_s3 + $0x198] sm:$0xff]   ;;  %v8549_v56 = vpack.c.bf16 %v6689_v27, %v6664_v42 }
  0xb9   : > { %5622 = vmatprep.mubr.bf16.mxu1 %v8536_v24  ;;  %v6077_v24 = vld [vmem:[%s8230_s3 + $0x190] sm:$0xff]   ;;  %v8551_v42 = vld [vmem:[#allocation22_spill] sm:$0xff] }
  0xba   : > { %v2201_v27 = vpack.c.bf16 %v8537_v16, %v8551_v42  ;;  %v8565_v42 = vld [vmem:[#allocation80_spill] sm:$0xff] }
  0xbf   : > { %5687 = vmatmul.mubr.bf16.vlgmr.msra.gmra.mrb[72].mxu0 %v2197_v38  ;;  %v8547_v38 = vld [vmem:[#allocation20_spill] sm:$0xff] }
  0xc0   : > { %5623 = vmatmul.mubr.bf16.vlgmr.msra.gmra.mrb[72].mxu1 %v8542_v47  ;;  %5799 = vmatpush3.bf16.msra.mxu0 %v7037_v5  ;;  %v8546_v47 = vld [vmem:[#allocation15_spill] sm:$0xff]  ;;  %v8548_v5 = vld [vmem:[#allocation21_spill] sm:$0xff] }
  0xc1   : > { %5735 = vmatpush3.bf16.msra.mxu1 %v7032_v45  ;;  %5626 = vmatprep.mubr.bf16.mxu1 %v8545_v36  ;;  %v2199_v45 = vpack.c.bf16 %v8547_v38, %v8546_v47  ;;  %v2200_v29 = vpack.c.bf16 %v8548_v5, %v8537_v16  ;;  %v8553_v36 = vld [vmem:[#allocation69_spill] sm:$0xff]  ;;  %v8556_v47 = vld [vmem:[#allocation26_spill] sm:$0xff]  ;;  %v2204_v5 = vpack.c.bf16 %v8537_v16, %v8558_v59 }
  0xc2   : > { %5690 = vmatprep.mubr.bf16.mxu0 %v2198_v54  ;;  %5736 = vmatprep.subr.bf16.mxu1 %v6074_v34  ;;  %v6078_v54 = vld [vmem:[%s8230_s3 + $0x158] sm:$0xff]   ;;  %v2212_v59 = vpack.c.bf16 %v6396_v12, %v8537_v16 }
  0xc3   : > { %5800 = vmatprep.subr.bf16.mxu0 %v6075_v0 }
  0xc4   : > { %5801 = vmatpush3.bf16.msra.mxu0 %v6075_v0  ;;  %v6080_v0 = vld [vmem:[%s8230_s3 + $0x160] sm:$0xff]  }
  0xc5   : > { %5737 = vmatpush3.bf16.msra.mxu1 %v6074_v34  ;;  %5802 = vmatprep.subr.bf16.mxu0 %v6077_v24  ;;  %v8550_v34 = vpack.c.bf16 %v6715_v21, %v6684_v10  ;;  %v6082_v10 = vld [vmem:[%s8230_s3 + $0x168] sm:$0xff]  }
  0xc6   : > { %5738 = vmatprep.subr.bf16.mxu1 %v6076_v14  ;;  %v6083_v21 = vld [vmem:[%s8230_s3 + $0x1a8] sm:$0xff]  }
  0xc7   : > { %5691 = vmatmul.mubr.bf16.gmra.mrb[76].mxu0 %v2199_v45  ;;  %v6084_v45 = vld [vmem:[%s8230_s3 + $0x170] sm:$0xff]  }
  0xc8   : > { %5627 = vmatmul.mubr.bf16.gmra.mrb[76].mxu1 %v8549_v56  ;;  %5694 = vmatprep.mubr.bf16.mxu0 %v2200_v29  ;;  %v6086_v29 = vld [vmem:[%s8230_s3 + $0x178] sm:$0xff]  }
  0xc9   : > { %5630 = vmatprep.mubr.bf16.mxu1 %v8550_v34  ;;  %5739 = vmatpush3.bf16.msra.mxu1 %v6076_v14  ;;  %v8554_v14 = vpack.c.bf16 %v6790_v63, %v8553_v36  ;;  %v2203_v63 = vpack.c.bf16 %v6502_v57, %v8537_v16  ;;  %v8561_v57 = vpack.c.bf16 %v6855_v46, %v6829_v28  ;;  %v7474_v34 = vld [vmem:[%s8230_s3 + $0x1c0] sm:$0xff]  }
  0xca   : > { %5803 = vmatpush3.bf16.msra.mxu0 %v6077_v24  ;;  %5740 = vmatprep.subr.bf16.mxu1 %v6078_v54  ;;  %v8555_v24 = vld [vmem:[#allocation28_spill] sm:$0xff]  ;;  %v8562_v46 = vpack.c.bf16 %v6864_v44, %v6850_v55  ;;  %v8563_v28 = vpack.c.bf16 %v6558_v9, %v6522_v18  ;;  %v8572_v44 = vld [vmem:[#allocation83_spill] sm:$0xff]  ;;  %v8574_v9 = vld [vmem:[#allocation13_spill] sm:$0xff] }
  0xcb   : > { %5804 = vmatprep.subr.bf16.mxu0 %v6079_v35  ;;  %v8557_v38 = vpack.c.bf16 %v8555_v24, %v8556_v47  ;;  %v8573_v18 = vpack.c.bf16 %v6908_v23, %v8572_v44  ;;  %v2209_v24 = vpack.c.bf16 %v8574_v9, %v8537_v16  ;;  %v8575_v47 = vld [vmem:[#allocation14_spill] sm:$0xff]  ;;  %v2211_v23 = vpack.c.bf16 %v6374_v61, %v6336_v37  ;;  %v8585_v44 = vld [vmem:[#allocation107_spill] sm:$0xff] }
  0xcc   : > { %v2213_v37 = vpack.c.bf16 %v8537_v16, %v6398_v13  ;;  %v2214_v61 = vpack.c.bf16 %v6466_v7, %v6439_v49 }
  0xcd   : > { %5741 = vmatpush3.bf16.msra.mxu1 %v6078_v54  ;;  %v6087_v54 = vld [vmem:[%s8230_s3 + $0x1b8] sm:$0xff]  }
  0xce   : > { %5805 = vmatpush3.bf16.msra.mxu0 %v6079_v35  ;;  %5742 = vmatprep.subr.bf16.mxu1 %v6080_v0  ;;  %v8559_v35 = vld [vmem:[#allocation72_spill] sm:$0xff] }
  0xcf   : > { %5806 = vmatprep.subr.bf16.mxu0 %v6081_v17  ;;  %5695 = vmatmul.mubr.bf16.gmra.mrb[80].mxu0 %v2201_v27  ;;  %v8560_v56 = vpack.c.bf16 %v6845_v26, %v8559_v35  ;;  %v7479_v26 = vld [vmem:[%s8230_s3 + $0x200] sm:$0xff]  }
  0xd0   : > { %5631 = vmatmul.mubr.bf16.gmra.mrb[80].mxu1 %v8552_v60  ;;  %5698 = vmatprep.mubr.bf16.mxu0 %v8557_v38  ;;  %v8569_v60 = vld [vmem:[#allocation8_spill] sm:$0xff]  ;;  %v2210_v38 = vpack.c.bf16 %v8537_v16, %v8575_v47 }
  0xd1   : > { %5634 = vmatprep.mubr.bf16.mxu1 %v8554_v14  ;;  %5743 = vmatpush3.bf16.msra.mxu1 %v6080_v0  ;;  %v2206_v0 = vpack.c.bf16 %v6228_v19, %v8537_v16  ;;  %v8567_v19 = vld [vmem:[#allocation3_spill] sm:$0xff]  ;;  %v8570_v14 = vld [vmem:[#allocation82_spill] sm:$0xff] }
  0xd2   : > { %5807 = vmatpush3.bf16.msra.mxu0 %v6081_v17  ;;  %5744 = vmatprep.subr.bf16.mxu1 %v6082_v10  ;;  %v8564_v17 = vld [vmem:[#allocation81_spill] sm:$0xff]  ;;  %v8571_v55 = vpack.c.bf16 %v6888_v8, %v8570_v14  ;;  %v8578_v8 = vpack.c.bf16 %v6950_v3, %v6934_v51  ;;  %v6104_v51 = vld [vmem:[%s8228_s1] ss:$0 sm:$0xff] }
  0xd3   : > { %5808 = vmatprep.subr.bf16.mxu0 %v6083_v21  ;;  %v8566_v27 = vpack.c.bf16 %v8564_v17, %v8565_v42  ;;  %v8583_v17 = vpack.c.bf16 %v7120_v40, %v7115_v52 }
  0xd5   : > { %5745 = vmatpush3.bf16.msra.mxu1 %v6082_v10  ;;  %v2207_v10 = vpack.c.bf16 %v8537_v16, %v8567_v19 }
  0xd6   : > { %5809 = vmatpush3.bf16.msra.mxu0 %v6083_v21  ;;  %5746 = vmatprep.subr.bf16.mxu1 %v6084_v45  ;;  %v8568_v21 = vld [vmem:[#allocation6_spill] sm:$0xff] }
  0xd7   : > { %5810 = vmatprep.subr.bf16.mxu0 %v6085_v6  ;;  %5699 = vmatmul.mubr.bf16.gmra.mrb[84].mxu0 %v2203_v63  ;;  %v2208_v36 = vpack.c.bf16 %v8569_v60, %v8568_v21  ;;  %v5110_v63 = vld [vmem:[%s6203_s10 + $0x78] sm:$0xff]  }
  0xd8   : > { %5635 = vmatmul.mubr.bf16.gmra.mrb[84].mxu1 %v8560_v56  ;;  %5702 = vmatprep.mubr.bf16.mxu0 %v2204_v5  ;;  %v5014_v5 = vunpack.c.l.bf16 %v5110_v63  ;;  %v5015_v12 = vunpack.c.h.bf16 %v5110_v63  ;;  %v8588_v63 = vld [vmem:[#allocation51_spill] sm:$0xff] }
  0xd9   : > { %5638 = vmatprep.mubr.bf16.mxu1 %v8561_v57  ;;  %5747 = vmatpush3.bf16.msra.mxu1 %v6084_v45  ;;  %v8576_v45 = vld [vmem:[#allocation84_spill] sm:$0xff]  ;;  %v2215_v57 = vpack.c.bf16 %v6514_v39, %v8537_v16  ;;  %v8584_v39 = vpack.c.bf16 %v7173_v20, %v7168_v4  ;;  %v2217_v4 = vpack.c.bf16 %v8490_v58, %v8489_v48 }
  0xda   : > { %5811 = vmatpush3.bf16.msra.mxu0 %v6085_v6  ;;  %5748 = vmatprep.subr.bf16.mxu1 %v6086_v29  ;;  %v8577_v6 = vpack.c.bf16 %v6926_v62, %v8576_v45  ;;  %v8580_v62 = vpack.c.bf16 %v6984_v33, %v6979_v22  ;;  %v424_v3 = vmul.f32 %v6104_v51, %v5014_v5 }
  0xdb   : > { %5812 = vmatprep.subr.bf16.mxu0 %v6087_v54  ;;  %v8581_v33 = vpack.c.bf16 %v7001_v31, %v6996_v15  ;;  %v8582_v22 = vpack.c.bf16 %v7106_v25, %v7102_v1  ;;  %v425_v13 = vmul.f32 %v6104_v51, %v5015_v12  ;;  %v2216_v1 = vpack.c.bf16 %v8537_v16, %v6516_v41 }
  0xdd   : > { %5749 = vmatpush3.bf16.msra.mxu1 %v6086_v29  ;;  %v8579_v29 = vpack.c.bf16 %v6964_v2, %v6960_v53  ;;  %v6105_v2 = vld [vmem:[%s8229_s2] ss:$0 sm:$0xff] }
  0xde   : > { %5813 = vmatpush3.bf16.msra.mxu0 %v6087_v54  ;;  %5862 = vmatprep.subr.bf16.mxu1 %v7474_v34  ;;  %v463_v53 = vadd.f32 %v6105_v2, %v424_v3  ;;  %v464_v25 = vadd.f32 %v6105_v2, %v425_v13  ;;  %v8590_v3 = vld [vmem:[#allocation50_spill] sm:$0xff]  ;;  %v8592_v13 = vld [vmem:[#allocation53_spill] sm:$0xff] }
  0xdf   : > { %5926 = vmatprep.subr.bf16.mxu0 %v7479_v26  ;;  %5703 = vmatmul.mubr.bf16.gmra.mrb[88].mxu0 %v8563_v28 }
  0xe0   : > { %5639 = vmatmul.mubr.bf16.gmra.mrb[88].mxu1 %v8562_v46  ;;  %5706 = vmatprep.mubr.bf16.mxu0 %v2206_v0  ;;  %v7541_v54 = vmax.f32 %v463_v53, 0.0  ;;  %v7566_v42 = vmax.f32 %v464_v25, 0.0  ;;  %v8594_v25 = vld [vmem:[#allocation62_spill] sm:$0xff] }
  0xe1   : > { %5642 = vmatprep.mubr.bf16.mxu1 %v8566_v27 }
  0xe2   : > { %v1815_v28 = vrot.slane %v7541_v54, 7  ;;  %v2218_v60 = vpack.c.bf16 %v7541_v54, %v8537_v16 }
  0xe4   : > { %v7571_v41 = vsel %vm651_vm0, %v6393_v11, %v1815_v28 }
  0xe5   : > { %v1888_v21 = vpack.c.bf16 %v7571_v41, %v7367_v50 }
  0xe7   : > { %5707 = vmatmul.mubr.bf16.gmra.mrb[92].mxu0 %v2207_v10 }
  0xe8   : > { %5643 = vmatmul.mubr.bf16.gmra.mrb[92].mxu1 %v8571_v55  ;;  %5710 = vmatprep.mubr.bf16.mxu0 %v2208_v36  ;;  %v1816_v36 = vrot.slane %v7566_v42, 7 }
  0xe9   : > { %5646 = vmatprep.mubr.bf16.mxu1 %v8573_v18  ;;  %v8586_v18 = vpack.c.bf16 %v7188_v32, %v8585_v44 }
  0xea   : > { %v7598_v48 = vsel %vm651_vm0, %v1816_v36, %v6393_v11  ;;  %v7602_v58 = vsel %vm651_vm0, %v1815_v28, %v1816_v36  ;;  %v8595_v28 = vld [vmem:[#allocation64_spill] sm:$0xff] }
  0xeb   : > { %v1889_v32 = vpack.c.bf16 %v7598_v48, %v7602_v58  ;;  %v8597_v36 = vld [vmem:[#allocation60_spill] sm:$0xff] }
  0xef   : > { %5711 = vmatmul.mubr.bf16.gmra.mrb[96].mxu0 %v2209_v24 }
  0xf0   : > { %5647 = vmatmul.mubr.bf16.gmra.mrb[96].mxu1 %v8577_v6  ;;  %5714 = vmatprep.mubr.bf16.mxu0 %v2210_v38  ;;  %v2219_v38 = vpack.c.bf16 %v8537_v16, %v7566_v42 }
  0xf1   : > { %5650 = vmatprep.mubr.bf16.mxu1 %v8578_v8  ;;  %v8587_v8 = vld [vmem:[#allocation48_spill] sm:$0xff] }
  0xf7   : > { %5715 = vmatmul.mubr.bf16.gmra.mrb[100].mxu0 %v2211_v23  ;;  %v2622_v23 = vpack.c.bf16 %v8588_v63, %v8587_v8  ;;  %v8600_v8 = vld [vmem:[#allocation67_spill] sm:$0xff]  ;;  %v8601_v63 = vld [vmem:[#allocation76_spill] sm:$0xff] }
  0xf8   : > { %5651 = vmatmul.mubr.bf16.gmra.mrb[100].mxu1 %v8579_v29  ;;  %5718 = vmatprep.mubr.bf16.mxu0 %v2212_v59  ;;  %v8589_v29 = vld [vmem:[#allocation55_spill] sm:$0xff] }
  0xf9   : > { %5654 = vmatprep.mubr.bf16.mxu1 %v8580_v62 }
  0xff   : > { %5719 = vmatmul.mubr.bf16.gmra.mrb[104].mxu0 %v2213_v37  ;;  %v8591_v37 = vld [vmem:[#allocation54_spill] sm:$0xff] }
 0x100   : > { %5655 = vmatmul.mubr.bf16.gmra.mrb[104].mxu1 %v8581_v33  ;;  %5722 = vmatprep.mubr.bf16.mxu0 %v2214_v61  ;;  %v2623_v61 = vpack.c.bf16 %v8591_v37, %v8590_v3 }
 0x101   : > { %5658 = vmatprep.mubr.bf16.mxu1 %v8582_v22 }
 0x102   : > { %v5432_v49 = vpop.f32.mrb[0].mxu0 }
 0x103   : > { %v5456_v7 = vpop.f32.mrb[0].mxu1  ;;  %v7543_v35 = vpop.f32.mrb[1].mxu0  ;;  %v8593_v49 = vld [vmem:[#allocation58_spill] sm:$0xff] }
 0x104   : > { %v7545_v56 = vpop.f32.mrb[1].mxu1  ;;  %v7549_v31 = vpop.f32.mrb[2].mxu0  ;;  %v2624_v7 = vpack.c.bf16 %v8593_v49, %v8592_v13  ;;  %v8602_v13 = vld [vmem:[#allocation66_spill] sm:$0xff]  ;;  %v8603_v49 = vld [vmem:[#allocation71_spill] sm:$0xff] }
 0x105   : > { %v7551_v15 = vpop.f32.mrb[2].mxu1  ;;  %v7555_v0 = vpop.f32.mrb[3].mxu0 }
 0x106   : > { %v7557_v46 = vpop.f32.mrb[3].mxu1 }
 0x107   : > { %5723 = vmatmul.mubr.bf16.gmra.mrb[108].mxu0 %v2215_v57  ;;  %v6090_v57 = vld [vmem:[%s8230_s3 + $0x1c8] sm:$0xff]  }
 0x108   : > { %5659 = vmatmul.mubr.bf16.gmra.mrb[108].mxu1 %v8583_v17  ;;  %5726 = vmatprep.mubr.bf16.mxu0 %v2216_v1  ;;  %v6091_v1 = vld [vmem:[%s8230_s3 + $0x208] sm:$0xff]   ;;  %v6092_v17 = vld [vmem:[%s8230_s3 + $0x1d0] sm:$0xff]  }
 0x109   : > { %5662 = vmatprep.mubr.bf16.mxu1 %v8584_v39  ;;  %v6093_v39 = vld [vmem:[%s8230_s3 + $0x210] sm:$0xff]  }
 0x10a   : > { %v7573_v27 = vpop.f32.mrb[4].mxu0 }
 0x10b   : > { %v7575_v19 = vpop.f32.mrb[4].mxu1  ;;  %v7577_v10 = vpop.f32.mrb[5].mxu0 }
 0x10c   : > { %v7579_v52 = vpop.f32.mrb[5].mxu1  ;;  %v7583_v40 = vpop.f32.mrb[6].mxu0 }
 0x10d   : > { %v7585_v20 = vpop.f32.mrb[6].mxu1  ;;  %v881_v14 = vpop.f32.mrb[7].mxu0 }
 0x10e   : > { %v969_v55 = vpop.f32.mrb[7].mxu1 }
 0x10f   : > { %5727 = vmatmul.mubr.bf16.gmra.mrb[112].mxu0 %v2217_v4 }
 0x110   : > { %5663 = vmatmul.mubr.bf16.gmra.mrb[112].mxu1 %v8586_v18  ;;  %5730 = vmatprep.mubr.bf16.mxu0 %v2218_v60  ;;  %v8596_v60 = vld [vmem:[#allocation57_spill] sm:$0xff]  ;;  %v8598_v18 = vld [vmem:[#allocation59_spill] sm:$0xff] }
 0x111   : > { %5666 = vmatprep.mubr.bf16.mxu1 %v1888_v21  ;;  %v2625_v14 = vpack.c.bf16 %v8597_v36, %v8596_v60  ;;  %v6098_v36 = vld [vmem:[%s8230_s3 + $0x1e8] sm:$0xff]  }
 0x112   : > { %v7604_v50 = vpop.f32.mrb[8].mxu0 }
 0x113   : > { %v7606_v9 = vpop.f32.mrb[8].mxu1  ;;  %v893_v24 = vpop.f32.mrb[9].mxu0 }
 0x114   : > { %v981_v47 = vpop.f32.mrb[9].mxu1  ;;  %v5441_v45 = vpop.f32.mrb[10].mxu0  ;;  %v8599_v24 = vld [vmem:[#allocation68_spill] sm:$0xff] }
 0x115   : > { %v5465_v6 = vpop.f32.mrb[10].mxu1  ;;  %v7614_v59 = vpop.f32.mrb[11].mxu0  ;;  %v2626_v47 = vpack.c.bf16 %v8599_v24, %v8598_v18  ;;  %v6094_v45 = vld [vmem:[%s8230_s3 + $0x1d8] sm:$0xff]   ;;  %v8607_v24 = vld [vmem:[#allocation89_spill] sm:$0xff] }
 0x116   : > { %v7616_v5 = vpop.f32.mrb[11].mxu1  ;;  %v6095_v6 = vld [vmem:[%s8230_s3 + $0x218] sm:$0xff]  }
 0x117   : > { %5731 = vmatmul.mubr.bf16.gmra.mrb[116].mxu0 %v2219_v38  ;;  %v8606_v18 = vld [vmem:[#allocation78_spill] sm:$0xff] }
 0x118   : > { %5667 = vmatmul.mubr.bf16.gmra.mrb[116].mxu1 %v1889_v32  ;;  %5814 = vmatprep.mubr.bf16.mxu0 %v8589_v29 }
 0x119   : > { %5750 = vmatprep.mubr.bf16.mxu1 %v2622_v23 }
 0x11a   : > { %v5444_v62 = vpop.f32.mrb[12].mxu0 }
 0x11b   : > { %v5468_v51 = vpop.f32.mrb[12].mxu1  ;;  %v7621_v16 = vpop.f32.mrb[13].mxu0  ;;  %v6096_v62 = vld [vmem:[%s8230_s3 + $0x1e0] sm:$0xff]  }
 0x11c   : > { %v7623_v12 = vpop.f32.mrb[13].mxu1  ;;  %v7625_v2 = vpop.f32.mrb[14].mxu0  ;;  %v6097_v51 = vld [vmem:[%s8230_s3 + $0x220] sm:$0xff]  }
 0x11d   : > { %v7627_v53 = vpop.f32.mrb[14].mxu1  ;;  %v7629_v33 = vpop.f32.mrb[15].mxu0 }
 0x11e   : > { %v7631_v22 = vpop.f32.mrb[15].mxu1 }
 0x11f   : > { %5815 = vmatmul.mubr.bf16.vlgmr.msra.gmra.mrb[120].mxu0 %v8594_v25  ;;  %v8604_v25 = vld [vmem:[#allocation70_spill] sm:$0xff] }
 0x120   : > { %5751 = vmatmul.mubr.bf16.vlgmr.msra.gmra.mrb[120].mxu1 %v2623_v61  ;;  %5927 = vmatpush3.bf16.msra.mxu0 %v7479_v26 }
 0x121   : > { %5863 = vmatpush3.bf16.msra.mxu1 %v7474_v34  ;;  %5754 = vmatprep.mubr.bf16.mxu1 %v2624_v7  ;;  %v2627_v7 = vpack.c.bf16 %v8603_v49, %v8602_v13  ;;  %v8610_v49 = vld [vmem:[#allocation85_spill] sm:$0xff] }
 0x122   : > { %5818 = vmatprep.mubr.bf16.mxu0 %v8595_v28  ;;  %v7651_v4 = vpop.f32.mrb[16].mxu0  ;;  %5864 = vmatprep.subr.bf16.mxu1 %v6090_v57  ;;  %v8605_v28 = vld [vmem:[#allocation74_spill] sm:$0xff] }
 0x123   : > { %v7653_v21 = vpop.f32.mrb[16].mxu1  ;;  %5928 = vmatprep.subr.bf16.mxu0 %v6091_v1  ;;  %v7655_v34 = vpop.f32.mrb[17].mxu0 }
 0x124   : > { %v7657_v26 = vpop.f32.mrb[17].mxu1  ;;  %v7661_v55 = vpop.f32.mrb[18].mxu0  ;;  %5929 = vmatpush3.bf16.msra.mxu0 %v6091_v1 }
 0x125   : > { %v7663_v44 = vpop.f32.mrb[18].mxu1  ;;  %5865 = vmatpush3.bf16.msra.mxu1 %v6090_v57  ;;  %v925_v32 = vpop.f32.mrb[19].mxu0  ;;  %5930 = vmatprep.subr.bf16.mxu0 %v6093_v39 }
 0x126   : > { %v1013_v38 = vpop.f32.mrb[19].mxu1  ;;  %5866 = vmatprep.subr.bf16.mxu1 %v6092_v17 }
 0x127   : > { %5819 = vmatmul.mubr.bf16.gmra.mrb[124].mxu0 %v8600_v8  ;;  %v6100_v38 = vld [vmem:[%s8230_s3 + $0x1f0] sm:$0xff]  }
 0x128   : > { %5755 = vmatmul.mubr.bf16.gmra.mrb[124].mxu1 %v2625_v14  ;;  %5822 = vmatprep.mubr.bf16.mxu0 %v8601_v63  ;;  %v6099_v14 = vld [vmem:[%s8230_s3 + $0x228] sm:$0xff]   ;;  %v8608_v63 = vld [vmem:[#allocation73_spill] sm:$0xff] }
 0x129   : > { %5758 = vmatprep.mubr.bf16.mxu1 %v2626_v47  ;;  %5867 = vmatpush3.bf16.msra.mxu1 %v6092_v17  ;;  %v2628_v17 = vpack.c.bf16 %v8605_v28, %v8604_v25 }
 0x12a   : > { %5931 = vmatpush3.bf16.msra.mxu0 %v6093_v39  ;;  %v7675_v23 = vpop.f32.mrb[20].mxu0  ;;  %5868 = vmatprep.subr.bf16.mxu1 %v6094_v45 }
 0x12b   : > { %v7677_v29 = vpop.f32.mrb[20].mxu1  ;;  %5932 = vmatprep.subr.bf16.mxu0 %v6095_v6  ;;  %v937_v37 = vpop.f32.mrb[21].mxu0 }
 0x12c   : > { %v1025_v61 = vpop.f32.mrb[21].mxu1  ;;  %v5453_v57 = vpop.f32.mrb[22].mxu0  ;;  %v8609_v37 = vld [vmem:[#allocation86_spill] sm:$0xff] }
 0x12d   : > { %v5477_v1 = vpop.f32.mrb[22].mxu1  ;;  %v7689_v39 = vpop.f32.mrb[23].mxu0  ;;  %5869 = vmatpush3.bf16.msra.mxu1 %v6094_v45  ;;  %v6101_v45 = vld [vmem:[%s8230_s3 + $0x230] sm:$0xff]   ;;  %v2629_v61 = vpack.c.bf16 %v8609_v37, %v8608_v63  ;;  %v8614_v37 = vld [vmem:[#allocation87_spill] sm:$0xff] }
 0x12e   : > { %v7691_v60 = vpop.f32.mrb[23].mxu1  ;;  %5933 = vmatpush3.bf16.msra.mxu0 %v6095_v6  ;;  %5870 = vmatprep.subr.bf16.mxu1 %v6096_v62 }
 0x12f   : > { %5934 = vmatprep.subr.bf16.mxu0 %v6097_v51  ;;  %5823 = vmatmul.mubr.bf16.gmra.mrb[128].mxu0 %v8606_v18 }
 0x130   : > { %5759 = vmatmul.mubr.bf16.gmra.mrb[128].mxu1 %v2627_v7  ;;  %5826 = vmatprep.mubr.bf16.mxu0 %v8607_v24  ;;  %v8611_v7 = vld [vmem:[#allocation88_spill] sm:$0xff]  ;;  %v6103_v24 = vld [vmem:[%s8230_s3 + $0x238] sm:$0xff]  }
 0x131   : > { %5762 = vmatprep.mubr.bf16.mxu1 %v2628_v17  ;;  %5871 = vmatpush3.bf16.msra.mxu1 %v6096_v62  ;;  %v2630_v57 = vpack.c.bf16 %v8611_v7, %v8610_v49  ;;  %v8616_v7 = vld [vmem:[#allocation93_spill] sm:$0xff] }
 0x132   : > { %5935 = vmatpush3.bf16.msra.mxu0 %v6097_v51  ;;  %v5560_v32 = vpop.f32.mrb[24].mxu0  ;;  %5872 = vmatprep.subr.bf16.mxu1 %v6098_v36 }
 0x133   : > { %v5496_v47 = vpop.f32.mrb[24].mxu1  ;;  %5936 = vmatprep.subr.bf16.mxu0 %v6099_v14  ;;  %v1515_v8 = vpop.f32.mrb[25].mxu0 }
 0x134   : > { %v1120_v6 = vpop.f32.mrb[25].mxu1  ;;  %v5561_v13 = vpop.f32.mrb[26].mxu0 }
 0x135   : > { %v1121_v62 = vadd.f32 %v1120_v6, %v7543_v35  ;;  %v5497_v51 = vpop.f32.mrb[26].mxu1  ;;  %v1518_v28 = vpop.f32.mrb[27].mxu0  ;;  %5873 = vmatpush3.bf16.msra.mxu1 %v6098_v36  ;;  %v6102_v35 = vld [vmem:[%s8230_s3 + $0x1f8] sm:$0xff]  }
 0x136   : > { %v1131_v1 = vadd.f32 %v5497_v51, %v7549_v31  ;;  %v1123_v25 = vpop.f32.mrb[27].mxu1  ;;  %5937 = vmatpush3.bf16.msra.mxu0 %v6099_v14  ;;  %5874 = vmatprep.subr.bf16.mxu1 %v6100_v38  ;;  %v8612_v31 = vld [vmem:[#allocation91_spill] sm:$0xff]  ;;  %v8613_v14 = vld [vmem:[#allocation97_spill] sm:$0xff] }
 0x137   : > { %v7713_v17 = vadd.f32 %v1515_v8, %v1121_v62  ;;  %v1124_v18 = vadd.f32 %v1123_v25, %v7555_v0  ;;  %5938 = vmatprep.subr.bf16.mxu0 %v6101_v45  ;;  %5827 = vmatmul.mubr.bf16.gmra.mrb[132].mxu0 %v8612_v31  ;;  %v8615_v62 = vld [vmem:[#allocation94_spill] sm:$0xff]  ;;  %v8618_v31 = vld [vmem:[#allocation99_spill] sm:$0xff] }
 0x138   : > { %v7722_v47 = vadd.f32 %v5561_v13, %v1131_v1  ;;  %5763 = vmatmul.mubr.bf16.gmra.mrb[132].mxu1 %v2629_v61  ;;  %5830 = vmatprep.mubr.bf16.mxu0 %v8613_v14  ;;  %v2631_v61 = vpack.c.bf16 %v8615_v62, %v8614_v37  ;;  %v8621_v37 = vld [vmem:[#allocation102_spill] sm:$0xff]  ;;  %v8622_v62 = vld [vmem:[#allocation101_spill] sm:$0xff] }
 0x139   : > { %v7725_v36 = vadd.f32 %v1518_v28, %v1124_v18  ;;  %5766 = vmatprep.mubr.bf16.mxu1 %v2630_v57  ;;  %5875 = vmatpush3.bf16.msra.mxu1 %v6100_v38  ;;  %v8617_v57 = vld [vmem:[#allocation96_spill] sm:$0xff] }
 0x13a   : > { %5939 = vmatpush3.bf16.msra.mxu0 %v6101_v45  ;;  %v5564_v32 = vpop.f32.mrb[28].mxu0  ;;  %5876 = vmatprep.subr.bf16.mxu1 %v6102_v35  ;;  %v2632_v1 = vpack.c.bf16 %v8617_v57, %v8616_v7 }
 0x13b   : > { %v5500_v0 = vpop.f32.mrb[28].mxu1  ;;  %5940 = vmatprep.subr.bf16.mxu0 %v6103_v24  ;;  %v1530_v63 = vpop.f32.mrb[29].mxu0 }
 0x13c   : > { %v1143_v6 = vadd.f32 %v5500_v0, %v7573_v27  ;;  %v1135_v8 = vpop.f32.mrb[29].mxu1  ;;  %v5565_v49 = vpop.f32.mrb[30].mxu0 }
 0x13d   : > { %v1136_v51 = vadd.f32 %v1135_v8, %v7577_v10  ;;  %v5501_v13 = vpop.f32.mrb[30].mxu1  ;;  %v1533_v28 = vpop.f32.mrb[31].mxu0  ;;  %5877 = vmatpush3.bf16.msra.mxu1 %v6102_v35  ;;  %v8619_v10 = vld [vmem:[#allocation103_spill] sm:$0xff] }
 0x13e   : > { %v7734_v38 = vadd.f32 %v5564_v32, %v1143_v6  ;;  %v1146_v45 = vadd.f32 %v5501_v13, %v7583_v40  ;;  %v1138_v25 = vpop.f32.mrb[31].mxu1  ;;  %5941 = vmatpush3.bf16.msra.mxu0 %v6103_v24  ;;  %v8620_v8 = vld [vmem:[#allocation95_spill] sm:$0xff] }
 0x13f   : > { %v7737_v27 = vadd.f32 %v1530_v63, %v1136_v51  ;;  %5831 = vmatmul.mubr.bf16.gmra.mrb[136].mxu0 %v8618_v31  ;;  %v2633_v35 = vpack.c.bf16 %v8621_v37, %v8620_v8  ;;  %v8623_v51 = vld [vmem:[#allocation42_spill] sm:$0xff]  ;;  %v8629_v37 = vld [vmem:[#allocation111_spill] sm:$0xff] }
 0x140   : > { %v7739_v18 = vadd.f32 %v5565_v49, %v1146_v45  ;;  %5767 = vmatmul.mubr.bf16.gmra.mrb[136].mxu1 %v2631_v61  ;;  %5834 = vmatprep.mubr.bf16.mxu0 %v8619_v10  ;;  %v2634_v13 = vpack.c.bf16 %v8623_v51, %v8622_v62  ;;  %v8625_v45 = vld [vmem:[#allocation112_spill] sm:$0xff] }
 0x141   : > { %5770 = vmatprep.mubr.bf16.mxu1 %v2632_v1  ;;  %v8624_v1 = vld [vmem:[#allocation105_spill] sm:$0xff] }
 0x142   : > { %v5568_v0 = vpop.f32.mrb[32].mxu0 }
 0x143   : > { %v5504_v14 = vpop.f32.mrb[32].mxu1  ;;  %v1545_v40 = vpop.f32.mrb[33].mxu0 }
 0x144   : > { %v1158_v32 = vadd.f32 %v5504_v14, %v7604_v50  ;;  %v1150_v6 = vpop.f32.mrb[33].mxu1  ;;  %v5569_v63 = vpop.f32.mrb[34].mxu0  ;;  %v8626_v14 = vld [vmem:[#allocation36_spill] sm:$0xff] }
 0x145   : > { %v5505_v24 = vpop.f32.mrb[34].mxu1  ;;  %v1547_v7 = vpop.f32.mrb[35].mxu0  ;;  %v8627_v6 = vld [vmem:[#allocation109_spill] sm:$0xff] }
 0x146   : > { %v7748_v61 = vadd.f32 %v5568_v0, %v1158_v32  ;;  %v1152_v49 = vpop.f32.mrb[35].mxu1  ;;  %v2635_v0 = vpack.c.bf16 %v8627_v6, %v8626_v14 }
 0x147   : > { %v1153_v57 = vadd.f32 %v1152_v49, %v7614_v59  ;;  %5835 = vmatmul.mubr.bf16.gmra.mrb[140].mxu0 %v8624_v1  ;;  %v8628_v59 = vld [vmem:[#allocation108_spill] sm:$0xff] }
 0x148   : > { %5771 = vmatmul.mubr.bf16.gmra.mrb[140].mxu1 %v2633_v35  ;;  %5838 = vmatprep.mubr.bf16.mxu0 %v8625_v45  ;;  %v2636_v35 = vpack.c.bf16 %v8629_v37, %v8628_v59 }
 0x149   : > { %v7752_v50 = vadd.f32 %v1547_v7, %v1153_v57  ;;  %5774 = vmatprep.mubr.bf16.mxu1 %v2634_v13  ;;  %v8630_v7 = vld [vmem:[#allocation114_spill] sm:$0xff] }
 0x14a   : > { %v5572_v28 = vpop.f32.mrb[36].mxu0 }
 0x14b   : > { %v5508_v25 = vpop.f32.mrb[36].mxu1  ;;  %v1559_v10 = vpop.f32.mrb[37].mxu0 }
 0x14c   : > { %v1164_v31 = vpop.f32.mrb[37].mxu1  ;;  %v5573_v8 = vpop.f32.mrb[38].mxu0 }
 0x14d   : > { %v1165_v32 = vadd.f32 %v1164_v31, %v7621_v16  ;;  %v5509_v40 = vpop.f32.mrb[38].mxu1  ;;  %v1562_v62 = vpop.f32.mrb[39].mxu0  ;;  %v8631_v16 = vld [vmem:[#allocation120_spill] sm:$0xff]  ;;  %v8632_v31 = vld [vmem:[#allocation110_spill] sm:$0xff] }
 0x14e   : > { %v1175_v24 = vadd.f32 %v5509_v40, %v7625_v2  ;;  %v1167_v63 = vpop.f32.mrb[39].mxu1  ;;  %v8635_v40 = vld [vmem:[#allocation119_spill] sm:$0xff] }
 0x14f   : > { %v7761_v51 = vadd.f32 %v1559_v10, %v1165_v32  ;;  %v1168_v13 = vadd.f32 %v1167_v63, %v7629_v33  ;;  %5839 = vmatmul.mubr.bf16.gmra.mrb[144].mxu0 %v8630_v7  ;;  %v8633_v10 = vld [vmem:[#allocation117_spill] sm:$0xff]  ;;  %v8634_v32 = vld [vmem:[#allocation116_spill] sm:$0xff] }
 0x150   : > { %v7764_v49 = vadd.f32 %v5573_v8, %v1175_v24  ;;  %5775 = vmatmul.mubr.bf16.gmra.mrb[144].mxu1 %v2635_v0  ;;  %5842 = vmatprep.mubr.bf16.mxu0 %v8631_v16  ;;  %v2637_v14 = vpack.c.bf16 %v8633_v10, %v8632_v31  ;;  %v2638_v8 = vpack.c.bf16 %v8635_v40, %v8634_v32  ;;  %v8640_v10 = vld [vmem:[#allocation124_spill] sm:$0xff] }
 0x151   : > { %v7767_v57 = vadd.f32 %v1562_v62, %v1168_v13  ;;  %5778 = vmatprep.mubr.bf16.mxu1 %v2636_v35  ;;  %v8636_v62 = vld [vmem:[#allocation122_spill] sm:$0xff] }
 0x152   : > { %v5576_v45 = vpop.f32.mrb[40].mxu0 }
 0x153   : > { %v5512_v1 = vpop.f32.mrb[40].mxu1  ;;  %v1574_v28 = vpop.f32.mrb[41].mxu0 }
 0x154   : > { %v1187_v2 = vadd.f32 %v5512_v1, %v7651_v4  ;;  %v1179_v25 = vpop.f32.mrb[41].mxu1  ;;  %v5577_v0 = vpop.f32.mrb[42].mxu0 }
 0x155   : > { %v1180_v33 = vadd.f32 %v1179_v25, %v7655_v34  ;;  %v5513_v6 = vpop.f32.mrb[42].mxu1  ;;  %v1577_v24 = vpop.f32.mrb[43].mxu0  ;;  %v8637_v34 = vld [vmem:[#allocation128_spill] sm:$0xff] }
 0x156   : > { %v7776_v59 = vadd.f32 %v5576_v45, %v1187_v2  ;;  %v1190_v37 = vadd.f32 %v5513_v6, %v7661_v55  ;;  %v1182_v35 = vpop.f32.mrb[43].mxu1  ;;  %v8638_v2 = vld [vmem:[#allocation118_spill] sm:$0xff]  ;;  %v8639_v55 = vld [vmem:[#allocation125_spill] sm:$0xff] }
 0x157   : > { %v7779_v63 = vadd.f32 %v1574_v28, %v1180_v33  ;;  %5843 = vmatmul.mubr.bf16.gmra.mrb[148].mxu0 %v8636_v62  ;;  %v2639_v25 = vpack.c.bf16 %v8639_v55, %v8638_v2  ;;  %v8641_v33 = vld [vmem:[#allocation127_spill] sm:$0xff] }
 0x158   : > { %v7781_v4 = vadd.f32 %v5577_v0, %v1190_v37  ;;  %5779 = vmatmul.mubr.bf16.gmra.mrb[148].mxu1 %v2637_v14  ;;  %5846 = vmatprep.mubr.bf16.mxu0 %v8637_v34  ;;  %v2640_v6 = vpack.c.bf16 %v8641_v33, %v8640_v10  ;;  %v8643_v37 = vld [vmem:[#allocation136_spill] sm:$0xff]  ;;  %v8647_v55 = vld [vmem:[#allocation135_spill] sm:$0xff]  ;;  %v2571_v33 = vrot.slane %v7541_v54, 1 }
 0x159   : > { %5782 = vmatprep.mubr.bf16.mxu1 %v2638_v8  ;;  %v8642_v8 = vld [vmem:[#allocation130_spill] sm:$0xff] }
 0x15a   : > { %v5580_v7 = vpop.f32.mrb[44].mxu0 }
 0x15b   : > { %v5516_v13 = vpop.f32.mrb[44].mxu1  ;;  %v1589_v45 = vpop.f32.mrb[45].mxu0 }
 0x15c   : > { %v1202_v16 = vadd.f32 %v5516_v13, %v7675_v23  ;;  %v1194_v1 = vpop.f32.mrb[45].mxu1  ;;  %v5581_v28 = vpop.f32.mrb[46].mxu0  ;;  %v8644_v13 = vld [vmem:[#allocation126_spill] sm:$0xff] }
 0x15d   : > { %v5517_v31 = vpop.f32.mrb[46].mxu1  ;;  %v1591_v32 = vpop.f32.mrb[47].mxu0  ;;  %v8645_v1 = vld [vmem:[#allocation133_spill] sm:$0xff] }
 0x15e   : > { %v7790_v14 = vadd.f32 %v5580_v7, %v1202_v16  ;;  %v1196_v0 = vpop.f32.mrb[47].mxu1  ;;  %v2641_v7 = vpack.c.bf16 %v8645_v1, %v8644_v13  ;;  %v8650_v1 = vld [vmem:[#allocation134_spill] sm:$0xff] }
 0x15f   : > { %v1197_v40 = vadd.f32 %v1196_v0, %v7689_v39  ;;  %5847 = vmatmul.mubr.bf16.gmra.mrb[152].mxu0 %v8642_v8  ;;  %v8646_v39 = vld [vmem:[#allocation132_spill] sm:$0xff] }
 0x160   : > { %5783 = vmatmul.mubr.bf16.gmra.mrb[152].mxu1 %v2639_v25  ;;  %5850 = vmatprep.mubr.bf16.mxu0 %v8643_v37  ;;  %v2642_v25 = vpack.c.bf16 %v8647_v55, %v8646_v39  ;;  %v8649_v37 = vld [vmem:[#allocation41_spill] sm:$0xff] }
 0x161   : > { %v7794_v23 = vadd.f32 %v1591_v32, %v1197_v40  ;;  %5786 = vmatprep.mubr.bf16.mxu1 %v2640_v6  ;;  %v2572_v6 = vrot.slane %v7566_v42, 1 }
 0x162   : > { %v5584_v24 = vpop.f32.mrb[48].mxu0 }
 0x163   : > { %v5520_v35 = vpop.f32.mrb[48].mxu1  ;;  %v1603_v34 = vpop.f32.mrb[49].mxu0 }
 0x164   : > { %v1208_v62 = vpop.f32.mrb[49].mxu1  ;;  %v5585_v2 = vpop.f32.mrb[50].mxu0  ;;  %v7821_v35 = vsel %vm1343_vm1, %v8649_v37, %v2571_v33 }
 0x165   : > { %v1209_v16 = vadd.f32 %v1208_v62, %v7545_v56  ;;  %v5521_v45 = vpop.f32.mrb[50].mxu1  ;;  %v1606_v10 = vpop.f32.mrb[51].mxu0  ;;  %v8648_v56 = vld [vmem:[#allocation138_spill] sm:$0xff] }
 0x166   : > { %v1219_v31 = vadd.f32 %v5521_v45, %v7551_v15  ;;  %v1211_v28 = vpop.f32.mrb[51].mxu1  ;;  %v7816_v15 = vsel %vm1343_vm1, %v2571_v33, %v2572_v6 }
 0x167   : > { %v7805_v0 = vadd.f32 %v1603_v34, %v1209_v16  ;;  %v1212_v32 = vadd.f32 %v1211_v28, %v7557_v46  ;;  %5851 = vmatmul.mubr.bf16.gmra.mrb[156].mxu0 %v8648_v56  ;;  %v2644_v55 = vpack.c.bf16 %v7816_v15, %v7821_v35  ;;  %v8652_v56 = vld [vmem:[#allocation49_spill] sm:$0xff] }
 0x168   : > { %v7808_v40 = vadd.f32 %v5585_v2, %v1219_v31  ;;  %5787 = vmatmul.mubr.bf16.gmra.mrb[156].mxu1 %v2641_v7  ;;  %5854 = vmatprep.mubr.bf16.mxu0 %v7376_v30  ;;  %v8651_v7 = vld [vmem:[#allocation140_spill] sm:$0xff]  ;;  %v3118_v30 = vpack.c.bf16 %v7602_v58, %v7571_v41  ;;  %v7843_v41 = vsel %vm1343_vm1, %v2572_v6, %v8649_v37 }
 0x169   : > { %v7811_v8 = vadd.f32 %v1606_v10, %v1212_v32  ;;  %5790 = vmatprep.mubr.bf16.mxu1 %v2642_v25  ;;  %v2643_v16 = vpack.c.bf16 %v8651_v7, %v8650_v1  ;;  %v3119_v25 = vpack.c.bf16 %v6393_v11, %v7598_v48 }
 0x16a   : > { %v5588_v24 = vpop.f32.mrb[52].mxu0 }
 0x16b   : > { %v5524_v46 = vpop.f32.mrb[52].mxu1  ;;  %v1618_v13 = vpop.f32.mrb[53].mxu0 }
 0x16c   : > { %v1231_v62 = vadd.f32 %v5524_v46, %v7575_v19  ;;  %v1223_v34 = vpop.f32.mrb[53].mxu1  ;;  %v5589_v39 = vpop.f32.mrb[54].mxu0  ;;  %v2645_v46 = vpack.c.bf16 %v8652_v56, %v7843_v41  ;;  %v8657_v56 = vld [vmem:[#allocation63_spill] sm:$0xff] }
 0x16d   : > { %v1224_v45 = vadd.f32 %v1223_v34, %v7579_v52  ;;  %v5525_v2 = vpop.f32.mrb[54].mxu1  ;;  %v1621_v10 = vpop.f32.mrb[55].mxu0 }
 0x16e   : > { %v7833_v31 = vadd.f32 %v5588_v24, %v1231_v62  ;;  %v1234_v19 = vadd.f32 %v5525_v2, %v7585_v20  ;;  %v1226_v28 = vpop.f32.mrb[55].mxu1 }
 0x16f   : > { %v7836_v33 = vadd.f32 %v1618_v13, %v1224_v45  ;;  %5855 = vmatmul.mubr.bf16.gmra.mrb[160].mxu0 %v3118_v30  ;;  %v8654_v30 = vld [vmem:[#allocation16_spill] sm:$0xff] }
 0x170   : > { %v7838_v32 = vadd.f32 %v5589_v39, %v1234_v19  ;;  %5791 = vmatmul.mubr.bf16.gmra.mrb[160].mxu1 %v2643_v16  ;;  %5858 = vmatprep.mubr.bf16.mxu0 %v3119_v25 }
 0x171   : > { %5794 = vmatprep.mubr.bf16.mxu1 %v2644_v55 }
 0x172   : > { %v5592_v52 = vpop.f32.mrb[56].mxu0 }
 0x173   : > { %v5528_v11 = vpop.f32.mrb[56].mxu1  ;;  %v1633_v58 = vpop.f32.mrb[57].mxu0 }
 0x174   : > { %v1246_v48 = vadd.f32 %v5528_v11, %v7606_v9  ;;  %v1238_v20 = vpop.f32.mrb[57].mxu1  ;;  %v5593_v62 = vpop.f32.mrb[58].mxu0  ;;  %v8655_v9 = vld [vmem:[#allocation61_spill] sm:$0xff]  ;;  %v8656_v58 = vld [vmem:[#allocation18_spill] sm:$0xff] }
 0x175   : > { %v5529_v24 = vpop.f32.mrb[58].mxu1  ;;  %v1635_v1 = vpop.f32.mrb[59].mxu0 }
 0x176   : > { %v7848_v34 = vadd.f32 %v5592_v52, %v1246_v48  ;;  %v1240_v13 = vpop.f32.mrb[59].mxu1  ;;  %v8658_v24 = vld [vmem:[#allocation23_spill] sm:$0xff] }
 0x177   : > { %v1241_v16 = vadd.f32 %v1240_v13, %v7616_v5  ;;  %5859 = vmatmul.mubr.bf16.gmra.mrb[164].mxu0 %v8653_v43 }
 0x178   : > { %5795 = vmatmul.mubr.bf16.gmra.mrb[164].mxu1 %v2645_v46  ;;  %5942 = vmatprep.mubr.bf16.mxu0 %v8655_v9 }
 0x179   : > { %v7852_v6 = vadd.f32 %v1635_v1, %v1241_v16  ;;  %5878 = vmatprep.mubr.bf16.mxu1 %v8654_v30 }
 0x17a   : > { %v5596_v2 = vpop.f32.mrb[60].mxu0 }
 0x17b   : > { %v5532_v45 = vpop.f32.mrb[60].mxu1  ;;  %v1647_v55 = vpop.f32.mrb[61].mxu0 }
 0x17c   : > { %v1252_v39 = vpop.f32.mrb[61].mxu1  ;;  %v5597_v28 = vpop.f32.mrb[62].mxu0 }
 0x17d   : > { %v1253_v25 = vadd.f32 %v1252_v39, %v7623_v12  ;;  %v5533_v19 = vpop.f32.mrb[62].mxu1  ;;  %v1650_v11 = vpop.f32.mrb[63].mxu0  ;;  %v8659_v12 = vld [vmem:[#allocation65_spill] sm:$0xff] }
 0x17e   : > { %v1263_v10 = vadd.f32 %v5533_v19, %v7627_v53  ;;  %v1255_v5 = vpop.f32.mrb[63].mxu1  ;;  %v8660_v19 = vld [vmem:[#allocation25_spill] sm:$0xff] }
 0x17f   : > { %v7858_v52 = vadd.f32 %v1647_v55, %v1253_v25  ;;  %v1256_v48 = vadd.f32 %v1255_v5, %v7631_v22  ;;  %5943 = vmatmul.mubr.bf16.vlgmr.msra.gmra.mrb[168].mxu0 %v8657_v56 }
 0x180   : > { %v7861_v20 = vadd.f32 %v5597_v28, %v1263_v10  ;;  %5879 = vmatmul.mubr.bf16.vlgmr.msra.gmra.mrb[168].mxu1 %v8656_v58  ;;  %5946 = vmatprep.mubr.bf16.mxu0 %v8659_v12  ;;  %v8661_v28 = vld [vmem:[#allocation75_spill] sm:$0xff]  ;;  %v8663_v10 = vld [vmem:[#allocation77_spill] sm:$0xff] }
 0x181   : > { %v7865_v46 = vadd.f32 %v1650_v11, %v1256_v48  ;;  %5882 = vmatprep.mubr.bf16.mxu1 %v8658_v24 }
 0x182   : > { %v5600_v53 = vpop.f32.mrb[64].mxu0 }
 0x183   : > { %v5536_v62 = vpop.f32.mrb[64].mxu1  ;;  %v1662_v16 = vpop.f32.mrb[65].mxu0 }
 0x184   : > { %v1275_v13 = vadd.f32 %v5536_v62, %v7653_v21  ;;  %v1267_v1 = vpop.f32.mrb[65].mxu1  ;;  %v5601_v30 = vpop.f32.mrb[66].mxu0  ;;  %v8662_v21 = vld [vmem:[#allocation31_spill] sm:$0xff] }
 0x185   : > { %v1268_v22 = vadd.f32 %v1267_v1, %v7657_v26  ;;  %v5537_v43 = vpop.f32.mrb[66].mxu1  ;;  %v1665_v39 = vpop.f32.mrb[67].mxu0  ;;  %v8665_v1 = vld [vmem:[#allocation79_spill] sm:$0xff] }
 0x186   : > { %v7871_v9 = vadd.f32 %v5600_v53, %v1275_v13  ;;  %v1278_v45 = vadd.f32 %v5537_v43, %v7663_v44  ;;  %v1270_v2 = vpop.f32.mrb[67].mxu1  ;;  %v8664_v13 = vld [vmem:[#allocation33_spill] sm:$0xff]  ;;  %v8667_v43 = vld [vmem:[#allocation90_spill] sm:$0xff] }
 0x187   : > { %v7874_v55 = vadd.f32 %v1662_v16, %v1268_v22  ;;  %5947 = vmatmul.mubr.bf16.gmra.mrb[172].mxu0 %v8661_v28  ;;  %v8666_v22 = vld [vmem:[#allocation37_spill] sm:$0xff] }
 0x188   : > { %v7876_v25 = vadd.f32 %v5601_v30, %v1278_v45  ;;  %5883 = vmatmul.mubr.bf16.gmra.mrb[172].mxu1 %v8660_v19  ;;  %5950 = vmatprep.mubr.bf16.mxu0 %v8663_v10 }
 0x189   : > { %5886 = vmatprep.mubr.bf16.mxu1 %v8662_v21 }
 0x18a   : > { %v5604_v5 = vpop.f32.mrb[68].mxu0 }
 0x18b   : > { %v5540_v26 = vpop.f32.mrb[68].mxu1  ;;  %v1677_v44 = vpop.f32.mrb[69].mxu0 }
 0x18c   : > { %v1290_v11 = vadd.f32 %v5540_v26, %v7677_v29  ;;  %v1282_v48 = vpop.f32.mrb[69].mxu1  ;;  %v5605_v56 = vpop.f32.mrb[70].mxu0  ;;  %v8669_v44 = vld [vmem:[#allocation92_spill] sm:$0xff] }
 0x18d   : > { %v5541_v58 = vpop.f32.mrb[70].mxu1  ;;  %v1679_v62 = vpop.f32.mrb[71].mxu0  ;;  %v8668_v48 = vld [vmem:[#allocation39_spill] sm:$0xff]  ;;  %v8670_v56 = vld [vmem:[#allocation44_spill] sm:$0xff] }
 0x18e   : > { %v7883_v24 = vadd.f32 %v5604_v5, %v1290_v11  ;;  %v1284_v12 = vpop.f32.mrb[71].mxu1 }
 0x18f   : > { %v1285_v53 = vadd.f32 %v1284_v12, %v7691_v60  ;;  %5951 = vmatmul.mubr.bf16.gmra.mrb[176].mxu0 %v8665_v1 }
 0x190   : > { %5887 = vmatmul.mubr.bf16.gmra.mrb[176].mxu1 %v8664_v13  ;;  %5954 = vmatprep.mubr.bf16.mxu0 %v8667_v43 }
 0x191   : > { %v7888_v16 = vadd.f32 %v1679_v62, %v1285_v53  ;;  %5890 = vmatprep.mubr.bf16.mxu1 %v8666_v22 }
 0x192   : > { %v5688_v30 = vpop.f32.mrb[72].mxu0 }
 0x193   : > { %v5624_v29 = vpop.f32.mrb[72].mxu1  ;;  %v2319_v2 = vpop.f32.mrb[73].mxu0 }
 0x194   : > { %v1989_v45 = vpop.f32.mrb[73].mxu1  ;;  %v5689_v28 = vpop.f32.mrb[74].mxu0 }
 0x195   : > { %v2164_v39 = vadd.f32 %v1989_v45, %v7713_v17  ;;  %v5625_v19 = vpop.f32.mrb[74].mxu1  ;;  %v2322_v10 = vpop.f32.mrb[75].mxu0  ;;  %v8671_v17 = vld [vmem:[#allocation98_spill] sm:$0xff] }
 0x196   : > { %v2166_v60 = vadd.f32 %v5625_v19, %v7722_v47  ;;  %v1992_v21 = vpop.f32.mrb[75].mxu1  ;;  %v8672_v19 = vld [vmem:[#allocation4_spill] sm:$0xff] }
 0x197   : > { %v7894_v26 = vadd.f32 %v2319_v2, %v2164_v39  ;;  %v2165_v5 = vadd.f32 %v1992_v21, %v7725_v36  ;;  %5955 = vmatmul.mubr.bf16.gmra.mrb[180].mxu0 %v8669_v44 }
 0x198   : > { %v7897_v11 = vadd.f32 %v5689_v28, %v2166_v60  ;;  %5891 = vmatmul.mubr.bf16.gmra.mrb[180].mxu1 %v8668_v48  ;;  %5958 = vmatprep.mubr.bf16.mxu0 %v8671_v17  ;;  %v8673_v28 = vld [vmem:[#allocation100_spill] sm:$0xff] }
 0x199   : > { %v7901_v58 = vadd.f32 %v2322_v10, %v2165_v5  ;;  %5894 = vmatprep.mubr.bf16.mxu1 %v8670_v56  ;;  %v8675_v60 = vld [vmem:[#allocation104_spill] sm:$0xff] }
 0x19a   : > { %v5692_v47 = vpop.f32.mrb[76].mxu0 }
 0x19b   : > { %v5628_v12 = vpop.f32.mrb[76].mxu1  ;;  %v2334_v13 = vpop.f32.mrb[77].mxu0 }
 0x19c   : > { %v2168_v62 = vadd.f32 %v5628_v12, %v7734_v38  ;;  %v2004_v53 = vpop.f32.mrb[77].mxu1  ;;  %v5693_v22 = vpop.f32.mrb[78].mxu0  ;;  %v8674_v38 = vld [vmem:[#allocation9_spill] sm:$0xff] }
 0x19d   : > { %v2167_v36 = vadd.f32 %v2004_v53, %v7737_v27  ;;  %v5629_v1 = vpop.f32.mrb[78].mxu1  ;;  %v2337_v45 = vpop.f32.mrb[79].mxu0  ;;  %v8677_v53 = vld [vmem:[#allocation106_spill] sm:$0xff] }
 0x19e   : > { %v7907_v43 = vadd.f32 %v5692_v47, %v2168_v62  ;;  %v2169_v29 = vadd.f32 %v5629_v1, %v7739_v18  ;;  %v2007_v30 = vpop.f32.mrb[79].mxu1  ;;  %v8676_v62 = vld [vmem:[#allocation11_spill] sm:$0xff]  ;;  %v8679_v1 = vld [vmem:[#allocation113_spill] sm:$0xff] }
 0x19f   : > { %v7910_v2 = vadd.f32 %v2334_v13, %v2167_v36  ;;  %5959 = vmatmul.mubr.bf16.gmra.mrb[184].mxu0 %v8673_v28  ;;  %v8678_v36 = vld [vmem:[#allocation17_spill] sm:$0xff] }
 0x1a0   : > { %v7912_v39 = vadd.f32 %v5693_v22, %v2169_v29  ;;  %5895 = vmatmul.mubr.bf16.gmra.mrb[184].mxu1 %v8672_v19  ;;  %5962 = vmatprep.mubr.bf16.mxu0 %v8675_v60 }
 0x1a1   : > { %5898 = vmatprep.mubr.bf16.mxu1 %v8674_v38 }
 0x1a2   : > { %v5696_v21 = vpop.f32.mrb[80].mxu0 }
 0x1a3   : > { %v5632_v27 = vpop.f32.mrb[80].mxu1  ;;  %v2349_v18 = vpop.f32.mrb[81].mxu0 }
 0x1a4   : > { %v2171_v10 = vadd.f32 %v5632_v27, %v7748_v61  ;;  %v2019_v5 = vpop.f32.mrb[81].mxu1  ;;  %v5697_v44 = vpop.f32.mrb[82].mxu0  ;;  %v8681_v18 = vld [vmem:[#allocation115_spill] sm:$0xff] }
 0x1a5   : > { %v5633_v48 = vpop.f32.mrb[82].mxu1  ;;  %v2351_v12 = vpop.f32.mrb[83].mxu0  ;;  %v8680_v5 = vld [vmem:[#allocation19_spill] sm:$0xff]  ;;  %v8682_v44 = vld [vmem:[#allocation24_spill] sm:$0xff] }
 0x1a6   : > { %v7919_v56 = vadd.f32 %v5696_v21, %v2171_v10  ;;  %v2021_v17 = vpop.f32.mrb[83].mxu1 }
 0x1a7   : > { %v2170_v47 = vadd.f32 %v2021_v17, %v7752_v50  ;;  %5963 = vmatmul.mubr.bf16.gmra.mrb[188].mxu0 %v8677_v53 }
 0x1a8   : > { %5899 = vmatmul.mubr.bf16.gmra.mrb[188].mxu1 %v8676_v62  ;;  %5966 = vmatprep.mubr.bf16.mxu0 %v8679_v1 }
 0x1a9   : > { %v7924_v13 = vadd.f32 %v2351_v12, %v2170_v47  ;;  %5902 = vmatprep.mubr.bf16.mxu1 %v8678_v36 }
 0x1aa   : > { %v5700_v22 = vpop.f32.mrb[84].mxu0 }
 0x1ab   : > { %v5636_v61 = vpop.f32.mrb[84].mxu1  ;;  %v2363_v30 = vpop.f32.mrb[85].mxu0 }
 0x1ac   : > { %v2033_v29 = vpop.f32.mrb[85].mxu1  ;;  %v5701_v28 = vpop.f32.mrb[86].mxu0 }
 0x1ad   : > { %v2172_v45 = vadd.f32 %v2033_v29, %v7761_v51  ;;  %v5637_v19 = vpop.f32.mrb[86].mxu1  ;;  %v2366_v60 = vpop.f32.mrb[87].mxu0  ;;  %v8683_v51 = vld [vmem:[#allocation121_spill] sm:$0xff] }
 0x1ae   : > { %v2174_v50 = vadd.f32 %v5637_v19, %v7764_v49  ;;  %v2036_v38 = vpop.f32.mrb[87].mxu1  ;;  %v8684_v19 = vld [vmem:[#allocation27_spill] sm:$0xff] }
 0x1af   : > { %v7930_v27 = vadd.f32 %v2363_v30, %v2172_v45  ;;  %v2173_v21 = vadd.f32 %v2036_v38, %v7767_v57  ;;  %5967 = vmatmul.mubr.bf16.gmra.mrb[192].mxu0 %v8681_v18 }
 0x1b0   : > { %v7933_v10 = vadd.f32 %v5701_v28, %v2174_v50  ;;  %5903 = vmatmul.mubr.bf16.gmra.mrb[192].mxu1 %v8680_v5  ;;  %5970 = vmatprep.mubr.bf16.mxu0 %v8683_v51  ;;  %v8685_v28 = vld [vmem:[#allocation123_spill] sm:$0xff]  ;;  %v8687_v50 = vld [vmem:[#allocation129_spill] sm:$0xff] }
 0x1b1   : > { %v7937_v48 = vadd.f32 %v2366_v60, %v2173_v21  ;;  %5906 = vmatprep.mubr.bf16.mxu1 %v8682_v44 }
 0x1b2   : > { %v5704_v49 = vpop.f32.mrb[88].mxu0 }
 0x1b3   : > { %v5640_v17 = vpop.f32.mrb[88].mxu1  ;;  %v2378_v62 = vpop.f32.mrb[89].mxu0 }
 0x1b4   : > { %v2176_v12 = vadd.f32 %v5640_v17, %v7776_v59  ;;  %v2048_v47 = vpop.f32.mrb[89].mxu1  ;;  %v5705_v36 = vpop.f32.mrb[90].mxu0  ;;  %v8686_v59 = vld [vmem:[#allocation32_spill] sm:$0xff] }
 0x1b5   : > { %v2175_v57 = vadd.f32 %v2048_v47, %v7779_v63  ;;  %v5641_v53 = vpop.f32.mrb[90].mxu1  ;;  %v2381_v29 = vpop.f32.mrb[91].mxu0  ;;  %v8689_v47 = vld [vmem:[#allocation131_spill] sm:$0xff] }
 0x1b6   : > { %v7943_v1 = vadd.f32 %v5704_v49, %v2176_v12  ;;  %v2177_v61 = vadd.f32 %v5641_v53, %v7781_v4  ;;  %v2051_v22 = vpop.f32.mrb[91].mxu1  ;;  %v8688_v12 = vld [vmem:[#allocation34_spill] sm:$0xff]  ;;  %v8691_v53 = vld [vmem:[#allocation137_spill] sm:$0xff] }
 0x1b7   : > { %v7946_v30 = vadd.f32 %v2378_v62, %v2175_v57  ;;  %5971 = vmatmul.mubr.bf16.gmra.mrb[196].mxu0 %v8685_v28  ;;  %v8690_v57 = vld [vmem:[#allocation38_spill] sm:$0xff] }
 0x1b8   : > { %v7948_v45 = vadd.f32 %v5705_v36, %v2177_v61  ;;  %5907 = vmatmul.mubr.bf16.gmra.mrb[196].mxu1 %v8684_v19  ;;  %5974 = vmatprep.mubr.bf16.mxu0 %v8687_v50 }
 0x1b9   : > { %5910 = vmatprep.mubr.bf16.mxu1 %v8686_v59 }
 0x1ba   : > { %v5708_v38 = vpop.f32.mrb[92].mxu0 }
 0x1bb   : > { %v5644_v63 = vpop.f32.mrb[92].mxu1  ;;  %v2393_v4 = vpop.f32.mrb[93].mxu0 }
 0x1bc   : > { %v2179_v60 = vadd.f32 %v5644_v63, %v7790_v14  ;;  %v2063_v21 = vpop.f32.mrb[93].mxu1  ;;  %v5709_v18 = vpop.f32.mrb[94].mxu0  ;;  %v8692_v4 = vld [vmem:[#allocation40_spill] sm:$0xff] }
 0x1bd   : > { %v5645_v5 = vpop.f32.mrb[94].mxu1  ;;  %v2395_v17 = vpop.f32.mrb[95].mxu0  ;;  %v8694_v18 = vld [vmem:[#allocation45_spill] sm:$0xff] }
 0x1be   : > { %v7955_v44 = vadd.f32 %v5708_v38, %v2179_v60  ;;  %v2065_v51 = vpop.f32.mrb[95].mxu1  ;;  %v8693_v5 = vld [vmem:[#allocation139_spill] sm:$0xff] }
 0x1bf   : > { %v2178_v49 = vadd.f32 %v2065_v51, %v7794_v23  ;;  %5975 = vmatmul.mubr.bf16.gmra.mrb[200].mxu0 %v8689_v47  ;;  %v3873_v23 = vpack.c.bf16 %v7821_v35, %v8651_v7 }
 0x1c0   : > { %5911 = vmatmul.mubr.bf16.gmra.mrb[200].mxu1 %v8688_v12  ;;  %5978 = vmatprep.mubr.bf16.mxu0 %v8691_v53 }
 0x1c1   : > { %v7960_v62 = vadd.f32 %v2395_v17, %v2178_v49  ;;  %5914 = vmatprep.mubr.bf16.mxu1 %v8690_v57  ;;  %v3874_v49 = vpack.c.bf16 %v7843_v41, %v7816_v15 }
 0x1c2   : > { %v5712_v36 = vpop.f32.mrb[96].mxu0 }
 0x1c3   : > { %v5648_v14 = vpop.f32.mrb[96].mxu1  ;;  %v2407_v22 = vpop.f32.mrb[97].mxu0 }
 0x1c4   : > { %v2077_v61 = vpop.f32.mrb[97].mxu1  ;;  %v5713_v28 = vpop.f32.mrb[98].mxu0 }
 0x1c5   : > { %v2180_v29 = vadd.f32 %v2077_v61, %v7805_v0  ;;  %v5649_v19 = vpop.f32.mrb[98].mxu1  ;;  %v2410_v63 = vpop.f32.mrb[99].mxu0 }
 0x1c6   : > { %v2182_v59 = vadd.f32 %v5649_v19, %v7808_v40  ;;  %v2080_v50 = vpop.f32.mrb[99].mxu1 }
 0x1c7   : > { %v7968_v38 = vadd.f32 %v2407_v22, %v2180_v29  ;;  %v2181_v60 = vadd.f32 %v2080_v50, %v7811_v8  ;;  %5979 = vmatmul.mubr.bf16.gmra.mrb[204].mxu0 %v8693_v5  ;;  %v3448_v8 = vpack.c.bf16 %v7566_v42, %v7541_v54  ;;  %v8695_v54 = vmov 0.0|0.0   ;;  %v8696_v42 = vld [vmem:[#allocation46_spill] sm:$0xff] }
 0x1c8   : > { %v7971_v21 = vadd.f32 %v5713_v28, %v2182_v59  ;;  %5915 = vmatmul.mubr.bf16.gmra.mrb[204].mxu1 %v8692_v4  ;;  %5982 = vmatprep.mubr.bf16.mxu0 %v3873_v23 }
 0x1c9   : > { %v7975_v0 = vadd.f32 %v2410_v63, %v2181_v60  ;;  %5918 = vmatprep.mubr.bf16.mxu1 %v8694_v18 }
 0x1ca   : > { %v5716_v7 = vpop.f32.mrb[100].mxu0 }
 0x1cb   : > { %v5652_v35 = vpop.f32.mrb[100].mxu1  ;;  %v2422_v17 = vpop.f32.mrb[101].mxu0 }
 0x1cc   : > { %v2184_v40 = vadd.f32 %v5652_v35, %v7833_v31  ;;  %v2092_v51 = vpop.f32.mrb[101].mxu1  ;;  %v5717_v57 = vpop.f32.mrb[102].mxu0 }
 0x1cd   : > { %v2183_v12 = vadd.f32 %v2092_v51, %v7836_v33  ;;  %v5653_v47 = vpop.f32.mrb[102].mxu1  ;;  %v2425_v61 = vpop.f32.mrb[103].mxu0 }
 0x1ce   : > { %v7984_v53 = vadd.f32 %v5716_v7, %v2184_v40  ;;  %v2185_v14 = vadd.f32 %v5653_v47, %v7838_v32  ;;  %v2095_v36 = vpop.f32.mrb[103].mxu1  ;;  %v3876_v32 = vpack.c.bf16 %v8590_v3, %v8649_v37 }
 0x1cf   : > { %v7987_v22 = vadd.f32 %v2422_v17, %v2183_v12  ;;  %5983 = vmatmul.mubr.bf16.gmra.mrb[208].mxu0 %v3874_v49 }
 0x1d0   : > { %v7989_v31 = vadd.f32 %v5717_v57, %v2185_v14  ;;  %5919 = vmatmul.mubr.bf16.gmra.mrb[208].mxu1 %v3448_v8  ;;  %5986 = vmatprep.mubr.bf16.mxu0 %v8696_v42 }
 0x1d1   : > { %5922 = vmatprep.mubr.bf16.mxu1 %v8695_v54 }
 0x1d2   : > { %v5720_v33 = vpop.f32.mrb[104].mxu0 }
 0x1d3   : > { %v5656_v15 = vpop.f32.mrb[104].mxu1  ;;  %v2437_v19 = vpop.f32.mrb[105].mxu0 }
 0x1d4   : > { %v2187_v41 = vadd.f32 %v5656_v15, %v7848_v34  ;;  %v2107_v29 = vpop.f32.mrb[105].mxu1  ;;  %v5721_v23 = vpop.f32.mrb[106].mxu0 }
 0x1d5   : > { %v5657_v28 = vpop.f32.mrb[106].mxu1  ;;  %v2439_v63 = vpop.f32.mrb[107].mxu0 }
 0x1d6   : > { %v7996_v59 = vadd.f32 %v5720_v33, %v2187_v41  ;;  %v2109_v50 = vpop.f32.mrb[107].mxu1 }
 0x1d7   : > { %v2186_v60 = vadd.f32 %v2109_v50, %v7852_v6  ;;  %5987 = vmatmul.mubr.bf16.gmra.mrb[212].mxu0 %v3876_v32 }
 0x1d8   : > { %5923 = vmatmul.mubr.bf16.gmra.mrb[212].mxu1 %v8695_v54 }
 0x1d9   : > { %v8000_v4 = vadd.f32 %v2439_v63, %v2186_v60 }
 0x1da   : > { %v5724_v34 = vpop.f32.mrb[108].mxu0 }
 0x1db   : > { %v5660_v5 = vpop.f32.mrb[108].mxu1  ;;  %v2451_v35 = vpop.f32.mrb[109].mxu0 }
 0x1dc   : > { %v2121_v18 = vpop.f32.mrb[109].mxu1  ;;  %v5725_v37 = vpop.f32.mrb[110].mxu0 }
 0x1dd   : > { %v2188_v7 = vadd.f32 %v2121_v18, %v7858_v52  ;;  %v5661_v3 = vpop.f32.mrb[110].mxu1  ;;  %v2454_v17 = vpop.f32.mrb[111].mxu0 }
 0x1de   : > { %v2190_v40 = vadd.f32 %v5661_v3, %v7861_v20  ;;  %v2124_v51 = vpop.f32.mrb[111].mxu1 }
 0x1df   : > { %v8004_v8 = vadd.f32 %v2451_v35, %v2188_v7  ;;  %v2189_v6 = vadd.f32 %v2124_v51, %v7865_v46 }
 0x1e0   : > { %v8007_v49 = vadd.f32 %v5725_v37, %v2190_v40 }
 0x1e1   : > { %v8009_v12 = vadd.f32 %v2454_v17, %v2189_v6 }
 0x1e2   : > { %v5728_v57 = vpop.f32.mrb[112].mxu0 }
 0x1e3   : > { %v5664_v47 = vpop.f32.mrb[112].mxu1  ;;  %v2466_v52 = vpop.f32.mrb[113].mxu0 }
 0x1e4   : > { %v2192_v14 = vadd.f32 %v5664_v47, %v7871_v9  ;;  %v2136_v36 = vpop.f32.mrb[113].mxu1  ;;  %v5729_v20 = vpop.f32.mrb[114].mxu0 }
 0x1e5   : > { %v2191_v61 = vadd.f32 %v2136_v36, %v7874_v55  ;;  %v5665_v54 = vpop.f32.mrb[114].mxu1  ;;  %v2469_v46 = vpop.f32.mrb[115].mxu0 }
 0x1e6   : > { %v8013_v42 = vadd.f32 %v5728_v57, %v2192_v14  ;;  %v2193_v15 = vadd.f32 %v5665_v54, %v7876_v25  ;;  %v2139_v33 = vpop.f32.mrb[115].mxu1 }
 0x1e7   : > { %v8016_v41 = vadd.f32 %v2466_v52, %v2191_v61 }
 0x1e8   : > { %v8018_v29 = vadd.f32 %v5729_v20, %v2193_v15 }
 0x1ea   : > { %v5732_v32 = vpop.f32.mrb[116].mxu0 }
 0x1eb   : > { %v5668_v19 = vpop.f32.mrb[116].mxu1  ;;  %v2481_v23 = vpop.f32.mrb[117].mxu0 }
 0x1ec   : > { %v2195_v9 = vadd.f32 %v5668_v19, %v7883_v24  ;;  %v2151_v28 = vpop.f32.mrb[117].mxu1  ;;  %v5733_v55 = vpop.f32.mrb[118].mxu0 }
 0x1ed   : > { %v5669_v50 = vpop.f32.mrb[118].mxu1  ;;  %v2483_v5 = vpop.f32.mrb[119].mxu0 }
 0x1ee   : > { %v8021_v63 = vadd.f32 %v5732_v32, %v2195_v9  ;;  %v2153_v60 = vpop.f32.mrb[119].mxu1 }
 0x1ef   : > { %v2194_v25 = vadd.f32 %v2153_v60, %v7888_v16 }
 0x1f1   : > { %v8024_v34 = vadd.f32 %v2483_v5, %v2194_v25 }
 0x1f2   : > { %v5816_v35 = vpop.f32.mrb[120].mxu0 }
 0x1f3   : > { %v5752_v18 = vpop.f32.mrb[120].mxu1  ;;  %v3220_v3 = vpop.f32.mrb[121].mxu0 }
 0x1f4   : > { %v2745_v7 = vpop.f32.mrb[121].mxu1  ;;  %v5817_v24 = vpop.f32.mrb[122].mxu0 }
 0x1f5   : > { %v2920_v37 = vadd.f32 %v2745_v7, %v7894_v26  ;;  %v5753_v40 = vpop.f32.mrb[122].mxu1  ;;  %v3223_v6 = vpop.f32.mrb[123].mxu0 }
 0x1f6   : > { %v2922_v51 = vadd.f32 %v5753_v40, %v7897_v11  ;;  %v2748_v17 = vpop.f32.mrb[123].mxu1 }
 0x1f7   : > { %v8028_v47 = vadd.f32 %v3220_v3, %v2920_v37  ;;  %v2921_v57 = vadd.f32 %v2748_v17, %v7901_v58 }
 0x1f8   : > { %v8031_v14 = vadd.f32 %v5817_v24, %v2922_v51 }
 0x1f9   : > { %v8033_v16 = vadd.f32 %v3223_v6, %v2921_v57 }
 0x1fa   : > { %v5820_v52 = vpop.f32.mrb[124].mxu0 }
 0x1fb   : > { %v5756_v36 = vpop.f32.mrb[124].mxu1  ;;  %v3235_v26 = vpop.f32.mrb[125].mxu0 }
 0x1fc   : > { %v2924_v61 = vadd.f32 %v5756_v36, %v7907_v43  ;;  %v2760_v54 = vpop.f32.mrb[125].mxu1  ;;  %v5821_v11 = vpop.f32.mrb[126].mxu0 }
 0x1fd   : > { %v2923_v20 = vadd.f32 %v2760_v54, %v7910_v2  ;;  %v5757_v15 = vpop.f32.mrb[126].mxu1  ;;  %v3238_v58 = vpop.f32.mrb[127].mxu0 }
 0x1fe   : > { %v8037_v33 = vadd.f32 %v5820_v52, %v2924_v61  ;;  %v2925_v46 = vadd.f32 %v5757_v15, %v7912_v39  ;;  %v2763_v19 = vpop.f32.mrb[127].mxu1 }
 0x1ff   : > { %v8040_v32 = vadd.f32 %v3235_v26, %v2923_v20 }
 0x200   : > { %v8042_v9 = vadd.f32 %v5821_v11, %v2925_v46 }
 0x202   : > { %v5824_v23 = vpop.f32.mrb[128].mxu0 }
 0x203   : > { %v5760_v28 = vpop.f32.mrb[128].mxu1  ;;  %v3250_v55 = vpop.f32.mrb[129].mxu0 }
 0x204   : > { %v2927_v43 = vadd.f32 %v5760_v28, %v7919_v56  ;;  %v2775_v50 = vpop.f32.mrb[129].mxu1  ;;  %v5825_v2 = vpop.f32.mrb[130].mxu0 }
 0x205   : > { %v5761_v60 = vpop.f32.mrb[130].mxu1  ;;  %v3252_v18 = vpop.f32.mrb[131].mxu0 }
 0x206   : > { %v8045_v5 = vadd.f32 %v5824_v23, %v2927_v43  ;;  %v2777_v25 = vpop.f32.mrb[131].mxu1 }
 0x207   : > { %v2926_v39 = vadd.f32 %v2777_v25, %v7924_v13 }
 0x209   : > { %v8048_v35 = vadd.f32 %v3252_v18, %v2926_v39 }
 0x20a   : > { %v5828_v3 = vpop.f32.mrb[132].mxu0 }
 0x20b   : > { %v5764_v7 = vpop.f32.mrb[132].mxu1  ;;  %v3264_v40 = vpop.f32.mrb[133].mxu0 }
 0x20c   : > { %v2789_v37 = vpop.f32.mrb[133].mxu1  ;;  %v5829_v56 = vpop.f32.mrb[134].mxu0 }
 0x20d   : > { %v2928_v24 = vadd.f32 %v2789_v37, %v7930_v27  ;;  %v5765_v51 = vpop.f32.mrb[134].mxu1  ;;  %v3267_v57 = vpop.f32.mrb[135].mxu0 }
 0x20e   : > { %v2930_v17 = vadd.f32 %v5765_v51, %v7933_v10  ;;  %v2792_v6 = vpop.f32.mrb[135].mxu1 }
 0x20f   : > { %v8052_v36 = vadd.f32 %v3264_v40, %v2928_v24  ;;  %v2929_v52 = vadd.f32 %v2792_v6, %v7937_v48 }
 0x210   : > { %v8055_v61 = vadd.f32 %v5829_v56, %v2930_v17 }
 0x211   : > { %v8057_v13 = vadd.f32 %v3267_v57, %v2929_v52 }
 0x212   : > { %v5832_v26 = vpop.f32.mrb[136].mxu0 }
 0x213   : > { %v5768_v54 = vpop.f32.mrb[136].mxu1  ;;  %v3279_v27 = vpop.f32.mrb[137].mxu0 }
 0x214   : > { %v2932_v20 = vadd.f32 %v5768_v54, %v7943_v1  ;;  %v2804_v15 = vpop.f32.mrb[137].mxu1  ;;  %v5833_v10 = vpop.f32.mrb[138].mxu0 }
 0x215   : > { %v2931_v11 = vadd.f32 %v2804_v15, %v7946_v30  ;;  %v5769_v46 = vpop.f32.mrb[138].mxu1  ;;  %v3282_v48 = vpop.f32.mrb[139].mxu0 }
 0x216   : > { %v8061_v19 = vadd.f32 %v5832_v26, %v2932_v20  ;;  %v2933_v58 = vadd.f32 %v5769_v46, %v7948_v45  ;;  %v2807_v28 = vpop.f32.mrb[139].mxu1 }
 0x217   : > { %v8064_v23 = vadd.f32 %v3279_v27, %v2931_v11 }
 0x218   : > { %v8066_v43 = vadd.f32 %v5833_v10, %v2933_v58 }
 0x21a   : > { %v5836_v55 = vpop.f32.mrb[140].mxu0 }
 0x21b   : > { %v5772_v50 = vpop.f32.mrb[140].mxu1  ;;  %v3294_v2 = vpop.f32.mrb[141].mxu0 }
 0x21c   : > { %v2935_v1 = vadd.f32 %v5772_v50, %v7955_v44  ;;  %v2819_v60 = vpop.f32.mrb[141].mxu1  ;;  %v5837_v30 = vpop.f32.mrb[142].mxu0 }
 0x21d   : > { %v5773_v25 = vpop.f32.mrb[142].mxu1  ;;  %v3296_v7 = vpop.f32.mrb[143].mxu0 }
 0x21e   : > { %v8069_v18 = vadd.f32 %v5836_v55, %v2935_v1  ;;  %v2821_v39 = vpop.f32.mrb[143].mxu1 }
 0x21f   : > { %v2934_v45 = vadd.f32 %v2821_v39, %v7960_v62 }
 0x221   : > { %v8072_v3 = vadd.f32 %v3296_v7, %v2934_v45 }
 0x222   : > { %v5840_v40 = vpop.f32.mrb[144].mxu0 }
 0x223   : > { %v5776_v37 = vpop.f32.mrb[144].mxu1  ;;  %v3308_v51 = vpop.f32.mrb[145].mxu0 }
 0x224   : > { %v2833_v24 = vpop.f32.mrb[145].mxu1  ;;  %v5841_v44 = vpop.f32.mrb[146].mxu0 }
 0x225   : > { %v2936_v56 = vadd.f32 %v2833_v24, %v7968_v38  ;;  %v5777_v17 = vpop.f32.mrb[146].mxu1  ;;  %v3311_v52 = vpop.f32.mrb[147].mxu0 }
 0x226   : > { %v2938_v6 = vadd.f32 %v5777_v17, %v7971_v21  ;;  %v2836_v57 = vpop.f32.mrb[147].mxu1 }
 0x227   : > { %v8076_v54 = vadd.f32 %v3308_v51, %v2936_v56  ;;  %v2937_v26 = vadd.f32 %v2836_v57, %v7975_v0 }
 0x228   : > { %v8079_v20 = vadd.f32 %v5841_v44, %v2938_v6 }
 0x229   : > { %v8081_v62 = vadd.f32 %v3311_v52, %v2937_v26 }
 0x22a   : > { %v5844_v27 = vpop.f32.mrb[148].mxu0 }
 0x22b   : > { %v5780_v15 = vpop.f32.mrb[148].mxu1  ;;  %v3323_v38 = vpop.f32.mrb[149].mxu0 }
 0x22c   : > { %v2940_v11 = vadd.f32 %v5780_v15, %v7984_v53  ;;  %v2848_v46 = vpop.f32.mrb[149].mxu1  ;;  %v5845_v21 = vpop.f32.mrb[150].mxu0 }
 0x22d   : > { %v2939_v10 = vadd.f32 %v2848_v46, %v7987_v22  ;;  %v5781_v58 = vpop.f32.mrb[150].mxu1  ;;  %v3326_v0 = vpop.f32.mrb[151].mxu0 }
 0x22e   : > { %v8085_v28 = vadd.f32 %v5844_v27, %v2940_v11  ;;  %v2941_v48 = vadd.f32 %v5781_v58, %v7989_v31  ;;  %v2851_v50 = vpop.f32.mrb[151].mxu1 }
 0x22f   : > { %v8088_v55 = vadd.f32 %v3323_v38, %v2939_v10 }
 0x230   : > { %v8090_v1 = vadd.f32 %v5845_v21, %v2941_v48 }
 0x232   : > { %v5848_v2 = vpop.f32.mrb[152].mxu0 }
 0x233   : > { %v5784_v60 = vpop.f32.mrb[152].mxu1  ;;  %v3338_v30 = vpop.f32.mrb[153].mxu0 }
 0x234   : > { %v2943_v53 = vadd.f32 %v5784_v60, %v7996_v59  ;;  %v2863_v25 = vpop.f32.mrb[153].mxu1  ;;  %v5849_v22 = vpop.f32.mrb[154].mxu0 }
 0x235   : > { %v5785_v39 = vpop.f32.mrb[154].mxu1  ;;  %v3340_v37 = vpop.f32.mrb[155].mxu0 }
 0x236   : > { %v8093_v7 = vadd.f32 %v5848_v2, %v2943_v53  ;;  %v2865_v45 = vpop.f32.mrb[155].mxu1 }
 0x237   : > { %v2942_v31 = vadd.f32 %v2865_v45, %v8000_v4 }
 0x239   : > { %v8096_v40 = vadd.f32 %v3340_v37, %v2942_v31 }
 0x23a   : > { %v5852_v51 = vpop.f32.mrb[156].mxu0 }
 0x23b   : > { %v5788_v24 = vpop.f32.mrb[156].mxu1  ;;  %v3352_v17 = vpop.f32.mrb[157].mxu0 }
 0x23c   : > { %v2877_v56 = vpop.f32.mrb[157].mxu1  ;;  %v5853_v59 = vpop.f32.mrb[158].mxu0 }
 0x23d   : > { %v2944_v44 = vadd.f32 %v2877_v56, %v8004_v8  ;;  %v5789_v6 = vpop.f32.mrb[158].mxu1  ;;  %v3355_v26 = vpop.f32.mrb[159].mxu0 }
 0x23e   : > { %v2946_v57 = vadd.f32 %v5789_v6, %v8007_v49  ;;  %v2880_v52 = vpop.f32.mrb[159].mxu1 }
 0x23f   : > { %v8100_v15 = vadd.f32 %v3352_v17, %v2944_v44  ;;  %v2945_v27 = vadd.f32 %v2880_v52, %v8009_v12 }
 0x240   : > { %v8103_v11 = vadd.f32 %v5853_v59, %v2946_v57 }
 0x241   : > { %v8105_v4 = vadd.f32 %v3355_v26, %v2945_v27 }
 0x242   : > { %v5856_v38 = vpop.f32.mrb[160].mxu0 }
 0x243   : > { %v5792_v46 = vpop.f32.mrb[160].mxu1  ;;  %v3367_v8 = vpop.f32.mrb[161].mxu0 }
 0x244   : > { %v2948_v10 = vadd.f32 %v5792_v46, %v8013_v42  ;;  %v2892_v58 = vpop.f32.mrb[161].mxu1  ;;  %v5857_v49 = vpop.f32.mrb[162].mxu0 }
 0x245   : > { %v2947_v21 = vadd.f32 %v2892_v58, %v8016_v41  ;;  %v5793_v48 = vpop.f32.mrb[162].mxu1  ;;  %v3370_v12 = vpop.f32.mrb[163].mxu0 }
 0x246   : > { %v8109_v50 = vadd.f32 %v5856_v38, %v2948_v10  ;;  %v2949_v0 = vadd.f32 %v5793_v48, %v8018_v29  ;;  %v2895_v60 = vpop.f32.mrb[163].mxu1 }
 0x247   : > { %v8112_v2 = vadd.f32 %v3367_v8, %v2947_v21 }
 0x248   : > { %v8114_v53 = vadd.f32 %v5857_v49, %v2949_v0 }
 0x24a   : > { %v5860_v30 = vpop.f32.mrb[164].mxu0 }
 0x24b   : > { %v5796_v25 = vpop.f32.mrb[164].mxu1  ;;  %v3382_v22 = vpop.f32.mrb[165].mxu0 }
 0x24c   : > { %v2951_v42 = vadd.f32 %v5796_v25, %v8021_v63  ;;  %v2907_v39 = vpop.f32.mrb[165].mxu1  ;;  %v5861_v41 = vpop.f32.mrb[166].mxu0 }
 0x24d   : > { %v5797_v45 = vpop.f32.mrb[166].mxu1  ;;  %v3384_v24 = vpop.f32.mrb[167].mxu0 }
 0x24e   : > { %v8117_v37 = vadd.f32 %v5860_v30, %v2951_v42  ;;  %v2909_v31 = vpop.f32.mrb[167].mxu1 }
 0x24f   : > { %v2950_v29 = vadd.f32 %v2909_v31, %v8024_v34  ;;  %v8128_v34 = vld [vmem:[%s8231_s4] ss:$0 sm:$0xff] }
 0x251   : > { %v8120_v51 = vadd.f32 %v3384_v24, %v2950_v29 }
 0x252   : > { %v5944_v17 = vpop.f32.mrb[168].mxu0 }
 0x253   : > { %v5880_v56 = vpop.f32.mrb[168].mxu1  ;;  %v3976_v6 = vpop.f32.mrb[169].mxu0 }
 0x254   : > { %v3550_v44 = vpop.f32.mrb[169].mxu1  ;;  %v5945_v57 = vpop.f32.mrb[170].mxu0 }
 0x255   : > { %v3725_v59 = vadd.f32 %v3550_v44, %v8028_v47  ;;  %v5881_v63 = vpop.f32.mrb[170].mxu1  ;;  %v3979_v27 = vpop.f32.mrb[171].mxu0 }
 0x256   : > { %v3727_v52 = vadd.f32 %v5881_v63, %v8031_v14  ;;  %v3553_v26 = vpop.f32.mrb[171].mxu1 }
 0x257   : > { %v4151_v46 = vadd.f32 %v3976_v6, %v3725_v59  ;;  %v3726_v38 = vadd.f32 %v3553_v26, %v8033_v16 }
 0x258   : > { %v4153_v10 = vadd.f32 %v5945_v57, %v3727_v52 }
 0x259   : > { %v4152_v58 = vadd.f32 %v3979_v27, %v3726_v38  ;;  %v4190_v8 = vadd.f32 %v8128_v34, %v4151_v46 }
 0x25a   : > { %v5948_v48 = vpop.f32.mrb[172].mxu0 }
 0x25b   : > { %v4191_v47 = vadd.f32 %v8128_v34, %v4152_v58  ;;  %v5884_v21 = vpop.f32.mrb[172].mxu1  ;;  %v3991_v49 = vpop.f32.mrb[173].mxu0 }
 0x25c   : > { %v3729_v14 = vadd.f32 %v5884_v21, %v8037_v33  ;;  %v3565_v16 = vpop.f32.mrb[173].mxu1  ;;  %v5949_v25 = vpop.f32.mrb[174].mxu0  ;;  %v4192_v33 = vadd.f32 %v8128_v34, %v4153_v10 }
 0x25d   : > { %v4222_v0 = vpack.c.bf16 %v4191_v47, %v4190_v8  ;;  %v3728_v60 = vadd.f32 %v3565_v16, %v8040_v32  ;;  %v5885_v12 = vpop.f32.mrb[174].mxu1  ;;  %v3994_v22 = vpop.f32.mrb[175].mxu0 }
 0x25e   : > { %v4155_v30 = vadd.f32 %v5948_v48, %v3729_v14  ;;  %v3730_v42 = vadd.f32 %v5885_v12, %v8042_v9  ;;  %v3568_v39 = vpop.f32.mrb[175].mxu1 }
 0x25f   : > { %5020 = vst [vmem:[%s8137_s15] sm:$0xff] %v4222_v0   ;;  %v4382_v45 = vunpack.c.l.bf16 %v4222_v0  ;;  %v4383_v41 = vunpack.c.h.bf16 %v4222_v0  ;;  %v4154_v31 = vadd.f32 %v3991_v49, %v3728_v60 }
 0x260   : > { %v4156_v24 = vadd.f32 %v5949_v25, %v3730_v42  ;;  %v4194_v56 = vadd.f32 %v8128_v34, %v4155_v30 }
 0x261   : > { %v4193_v29 = vadd.f32 %v8128_v34, %v4154_v31  ;;  %v4451_v17 = vmul.f32 %v4382_v45, %v4382_v45  ;;  %v4452_v44 = vmul.f32 %v4383_v41, %v4383_v41  ;;  %v4414_v27 = vadd.f32 %v4383_v41, %v4382_v45 }
 0x262   : > { %v4195_v32 = vadd.f32 %v8128_v34, %v4156_v24  ;;  %v5952_v59 = vpop.f32.mrb[176].mxu0 }
 0x263   : > { %v4223_v9 = vpack.c.bf16 %v4193_v29, %v4192_v33  ;;  %v5888_v6 = vpop.f32.mrb[176].mxu1  ;;  %v4006_v26 = vpop.f32.mrb[177].mxu0  ;;  %v4483_v14 = vadd.f32 %v4452_v44, %v4451_v17 }
 0x264   : > { %v4224_v63 = vpack.c.bf16 %v4195_v32, %v4194_v56  ;;  %v3732_v57 = vadd.f32 %v5888_v6, %v8045_v5  ;;  %v3580_v52 = vpop.f32.mrb[177].mxu1  ;;  %v5953_v58 = vpop.f32.mrb[178].mxu0 }
 0x265   : > { %5111 = vst [vmem:[%s8137_s15 + $0x8] sm:$0xff] %v4223_v9   ;;  %v4384_v46 = vunpack.c.l.bf16 %v4223_v9  ;;  %v4385_v38 = vunpack.c.h.bf16 %v4223_v9  ;;  %v5889_v10 = vpop.f32.mrb[178].mxu1  ;;  %v4008_v48 = vpop.f32.mrb[179].mxu0 }
 0x266   : > { %5112 = vst [vmem:[%s8137_s15 + $0x10] sm:$0xff] %v4224_v63   ;;  %v4386_v8 = vunpack.c.l.bf16 %v4224_v63  ;;  %v4158_v47 = vadd.f32 %v5952_v59, %v3732_v57  ;;  %v3582_v21 = vpop.f32.mrb[179].mxu1  ;;  %v4387_v60 = vunpack.c.h.bf16 %v4224_v63 }
 0x267   : > { %v4415_v16 = vadd.f32 %v4414_v27, %v4384_v46  ;;  %v4453_v49 = vmul.f32 %v4384_v46, %v4384_v46  ;;  %v3731_v0 = vadd.f32 %v3582_v21, %v8048_v35  ;;  %v4454_v12 = vmul.f32 %v4385_v38, %v4385_v38 }
 0x268   : > { %v4455_v42 = vmul.f32 %v4386_v8, %v4386_v8  ;;  %v4197_v45 = vadd.f32 %v8128_v34, %v4158_v47  ;;  %v4456_v33 = vmul.f32 %v4387_v60, %v4387_v60 }
 0x269   : > { %v4416_v5 = vadd.f32 %v4415_v16, %v4385_v38  ;;  %v4484_v25 = vadd.f32 %v4483_v14, %v4453_v49  ;;  %v4157_v30 = vadd.f32 %v4008_v48, %v3731_v0 }
 0x26a   : > { %v5956_v24 = vpop.f32.mrb[180].mxu0 }
 0x26b   : > { %v4485_v39 = vadd.f32 %v4484_v25, %v4454_v12  ;;  %v4417_v22 = vadd.f32 %v4416_v5, %v4386_v8  ;;  %v4196_v41 = vadd.f32 %v8128_v34, %v4157_v30  ;;  %v5892_v31 = vpop.f32.mrb[180].mxu1  ;;  %v4020_v56 = vpop.f32.mrb[181].mxu0 }
 0x26c   : > { %v3594_v29 = vpop.f32.mrb[181].mxu1  ;;  %v5957_v6 = vpop.f32.mrb[182].mxu0 }
 0x26d   : > { %v4418_v32 = vadd.f32 %v4417_v22, %v4387_v60  ;;  %v4486_v35 = vadd.f32 %v4485_v39, %v4455_v42  ;;  %v4225_v17 = vpack.c.bf16 %v4197_v45, %v4196_v41  ;;  %v3733_v44 = vadd.f32 %v3594_v29, %v8052_v36  ;;  %v5893_v9 = vpop.f32.mrb[182].mxu1  ;;  %v4023_v57 = vpop.f32.mrb[183].mxu0 }
 0x26e   : > { %v3735_v59 = vadd.f32 %v5893_v9, %v8055_v61  ;;  %v3597_v63 = vpop.f32.mrb[183].mxu1 }
 0x26f   : > { %v4487_v52 = vadd.f32 %v4486_v35, %v4456_v33  ;;  %5113 = vst [vmem:[%s8137_s15 + $0x18] sm:$0xff] %v4225_v17   ;;  %v4388_v26 = vunpack.c.l.bf16 %v4225_v17  ;;  %v4389_v27 = vunpack.c.h.bf16 %v4225_v17  ;;  %v4159_v46 = vadd.f32 %v4020_v56, %v3733_v44 }
 0x270   : > { %v4161_v38 = vadd.f32 %v5957_v6, %v3735_v59  ;;  %v3734_v10 = vadd.f32 %v3597_v63, %v8057_v13 }
 0x271   : > { %v4419_v58 = vadd.f32 %v4418_v32, %v4388_v26  ;;  %v4457_v8 = vmul.f32 %v4388_v26, %v4388_v26  ;;  %v4458_v48 = vmul.f32 %v4389_v27, %v4389_v27  ;;  %v4198_v61 = vadd.f32 %v8128_v34, %v4159_v46 }
 0x272   : > { %v4160_v47 = vadd.f32 %v4023_v57, %v3734_v10  ;;  %v5960_v16 = vpop.f32.mrb[184].mxu0 }
 0x273   : > { %v4420_v21 = vadd.f32 %v4419_v58, %v4389_v27  ;;  %v4488_v36 = vadd.f32 %v4487_v52, %v4457_v8  ;;  %v5896_v14 = vpop.f32.mrb[184].mxu1  ;;  %v4035_v5 = vpop.f32.mrb[185].mxu0 }
 0x274   : > { %v4199_v49 = vadd.f32 %v8128_v34, %v4160_v47  ;;  %v3737_v0 = vadd.f32 %v5896_v14, %v8061_v19  ;;  %v3609_v60 = vpop.f32.mrb[185].mxu1  ;;  %v5961_v30 = vpop.f32.mrb[186].mxu0  ;;  %v4200_v19 = vadd.f32 %v8128_v34, %v4161_v38 }
 0x275   : > { %v4489_v12 = vadd.f32 %v4488_v36, %v4458_v48  ;;  %v3736_v13 = vadd.f32 %v3609_v60, %v8064_v23  ;;  %v5897_v25 = vpop.f32.mrb[186].mxu1  ;;  %v4038_v41 = vpop.f32.mrb[187].mxu0 }
 0x276   : > { %v4226_v42 = vpack.c.bf16 %v4199_v49, %v4198_v61  ;;  %v4163_v39 = vadd.f32 %v5960_v16, %v3737_v0  ;;  %v3738_v22 = vadd.f32 %v5897_v25, %v8066_v43  ;;  %v3612_v45 = vpop.f32.mrb[187].mxu1 }
 0x277   : > { %v4162_v31 = vadd.f32 %v4035_v5, %v3736_v13 }
 0x278   : > { %5114 = vst [vmem:[%s8137_s15 + $0x20] sm:$0xff] %v4226_v42   ;;  %v4390_v24 = vunpack.c.l.bf16 %v4226_v42  ;;  %v4391_v33 = vunpack.c.h.bf16 %v4226_v42  ;;  %v4164_v29 = vadd.f32 %v5961_v30, %v3738_v22  ;;  %v4202_v35 = vadd.f32 %v8128_v34, %v4163_v39 }
 0x279   : > { %v4201_v56 = vadd.f32 %v8128_v34, %v4162_v31 }
 0x27a   : > { %v4421_v32 = vadd.f32 %v4420_v21, %v4390_v24  ;;  %v4459_v23 = vmul.f32 %v4390_v24, %v4390_v24  ;;  %v4203_v17 = vadd.f32 %v8128_v34, %v4164_v29  ;;  %v4460_v44 = vmul.f32 %v4391_v33, %v4391_v33  ;;  %v5964_v6 = vpop.f32.mrb[188].mxu0 }
 0x27b   : > { %v4227_v43 = vpack.c.bf16 %v4201_v56, %v4200_v19  ;;  %v5900_v9 = vpop.f32.mrb[188].mxu1  ;;  %v4050_v27 = vpop.f32.mrb[189].mxu0 }
 0x27c   : > { %v4422_v59 = vadd.f32 %v4421_v32, %v4391_v33  ;;  %v4490_v63 = vadd.f32 %v4489_v12, %v4459_v23  ;;  %v4228_v57 = vpack.c.bf16 %v4203_v17, %v4202_v35  ;;  %v3740_v52 = vadd.f32 %v5900_v9, %v8069_v18  ;;  %v3624_v26 = vpop.f32.mrb[189].mxu1  ;;  %v5965_v58 = vpop.f32.mrb[190].mxu0 }
 0x27d   : > { %5115 = vst [vmem:[%s8137_s15 + $0x28] sm:$0xff] %v4227_v43   ;;  %v4392_v46 = vunpack.c.l.bf16 %v4227_v43  ;;  %v4393_v38 = vunpack.c.h.bf16 %v4227_v43  ;;  %v5901_v10 = vpop.f32.mrb[190].mxu1  ;;  %v4052_v36 = vpop.f32.mrb[191].mxu0 }
 0x27e   : > { %v4491_v8 = vadd.f32 %v4490_v63, %v4460_v44  ;;  %5116 = vst [vmem:[%s8137_s15 + $0x30] sm:$0xff] %v4228_v57   ;;  %v4394_v47 = vunpack.c.l.bf16 %v4228_v57  ;;  %v4166_v21 = vadd.f32 %v5964_v6, %v3740_v52  ;;  %v3626_v48 = vpop.f32.mrb[191].mxu1  ;;  %v4395_v49 = vunpack.c.h.bf16 %v4228_v57 }
 0x27f   : > { %v4423_v14 = vadd.f32 %v4422_v59, %v4392_v46  ;;  %v4461_v16 = vmul.f32 %v4392_v46, %v4392_v46  ;;  %v3739_v61 = vadd.f32 %v3626_v48, %v8072_v3  ;;  %v4462_v18 = vmul.f32 %v4393_v38, %v4393_v38 }
 0x280   : > { %v4463_v12 = vmul.f32 %v4394_v47, %v4394_v47  ;;  %v4205_v30 = vadd.f32 %v8128_v34, %v4166_v21  ;;  %v4464_v45 = vmul.f32 %v4395_v49, %v4395_v49 }
 0x281   : > { %v4424_v0 = vadd.f32 %v4423_v14, %v4393_v38  ;;  %v4492_v60 = vadd.f32 %v4491_v8, %v4461_v16  ;;  %v4165_v5 = vadd.f32 %v4052_v36, %v3739_v61 }
 0x282   : > { %v5968_v22 = vpop.f32.mrb[192].mxu0 }
 0x283   : > { %v4493_v13 = vadd.f32 %v4492_v60, %v4462_v18  ;;  %v4425_v25 = vadd.f32 %v4424_v0, %v4394_v47  ;;  %v4204_v42 = vadd.f32 %v8128_v34, %v4165_v5  ;;  %v5904_v39 = vpop.f32.mrb[192].mxu1  ;;  %v4064_v31 = vpop.f32.mrb[193].mxu0 }
 0x284   : > { %v3638_v41 = vpop.f32.mrb[193].mxu1  ;;  %v5969_v56 = vpop.f32.mrb[194].mxu0 }
 0x285   : > { %v4426_v24 = vadd.f32 %v4425_v25, %v4395_v49  ;;  %v4494_v3 = vadd.f32 %v4493_v13, %v4463_v12  ;;  %v4229_v33 = vpack.c.bf16 %v4205_v30, %v4204_v42  ;;  %v3741_v29 = vadd.f32 %v3638_v41, %v8076_v54  ;;  %v5905_v19 = vpop.f32.mrb[194].mxu1  ;;  %v4067_v35 = vpop.f32.mrb[195].mxu0 }
 0x286   : > { %v3743_v32 = vadd.f32 %v5905_v19, %v8079_v20  ;;  %v3641_v23 = vpop.f32.mrb[195].mxu1 }
 0x287   : > { %v4495_v17 = vadd.f32 %v4494_v3, %v4464_v45  ;;  %5117 = vst [vmem:[%s8137_s15 + $0x38] sm:$0xff] %v4229_v33   ;;  %v4396_v44 = vunpack.c.l.bf16 %v4229_v33  ;;  %v4397_v43 = vunpack.c.h.bf16 %v4229_v33  ;;  %v4167_v9 = vadd.f32 %v4064_v31, %v3741_v29 }
 0x288   : > { %v4169_v6 = vadd.f32 %v5969_v56, %v3743_v32  ;;  %v3742_v59 = vadd.f32 %v3641_v23, %v8081_v62 }
 0x289   : > { %v4427_v63 = vadd.f32 %v4426_v24, %v4396_v44  ;;  %v4465_v57 = vmul.f32 %v4396_v44, %v4396_v44  ;;  %v4466_v27 = vmul.f32 %v4397_v43, %v4397_v43  ;;  %v4206_v20 = vadd.f32 %v8128_v34, %v4167_v9 }
 0x28a   : > { %v4168_v52 = vadd.f32 %v4067_v35, %v3742_v59  ;;  %v5972_v38 = vpop.f32.mrb[196].mxu0 }
 0x28b   : > { %v4428_v26 = vadd.f32 %v4427_v63, %v4397_v43  ;;  %v4496_v54 = vadd.f32 %v4495_v17, %v4465_v57  ;;  %v5908_v46 = vpop.f32.mrb[196].mxu1  ;;  %v4079_v47 = vpop.f32.mrb[197].mxu0 }
 0x28c   : > { %v4207_v10 = vadd.f32 %v8128_v34, %v4168_v52  ;;  %v3745_v58 = vadd.f32 %v5908_v46, %v8085_v28  ;;  %v3653_v8 = vpop.f32.mrb[197].mxu1  ;;  %v5973_v36 = vpop.f32.mrb[198].mxu0  ;;  %v4208_v28 = vadd.f32 %v8128_v34, %v4169_v6 }
 0x28d   : > { %v4497_v21 = vadd.f32 %v4496_v54, %v4466_v27  ;;  %v3744_v62 = vadd.f32 %v3653_v8, %v8088_v55  ;;  %v5909_v48 = vpop.f32.mrb[198].mxu1  ;;  %v4082_v0 = vpop.f32.mrb[199].mxu0 }
 0x28e   : > { %v4230_v14 = vpack.c.bf16 %v4207_v10, %v4206_v20  ;;  %v4171_v16 = vadd.f32 %v5972_v38, %v3745_v58  ;;  %v3746_v61 = vadd.f32 %v5909_v48, %v8090_v1  ;;  %v3656_v49 = vpop.f32.mrb[199].mxu1 }
 0x28f   : > { %v4170_v18 = vadd.f32 %v4079_v47, %v3744_v62 }
 0x290   : > { %5118 = vst [vmem:[%s8137_s15 + $0x40] sm:$0xff] %v4230_v14   ;;  %v4398_v60 = vunpack.c.l.bf16 %v4230_v14  ;;  %v4399_v5 = vunpack.c.h.bf16 %v4230_v14  ;;  %v4172_v12 = vadd.f32 %v5973_v36, %v3746_v61  ;;  %v4210_v30 = vadd.f32 %v8128_v34, %v4171_v16 }
 0x291   : > { %v4209_v13 = vadd.f32 %v8128_v34, %v4170_v18 }
 0x292   : > { %v4429_v25 = vadd.f32 %v4428_v26, %v4398_v60  ;;  %v4467_v55 = vmul.f32 %v4398_v60, %v4398_v60  ;;  %v4211_v42 = vadd.f32 %v8128_v34, %v4172_v12  ;;  %v4468_v39 = vmul.f32 %v4399_v5, %v4399_v5  ;;  %v5976_v45 = vpop.f32.mrb[200].mxu0 }
 0x293   : > { %v4231_v1 = vpack.c.bf16 %v4209_v13, %v4208_v28  ;;  %v5912_v22 = vpop.f32.mrb[200].mxu1  ;;  %v4094_v29 = vpop.f32.mrb[201].mxu0 }
 0x294   : > { %v4430_v41 = vadd.f32 %v4429_v25, %v4399_v5  ;;  %v4498_v31 = vadd.f32 %v4497_v21, %v4467_v55  ;;  %v4232_v24 = vpack.c.bf16 %v4211_v42, %v4210_v30  ;;  %v3748_v3 = vadd.f32 %v5912_v22, %v8093_v7  ;;  %v3668_v33 = vpop.f32.mrb[201].mxu1  ;;  %v5977_v23 = vpop.f32.mrb[202].mxu0 }
 0x295   : > { %5119 = vst [vmem:[%s8137_s15 + $0x48] sm:$0xff] %v4231_v1   ;;  %v4400_v19 = vunpack.c.l.bf16 %v4231_v1  ;;  %v4401_v56 = vunpack.c.h.bf16 %v4231_v1  ;;  %v5913_v32 = vpop.f32.mrb[202].mxu1  ;;  %v4096_v9 = vpop.f32.mrb[203].mxu0 }
 0x296   : > { %v4499_v35 = vadd.f32 %v4498_v31, %v4468_v39  ;;  %5120 = vst [vmem:[%s8137_s15 + $0x50] sm:$0xff] %v4232_v24   ;;  %v4402_v17 = vunpack.c.l.bf16 %v4232_v24  ;;  %v4174_v44 = vadd.f32 %v5976_v45, %v3748_v3  ;;  %v3670_v43 = vpop.f32.mrb[203].mxu1  ;;  %v4403_v57 = vunpack.c.h.bf16 %v4232_v24 }
 0x297   : > { %v4431_v6 = vadd.f32 %v4430_v41, %v4400_v19  ;;  %v4469_v59 = vmul.f32 %v4400_v19, %v4400_v19  ;;  %v3747_v63 = vadd.f32 %v3670_v43, %v8096_v40  ;;  %v4470_v7 = vmul.f32 %v4401_v56, %v4401_v56 }
 0x298   : > { %v4471_v54 = vmul.f32 %v4402_v17, %v4402_v17  ;;  %v4213_v20 = vadd.f32 %v8128_v34, %v4174_v44  ;;  %v4472_v47 = vmul.f32 %v4403_v57, %v4403_v57 }
 0x299   : > { %v4432_v52 = vadd.f32 %v4431_v6, %v4401_v56  ;;  %v4500_v26 = vadd.f32 %v4499_v35, %v4469_v59  ;;  %v4173_v27 = vadd.f32 %v4096_v9, %v3747_v63 }
 0x29a   : > { %v5980_v8 = vpop.f32.mrb[204].mxu0 }
 0x29b   : > { %v4501_v46 = vadd.f32 %v4500_v26, %v4470_v7  ;;  %v4433_v38 = vadd.f32 %v4432_v52, %v4402_v17  ;;  %v4212_v10 = vadd.f32 %v8128_v34, %v4173_v27  ;;  %v5916_v58 = vpop.f32.mrb[204].mxu1  ;;  %v4108_v62 = vpop.f32.mrb[205].mxu0 }
 0x29c   : > { %v3682_v21 = vpop.f32.mrb[205].mxu1  ;;  %v5981_v61 = vpop.f32.mrb[206].mxu0 }
 0x29d   : > { %v4434_v48 = vadd.f32 %v4433_v38, %v4403_v57  ;;  %v4502_v40 = vadd.f32 %v4501_v46, %v4471_v54  ;;  %v4233_v36 = vpack.c.bf16 %v4213_v20, %v4212_v10  ;;  %v3749_v14 = vadd.f32 %v3682_v21, %v8100_v15  ;;  %v5917_v16 = vpop.f32.mrb[206].mxu1  ;;  %v4111_v18 = vpop.f32.mrb[207].mxu0 }
 0x29e   : > { %v3751_v49 = vadd.f32 %v5917_v16, %v8103_v11  ;;  %v3685_v0 = vpop.f32.mrb[207].mxu1 }
 0x29f   : > { %v4503_v60 = vadd.f32 %v4502_v40, %v4472_v47  ;;  %5121 = vst [vmem:[%s8137_s15 + $0x58] sm:$0xff] %v4233_v36   ;;  %v4404_v5 = vunpack.c.l.bf16 %v4233_v36  ;;  %v4405_v12 = vunpack.c.h.bf16 %v4233_v36  ;;  %v4175_v28 = vadd.f32 %v4108_v62, %v3749_v14 }
 0x2a0   : > { %v4177_v13 = vadd.f32 %v5981_v61, %v3751_v49  ;;  %v3750_v25 = vadd.f32 %v3685_v0, %v8105_v4 }
 0x2a1   : > { %v4435_v55 = vadd.f32 %v4434_v48, %v4404_v5  ;;  %v4473_v30 = vmul.f32 %v4404_v5, %v4404_v5  ;;  %v4474_v1 = vmul.f32 %v4405_v12, %v4405_v12  ;;  %v4214_v11 = vadd.f32 %v8128_v34, %v4175_v28 }
 0x2a2   : > { %v4176_v42 = vadd.f32 %v4111_v18, %v3750_v25  ;;  %v5984_v45 = vpop.f32.mrb[208].mxu0 }
 0x2a3   : > { %v4436_v39 = vadd.f32 %v4435_v55, %v4405_v12  ;;  %v4504_v15 = vadd.f32 %v4503_v60, %v4473_v30  ;;  %v5920_v22 = vpop.f32.mrb[208].mxu1  ;;  %v4123_v3 = vpop.f32.mrb[209].mxu0 }
 0x2a4   : > { %v4215_v41 = vadd.f32 %v8128_v34, %v4176_v42  ;;  %v3753_v31 = vadd.f32 %v5920_v22, %v8109_v50  ;;  %v3697_v24 = vpop.f32.mrb[209].mxu1  ;;  %v5985_v19 = vpop.f32.mrb[210].mxu0  ;;  %v4216_v50 = vadd.f32 %v8128_v34, %v4177_v13 }
 0x2a5   : > { %v4505_v33 = vadd.f32 %v4504_v15, %v4474_v1  ;;  %v3752_v4 = vadd.f32 %v3697_v24, %v8112_v2  ;;  %v5921_v29 = vpop.f32.mrb[210].mxu1  ;;  %v4126_v17 = vpop.f32.mrb[211].mxu0 }
 0x2a6   : > { %v4234_v56 = vpack.c.bf16 %v4215_v41, %v4214_v11  ;;  %v4179_v32 = vadd.f32 %v5984_v45, %v3753_v31  ;;  %v3754_v23 = vadd.f32 %v5921_v29, %v8114_v53  ;;  %v3700_v35 = vpop.f32.mrb[211].mxu1 }
 0x2a7   : > { %v4178_v44 = vadd.f32 %v4123_v3, %v3752_v4 }
 0x2a8   : > { %5122 = vst [vmem:[%s8137_s15 + $0x60] sm:$0xff] %v4234_v56   ;;  %v4406_v43 = vunpack.c.l.bf16 %v4234_v56  ;;  %v4407_v9 = vunpack.c.h.bf16 %v4234_v56  ;;  %v4180_v6 = vadd.f32 %v5985_v19, %v3754_v23  ;;  %v4218_v57 = vadd.f32 %v8128_v34, %v4179_v32 }
 0x2a9   : > { %v4217_v59 = vadd.f32 %v8128_v34, %v4178_v44 }
 0x2aa   : > { %v4437_v63 = vadd.f32 %v4436_v39, %v4406_v43  ;;  %v4475_v2 = vmul.f32 %v4406_v43, %v4406_v43  ;;  %v4219_v52 = vadd.f32 %v8128_v34, %v4180_v6  ;;  %v4476_v7 = vmul.f32 %v4407_v9, %v4407_v9  ;;  %v5988_v27 = vpop.f32.mrb[212].mxu0 }
 0x2ab   : > { %v4235_v53 = vpack.c.bf16 %v4217_v59, %v4216_v50  ;;  %v5924_v26 = vpop.f32.mrb[212].mxu1  ;;  %v4138_v58 = vpop.f32.mrb[213].mxu0 }
 0x2ac   : > { %v4438_v54 = vadd.f32 %v4437_v63, %v4407_v9  ;;  %v4506_v46 = vadd.f32 %v4505_v33, %v4475_v2  ;;  %v4236_v38 = vpack.c.bf16 %v4219_v52, %v4218_v57  ;;  %v3756_v20 = vadd.f32 %v5924_v26, %v8117_v37  ;;  %v3712_v10 = vpop.f32.mrb[213].mxu1  ;;  %v5989_v62 = vpop.f32.mrb[214].mxu0 }
 0x2ad   : > { %5123 = vst [vmem:[%s8137_s15 + $0x68] sm:$0xff] %v4235_v53   ;;  %v4408_v8 = vunpack.c.l.bf16 %v4235_v53  ;;  %v4409_v47 = vunpack.c.h.bf16 %v4235_v53  ;;  %v5925_v21 = vpop.f32.mrb[214].mxu1  ;;  %v4140_v16 = vpop.f32.mrb[215].mxu0 }
 0x2ae   : > { %v4507_v48 = vadd.f32 %v4506_v46, %v4476_v7  ;;  %5124 = vst [vmem:[%s8137_s15 + $0x70] sm:$0xff] %v4236_v38   ;;  %v4410_v40 = vunpack.c.l.bf16 %v4236_v38  ;;  %v4182_v36 = vadd.f32 %v5988_v27, %v3756_v20  ;;  %v3714_v14 = vpop.f32.mrb[215].mxu1  ;;  %v4411_v18 = vunpack.c.h.bf16 %v4236_v38 }
 0x2af   : > { %v4439_v61 = vadd.f32 %v4438_v54, %v4408_v8  ;;  %v4477_v49 = vmul.f32 %v4408_v8, %v4408_v8  ;;  %v3755_v0 = vadd.f32 %v3714_v14, %v8120_v51  ;;  %v4478_v60 = vmul.f32 %v4409_v47, %v4409_v47 }
 0x2b0   : > { %v4479_v28 = vmul.f32 %v4410_v40, %v4410_v40  ;;  %v4221_v55 = vadd.f32 %v8128_v34, %v4182_v36  ;;  %v4480_v39 = vmul.f32 %v4411_v18, %v4411_v18 }
 0x2b1   : > { %v4440_v37 = vadd.f32 %v4439_v61, %v4409_v47  ;;  %v4508_v5 = vadd.f32 %v4507_v48, %v4477_v49  ;;  %v4181_v12 = vadd.f32 %v4140_v16, %v3755_v0 }
 0x2b3   : > { %v4509_v13 = vadd.f32 %v4508_v5, %v4478_v60  ;;  %v4441_v25 = vadd.f32 %v4440_v37, %v4410_v40  ;;  %v4220_v30 = vadd.f32 %v8128_v34, %v4181_v12 }
 0x2b5   : > { %v4442_v42 = vadd.f32 %v4441_v25, %v4411_v18  ;;  %v4510_v1 = vadd.f32 %v4509_v13, %v4479_v28  ;;  %v4237_v15 = vpack.c.bf16 %v4221_v55, %v4220_v30 }
 0x2b7   : > { %v4511_v22 = vadd.f32 %v4510_v1, %v4480_v39  ;;  %5125 = vst [vmem:[%s8137_s15 + $0x78] sm:$0xff] %v4237_v15   ;;  %v4412_v51 = vunpack.c.l.bf16 %v4237_v15  ;;  %v4413_v45 = vunpack.c.h.bf16 %v4237_v15 }
 0x2b9   : > { %v4443_v11 = vadd.f32 %v4442_v42, %v4412_v51  ;;  %v4481_v41 = vmul.f32 %v4412_v51, %v4412_v51  ;;  %v4482_v24 = vmul.f32 %v4413_v45, %v4413_v45 }
 0x2bb   : > { %v4444_v31 = vadd.f32 %v4443_v11, %v4413_v45  ;;  %v4512_v3 = vadd.f32 %v4511_v22, %v4481_v41 }
 0x2bd   : > { %v4445_v33 = vrot.slane %v4444_v31, 4  ;;  %v4513_v4 = vadd.f32 %v4512_v3, %v4482_v24 }
 0x2bf   : > { %v4446_v29 = vadd.f32 %v4445_v33, %v4444_v31  ;;  %v4514_v19 = vrot.slane %v4513_v4, 4 }
 0x2c1   : > { %v4447_v56 = vrot.slane %v4446_v29, 2  ;;  %v4515_v34 = vadd.f32 %v4514_v19, %v4513_v4 }
 0x2c3   : > { %v4448_v32 = vadd.f32 %v4447_v56, %v4446_v29  ;;  %v4516_v23 = vrot.slane %v4515_v34, 2 }
 0x2c5   : > { %v4449_v35 = vrot.slane %v4448_v32, 1  ;;  %v4517_v17 = vadd.f32 %v4516_v23, %v4515_v34 }
 0x2c7   : > { %v4518_v44 = vrot.slane %v4517_v17, 1  ;;  %v4450_v43 = vadd.f32 %v4449_v35, %v4448_v32 }
 0x2c9   : > { %v4519_v9 = vadd.f32 %v4518_v44, %v4517_v17 }
 0x2cb   : > { %v4521_v6 = vsel %vm4520_vm2, %v4450_v43, %v4519_v9 }
 0x2cc   : > { %4522 = vst [vmem:[%s321_s18] sm:$0x3] %v4521_v6 }
 0x2cd PF: > { %s17_s23 = sadd.s32 1, %s6128_s23   ;;  %s8697_s21 = smov %s6124_s22 }
 0x2ce   : > { %p14_p5 = scmp.ge.s32.totalorder %s17_s23, 4   ;;  %s8698_s22 = smov %s8700_s24 }
 0x2d0   :  { %16 = sbr.rel (!%p14_p5) target bundleno = 2 (0x2), region = 99 }

// kernel: upblock_forward.5
= control target key start
LH: loop header
LB: loop body
LE: loop exit
PB: predicated region body
PF: predicated region fallthrough
CT: control target
= control target key end

     0   :  { %s11169_s21 = smov 0   ;;  %s11171_s22 = smov 0   ;;  %s15167_s0 = inlined_call_operand.vmem [shape: bf16[2,16,16,128], index: 0, kind: input, shape index: {}]   ;;  %s15168_s1 = inlined_call_operand.vmem [shape: bf16[2,16,16,128], index: 1, kind: input, shape index: {}]   ;;  %s15169_s2 = inlined_call_operand.vmem [shape: bf16[9,128,128], index: 2, kind: input, shape index: {}]   ;;  %s15170_s3 = inlined_call_operand.vmem [shape: bf16[9,128,128], index: 3, kind: input, shape index: {}]   ;;  %s15171_s4 = inlined_call_operand.vmem [shape: f32[1,128], index: 4, kind: input, shape index: {}]   ;;  %s15172_s5 = inlined_call_operand.vmem [shape: bf16[2,16,16,128], index: 5, kind: output, shape index: {0}]   ;;  %s15173_s6 = inlined_call_operand.vmem [shape: f32[2,2,128], index: 6, kind: output, shape index: {1}]  }
   0x1   :  { %s11173_s23 = smov 0  }
   0x2 LB: > { %s29_s24 = sadd.s32 1, %s11126_s22  ;;  %p8440_p0 = scmp.ge.s32.totalorder %s11130_s23, 1  ;;  %s11130_s23 = sphi %s11173_s23, %s17_s23   ;;  %s11126_s22 = sphi %s11171_s22, %s16354_s22   ;;  %s11122_s21 = sphi %s11169_s21, %s16353_s21  }
   0x3   : > { %p31_p1 = scmp.ge.s32.totalorder %s29_s24, 2  ;;  %p267_p2 = scmp.lt.s32.totalorder %s11130_s23, 3 }
   0x5   : > { %s16356_s24 = smov (%p31_p1, %s29_s24), 0  ;;  %p268_p3 = pnand %p8440_p0, %p267_p2 }
   0x7   : > { %271 = sbr.rel (%p268_p3) target bundleno = 1149 (0x47d), region = 40 }
   0xe   : > { %v10925_v0 = vld [vmem:[%s15169_s2 + $0x40] sm:$0xff]   ;;  %v15174_v2 = vmov 0.0|0.0   ;;  %v10927_v3 = vld [vmem:[%s15169_s2 + $0x48] sm:$0xff]   ;;  %v15176_v4 = vmov 0.0   ;;  %p323_p4 = scmp.lt.s32.totalorder %s11122_s21, 1  ;;  %v10929_v7 = vld [vmem:[%s15169_s2 + $0x50] sm:$0xff]   ;;  %v576_v15 = vlaneseq }
   0xf   : > { %v10926_v1 = vld [vmem:[%s15169_s2] sm:$0xff]   ;;  %9763 = vmatprep.mubr.bf16.mxu0 %v15174_v2  ;;  %9747 = vmatprep.subr.bf16.mxu0 %v10925_v0  ;;  %v11198_v5 = vrot.slane %v15176_v4, 7  ;;  %v10928_v6 = vld [vmem:[%s15169_s2 + $0x8] sm:$0xff]   ;;  %v10930_v9 = vld [vmem:[%s15169_s2 + $0x10] sm:$0xff]   ;;  %vm8257_vm2 = vcmask 1040384  }
  0x10   : > { %9811 = vmatprep.subr.bf16.mxu1 %v10926_v1  ;;  %9748 = vmatpush3.bf16.msra.mxu0 %v10925_v0  ;;  %s16358_s21 = smov (!%p323_p4, %s11122_s21), 1  ;;  %v10931_v10 = vld [vmem:[%s15169_s2 + $0x58] sm:$0xff]   ;;  %v10933_v12 = vld [vmem:[%s15169_s2 + $0x60] sm:$0xff]   ;;  %v10935_v14 = vld [vmem:[%s15169_s2 + $0x68] sm:$0xff]   ;;  %v11249_v20 = vshrl.u32 %v576_v15, 7 }
  0x11   : > { %15567 = vst [vmem:[#allocation4_spill] sm:$0xff] %v11198_v5  ;;  %9812 = vmatpush3.bf16.msra.mxu1 %v10926_v1  ;;  %9749 = vmatprep.subr.bf16.mxu0 %v10927_v3  ;;  %v11208_v8 = vpack.c.bf16 %v11198_v5, %v11198_v5  ;;  %v10932_v11 = vld [vmem:[%s15169_s2 + $0x18] sm:$0xff]   ;;  %s11223_s17 = sshll.u32 %s16358_s21, 7  ;;  %v10934_v13 = vld [vmem:[%s15169_s2 + $0x20] sm:$0xff]   ;;  %v10936_v17 = vld [vmem:[%s15169_s2 + $0x28] sm:$0xff]  }
  0x12   : > { %9813 = vmatprep.subr.bf16.mxu1 %v10928_v6  ;;  %s11235_s28 = scalar_lea.vmem %s15167_s0, %s11223_s17  ;;  %v10937_v21 = vld [vmem:[%s15169_s2 + $0x70] sm:$0xff]   ;;  %vm578_vm0 = vcmp.lt.s32.totalorder %v11249_v20, 1  ;;  %v10939_v27 = vld [vmem:[%s15169_s2 + $0x78] sm:$0xff]   ;;  %v10941_v35 = vld [vmem:[%s15169_s2 + $0x80] sm:$0xff]   ;;  %vm1270_vm1 = vcmp.lt.s32.totalorder %v11249_v20, 7  ;;  %s12643_s11 = scalar_lea.vmem %s15168_s1, %s11223_s17 }
  0x13   : > { %15568 = vst [vmem:[#allocation5_spill] sm:$0xff] %v11208_v8  ;;  %9827 = vmatprep.mubr.bf16.mxu1 %v11208_v8  ;;  %v8919_v16 = vld [vmem:[%s11235_s28] sm:$0xff]   ;;  %v11247_v19 = vld [vmem:[%s11235_s28 + $0x8] sm:$0xff]   ;;  %v10938_v25 = vld [vmem:[%s15169_s2 + $0x30] sm:$0xff]   ;;  %s15077_s9 = scalar_lea.vmem %s15172_s5, %s11223_s17  ;;  %s8447_s17 = sshll.u32 %s16358_s21, 1 }
  0x14   : > { %9750 = vmatpush3.bf16.msra.mxu0 %v10927_v3  ;;  %v11244_v18 = vunpack.c.h.bf16 %v8919_v16  ;;  %v11254_v22 = vunpack.c.l.bf16 %v8919_v16  ;;  %v11258_v24 = vunpack.c.l.bf16 %v11247_v19  ;;  %v10940_v31 = vld [vmem:[%s15169_s2 + $0x38] sm:$0xff]   ;;  %v9127_v33 = vld [vmem:[%s11235_s28 + $0x10] sm:$0xff]   ;;  %v11294_v36 = vunpack.c.h.bf16 %v11247_v19  ;;  %v10942_v37 = vld [vmem:[%s15169_s2 + $0xc0] sm:$0xff]   ;;  %s358_s13 = scalar_lea.vmem %s15173_s6, %s8447_s17 }
  0x15   : > { %9814 = vmatpush3.bf16.msra.mxu1 %v10928_v6  ;;  %9751 = vmatprep.subr.bf16.mxu0 %v10929_v7  ;;  %v11299_v38 = vunpack.c.l.bf16 %v9127_v33  ;;  %v10943_v45 = vld [vmem:[%s15169_s2 + $0x88] sm:$0xff]   ;;  %v11322_v48 = vld [vmem:[%s11235_s28 + $0x18] sm:$0xff]   ;;  %v9129_v49 = vld [vmem:[%s11235_s28 + $0x20] sm:$0xff]   ;;  %v11329_v51 = vunpack.c.h.bf16 %v9127_v33 }
  0x16   : > { %9815 = vmatprep.subr.bf16.mxu1 %v10930_v9  ;;  %15569 = vst [vmem:[#allocation6_spill] sm:$0xff] %v11254_v22  ;;  %v532_v23 = vrot.slane %v11244_v18, 7  ;;  %15570 = vst [vmem:[#allocation7_spill] sm:$0xff] %v11258_v24  ;;  %v534_v26 = vrot.slane %v11258_v24, 7  ;;  %v531_v28 = vrot.slane %v11254_v22, 7  ;;  %v668_v39 = vpack.c.bf16 %v11254_v22, %v15176_v4  ;;  %v10944_v46 = vld [vmem:[%s15169_s2 + $0xc8] sm:$0xff]  }
  0x17   : > { %v669_v42 = vpack.c.bf16 %v15176_v4, %v11244_v18  ;;  %v535_v43 = vrot.slane %v11294_v36, 7  ;;  %v537_v47 = vrot.slane %v11299_v38, 7  ;;  %v10945_v52 = vld [vmem:[%s15169_s2 + $0x90] sm:$0xff]   ;;  %v11345_v55 = vunpack.c.l.bf16 %v11322_v48  ;;  %v10947_v60 = vld [vmem:[%s15169_s2 + $0x98] sm:$0xff]   ;;  %v11372_v0 = vld [vmem:[%s11235_s28 + $0x28] sm:$0xff]  }
  0x18   : > { %9752 = vmatpush3.bf16.msra.mxu0 %v10929_v7  ;;  %v11272_v29 = vsel %vm578_vm0, %v532_v23, %v11198_v5  ;;  %v11277_v30 = vsel %vm578_vm0, %v11198_v5, %v534_v26  ;;  %v11288_v34 = vsel %vm578_vm0, %v11198_v5, %v531_v28  ;;  %v11305_v40 = vsel %vm578_vm0, %v531_v28, %v532_v23  ;;  %v10946_v57 = vld [vmem:[%s15169_s2 + $0xd0] sm:$0xff]   ;;  %v10948_v1 = vld [vmem:[%s15169_s2 + $0xd8] sm:$0xff]   ;;  %v10949_v16 = vld [vmem:[%s15169_s2 + $0xa0] sm:$0xff]  }
  0x19   : > { %9816 = vmatpush3.bf16.msra.mxu1 %v10930_v9  ;;  %9753 = vmatprep.subr.bf16.mxu0 %v10931_v10  ;;  %15571 = vst [vmem:[#allocation8_spill] sm:$0xff] %v11272_v29  ;;  %15572 = vst [vmem:[#allocation9_spill] sm:$0xff] %v11277_v30  ;;  %v628_v41 = vpack.c.bf16 %v11288_v34, %v11198_v5  ;;  %v629_v44 = vpack.c.bf16 %v11272_v29, %v11305_v40  ;;  %v11348_v56 = vunpack.c.h.bf16 %v11322_v48  ;;  %v9131_v9 = vld [vmem:[%s11235_s28 + $0x30] sm:$0xff]  }
  0x1a   : > { %9817 = vmatprep.subr.bf16.mxu1 %v10932_v11  ;;  %15573 = vst [vmem:[#allocation10_spill] sm:$0xff] %v11288_v34  ;;  %15574 = vst [vmem:[#allocation11_spill] sm:$0xff] %v11305_v40  ;;  %v11327_v50 = vsel %vm578_vm0, %v534_v26, %v535_v43  ;;  %v11337_v53 = vsel %vm578_vm0, %v11198_v5, %v537_v47  ;;  %v11342_v54 = vsel %vm578_vm0, %v535_v43, %v11198_v5  ;;  %v10951_v43 = vld [vmem:[%s15169_s2 + $0xa8] sm:$0xff]  }
  0x1b   : > { %15575 = vst [vmem:[#allocation12_spill] sm:$0xff] %v11327_v50  ;;  %15576 = vst [vmem:[#allocation13_spill] sm:$0xff] %v11337_v53  ;;  %v11355_v58 = vpack.c.bf16 %v11327_v50, %v11277_v30  ;;  %v11359_v59 = vpack.c.bf16 %v11299_v38, %v15176_v4  ;;  %v11366_v61 = vpack.c.bf16 %v11337_v53, %v11342_v54  ;;  %v538_v62 = vrot.slane %v11329_v51, 7 }
  0x1c   : > { %9754 = vmatpush3.bf16.msra.mxu0 %v10931_v10  ;;  %15577 = vst [vmem:[#allocation14_spill] sm:$0xff] %v11342_v54  ;;  %15578 = vst [vmem:[#allocation15_spill] sm:$0xff] %v11345_v55  ;;  %v11369_v63 = vunpack.c.l.bf16 %v9129_v49  ;;  %v540_v3 = vrot.slane %v11345_v55, 7  ;;  %v541_v6 = vrot.slane %v11348_v56, 7  ;;  %v11379_v7 = vunpack.c.h.bf16 %v9129_v49  ;;  %v9137_v54 = vld [vmem:[%s11235_s28 + $0x60] sm:$0xff]  }
  0x1d   : > { %9818 = vmatpush3.bf16.msra.mxu1 %v10932_v11  ;;  %9755 = vmatprep.subr.bf16.mxu0 %v10933_v12  ;;  %15579 = vst [vmem:[#allocation16_spill] sm:$0xff] %v11348_v56  ;;  %15580 = vst [vmem:[#allocation17_spill] sm:$0xff] %v11355_v58  ;;  %v11384_v10 = vrot.slane %v15176_v4, 1  ;;  %v11418_v23 = vunpack.c.l.bf16 %v11372_v0  ;;  %v11425_v26 = vpack.c.bf16 %v15176_v4, %v11329_v51  ;;  %v11430_v28 = vunpack.c.l.bf16 %v9131_v9  ;;  %v10953_v11 = vld [vmem:[%s15169_s2 + $0xb0] sm:$0xff]  }
  0x1e   : > { %9819 = vmatprep.subr.bf16.mxu1 %v10934_v13  ;;  %15581 = vst [vmem:[#allocation18_spill] sm:$0xff] %v11359_v59  ;;  %15582 = vst [vmem:[#allocation19_spill] sm:$0xff] %v11366_v61  ;;  %v543_v15 = vrot.slane %v11369_v63, 7  ;;  %v11436_v33 = vunpack.c.h.bf16 %v9131_v9  ;;  %v11490_v9 = vpack.c.bf16 %v11369_v63, %v15176_v4  ;;  %v1231_v30 = vrot.slane %v11299_v38, 1 }
  0x1f   : > { %15587 = vst [vmem:[#allocation24_spill] sm:$0xff] %v11418_v23  ;;  %15588 = vst [vmem:[#allocation25_spill] sm:$0xff] %v11425_v26  ;;  %v11507_v2 = vpack.c.bf16 %v11430_v28, %v15176_v4  ;;  %v15619_v53 = vrot.slane %v11329_v51, 1 }
  0x20   : > { %9756 = vmatpush3.bf16.msra.mxu0 %v10933_v12  ;;  %v11390_v12 = vld [vmem:[%s11235_s28 + $0x38] sm:$0xff]   ;;  %15595 = vst [vmem:[#allocation32_spill] sm:$0xff] %v11490_v9 }
  0x21   : > { %9820 = vmatpush3.bf16.msra.mxu1 %v10934_v13  ;;  %9757 = vmatprep.subr.bf16.mxu0 %v10935_v14  ;;  %v11397_v13 = vsel %vm578_vm0, %v538_v62, %v11198_v5  ;;  %15598 = vst [vmem:[#allocation35_spill] sm:$0xff] %v11507_v2  ;;  %v11633_v38 = vsel %vm1270_vm1, %v1231_v30, %v15619_v53  ;;  %v1237_v53 = vrot.slane %v11369_v63, 1 }
  0x22   : > { %9821 = vmatprep.subr.bf16.mxu1 %v10936_v17  ;;  %15583 = vst [vmem:[#allocation20_spill] sm:$0xff] %v11397_v13  ;;  %15620 = vst [vmem:[#allocation53_spill] sm:$0xff] %v11633_v38 }
  0x24   : > { %9758 = vmatpush3.bf16.msra.mxu0 %v10935_v14  ;;  %v11401_v14 = vsel %vm578_vm0, %v537_v47, %v538_v62  ;;  %v10952_v47 = vld [vmem:[%s15169_s2 + $0xe8] sm:$0xff]   ;;  %v550_v62 = vrot.slane %v11436_v33, 7 }
  0x25   : > { %9822 = vmatpush3.bf16.msra.mxu1 %v10936_v17  ;;  %9759 = vmatprep.subr.bf16.mxu0 %v10937_v21  ;;  %15584 = vst [vmem:[#allocation21_spill] sm:$0xff] %v11401_v14  ;;  %v11409_v17 = vsel %vm578_vm0, %v540_v3, %v541_v6 }
  0x26   : > { %9823 = vmatprep.subr.bf16.mxu1 %v10938_v25  ;;  %15585 = vst [vmem:[#allocation22_spill] sm:$0xff] %v11409_v17 }
  0x28   : > { %9760 = vmatpush3.bf16.msra.mxu0 %v10937_v21  ;;  %v544_v21 = vrot.slane %v11379_v7, 7 }
  0x29   : > { %9824 = vmatpush3.bf16.msra.mxu1 %v10938_v25  ;;  %9761 = vmatprep.subr.bf16.mxu0 %v10939_v27  ;;  %v10950_v25 = vld [vmem:[%s15169_s2 + $0xe0] sm:$0xff]  }
  0x2a   : > { %9825 = vmatprep.subr.bf16.mxu1 %v10940_v31  ;;  %v11471_v49 = vsel %vm578_vm0, %v544_v21, %v11198_v5 }
  0x2c   : > { %9762 = vmatpush3.bf16.msra.mxu0 %v10939_v27  ;;  %v11428_v27 = vunpack.c.h.bf16 %v11372_v0 }
  0x2d   : > { %9826 = vmatpush3.bf16.msra.mxu1 %v10940_v31  ;;  %9875 = vmatprep.subr.bf16.mxu0 %v10941_v35  ;;  %v11434_v31 = vpack.c.bf16 %v11397_v13, %v11401_v14  ;;  %v1243_v14 = vrot.slane %v11430_v28, 1 }
  0x2e   : > { %9939 = vmatprep.subr.bf16.mxu1 %v10942_v37  ;;  %15589 = vst [vmem:[#allocation26_spill] sm:$0xff] %v11428_v27 }
  0x2f   : > { %9764 = vmatmul.mubr.bf16.vlgmr.msra.gmra.mrb[0].mxu0 %v668_v39  ;;  %15590 = vst [vmem:[#allocation27_spill] sm:$0xff] %v11434_v31 }
  0x30   : > { %9828 = vmatmul.mubr.bf16.vlgmr.msra.gmra.mrb[0].mxu1 %v628_v41  ;;  %9876 = vmatpush3.bf16.msra.mxu0 %v10941_v35  ;;  %v11439_v35 = vunpack.c.l.bf16 %v11390_v12 }
  0x31   : > { %9940 = vmatpush3.bf16.msra.mxu1 %v10942_v37  ;;  %9767 = vmatprep.mubr.bf16.mxu0 %v669_v42  ;;  %v11442_v37 = vunpack.c.h.bf16 %v11390_v12  ;;  %v9133_v42 = vld [vmem:[%s11235_s28 + $0x40] sm:$0xff]  }
  0x32   : > { %9831 = vmatprep.mubr.bf16.mxu1 %v629_v44  ;;  %9877 = vmatprep.subr.bf16.mxu0 %v10943_v45  ;;  %15591 = vst [vmem:[#allocation28_spill] sm:$0xff] %v11439_v35  ;;  %v11456_v44 = vsel %vm578_vm0, %v11198_v5, %v543_v15  ;;  %v11509_v32 = vunpack.c.l.bf16 %v9133_v42 }
  0x33   : > { %9941 = vmatprep.subr.bf16.mxu1 %v10944_v46  ;;  %15592 = vst [vmem:[#allocation29_spill] sm:$0xff] %v11442_v37  ;;  %15594 = vst [vmem:[#allocation31_spill] sm:$0xff] %v11456_v44 }
  0x34   : > { %9878 = vmatpush3.bf16.msra.mxu0 %v10943_v45  ;;  %v11461_v45 = vsel %vm578_vm0, %v541_v6, %v11198_v5  ;;  %v11485_v6 = vld [vmem:[%s11235_s28 + $0x48] sm:$0xff]  }
  0x35   : > { %9942 = vmatpush3.bf16.msra.mxu1 %v10944_v46  ;;  %9879 = vmatprep.subr.bf16.mxu0 %v10945_v52  ;;  %v546_v46 = vrot.slane %v11418_v23, 7  ;;  %v11619_v34 = vunpack.c.h.bf16 %v11485_v6  ;;  %v11676_v23 = vsel %vm1270_vm1, %v11384_v10, %v1237_v53 }
  0x36   : > { %9943 = vmatprep.subr.bf16.mxu1 %v10946_v57  ;;  %15626 = vst [vmem:[#allocation59_spill] sm:$0xff] %v11676_v23 }
  0x37   : > { %9768 = vmatmul.mubr.bf16.gmra.mrb[4].mxu0 %v11247_v19  ;;  %v11414_v19 = vsel %vm578_vm0, %v11198_v5, %v540_v3  ;;  %v553_v3 = vrot.slane %v11442_v37, 7  ;;  %v10956_v37 = vld [vmem:[%s15169_s2 + $0xf8] sm:$0xff]   ;;  %15618 = vst [vmem:[#allocation52_spill] sm:$0xff] %v11619_v34  ;;  %v559_v24 = vrot.slane %v11619_v34, 7 }
  0x38   : > { %9832 = vmatmul.mubr.bf16.gmra.mrb[4].mxu1 %v11355_v58  ;;  %9771 = vmatprep.mubr.bf16.mxu0 %v11359_v59  ;;  %15586 = vst [vmem:[#allocation23_spill] sm:$0xff] %v11414_v19  ;;  %v11447_v41 = vpack.c.bf16 %v11409_v17, %v11414_v19  ;;  %v15606_v59 = vrot.slane %v11244_v18, 1  ;;  %v11696_v17 = vunpack.c.h.bf16 %v9137_v54 }
  0x39   : > { %9835 = vmatprep.mubr.bf16.mxu1 %v11366_v61  ;;  %9880 = vmatpush3.bf16.msra.mxu0 %v10945_v52  ;;  %v547_v52 = vrot.slane %v11428_v27, 7  ;;  %v15607_v61 = vrot.slane %v11254_v22, 1  ;;  %v11668_v22 = vld [vmem:[%s11235_s28 + $0x68] sm:$0xff]  }
  0x3a   : > { %9944 = vmatpush3.bf16.msra.mxu1 %v10946_v57  ;;  %9881 = vmatprep.subr.bf16.mxu0 %v10947_v60  ;;  %15593 = vst [vmem:[#allocation30_spill] sm:$0xff] %v11447_v41  ;;  %v549_v57 = vrot.slane %v11430_v28, 7  ;;  %v9139_v28 = vld [vmem:[%s11235_s28 + $0x70] sm:$0xff]  }
  0x3b   : > { %9945 = vmatprep.subr.bf16.mxu1 %v10948_v1  ;;  %v11532_v8 = vsel %vm578_vm0, %v547_v52, %v11198_v5  ;;  %v11558_v58 = vsel %vm1270_vm1, %v15607_v61, %v15606_v59 }
  0x3c   : > { %15602 = vst [vmem:[#allocation39_spill] sm:$0xff] %v11532_v8 }
  0x3d   : > { %9882 = vmatpush3.bf16.msra.mxu0 %v10947_v60  ;;  %v11479_v60 = vsel %vm578_vm0, %v543_v15, %v544_v21  ;;  %v11498_v15 = vpack.c.bf16 %v15176_v4, %v11379_v7  ;;  %v11503_v21 = vsel %vm578_vm0, %v11198_v5, %v546_v46  ;;  %v11522_v4 = vsel %vm578_vm0, %v546_v46, %v547_v52  ;;  %v10955_v52 = vld [vmem:[%s15169_s2 + $0xb8] sm:$0xff]  }
  0x3e   : > { %9946 = vmatpush3.bf16.msra.mxu1 %v10948_v1  ;;  %9883 = vmatprep.subr.bf16.mxu0 %v10949_v16  ;;  %v552_v1 = vrot.slane %v11439_v35, 7  ;;  %v11518_v39 = vpack.c.bf16 %v11471_v49, %v11479_v60  ;;  %15600 = vst [vmem:[#allocation37_spill] sm:$0xff] %v11522_v4  ;;  %v11540_v46 = vsel %vm578_vm0, %v550_v62, %v11198_v5 }
  0x3f   : > { %9772 = vmatmul.mubr.bf16.gmra.mrb[8].mxu0 %v11425_v26  ;;  %9947 = vmatprep.subr.bf16.mxu1 %v10950_v25  ;;  %15597 = vst [vmem:[#allocation34_spill] sm:$0xff] %v11498_v15  ;;  %15603 = vst [vmem:[#allocation40_spill] sm:$0xff] %v11540_v46  ;;  %v11546_v26 = vunpack.c.h.bf16 %v9133_v42  ;;  %v11579_v59 = vpack.c.bf16 %v11522_v4, %v11503_v21 }
  0x40   : > { %9836 = vmatmul.mubr.bf16.gmra.mrb[8].mxu1 %v11434_v31  ;;  %9775 = vmatprep.mubr.bf16.mxu0 %v11322_v48  ;;  %v11494_v48 = vpack.c.bf16 %v11456_v44, %v11461_v45  ;;  %15599 = vst [vmem:[#allocation36_spill] sm:$0xff] %v11518_v39  ;;  %v9135_v31 = vld [vmem:[%s11235_s28 + $0x50] sm:$0xff]   ;;  %v11562_v35 = vsel %vm578_vm0, %v552_v1, %v553_v3  ;;  %v15627_v44 = vrot.slane %v11379_v7, 1 }
  0x41   : > { %9839 = vmatprep.mubr.bf16.mxu1 %v11447_v41  ;;  %9884 = vmatpush3.bf16.msra.mxu0 %v10949_v16  ;;  %v10954_v16 = vld [vmem:[%s15169_s2 + $0xf0] sm:$0xff]   ;;  %v11544_v41 = vsel %vm578_vm0, %v549_v57, %v550_v62  ;;  %15605 = vst [vmem:[#allocation42_spill] sm:$0xff] %v11546_v26  ;;  %15608 = vst [vmem:[#allocation43_spill] sm:$0xff] %v11562_v35  ;;  %v11567_v42 = vsel %vm578_vm0, %v11198_v5, %v552_v1  ;;  %v11573_v62 = vld [vmem:[%s11235_s28 + $0x58] sm:$0xff]   ;;  %v15613_v1 = vmov 0.0   ;;  %v556_v40 = vrot.slane %v11546_v26, 7 }
  0x42   : > { %15596 = vst [vmem:[#allocation33_spill] sm:$0xff] %v11494_v48  ;;  %9948 = vmatpush3.bf16.msra.mxu1 %v10950_v25  ;;  %9885 = vmatprep.subr.bf16.mxu0 %v10951_v43  ;;  %v11527_v25 = vsel %vm578_vm0, %v11198_v5, %v549_v57  ;;  %15604 = vst [vmem:[#allocation41_spill] sm:$0xff] %v11544_v41  ;;  %v11570_v57 = vunpack.c.l.bf16 %v11485_v6  ;;  %v11587_v29 = vpack.c.bf16 %v15613_v1, %v11436_v33 }
  0x43   : > { %15601 = vst [vmem:[#allocation38_spill] sm:$0xff] %v11527_v25  ;;  %9949 = vmatprep.subr.bf16.mxu1 %v10952_v47  ;;  %15609 = vst [vmem:[#allocation44_spill] sm:$0xff] %v11567_v42  ;;  %v11583_v61 = vpack.c.bf16 %v11527_v25, %v11532_v8  ;;  %v11596_v50 = vpack.c.bf16 %v11540_v46, %v11544_v41  ;;  %v11638_v13 = vunpack.c.l.bf16 %v11573_v62  ;;  %v11774_v25 = vunpack.c.l.bf16 %v9139_v28 }
  0x44   : > { %15610 = vst [vmem:[#allocation45_spill] sm:$0xff] %v11570_v57  ;;  %15611 = vst [vmem:[#allocation46_spill] sm:$0xff] %v11579_v59  ;;  %v11691_v34 = vsel %vm1270_vm1, %v1237_v53, %v15627_v44  ;;  %v15638_v41 = vrot.slane %v11546_v26, 1 }
  0x45   : > { %9886 = vmatpush3.bf16.msra.mxu0 %v10951_v43  ;;  %15612 = vst [vmem:[#allocation47_spill] sm:$0xff] %v11583_v61  ;;  %15614 = vst [vmem:[#allocation48_spill] sm:$0xff] %v11587_v29  ;;  %v555_v43 = vrot.slane %v11509_v32, 7  ;;  %v564_v27 = vrot.slane %v11638_v13, 7 }
  0x46   : > { %9950 = vmatpush3.bf16.msra.mxu1 %v10952_v47  ;;  %9887 = vmatprep.subr.bf16.mxu0 %v10953_v11  ;;  %15615 = vst [vmem:[#allocation49_spill] sm:$0xff] %v11596_v50  ;;  %v11606_v47 = vpack.c.bf16 %v11562_v35, %v11567_v42  ;;  %15621 = vst [vmem:[#allocation54_spill] sm:$0xff] %v11638_v13  ;;  %v15223_v13 = vrot.slane %v11436_v33, 1  ;;  %v11761_v42 = vunpack.c.h.bf16 %v11668_v22 }
  0x47   : > { %9776 = vmatmul.mubr.bf16.gmra.mrb[12].mxu0 %v11490_v9  ;;  %9951 = vmatprep.subr.bf16.mxu1 %v10954_v16  ;;  %v11611_v9 = vsel %vm578_vm0, %v553_v3, %v11198_v5  ;;  %v11627_v3 = vld [vmem:[%s15169_s2 + $0x100] sm:$0xff]   ;;  %15628 = vst [vmem:[#allocation60_spill] sm:$0xff] %v11691_v34  ;;  %v11803_v4 = vsel %vm578_vm0, %v11198_v5, %v564_v27 }
  0x48   : > { %9840 = vmatmul.mubr.bf16.gmra.mrb[12].mxu1 %v11494_v48  ;;  %9779 = vmatprep.mubr.bf16.mxu0 %v11498_v15  ;;  %15616 = vst [vmem:[#allocation50_spill] sm:$0xff] %v11606_v47  ;;  %15617 = vst [vmem:[#allocation51_spill] sm:$0xff] %v11611_v9  ;;  %v558_v15 = vrot.slane %v11570_v57, 7  ;;  %v11622_v48 = vunpack.c.l.bf16 %v9135_v31  ;;  %v11648_v57 = vsel %vm1270_vm1, %v11384_v10, %v1231_v30  ;;  %v11665_v30 = vunpack.c.l.bf16 %v9137_v54 }
  0x49   : > { %9843 = vmatprep.mubr.bf16.mxu1 %v11518_v39  ;;  %9888 = vmatpush3.bf16.msra.mxu0 %v10953_v11  ;;  %v11635_v39 = vunpack.c.h.bf16 %v9135_v31  ;;  %v11643_v11 = vld [vmem:[%s15169_s2 + $0x140] sm:$0xff]   ;;  %15622 = vst [vmem:[#allocation55_spill] sm:$0xff] %v11648_v57  ;;  %v11654_v31 = vsel %vm578_vm0, %v11198_v5, %v555_v43  ;;  %v11661_v19 = vpack.c.bf16 %v11633_v38, %v11648_v57  ;;  %15636 = vst [vmem:[#allocation68_spill] sm:$0xff] %v11761_v42 }
  0x4a   : > { %9952 = vmatpush3.bf16.msra.mxu1 %v10954_v16  ;;  %9889 = vmatprep.subr.bf16.mxu0 %v10955_v52  ;;  %15623 = vst [vmem:[#allocation56_spill] sm:$0xff] %v11654_v31  ;;  %v11657_v16 = vunpack.c.h.bf16 %v11573_v62  ;;  %v11714_v54 = vsel %vm578_vm0, %v555_v43, %v556_v40  ;;  %v567_v53 = vrot.slane %v11665_v30, 7  ;;  %v11754_v43 = vsel %vm578_vm0, %v559_v24, %v11198_v5 }
  0x4b   : > { %9953 = vmatprep.subr.bf16.mxu1 %v10956_v37  ;;  %15625 = vst [vmem:[#allocation58_spill] sm:$0xff] %v11661_v19  ;;  %v561_v19 = vrot.slane %v11622_v48, 7  ;;  %v562_v63 = vrot.slane %v11635_v39, 7  ;;  %15631 = vst [vmem:[#allocation63_spill] sm:$0xff] %v11714_v54 }
  0x4c   : > { %15624 = vst [vmem:[#allocation57_spill] sm:$0xff] %v11657_v16  ;;  %v565_v44 = vrot.slane %v11657_v16, 7  ;;  %v568_v16 = vrot.slane %v11696_v17, 7 }
  0x4d   : > { %9890 = vmatpush3.bf16.msra.mxu0 %v10955_v52  ;;  %v11721_v52 = vunpack.c.l.bf16 %v11668_v22 }
  0x4e   : > { %9954 = vmatpush3.bf16.msra.mxu1 %v10956_v37  ;;  %10003 = vmatprep.subr.bf16.mxu0 %v11627_v3  ;;  %v11701_v37 = vpack.c.bf16 %v11691_v34, %v11676_v23  ;;  %v11789_v35 = vsel %vm578_vm0, %v564_v27, %v565_v44  ;;  %v571_v27 = vrot.slane %v11761_v42, 7  ;;  %v11835_v42 = vpack.c.bf16 %v11509_v32, %v15613_v1 }
  0x4f   : > { %9780 = vmatmul.mubr.bf16.gmra.mrb[16].mxu0 %v11372_v0  ;;  %10067 = vmatprep.subr.bf16.mxu1 %v11643_v11  ;;  %v11710_v0 = vsel %vm578_vm0, %v556_v40, %v11198_v5  ;;  %15632 = vst [vmem:[#allocation64_spill] sm:$0xff] %v11721_v52  ;;  %v11732_v40 = vsel %vm1270_vm1, %v11384_v10, %v1243_v14  ;;  %v570_v46 = vrot.slane %v11721_v52, 7  ;;  %v15639_v52 = vrot.slane %v11509_v32, 1 }
  0x50   : > { %15629 = vst [vmem:[#allocation61_spill] sm:$0xff] %v11701_v37  ;;  %9844 = vmatmul.mubr.bf16.gmra.mrb[16].mxu1 %v11579_v59  ;;  %9783 = vmatprep.mubr.bf16.mxu0 %v11507_v2  ;;  %15630 = vst [vmem:[#allocation62_spill] sm:$0xff] %v11710_v0  ;;  %v11727_v2 = vsel %vm1270_vm1, %v1243_v14, %v15223_v13  ;;  %v11743_v59 = vsel %vm578_vm0, %v11198_v5, %v558_v15 }
  0x51   : > { %9847 = vmatprep.mubr.bf16.mxu1 %v11583_v61  ;;  %15633 = vst [vmem:[#allocation65_spill] sm:$0xff] %v11727_v2  ;;  %15634 = vst [vmem:[#allocation66_spill] sm:$0xff] %v11732_v40  ;;  %v11738_v61 = vsel %vm578_vm0, %v558_v15, %v559_v24  ;;  %v11747_v13 = vpack.c.bf16 %v11727_v2, %v11732_v40  ;;  %v11771_v24 = vsel %vm578_vm0, %v11198_v5, %v561_v19  ;;  %v15684_v40 = vld [vmem:[#allocation14_spill] sm:$0xff] }
  0x52   : > { %v11776_v15 = vunpack.c.h.bf16 %v9139_v28  ;;  %v11785_v14 = vsel %vm578_vm0, %v561_v19, %v562_v63  ;;  %v11797_v28 = vsel %vm1270_vm1, %v15639_v52, %v15638_v41  ;;  %v11808_v19 = vsel %vm578_vm0, %v11198_v5, %v567_v53  ;;  %15641 = vst [vmem:[#allocation71_spill] sm:$0xff] %v11835_v42 }
  0x53   : > { %15635 = vst [vmem:[#allocation67_spill] sm:$0xff] %v11747_v13  ;;  %v11781_v13 = vsel %vm578_vm0, %v562_v63, %v11198_v5  ;;  %15640 = vst [vmem:[#allocation70_spill] sm:$0xff] %v11797_v28  ;;  %v11813_v63 = vsel %vm578_vm0, %v565_v44, %v11198_v5  ;;  %v11817_v41 = vsel %vm578_vm0, %v567_v53, %v568_v16  ;;  %v15242_v28 = vrot.slane %v11635_v39, 1 }
  0x54   : > { %15637 = vst [vmem:[#allocation69_spill] sm:$0xff] %v11776_v15  ;;  %v573_v44 = vrot.slane %v11774_v25, 7  ;;  %v11839_v52 = vpack.c.bf16 %v15613_v1, %v11546_v26  ;;  %v11862_v26 = vsel %vm578_vm0, %v568_v16, %v11198_v5 }
  0x56   : > { %15642 = vst [vmem:[#allocation72_spill] sm:$0xff] %v11839_v52  ;;  %v11883_v16 = vsel %vm578_vm0, %v11198_v5, %v573_v44 }
  0x57   : > { %9784 = vmatmul.mubr.bf16.gmra.mrb[20].mxu0 %v11587_v29  ;;  %v15243_v29 = vrot.slane %v11622_v48, 1 }
  0x58   : > { %9848 = vmatmul.mubr.bf16.gmra.mrb[20].mxu1 %v11596_v50  ;;  %9787 = vmatprep.mubr.bf16.mxu0 %v11390_v12  ;;  %v11853_v12 = vpack.c.bf16 %v11654_v31, %v11611_v9  ;;  %v11871_v50 = vsel %vm578_vm0, %v570_v46, %v571_v27  ;;  %v15646_v31 = vrot.slane %v11776_v15, 7 }
  0x59   : > { %9851 = vmatprep.mubr.bf16.mxu1 %v11606_v47  ;;  %v11847_v53 = vsel %vm1270_vm1, %v15243_v29, %v15242_v28  ;;  %v11857_v47 = vpack.c.bf16 %v11710_v0, %v11714_v54  ;;  %v11867_v28 = vsel %vm578_vm0, %v11198_v5, %v570_v46  ;;  %v11876_v29 = vsel %vm578_vm0, %v571_v27, %v11198_v5 }
  0x5a   : > { %15643 = vst [vmem:[#allocation73_spill] sm:$0xff] %v11847_v53  ;;  %15644 = vst [vmem:[#allocation74_spill] sm:$0xff] %v11853_v12  ;;  %v15251_v53 = vrot.slane %v11665_v30, 1  ;;  %v15250_v0 = vrot.slane %v11696_v17, 1  ;;  %v11889_v46 = vsel %vm578_vm0, %v573_v44, %v15646_v31  ;;  %v15253_v31 = vrot.slane %v11774_v25, 1 }
  0x5b   : > { %15645 = vst [vmem:[#allocation75_spill] sm:$0xff] %v11857_v47  ;;  %v15252_v44 = vrot.slane %v11776_v15, 1  ;;  %v11922_v54 = vpack.c.bf16 %v11738_v61, %v11743_v59  ;;  %v12017_v57 = vpack.c.bf16 %v11871_v50, %v11867_v28 }
  0x5c   : > { %v11901_v9 = vsel %vm1270_vm1, %v15251_v53, %v15250_v0  ;;  %v11926_v0 = vpack.c.bf16 %v11622_v48, %v15613_v1  ;;  %v11930_v53 = vpack.c.bf16 %v11771_v24, %v11754_v43 }
  0x5d   : > { %v11917_v27 = vsel %vm1270_vm1, %v15253_v31, %v15252_v44  ;;  %15647 = vst [vmem:[#allocation76_spill] sm:$0xff] %v11922_v54  ;;  %v15650_v44 = vrot.slane %v11244_v18, 1  ;;  %v11951_v18 = vpack.c.bf16 %v11781_v13, %v11785_v14  ;;  %15663 = vst [vmem:[#allocation86_spill] sm:$0xff] %v12017_v57 }
  0x5e   : > { %15648 = vst [vmem:[#allocation77_spill] sm:$0xff] %v11926_v0  ;;  %15649 = vst [vmem:[#allocation78_spill] sm:$0xff] %v11930_v53 }
  0x5f   : > { %9788 = vmatmul.mubr.bf16.gmra.mrb[24].mxu0 %v11835_v42  ;;  %v11938_v31 = vsel %vm1270_vm1, %v15650_v44, %v11384_v10  ;;  %15652 = vst [vmem:[#allocation80_spill] sm:$0xff] %v11951_v18  ;;  %v15654_v44 = vrot.slane %v11294_v36, 1 }
  0x60   : > { %9852 = vmatmul.mubr.bf16.gmra.mrb[24].mxu1 %v11853_v12  ;;  %9791 = vmatprep.mubr.bf16.mxu0 %v11839_v52  ;;  %v11947_v52 = vpack.c.bf16 %v15613_v1, %v11635_v39 }
  0x61   : > { %9855 = vmatprep.mubr.bf16.mxu1 %v11857_v47  ;;  %v11965_v8 = vsel %vm1270_vm1, %v15654_v44, %v11384_v10  ;;  %v11982_v44 = vpack.c.bf16 %v15613_v1, %v11696_v17  ;;  %v15662_v47 = vld [vmem:[#allocation26_spill] sm:$0xff] }
  0x62   : > { %15651 = vst [vmem:[#allocation79_spill] sm:$0xff] %v11947_v52  ;;  %v1241_v38 = vrot.slane %v15662_v47, 1 }
  0x63   : > { %15657 = vst [vmem:[#allocation84_spill] sm:$0xff] %v11982_v44 }
  0x67   : > { %9792 = vmatmul.mubr.bf16.gmra.mrb[28].mxu0 %v11485_v6  ;;  %v11955_v6 = vpack.c.bf16 %v11789_v35, %v11803_v4 }
  0x68   : > { %9856 = vmatmul.mubr.bf16.gmra.mrb[28].mxu1 %v11922_v54  ;;  %9795 = vmatprep.mubr.bf16.mxu0 %v11926_v0  ;;  %v1234_v0 = vrot.slane %v11345_v55, 1  ;;  %v11986_v54 = vpack.c.bf16 %v11862_v26, %v11817_v41 }
  0x69   : > { %9859 = vmatprep.mubr.bf16.mxu1 %v11930_v53  ;;  %15653 = vst [vmem:[#allocation81_spill] sm:$0xff] %v11955_v6  ;;  %v1235_v53 = vrot.slane %v11348_v56, 1  ;;  %v15661_v56 = vld [vmem:[#allocation24_spill] sm:$0xff] }
  0x6a   : > { %15658 = vst [vmem:[#allocation85_spill] sm:$0xff] %v11986_v54  ;;  %v12001_v42 = vsel %vm1270_vm1, %v11384_v10, %v1234_v0  ;;  %v1240_v55 = vrot.slane %v15661_v56, 1 }
  0x6b   : > { %v12005_v12 = vsel %vm1270_vm1, %v1234_v0, %v1235_v53  ;;  %v12021_v0 = vpack.c.bf16 %v11774_v25, %v15613_v1 }
  0x6d   : > { %15664 = vst [vmem:[#allocation87_spill] sm:$0xff] %v12021_v0 }
  0x6f   : > { %9796 = vmatmul.mubr.bf16.gmra.mrb[32].mxu0 %v11947_v52 }
  0x70   : > { %9860 = vmatmul.mubr.bf16.gmra.mrb[32].mxu1 %v11951_v18  ;;  %9799 = vmatprep.mubr.bf16.mxu0 %v11573_v62  ;;  %v11974_v18 = vpack.c.bf16 %v11665_v30, %v15613_v1  ;;  %v11978_v62 = vpack.c.bf16 %v11808_v19, %v11813_v63 }
  0x71   : > { %9863 = vmatprep.mubr.bf16.mxu1 %v11955_v6  ;;  %v15659_v6 = vrot.slane %v11329_v51, 1  ;;  %v15660_v51 = vld [vmem:[#allocation7_spill] sm:$0xff] }
  0x72   : > { %15655 = vst [vmem:[#allocation82_spill] sm:$0xff] %v11974_v18  ;;  %15656 = vst [vmem:[#allocation83_spill] sm:$0xff] %v11978_v62 }
  0x73   : > { %v11993_v52 = vsel %vm1270_vm1, %v15659_v6, %v11384_v10  ;;  %v1228_v6 = vrot.slane %v15660_v51, 1 }
  0x75   : > { %v12093_v23 = vsel %vm1270_vm1, %v11384_v10, %v1228_v6 }
  0x77   : > { %9800 = vmatmul.mubr.bf16.gmra.mrb[36].mxu0 %v11974_v18  ;;  %v12055_v18 = vpack.c.bf16 %v11384_v10, %v11384_v10 }
  0x78   : > { %9864 = vmatmul.mubr.bf16.gmra.mrb[36].mxu1 %v11978_v62  ;;  %9803 = vmatprep.mubr.bf16.mxu0 %v11982_v44  ;;  %v12025_v44 = vpack.c.bf16 %v11883_v16, %v11876_v29  ;;  %v12030_v62 = vsel %vm1270_vm1, %v1235_v53, %v11384_v10  ;;  %v12047_v53 = vpack.c.bf16 %v15613_v1, %v11776_v15  ;;  %v15675_v1 = vld [vmem:[#allocation10_spill] sm:$0xff] }
  0x79   : > { %9867 = vmatprep.mubr.bf16.mxu1 %v11986_v54  ;;  %v15666_v54 = vrot.slane %v11776_v15, 7  ;;  %15669 = vst [vmem:[#allocation91_spill] sm:$0xff] %v12055_v18 }
  0x7a   : > { %15665 = vst [vmem:[#allocation88_spill] sm:$0xff] %v12025_v44  ;;  %15667 = vst [vmem:[#allocation89_spill] sm:$0xff] %v12047_v53 }
  0x7b   : > { %v12043_v47 = vsel %vm578_vm0, %v15666_v54, %v11198_v5  ;;  %v12067_v54 = vsel %vm1270_vm1, %v11384_v10, %v1240_v55 }
  0x7f   : > { %9804 = vmatmul.mubr.bf16.gmra.mrb[40].mxu0 %v11668_v22  ;;  %v12051_v22 = vpack.c.bf16 %v12043_v47, %v11889_v46 }
  0x80   : > { %9868 = vmatmul.mubr.bf16.gmra.mrb[40].mxu1 %v12017_v57  ;;  %9807 = vmatprep.mubr.bf16.mxu0 %v12021_v0  ;;  %v15670_v0 = vrot.slane %v11379_v7, 1  ;;  %v12071_v57 = vsel %vm1270_vm1, %v1240_v55, %v1241_v38  ;;  %v15671_v7 = vld [vmem:[#allocation6_spill] sm:$0xff]  ;;  %v15674_v55 = vld [vmem:[#allocation11_spill] sm:$0xff] }
  0x81   : > { %9871 = vmatprep.mubr.bf16.mxu1 %v12025_v44  ;;  %15668 = vst [vmem:[#allocation90_spill] sm:$0xff] %v12051_v22  ;;  %v15676_v15 = vpack.c.bf16 %v15674_v55, %v15675_v1  ;;  %15677 = vst [vmem:[#allocation11_spill] sm:$0xff] %v12093_v23  ;;  %v15678_v1 = vrot.slane %v11436_v33, 1  ;;  %v15679_v33 = vld [vmem:[#allocation9_spill] sm:$0xff] }
  0x82   : > { %v12062_v44 = vsel %vm1270_vm1, %v15670_v0, %v11384_v10  ;;  %v15672_v0 = vrot.slane %v15671_v7, 1  ;;  %v12100_v7 = vsel %vm1270_vm1, %v1241_v38, %v11384_v10  ;;  %v15683_v38 = vld [vmem:[#allocation29_spill] sm:$0xff] }
  0x83   : > { %v15285_v2 = vrot.slane %v15683_v38, 1 }
  0x84   : > { %v12085_v51 = vsel %vm1270_vm1, %v11384_v10, %v15672_v0  ;;  %v1321_v0 = vpack.c.bf16 %v12093_v23, %v11938_v31 }
  0x85   : > { %15673 = vst [vmem:[#allocation6_spill] sm:$0xff] %v12085_v51  ;;  %v1320_v56 = vpack.c.bf16 %v11558_v58, %v12085_v51 }
  0x87   : > { %9808 = vmatmul.mubr.bf16.gmra.mrb[44].mxu0 %v12047_v53  ;;  %v10960_v53 = vld [vmem:[%s15169_s2 + $0x148] sm:$0xff]  }
  0x88   : > { %9872 = vmatmul.mubr.bf16.gmra.mrb[44].mxu1 %v12051_v22  ;;  %9891 = vmatprep.mubr.bf16.mxu0 %v12055_v18  ;;  %v10959_v18 = vld [vmem:[%s15169_s2 + $0x108] sm:$0xff]   ;;  %v15680_v22 = vld [vmem:[#allocation8_spill] sm:$0xff] }
  0x89   : > { %9955 = vmatprep.mubr.bf16.mxu1 %v15676_v15  ;;  %v12109_v15 = vsel %vm1270_vm1, %v15678_v1, %v11384_v10  ;;  %v15681_v51 = vpack.c.bf16 %v15679_v33, %v15680_v22  ;;  %v15682_v1 = vrot.slane %v11294_v36, 1  ;;  %v15685_v22 = vld [vmem:[#allocation12_spill] sm:$0xff]  ;;  %v10964_v33 = vld [vmem:[%s15169_s2 + $0x158] sm:$0xff]  }
  0x8b   : > { %v12129_v55 = vsel %vm1270_vm1, %v1228_v6, %v15682_v1  ;;  %v15690_v1 = vld [vmem:[#allocation13_spill] sm:$0xff] }
  0x8c   : > { %v12144_v6 = vpack.c.bf16 %v11965_v8, %v12129_v55 }
  0x8e   : > { %15687 = vst [vmem:[#allocation10_spill] sm:$0xff] %v12144_v6 }
  0x8f   : > { %9892 = vmatmul.mubr.bf16.vlgmr.msra.gmra.mrb[48].mxu0 %v1320_v56  ;;  %v10961_v56 = vld [vmem:[%s15169_s2 + $0x110] sm:$0xff]  }
  0x90   : > { %9956 = vmatmul.mubr.bf16.vlgmr.msra.gmra.mrb[48].mxu1 %v15681_v51  ;;  %10004 = vmatpush3.bf16.msra.mxu0 %v11627_v3  ;;  %v15686_v51 = vpack.c.bf16 %v15684_v40, %v15685_v22  ;;  %v10962_v3 = vld [vmem:[%s15169_s2 + $0x150] sm:$0xff]   ;;  %v15688_v40 = vrot.slane %v11509_v32, 1  ;;  %v15689_v32 = vld [vmem:[#allocation21_spill] sm:$0xff] }
  0x91   : > { %10068 = vmatpush3.bf16.msra.mxu1 %v11643_v11  ;;  %9895 = vmatprep.mubr.bf16.mxu0 %v1321_v0  ;;  %v12151_v11 = vsel %vm1270_vm1, %v15285_v2, %v11384_v10  ;;  %v15691_v22 = vpack.c.bf16 %v15689_v32, %v15690_v1  ;;  %v15694_v2 = vld [vmem:[#allocation20_spill] sm:$0xff] }
  0x92   : > { %9959 = vmatprep.mubr.bf16.mxu1 %v15686_v51  ;;  %10005 = vmatprep.subr.bf16.mxu0 %v10959_v18  ;;  %v12158_v0 = vsel %vm1270_vm1, %v11384_v10, %v15688_v40  ;;  %v15692_v51 = vld [vmem:[#allocation58_spill] sm:$0xff]  ;;  %v15693_v40 = vld [vmem:[#allocation23_spill] sm:$0xff]  ;;  %v10966_v32 = vld [vmem:[%s15169_s2 + $0x160] sm:$0xff]  }
  0x93   : > { %10069 = vmatprep.subr.bf16.mxu1 %v10960_v53  ;;  %v15695_v34 = vpack.c.bf16 %v15693_v40, %v15694_v2  ;;  %v12188_v2 = vpack.c.bf16 %v12030_v62, %v12005_v12  ;;  %v10970_v40 = vld [vmem:[%s15169_s2 + $0x170] sm:$0xff]  }
  0x94   : > { %10006 = vmatpush3.bf16.msra.mxu0 %v10959_v18  ;;  %v10963_v18 = vld [vmem:[%s15169_s2 + $0x118] sm:$0xff]  }
  0x95   : > { %10070 = vmatpush3.bf16.msra.mxu1 %v10960_v53  ;;  %10007 = vmatprep.subr.bf16.mxu0 %v10961_v56  ;;  %v10965_v53 = vld [vmem:[%s15169_s2 + $0x120] sm:$0xff]   ;;  %15697 = vst [vmem:[#allocation8_spill] sm:$0xff] %v12188_v2 }
  0x96   : > { %10071 = vmatprep.subr.bf16.mxu1 %v10962_v3 }
  0x97   : > { %9896 = vmatmul.mubr.bf16.gmra.mrb[52].mxu0 %v12144_v6  ;;  %v12181_v6 = vpack.c.bf16 %v12001_v42, %v11993_v52 }
  0x98   : > { %9960 = vmatmul.mubr.bf16.gmra.mrb[52].mxu1 %v15691_v22  ;;  %9899 = vmatprep.mubr.bf16.mxu0 %v15692_v51  ;;  %v10969_v22 = vld [vmem:[%s15169_s2 + $0x130] sm:$0xff]  }
  0x99   : > { %9963 = vmatprep.mubr.bf16.mxu1 %v15695_v34  ;;  %10008 = vmatpush3.bf16.msra.mxu0 %v10961_v56  ;;  %15696 = vst [vmem:[#allocation9_spill] sm:$0xff] %v12181_v6  ;;  %v10967_v34 = vld [vmem:[%s15169_s2 + $0x128] sm:$0xff]  }
  0x9a   : > { %10072 = vmatpush3.bf16.msra.mxu1 %v10962_v3  ;;  %10009 = vmatprep.subr.bf16.mxu0 %v10963_v18  ;;  %v10968_v56 = vld [vmem:[%s15169_s2 + $0x168] sm:$0xff]   ;;  %v15698_v3 = vld [vmem:[#allocation22_spill] sm:$0xff] }
  0x9b   : > { %10073 = vmatprep.subr.bf16.mxu1 %v10964_v33  ;;  %v15699_v1 = vpack.c.bf16 %v11461_v45, %v15698_v3  ;;  %v12212_v45 = vpack.c.bf16 %v12067_v54, %v12062_v44 }
  0x9d   : > { %10010 = vmatpush3.bf16.msra.mxu0 %v10963_v18  ;;  %v15700_v18 = vld [vmem:[#allocation31_spill] sm:$0xff]  ;;  %15702 = vst [vmem:[#allocation29_spill] sm:$0xff] %v12212_v45 }
  0x9e   : > { %10074 = vmatpush3.bf16.msra.mxu1 %v10964_v33  ;;  %10011 = vmatprep.subr.bf16.mxu0 %v10965_v53  ;;  %v15701_v33 = vpack.c.bf16 %v11479_v60, %v15700_v18  ;;  %v10971_v60 = vld [vmem:[%s15169_s2 + $0x138] sm:$0xff]   ;;  %v12235_v18 = vpack.c.bf16 %v12100_v7, %v12071_v57 }
  0x9f   : > { %9900 = vmatmul.mubr.bf16.gmra.mrb[56].mxu0 %v12181_v6  ;;  %10075 = vmatprep.subr.bf16.mxu1 %v10966_v32  ;;  %v15726_v6 = vld [vmem:[#allocation42_spill] sm:$0xff] }
  0xa0   : > { %9964 = vmatmul.mubr.bf16.gmra.mrb[56].mxu1 %v15699_v1  ;;  %9903 = vmatprep.mubr.bf16.mxu0 %v12188_v2  ;;  %v12231_v1 = vld [vmem:[%s15169_s2 + $0x180] sm:$0xff]   ;;  %15707 = vst [vmem:[#allocation14_spill] sm:$0xff] %v12235_v18  ;;  %v15727_v51 = vrot.slane %v15726_v6, 1 }
  0xa1   : > { %9967 = vmatprep.mubr.bf16.mxu1 %v15701_v33  ;;  %10012 = vmatpush3.bf16.msra.mxu0 %v10965_v53  ;;  %v10972_v53 = vld [vmem:[%s15169_s2 + $0x178] sm:$0xff]  }
  0xa2   : > { %10076 = vmatpush3.bf16.msra.mxu1 %v10966_v32  ;;  %10013 = vmatprep.subr.bf16.mxu0 %v10967_v34  ;;  %v15703_v32 = vpack.c.bf16 %v11503_v21, %v11471_v49  ;;  %v12240_v49 = vld [vmem:[%s15169_s2 + $0x1c0] sm:$0xff]  }
  0xa3   : > { %10077 = vmatprep.subr.bf16.mxu1 %v10968_v56  ;;  %v15708_v21 = vld [vmem:[#allocation28_spill] sm:$0xff] }
  0xa4   : > { %v1246_v33 = vrot.slane %v15708_v21, 1 }
  0xa5   : > { %10014 = vmatpush3.bf16.msra.mxu0 %v10967_v34  ;;  %v15704_v34 = vld [vmem:[#allocation39_spill] sm:$0xff] }
  0xa6   : > { %10078 = vmatpush3.bf16.msra.mxu1 %v10968_v56  ;;  %10015 = vmatprep.subr.bf16.mxu0 %v10969_v22  ;;  %v15705_v56 = vld [vmem:[#allocation37_spill] sm:$0xff] }
  0xa7   : > { %9904 = vmatmul.mubr.bf16.gmra.mrb[60].mxu0 %v11701_v37  ;;  %10079 = vmatprep.subr.bf16.mxu1 %v10970_v40  ;;  %v15706_v3 = vpack.c.bf16 %v15704_v34, %v15705_v56  ;;  %v15712_v34 = vld [vmem:[#allocation67_spill] sm:$0xff]  ;;  %v12253_v56 = vsel %vm1270_vm1, %v11384_v10, %v1246_v33 }
  0xa8   : > { %9968 = vmatmul.mubr.bf16.gmra.mrb[60].mxu1 %v15703_v32  ;;  %9907 = vmatprep.mubr.bf16.mxu0 %v12212_v45  ;;  %v15716_v45 = vrot.slane %v15683_v38, 1 }
  0xa9   : > { %9971 = vmatprep.mubr.bf16.mxu1 %v15706_v3  ;;  %10016 = vmatpush3.bf16.msra.mxu0 %v10969_v22  ;;  %v15709_v22 = vld [vmem:[#allocation41_spill] sm:$0xff]  ;;  %v15713_v3 = vld [vmem:[#allocation44_spill] sm:$0xff] }
  0xaa   : > { %10080 = vmatpush3.bf16.msra.mxu1 %v10970_v40  ;;  %10017 = vmatprep.subr.bf16.mxu0 %v10971_v60  ;;  %v15710_v40 = vld [vmem:[#allocation38_spill] sm:$0xff] }
  0xab   : > { %10081 = vmatprep.subr.bf16.mxu1 %v10972_v53  ;;  %v15711_v32 = vpack.c.bf16 %v15709_v22, %v15710_v40  ;;  %v12266_v22 = vpack.c.bf16 %v12253_v56, %v12109_v15 }
  0xad   : > { %10018 = vmatpush3.bf16.msra.mxu0 %v10971_v60  ;;  %v15714_v60 = vld [vmem:[#allocation40_spill] sm:$0xff]  ;;  %15717 = vst [vmem:[#allocation12_spill] sm:$0xff] %v12266_v22 }
  0xae   : > { %10082 = vmatpush3.bf16.msra.mxu1 %v10972_v53  ;;  %10131 = vmatprep.subr.bf16.mxu0 %v12231_v1  ;;  %v15715_v53 = vpack.c.bf16 %v15713_v3, %v15714_v60  ;;  %v15720_v3 = vld [vmem:[#allocation51_spill] sm:$0xff] }
  0xaf   : > { %9908 = vmatmul.mubr.bf16.gmra.mrb[64].mxu0 %v12235_v18  ;;  %10195 = vmatprep.subr.bf16.mxu1 %v12240_v49  ;;  %v12262_v18 = vsel %vm1270_vm1, %v1246_v33, %v15716_v45  ;;  %v15721_v60 = vld [vmem:[#allocation43_spill] sm:$0xff]  ;;  %v15724_v33 = vld [vmem:[#allocation56_spill] sm:$0xff] }
  0xb0   : > { %9972 = vmatmul.mubr.bf16.gmra.mrb[64].mxu1 %v15711_v32  ;;  %9911 = vmatprep.mubr.bf16.mxu0 %v15712_v34  ;;  %v12270_v40 = vpack.c.bf16 %v12151_v11, %v12262_v18  ;;  %v15719_v32 = vld [vmem:[#allocation45_spill] sm:$0xff]  ;;  %v15723_v45 = vld [vmem:[#allocation63_spill] sm:$0xff] }
  0xb1   : > { %9975 = vmatprep.mubr.bf16.mxu1 %v15715_v53  ;;  %v1252_v34 = vrot.slane %v15719_v32, 1  ;;  %v15722_v53 = vpack.c.bf16 %v15720_v3, %v15721_v60  ;;  %v15725_v37 = vpack.c.bf16 %v15723_v45, %v15724_v33  ;;  %v15728_v3 = vld [vmem:[#allocation70_spill] sm:$0xff] }
  0xb2   : > { %15718 = vst [vmem:[#allocation21_spill] sm:$0xff] %v12270_v40  ;;  %v12295_v60 = vpack.c.bf16 %v15728_v3, %v12158_v0  ;;  %v15732_v33 = vld [vmem:[#allocation62_spill] sm:$0xff] }
  0xb3   : > { %v12284_v2 = vsel %vm1270_vm1, %v11384_v10, %v1252_v34 }
  0xb4   : > { %15729 = vst [vmem:[#allocation13_spill] sm:$0xff] %v12295_v60 }
  0xb7   : > { %9912 = vmatmul.mubr.bf16.gmra.mrb[68].mxu0 %v12266_v22  ;;  %v12291_v22 = vsel %vm1270_vm1, %v15727_v51, %v11384_v10 }
  0xb8   : > { %9976 = vmatmul.mubr.bf16.gmra.mrb[68].mxu1 %v15722_v53  ;;  %9915 = vmatprep.mubr.bf16.mxu0 %v12270_v40  ;;  %v12299_v53 = vpack.c.bf16 %v12284_v2, %v12291_v22  ;;  %v15733_v40 = vpack.c.bf16 %v11743_v59, %v15732_v33  ;;  %v15737_v33 = vld [vmem:[#allocation73_spill] sm:$0xff] }
  0xb9   : > { %9979 = vmatprep.mubr.bf16.mxu1 %v15725_v37  ;;  %v15731_v37 = vld [vmem:[#allocation52_spill] sm:$0xff] }
  0xba   : > { %15730 = vst [vmem:[#allocation23_spill] sm:$0xff] %v12299_v53  ;;  %v1253_v45 = vrot.slane %v15731_v37, 1  ;;  %v15734_v37 = vpack.c.bf16 %v11754_v43, %v11738_v61  ;;  %v15740_v61 = vld [vmem:[#allocation57_spill] sm:$0xff] }
  0xbb   : > { %v1259_v43 = vrot.slane %v15740_v61, 1 }
  0xbc   : > { %v12310_v6 = vsel %vm1270_vm1, %v1253_v45, %v11384_v10  ;;  %v12314_v51 = vsel %vm1270_vm1, %v1252_v34, %v1253_v45  ;;  %v15739_v45 = vld [vmem:[#allocation54_spill] sm:$0xff] }
  0xbf   : > { %9916 = vmatmul.mubr.bf16.gmra.mrb[72].mxu0 %v12295_v60  ;;  %v15735_v60 = vrot.slane %v11622_v48, 1  ;;  %v15741_v48 = vpack.c.bf16 %v11785_v14, %v11771_v24  ;;  %v12359_v14 = vsel %vm1270_vm1, %v1259_v43, %v11384_v10 }
  0xc0   : > { %9980 = vmatmul.mubr.bf16.gmra.mrb[72].mxu1 %v15733_v40  ;;  %9919 = vmatprep.mubr.bf16.mxu0 %v12299_v53  ;;  %v12328_v40 = vpack.c.bf16 %v12310_v6, %v12314_v51  ;;  %v1258_v53 = vrot.slane %v15739_v45, 1 }
  0xc1   : > { %9983 = vmatprep.mubr.bf16.mxu1 %v15734_v37  ;;  %v12324_v59 = vsel %vm1270_vm1, %v11384_v10, %v15735_v60  ;;  %v15742_v37 = vrot.slane %v11635_v39, 1 }
  0xc2   : > { %15736 = vst [vmem:[#allocation20_spill] sm:$0xff] %v12328_v40  ;;  %v12332_v34 = vpack.c.bf16 %v15737_v33, %v12324_v59  ;;  %v12344_v60 = vsel %vm1270_vm1, %v11384_v10, %v1258_v53  ;;  %v12363_v24 = vsel %vm1270_vm1, %v1258_v53, %v1259_v43  ;;  %v15748_v53 = vrot.slane %v11665_v30, 1 }
  0xc3   : > { %v12351_v45 = vsel %vm1270_vm1, %v15742_v37, %v11384_v10  ;;  %v15746_v37 = vld [vmem:[#allocation64_spill] sm:$0xff] }
  0xc4   : > { %15738 = vst [vmem:[#allocation22_spill] sm:$0xff] %v12332_v34  ;;  %v12367_v39 = vpack.c.bf16 %v12344_v60, %v12351_v45  ;;  %v12385_v43 = vsel %vm1270_vm1, %v11384_v10, %v15748_v53 }
  0xc6   : > { %15744 = vst [vmem:[#allocation31_spill] sm:$0xff] %v12367_v39 }
  0xc7   : > { %9920 = vmatmul.mubr.bf16.gmra.mrb[76].mxu0 %v12328_v40  ;;  %v15743_v40 = vpack.c.bf16 %v11803_v4, %v11781_v13  ;;  %v1264_v4 = vrot.slane %v15746_v37, 1  ;;  %v9140_v13 = vld [vmem:[%s11235_s28 + $0x78] sm:$0xff]  }
  0xc8   : > { %9984 = vmatmul.mubr.bf16.gmra.mrb[76].mxu1 %v15741_v48  ;;  %9923 = vmatprep.mubr.bf16.mxu0 %v12332_v34  ;;  %v12371_v48 = vpack.c.bf16 %v12359_v14, %v12363_v24  ;;  %v15749_v34 = vpack.c.bf16 %v11817_v41, %v11808_v19  ;;  %v15754_v41 = vld [vmem:[#allocation68_spill] sm:$0xff] }
  0xc9   : > { %9987 = vmatprep.mubr.bf16.mxu1 %v15743_v40  ;;  %v15747_v40 = vpack.c.bf16 %v11813_v63, %v11789_v35  ;;  %v15750_v35 = vrot.slane %v11696_v17, 1  ;;  %v12402_v63 = vunpack.c.l.bf16 %v9140_v13  ;;  %v15755_v17 = vpack.c.bf16 %v11867_v28, %v11862_v26 }
  0xca   : > { %15745 = vst [vmem:[#allocation39_spill] sm:$0xff] %v12371_v48  ;;  %v12438_v28 = vunpack.c.h.bf16 %v9140_v13  ;;  %v15760_v13 = vpack.c.bf16 %v11889_v46, %v11883_v16 }
  0xcb   : > { %v12400_v30 = vsel %vm1270_vm1, %v15750_v35, %v11384_v10  ;;  %15751 = vst [vmem:[#allocation37_spill] sm:$0xff] %v12402_v63  ;;  %v1742_v53 = vrot.slane %v12402_v63, 7  ;;  %v15756_v63 = vpack.c.bf16 %v11876_v29, %v11871_v50 }
  0xcf   : > { %9924 = vmatmul.mubr.bf16.gmra.mrb[80].mxu0 %v12367_v39  ;;  %v12393_v39 = vsel %vm1270_vm1, %v11384_v10, %v1264_v4 }
  0xd0   : > { %9988 = vmatmul.mubr.bf16.gmra.mrb[80].mxu1 %v15747_v40  ;;  %9927 = vmatprep.mubr.bf16.mxu0 %v12371_v48  ;;  %v12406_v40 = vpack.c.bf16 %v11901_v9, %v12385_v43  ;;  %v12410_v19 = vpack.c.bf16 %v12393_v39, %v12400_v30 }
  0xd1   : > { %9991 = vmatprep.mubr.bf16.mxu1 %v15749_v34  ;;  %v1265_v34 = vrot.slane %v15754_v41, 1 }
  0xd2   : > { %15752 = vst [vmem:[#allocation28_spill] sm:$0xff] %v12406_v40  ;;  %15753 = vst [vmem:[#allocation41_spill] sm:$0xff] %v12410_v19 }
  0xd3   : > { %v12422_v35 = vsel %vm1270_vm1, %v1265_v34, %v11384_v10  ;;  %v12426_v48 = vsel %vm1270_vm1, %v1264_v4, %v1265_v34 }
  0xd4   : > { %v12447_v4 = vpack.c.bf16 %v12422_v35, %v12426_v48 }
  0xd6   : > { %15758 = vst [vmem:[#allocation38_spill] sm:$0xff] %v12447_v4 }
  0xd7   : > { %9928 = vmatmul.mubr.bf16.gmra.mrb[84].mxu0 %v12406_v40  ;;  %v15757_v40 = vrot.slane %v11774_v25, 1  ;;  %v1743_v25 = vrot.slane %v12438_v28, 7 }
  0xd8   : > { %9992 = vmatmul.mubr.bf16.gmra.mrb[84].mxu1 %v15755_v17  ;;  %9931 = vmatprep.mubr.bf16.mxu0 %v12410_v19  ;;  %v12443_v17 = vsel %vm578_vm0, %v11198_v5, %v1742_v53  ;;  %v10993_v19 = vld [vmem:[%s15169_s2 + $0x210] sm:$0xff]  }
  0xd9   : > { %9995 = vmatprep.mubr.bf16.mxu1 %v15756_v63  ;;  %v12436_v26 = vsel %vm1270_vm1, %v11384_v10, %v15757_v40  ;;  %v1815_v50 = vpack.c.bf16 %v12443_v17, %v12043_v47  ;;  %v15761_v63 = vld [vmem:[#allocation69_spill] sm:$0xff]  ;;  %v12471_v47 = vsel %vm578_vm0, %v1743_v25, %v11198_v5 }
  0xda   : > { %v12451_v29 = vpack.c.bf16 %v11917_v27, %v12436_v26  ;;  %v15762_v40 = vrot.slane %v15761_v63, 1  ;;  %v15765_v63 = vmov 0.0  }
  0xdc   : > { %15759 = vst [vmem:[#allocation44_spill] sm:$0xff] %v12451_v29  ;;  %v12466_v34 = vsel %vm1270_vm1, %v15762_v40, %v11384_v10  ;;  %v15766_v40 = vld [vmem:[#allocation7_spill] sm:$0xff] }
  0xdd   : > { %15763 = vst [vmem:[#allocation40_spill] sm:$0xff] %v12466_v34  ;;  %v1342_v16 = vpack.c.bf16 %v11384_v10, %v12466_v34 }
  0xdf   : > { %9932 = vmatmul.mubr.bf16.gmra.mrb[88].mxu0 %v12447_v4  ;;  %v12475_v4 = vsel %vm578_vm0, %v1742_v53, %v1743_v25  ;;  %v2550_v53 = vpack.c.bf16 %v12129_v55, %v12093_v23  ;;  %v2125_v25 = vpack.c.bf16 %v15765_v63, %v11294_v36  ;;  %v10977_v36 = vld [vmem:[%s15169_s2 + $0x190] sm:$0xff]  }
  0xe0   : > { %9996 = vmatmul.mubr.bf16.gmra.mrb[88].mxu1 %v15760_v13  ;;  %9935 = vmatprep.mubr.bf16.mxu0 %v12451_v29  ;;  %v1816_v46 = vpack.c.bf16 %v12471_v47, %v12475_v4  ;;  %v11069_v13 = vld [vmem:[%s11235_s28] sm:$0xff]   ;;  %v2124_v29 = vpack.c.bf16 %v15766_v40, %v15765_v63  ;;  %v10978_v55 = vld [vmem:[%s15169_s2 + $0x1d0] sm:$0xff]  }
  0xe1   : > { %9999 = vmatprep.mubr.bf16.mxu1 %v1815_v50  ;;  %v15764_v50 = vpack.c.bf16 %v11938_v31, %v11558_v58  ;;  %v15767_v58 = vld [vmem:[#allocation55_spill] sm:$0xff] }
  0xe2   : > { %v15768_v31 = vpack.c.bf16 %v15767_v58, %v11965_v8  ;;  %v10980_v8 = vld [vmem:[%s15169_s2 + $0x1d8] sm:$0xff]  }
  0xe7   : > { %9936 = vmatmul.mubr.bf16.gmra.mrb[92].mxu0 %v1342_v16  ;;  %v10975_v16 = vld [vmem:[%s15169_s2 + $0x188] sm:$0xff]  }
  0xe8   : > { %10000 = vmatmul.mubr.bf16.gmra.mrb[92].mxu1 %v1816_v46  ;;  %10019 = vmatprep.mubr.bf16.mxu0 %v11069_v13  ;;  %v10976_v46 = vld [vmem:[%s15169_s2 + $0x1c8] sm:$0xff]   ;;  %v11070_v13 = vld [vmem:[%s11235_s28 + $0x10] sm:$0xff]  }
  0xe9   : > { %10083 = vmatprep.mubr.bf16.mxu1 %v15764_v50  ;;  %v15770_v50 = vld [vmem:[#allocation53_spill] sm:$0xff] }
  0xea   : > { %v15771_v40 = vpack.c.bf16 %v11993_v52, %v15770_v50  ;;  %v10982_v52 = vld [vmem:[%s15169_s2 + $0x1e0] sm:$0xff]  }
  0xeb   : > { %v15778_v50 = vld [vmem:[#allocation24_spill] sm:$0xff] }
  0xef   : > { %10020 = vmatmul.mubr.bf16.vlgmr.msra.gmra.mrb[96].mxu0 %v2124_v29 }
  0xf0   : > { %10084 = vmatmul.mubr.bf16.vlgmr.msra.gmra.mrb[96].mxu1 %v2550_v53  ;;  %10132 = vmatpush3.bf16.msra.mxu0 %v12231_v1  ;;  %v15769_v1 = vld [vmem:[#allocation15_spill] sm:$0xff]  ;;  %v15772_v53 = vpack.c.bf16 %v12005_v12, %v12001_v42  ;;  %v10983_v42 = vld [vmem:[%s15169_s2 + $0x1a8] sm:$0xff]  }
  0xf1   : > { %10196 = vmatpush3.bf16.msra.mxu1 %v12240_v49  ;;  %10023 = vmatprep.mubr.bf16.mxu0 %v2125_v25  ;;  %v2127_v29 = vpack.c.bf16 %v15769_v1, %v15765_v63  ;;  %v10979_v49 = vld [vmem:[%s15169_s2 + $0x198] sm:$0xff]   ;;  %v10981_v25 = vld [vmem:[%s15169_s2 + $0x1a0] sm:$0xff]   ;;  %v10984_v12 = vld [vmem:[%s15169_s2 + $0x1e8] sm:$0xff]  }
  0xf2   : > { %10087 = vmatprep.mubr.bf16.mxu1 %v15768_v31  ;;  %10133 = vmatprep.subr.bf16.mxu0 %v10975_v16  ;;  %v11071_v31 = vld [vmem:[%s11235_s28 + $0x20] sm:$0xff]  }
  0xf3   : > { %10197 = vmatprep.subr.bf16.mxu1 %v10976_v46 }
  0xf4   : > { %10134 = vmatpush3.bf16.msra.mxu0 %v10975_v16  ;;  %v15773_v16 = vld [vmem:[#allocation16_spill] sm:$0xff] }
  0xf5   : > { %10198 = vmatpush3.bf16.msra.mxu1 %v10976_v46  ;;  %10135 = vmatprep.subr.bf16.mxu0 %v10977_v36  ;;  %v2128_v46 = vpack.c.bf16 %v15765_v63, %v15773_v16 }
  0xf6   : > { %10199 = vmatprep.subr.bf16.mxu1 %v10978_v55 }
  0xf7   : > { %10024 = vmatmul.mubr.bf16.gmra.mrb[100].mxu0 %v11070_v13 }
  0xf8   : > { %10088 = vmatmul.mubr.bf16.gmra.mrb[100].mxu1 %v15771_v40  ;;  %10027 = vmatprep.mubr.bf16.mxu0 %v2127_v29  ;;  %v10986_v40 = vld [vmem:[%s15169_s2 + $0x1f0] sm:$0xff]  }
  0xf9   : > { %10091 = vmatprep.mubr.bf16.mxu1 %v15772_v53  ;;  %10136 = vmatpush3.bf16.msra.mxu0 %v10977_v36  ;;  %v15774_v36 = vld [vmem:[#allocation59_spill] sm:$0xff] }
  0xfa   : > { %10200 = vmatpush3.bf16.msra.mxu1 %v10978_v55  ;;  %10137 = vmatprep.subr.bf16.mxu0 %v10979_v49  ;;  %v15775_v58 = vpack.c.bf16 %v15774_v36, %v12030_v62  ;;  %v15776_v55 = vld [vmem:[#allocation60_spill] sm:$0xff]  ;;  %v2130_v62 = vpack.c.bf16 %v15778_v50, %v15765_v63 }
  0xfb   : > { %10201 = vmatprep.subr.bf16.mxu1 %v10980_v8  ;;  %v15777_v1 = vpack.c.bf16 %v12062_v44, %v15776_v55  ;;  %v10987_v55 = vld [vmem:[%s15169_s2 + $0x1b8] sm:$0xff]   ;;  %v12575_v50 = vld [vmem:[%s15169_s2 + $0x200] sm:$0xff]  }
  0xfd   : > { %10138 = vmatpush3.bf16.msra.mxu0 %v10979_v49  ;;  %v10985_v49 = vld [vmem:[%s15169_s2 + $0x1b0] sm:$0xff]  }
  0xfe   : > { %10202 = vmatpush3.bf16.msra.mxu1 %v10980_v8  ;;  %10139 = vmatprep.subr.bf16.mxu0 %v10981_v25 }
  0xff   : > { %10028 = vmatmul.mubr.bf16.gmra.mrb[104].mxu0 %v2128_v46  ;;  %10203 = vmatprep.subr.bf16.mxu1 %v10982_v52 }
 0x100   : > { %10092 = vmatmul.mubr.bf16.gmra.mrb[104].mxu1 %v15775_v58  ;;  %10031 = vmatprep.mubr.bf16.mxu0 %v11071_v31 }
 0x101   : > { %10095 = vmatprep.mubr.bf16.mxu1 %v15777_v1  ;;  %10140 = vmatpush3.bf16.msra.mxu0 %v10981_v25  ;;  %v15779_v25 = vld [vmem:[#allocation26_spill] sm:$0xff] }
 0x102   : > { %v9765_v29 = vpop.f32.mrb[0].mxu0  ;;  %10204 = vmatpush3.bf16.msra.mxu1 %v10982_v52  ;;  %10141 = vmatprep.subr.bf16.mxu0 %v10983_v42  ;;  %v2131_v16 = vpack.c.bf16 %v15765_v63, %v15779_v25 }
 0x103   : > { %v9829_v13 = vpop.f32.mrb[0].mxu1  ;;  %v790_v8 = vpop.f32.mrb[1].mxu0  ;;  %10205 = vmatprep.subr.bf16.mxu1 %v10984_v12  ;;  %v10988_v29 = vld [vmem:[%s15169_s2 + $0x1f8] sm:$0xff]  }
 0x104   : > { %v1047_v44 = vpop.f32.mrb[1].mxu1  ;;  %v9766_v53 = vpop.f32.mrb[2].mxu0  ;;  %v15781_v13 = vld [vmem:[#allocation66_spill] sm:$0xff] }
 0x105   : > { %v12554_v46 = vadd.f32 %v1047_v44, %v790_v8  ;;  %v9830_v52 = vpop.f32.mrb[2].mxu1  ;;  %v793_v36 = vpop.f32.mrb[3].mxu0  ;;  %10142 = vmatpush3.bf16.msra.mxu0 %v10983_v42  ;;  %v15780_v42 = vpack.c.bf16 %v12071_v57, %v12067_v54  ;;  %v12580_v57 = vld [vmem:[%s15170_s3] sm:$0xff]  }
 0x106   : > { %v12556_v58 = vadd.f32 %v9830_v52, %v9766_v53  ;;  %v1050_v31 = vpop.f32.mrb[3].mxu1  ;;  %10206 = vmatpush3.bf16.msra.mxu1 %v10984_v12  ;;  %10143 = vmatprep.subr.bf16.mxu0 %v10985_v49  ;;  %v15782_v12 = vpack.c.bf16 %v15781_v13, %v12100_v7  ;;  %v2559_v52 = vpack.c.bf16 %v12262_v18, %v12253_v56 }
 0x107   : > { %v12561_v1 = vadd.f32 %v1050_v31, %v793_v36  ;;  %10032 = vmatmul.mubr.bf16.gmra.mrb[108].mxu0 %v2130_v62  ;;  %10207 = vmatprep.subr.bf16.mxu1 %v10986_v40 }
 0x108   : > { %10096 = vmatmul.mubr.bf16.gmra.mrb[108].mxu1 %v15780_v42  ;;  %10035 = vmatprep.mubr.bf16.mxu0 %v2131_v16  ;;  %v11072_v42 = vld [vmem:[%s11235_s28 + $0x30] sm:$0xff]  }
 0x109   : > { %10099 = vmatprep.mubr.bf16.mxu1 %v15782_v12  ;;  %10144 = vmatpush3.bf16.msra.mxu0 %v10985_v49 }
 0x10a   : > { %v9769_v8 = vpop.f32.mrb[4].mxu0  ;;  %10208 = vmatpush3.bf16.msra.mxu1 %v10986_v40  ;;  %10145 = vmatprep.subr.bf16.mxu0 %v10987_v55  ;;  %v2133_v40 = vpack.c.bf16 %v15708_v21, %v15765_v63  ;;  %v15783_v21 = vld [vmem:[#allocation65_spill] sm:$0xff] }
 0x10b   : > { %v9833_v62 = vpop.f32.mrb[4].mxu1  ;;  %v805_v44 = vpop.f32.mrb[5].mxu0  ;;  %10209 = vmatprep.subr.bf16.mxu1 %v10988_v29  ;;  %v15784_v13 = vpack.c.bf16 %v12109_v15, %v15783_v21 }
 0x10c   : > { %v12582_v54 = vadd.f32 %v9833_v62, %v9769_v8  ;;  %v1062_v7 = vpop.f32.mrb[5].mxu1  ;;  %v9770_v49 = vpop.f32.mrb[6].mxu0 }
 0x10d   : > { %v12586_v53 = vadd.f32 %v1062_v7, %v805_v44  ;;  %v9834_v25 = vpop.f32.mrb[6].mxu1  ;;  %v808_v16 = vpop.f32.mrb[7].mxu0  ;;  %10146 = vmatpush3.bf16.msra.mxu0 %v10987_v55  ;;  %v2134_v55 = vpack.c.bf16 %v15765_v63, %v15683_v38 }
 0x10e   : > { %v12590_v36 = vadd.f32 %v9834_v25, %v9770_v49  ;;  %v1065_v31 = vpop.f32.mrb[7].mxu1  ;;  %10210 = vmatpush3.bf16.msra.mxu1 %v10988_v29  ;;  %10259 = vmatprep.subr.bf16.mxu0 %v12575_v50  ;;  %v2561_v49 = vpack.c.bf16 %v12291_v22, %v15728_v3  ;;  %v11073_v16 = vld [vmem:[%s11235_s28 + $0x40] sm:$0xff]   ;;  %v2562_v22 = vpack.c.bf16 %v12314_v51, %v12284_v2 }
 0x10f   : > { %10036 = vmatmul.mubr.bf16.gmra.mrb[112].mxu0 %v11072_v42  ;;  %10323 = vmatprep.subr.bf16.mxu1 %v12580_v57  ;;  %v2136_v42 = vpack.c.bf16 %v15719_v32, %v15765_v63  ;;  %v15786_v3 = vld [vmem:[#allocation52_spill] sm:$0xff] }
 0x110   : > { %10100 = vmatmul.mubr.bf16.gmra.mrb[112].mxu1 %v15784_v13  ;;  %10039 = vmatprep.mubr.bf16.mxu0 %v2133_v40  ;;  %v15785_v40 = vpack.c.bf16 %v12158_v0, %v12151_v11 }
 0x111   : > { %10103 = vmatprep.mubr.bf16.mxu1 %v2559_v52 }
 0x112   : > { %v9773_v12 = vpop.f32.mrb[8].mxu0 }
 0x113   : > { %v9837_v18 = vpop.f32.mrb[8].mxu1  ;;  %v820_v56 = vpop.f32.mrb[9].mxu0 }
 0x114   : > { %v12600_v29 = vadd.f32 %v9837_v18, %v9773_v12  ;;  %v1077_v8 = vpop.f32.mrb[9].mxu1  ;;  %v9774_v62 = vpop.f32.mrb[10].mxu0  ;;  %v2137_v12 = vpack.c.bf16 %v15765_v63, %v15786_v3  ;;  %v2563_v56 = vpack.c.bf16 %v12324_v59, %v12310_v6  ;;  %v2564_v6 = vpack.c.bf16 %v12351_v45, %v15737_v33  ;;  %v15787_v59 = vld [vmem:[#allocation54_spill] sm:$0xff] }
 0x115   : > { %v9838_v44 = vpop.f32.mrb[10].mxu1  ;;  %v822_v7 = vpop.f32.mrb[11].mxu0 }
 0x116   : > { %v1079_v15 = vpop.f32.mrb[11].mxu1 }
 0x117   : > { %v12604_v25 = vadd.f32 %v1079_v15, %v822_v7  ;;  %10040 = vmatmul.mubr.bf16.gmra.mrb[116].mxu0 %v2134_v55  ;;  %v2139_v15 = vpack.c.bf16 %v15787_v59, %v15765_v63 }
 0x118   : > { %10104 = vmatmul.mubr.bf16.gmra.mrb[116].mxu1 %v15785_v40  ;;  %10043 = vmatprep.mubr.bf16.mxu0 %v11073_v16 }
 0x119   : > { %10107 = vmatprep.mubr.bf16.mxu1 %v2561_v49 }
 0x11a   : > { %v9777_v38 = vpop.f32.mrb[12].mxu0 }
 0x11b   : > { %v9841_v52 = vpop.f32.mrb[12].mxu1  ;;  %v834_v31 = vpop.f32.mrb[13].mxu0 }
 0x11c   : > { %v1091_v21 = vpop.f32.mrb[13].mxu1  ;;  %v9778_v13 = vpop.f32.mrb[14].mxu0  ;;  %v2565_v52 = vpack.c.bf16 %v12363_v24, %v12344_v60 }
 0x11d   : > { %v12616_v18 = vadd.f32 %v1091_v21, %v834_v31  ;;  %v9842_v11 = vpop.f32.mrb[14].mxu1  ;;  %v837_v0 = vpop.f32.mrb[15].mxu0  ;;  %v11074_v21 = vld [vmem:[%s11235_s28 + $0x50] sm:$0xff]  }
 0x11e   : > { %v12620_v55 = vadd.f32 %v9842_v11, %v9778_v13  ;;  %v1094_v8 = vpop.f32.mrb[15].mxu1 }
 0x11f   : > { %v12622_v62 = vadd.f32 %v1094_v8, %v837_v0  ;;  %10044 = vmatmul.mubr.bf16.gmra.mrb[120].mxu0 %v2136_v42 }
 0x120   : > { %10108 = vmatmul.mubr.bf16.gmra.mrb[120].mxu1 %v2562_v22  ;;  %10047 = vmatprep.mubr.bf16.mxu0 %v2137_v12  ;;  %v2140_v22 = vpack.c.bf16 %v15765_v63, %v15740_v61  ;;  %v2566_v12 = vpack.c.bf16 %v12385_v43, %v12359_v14 }
 0x121   : > { %10111 = vmatprep.mubr.bf16.mxu1 %v2563_v56  ;;  %v2567_v56 = vpack.c.bf16 %v12400_v30, %v11901_v9 }
 0x122   : > { %v9781_v2 = vpop.f32.mrb[16].mxu0 }
 0x123   : > { %v9845_v32 = vpop.f32.mrb[16].mxu1  ;;  %v849_v51 = vpop.f32.mrb[17].mxu0 }
 0x124   : > { %v12624_v44 = vadd.f32 %v9845_v32, %v9781_v2  ;;  %v1106_v7 = vpop.f32.mrb[17].mxu1  ;;  %v9782_v49 = vpop.f32.mrb[18].mxu0  ;;  %v12654_v2 = vld [vmem:[%s12643_s11] sm:$0xff]  }
 0x125   : > { %v12630_v40 = vadd.f32 %v1106_v7, %v849_v51  ;;  %v9846_v16 = vpop.f32.mrb[18].mxu1  ;;  %v852_v38 = vpop.f32.mrb[19].mxu0  ;;  %v11075_v32 = vld [vmem:[%s11235_s28 + $0x60] sm:$0xff]   ;;  %v12658_v51 = vunpack.c.h.bf16 %v12654_v2  ;;  %v12661_v7 = vld [vmem:[%s12643_s11 + $0x8] sm:$0xff]  }
 0x126   : > { %v12634_v31 = vadd.f32 %v9846_v16, %v9782_v49  ;;  %v1109_v42 = vpop.f32.mrb[19].mxu1  ;;  %v12664_v14 = vunpack.c.l.bf16 %v12661_v7  ;;  %v2142_v49 = vpack.c.bf16 %v15746_v37, %v15765_v63  ;;  %v2568_v38 = vpack.c.bf16 %v12426_v48, %v12393_v39 }
 0x127   : > { %10048 = vmatmul.mubr.bf16.gmra.mrb[124].mxu0 %v11074_v21  ;;  %v2569_v37 = vpack.c.bf16 %v12436_v26, %v12422_v35 }
 0x128   : > { %10112 = vmatmul.mubr.bf16.gmra.mrb[124].mxu1 %v2564_v6  ;;  %10051 = vmatprep.mubr.bf16.mxu0 %v2139_v15  ;;  %15788 = vst [vmem:[#allocation45_spill] sm:$0xff] %v12664_v14  ;;  %v15308_v6 = vrot.slane %v12658_v51, 7  ;;  %v15307_v59 = vrot.slane %v12664_v14, 7 }
 0x129   : > { %10115 = vmatprep.mubr.bf16.mxu1 %v2565_v52  ;;  %v2143_v52 = vpack.c.bf16 %v15765_v63, %v15754_v41  ;;  %v9142_v41 = vld [vmem:[%s12643_s11 + $0x10] sm:$0xff]  }
 0x12a   : > { %v9785_v33 = vpop.f32.mrb[20].mxu0  ;;  %v12689_v39 = vsel %vm578_vm0, %v15308_v6, %v11198_v5  ;;  %v12696_v48 = vsel %vm578_vm0, %v11198_v5, %v15307_v59  ;;  %v12701_v26 = vunpack.c.l.bf16 %v9142_v41 }
 0x12b   : > { %v9849_v45 = vpop.f32.mrb[20].mxu1  ;;  %v864_v13 = vpop.f32.mrb[21].mxu0  ;;  %15790 = vst [vmem:[#allocation51_spill] sm:$0xff] %v12689_v39  ;;  %15791 = vst [vmem:[#allocation43_spill] sm:$0xff] %v12696_v48 }
 0x12c   : > { %v12645_v60 = vadd.f32 %v9849_v45, %v9785_v33  ;;  %v1121_v24 = vpop.f32.mrb[21].mxu1  ;;  %v9786_v3 = vpop.f32.mrb[22].mxu0  ;;  %15792 = vst [vmem:[#allocation63_spill] sm:$0xff] %v12701_v26 }
 0x12d   : > { %v9850_v11 = vpop.f32.mrb[22].mxu1  ;;  %v866_v0 = vpop.f32.mrb[23].mxu0  ;;  %v2499_v3 = vrot.slane %v12438_v28, 1 }
 0x12e   : > { %v1123_v61 = vpop.f32.mrb[23].mxu1  ;;  %v12703_v11 = vunpack.c.h.bf16 %v9142_v41 }
 0x12f   : > { %v12651_v8 = vadd.f32 %v1123_v61, %v866_v0  ;;  %10052 = vmatmul.mubr.bf16.gmra.mrb[128].mxu0 %v2140_v22  ;;  %v15789_v22 = vld [vmem:[#allocation37_spill] sm:$0xff] }
 0x130   : > { %10116 = vmatmul.mubr.bf16.gmra.mrb[128].mxu1 %v2566_v12  ;;  %10055 = vmatprep.mubr.bf16.mxu0 %v11075_v32  ;;  %v2498_v24 = vrot.slane %v15789_v22, 1  ;;  %15793 = vst [vmem:[#allocation56_spill] sm:$0xff] %v12703_v11 }
 0x131   : > { %10119 = vmatprep.mubr.bf16.mxu1 %v2567_v56 }
 0x132   : > { %v9789_v43 = vpop.f32.mrb[24].mxu0  ;;  %v12707_v56 = vsel %vm1270_vm1, %v2498_v24, %v2499_v3  ;;  %v12712_v61 = vsel %vm1270_vm1, %v11384_v10, %v2498_v24 }
 0x133   : > { %v9853_v9 = vpop.f32.mrb[24].mxu1  ;;  %v878_v30 = vpop.f32.mrb[25].mxu0  ;;  %15794 = vst [vmem:[#allocation42_spill] sm:$0xff] %v12707_v56  ;;  %15795 = vst [vmem:[#allocation70_spill] sm:$0xff] %v12712_v61 }
 0x134   : > { %v1135_v15 = vpop.f32.mrb[25].mxu1  ;;  %v9790_v16 = vpop.f32.mrb[26].mxu0  ;;  %v4287_v9 = vrot.slane %v12701_v26, 7 }
 0x135   : > { %v12674_v42 = vadd.f32 %v1135_v15, %v878_v30  ;;  %v9854_v21 = vpop.f32.mrb[26].mxu1  ;;  %v881_v33 = vpop.f32.mrb[27].mxu0  ;;  %v15306_v30 = vrot.slane %v12703_v11, 7 }
 0x136   : > { %v12678_v45 = vadd.f32 %v9854_v21, %v9790_v16  ;;  %v1138_v13 = vpop.f32.mrb[27].mxu1 }
 0x137   : > { %v12682_v12 = vadd.f32 %v1138_v13, %v881_v33  ;;  %10056 = vmatmul.mubr.bf16.gmra.mrb[132].mxu0 %v2142_v49  ;;  %v2571_v13 = vpack.c.bf16 %v12707_v56, %v12712_v61 }
 0x138   : > { %10120 = vmatmul.mubr.bf16.gmra.mrb[132].mxu1 %v2568_v38  ;;  %10059 = vmatprep.mubr.bf16.mxu0 %v2143_v52  ;;  %v2570_v38 = vpack.c.bf16 %v12466_v34, %v11917_v27  ;;  %v2145_v52 = vpack.c.bf16 %v15789_v22, %v15765_v63  ;;  %v12738_v27 = vsel %vm578_vm0, %v4287_v9, %v15306_v30  ;;  %v9143_v22 = vld [vmem:[%s12643_s11 + $0x18] sm:$0xff]  }
 0x139   : > { %10123 = vmatprep.mubr.bf16.mxu1 %v2569_v37  ;;  %15797 = vst [vmem:[#allocation73_spill] sm:$0xff] %v12738_v27  ;;  %v15807_v34 = vld [vmem:[#allocation19_spill] sm:$0xff] }
 0x13a   : > { %v9793_v0 = vpop.f32.mrb[28].mxu0 }
 0x13b   : > { %v9857_v32 = vpop.f32.mrb[28].mxu1  ;;  %v893_v43 = vpop.f32.mrb[29].mxu0 }
 0x13c   : > { %v12716_v49 = vadd.f32 %v9857_v32, %v9793_v0  ;;  %v1150_v15 = vpop.f32.mrb[29].mxu1  ;;  %v9794_v16 = vpop.f32.mrb[30].mxu0  ;;  %v11076_v0 = vld [vmem:[%s11235_s28 + $0x70] sm:$0xff]   ;;  %v12732_v32 = vsel %vm578_vm0, %v11198_v5, %v4287_v9 }
 0x13d   : > { %v12722_v21 = vadd.f32 %v1150_v15, %v893_v43  ;;  %v9858_v33 = vpop.f32.mrb[30].mxu1  ;;  %v896_v37 = vpop.f32.mrb[31].mxu0  ;;  %15796 = vst [vmem:[#allocation62_spill] sm:$0xff] %v12732_v32  ;;  %v12743_v15 = vunpack.c.l.bf16 %v9143_v22 }
 0x13e   : > { %v12726_v24 = vadd.f32 %v9858_v33, %v9794_v16  ;;  %v1153_v41 = vpop.f32.mrb[31].mxu1  ;;  %v12745_v16 = vunpack.c.h.bf16 %v9143_v22  ;;  %v12750_v33 = vsel %vm1270_vm1, %v2499_v3, %v11384_v10  ;;  %v15801_v3 = vld [vmem:[#allocation6_spill] sm:$0xff] }
 0x13f   : > { %10060 = vmatmul.mubr.bf16.gmra.mrb[136].mxu0 %v11076_v0  ;;  %15798 = vst [vmem:[#allocation57_spill] sm:$0xff] %v12743_v15  ;;  %15800 = vst [vmem:[#allocation68_spill] sm:$0xff] %v12750_v33  ;;  %v2572_v35 = vpack.c.bf16 %v15801_v3, %v12750_v33 }
 0x140   : > { %10124 = vmatmul.mubr.bf16.gmra.mrb[136].mxu1 %v2570_v38  ;;  %10063 = vmatprep.mubr.bf16.mxu0 %v2145_v52  ;;  %15799 = vst [vmem:[#allocation64_spill] sm:$0xff] %v12745_v16  ;;  %v2146_v38 = vpack.c.bf16 %v15765_v63, %v12438_v28  ;;  %v15309_v52 = vrot.slane %v12743_v15, 7  ;;  %v4291_v0 = vrot.slane %v12745_v16, 7 }
 0x141   : > { %10127 = vmatprep.mubr.bf16.mxu1 %v2571_v13 }
 0x142   : > { %v9797_v37 = vpop.f32.mrb[32].mxu0  ;;  %v12766_v28 = vsel %vm578_vm0, %v15309_v52, %v4291_v0 }
 0x143   : > { %v9861_v9 = vpop.f32.mrb[32].mxu1  ;;  %v908_v41 = vpop.f32.mrb[33].mxu0  ;;  %15802 = vst [vmem:[#allocation69_spill] sm:$0xff] %v12766_v28 }
 0x144   : > { %v12756_v43 = vadd.f32 %v9861_v9, %v9797_v37  ;;  %v1165_v13 = vpop.f32.mrb[33].mxu1  ;;  %v9798_v22 = vpop.f32.mrb[34].mxu0  ;;  %v12769_v37 = vld [vmem:[%s12643_s11 + $0x20] sm:$0xff]   ;;  %v12774_v9 = vsel %vm578_vm0, %v4291_v0, %v11198_v5 }
 0x145   : > { %v9862_v30 = vpop.f32.mrb[34].mxu1  ;;  %v910_v59 = vpop.f32.mrb[35].mxu0  ;;  %15803 = vst [vmem:[#allocation7_spill] sm:$0xff] %v12774_v9  ;;  %v11077_v13 = vld [vmem:[%s11235_s28 + $0x8] sm:$0xff]  }
 0x146   : > { %v1167_v6 = vpop.f32.mrb[35].mxu1  ;;  %v15804_v30 = vld [vmem:[#allocation17_spill] sm:$0xff] }
 0x147   : > { %v12760_v41 = vadd.f32 %v1167_v6, %v910_v59  ;;  %10064 = vmatmul.mubr.bf16.gmra.mrb[140].mxu0 %v2146_v38  ;;  %v12780_v59 = vunpack.c.h.bf16 %v12769_v37  ;;  %v12783_v38 = vld [vmem:[%s12643_s11 + $0x28] sm:$0xff]  }
 0x148   : > { %10128 = vmatmul.mubr.bf16.gmra.mrb[140].mxu1 %v2572_v35  ;;  %10147 = vmatprep.mubr.bf16.mxu0 %v15804_v30  ;;  %v12787_v22 = vunpack.c.l.bf16 %v12783_v38  ;;  %v10992_v30 = vld [vmem:[%s15170_s3 + $0x8] sm:$0xff]  }
 0x149   : > { %15805 = vst [vmem:[#allocation55_spill] sm:$0xff] %v12780_v59  ;;  %10211 = vmatprep.mubr.bf16.mxu1 %v11077_v13  ;;  %v15316_v35 = vrot.slane %v12780_v59, 7  ;;  %v15814_v59 = vld [vmem:[#allocation25_spill] sm:$0xff] }
 0x14a   : > { %15806 = vst [vmem:[#allocation15_spill] sm:$0xff] %v12787_v22  ;;  %v9801_v3 = vpop.f32.mrb[36].mxu0 }
 0x14b   : > { %v9865_v52 = vpop.f32.mrb[36].mxu1  ;;  %v922_v0 = vpop.f32.mrb[37].mxu0  ;;  %v10991_v3 = vld [vmem:[%s15169_s2 + $0x208] sm:$0xff]  }
 0x14c   : > { %v1179_v63 = vpop.f32.mrb[37].mxu1  ;;  %v9802_v6 = vpop.f32.mrb[38].mxu0 }
 0x14d   : > { %v12791_v23 = vadd.f32 %v1179_v63, %v922_v0  ;;  %v9866_v33 = vpop.f32.mrb[38].mxu1  ;;  %v925_v56 = vpop.f32.mrb[39].mxu0  ;;  %v12809_v63 = vsel %vm578_vm0, %v15316_v35, %v11198_v5  ;;  %v15813_v35 = vld [vmem:[#allocation27_spill] sm:$0xff] }
 0x14e   : > { %v12793_v61 = vadd.f32 %v9866_v33, %v9802_v6  ;;  %v1182_v13 = vpop.f32.mrb[39].mxu1  ;;  %15808 = vst [vmem:[#allocation53_spill] sm:$0xff] %v12809_v63  ;;  %v15809_v33 = vrot.slane %v12787_v22, 7  ;;  %v9146_v6 = vld [vmem:[%s12643_s11 + $0x30] sm:$0xff]  }
 0x14f   : > { %v12798_v52 = vadd.f32 %v1182_v13, %v925_v56  ;;  %10148 = vmatmul.mubr.bf16.vlgmr.msra.gmra.mrb[144].mxu0 %v15807_v34  ;;  %v15811_v34 = vld [vmem:[#allocation18_spill] sm:$0xff]  ;;  %v12823_v13 = vunpack.c.l.bf16 %v9146_v6 }
 0x150   : > { %v12816_v56 = vsel %vm578_vm0, %v11198_v5, %v15809_v33  ;;  %10212 = vmatmul.mubr.bf16.vlgmr.msra.gmra.mrb[144].mxu1 %v15811_v34  ;;  %10260 = vmatpush3.bf16.msra.mxu0 %v12575_v50  ;;  %v12830_v33 = vunpack.c.h.bf16 %v9146_v6  ;;  %v10994_v50 = vld [vmem:[%s15170_s3 + $0x10] sm:$0xff]  }
 0x151   : > { %15810 = vst [vmem:[#allocation16_spill] sm:$0xff] %v12816_v56  ;;  %15812 = vst [vmem:[#allocation59_spill] sm:$0xff] %v12823_v13  ;;  %10324 = vmatpush3.bf16.msra.mxu1 %v12580_v57  ;;  %10151 = vmatprep.mubr.bf16.mxu0 %v15813_v35  ;;  %v4299_v57 = vrot.slane %v12823_v13, 7 }
 0x152   : > { %v9805_v9 = vpop.f32.mrb[40].mxu0  ;;  %10215 = vmatprep.mubr.bf16.mxu1 %v15814_v59  ;;  %10261 = vmatprep.subr.bf16.mxu0 %v10991_v3  ;;  %v15336_v35 = vrot.slane %v12830_v33, 7 }
 0x153   : > { %v9869_v34 = vpop.f32.mrb[40].mxu1  ;;  %v937_v0 = vpop.f32.mrb[41].mxu0  ;;  %10325 = vmatprep.subr.bf16.mxu1 %v10992_v30 }
 0x154   : > { %v12838_v56 = vadd.f32 %v9869_v34, %v9805_v9  ;;  %v1194_v63 = vpop.f32.mrb[41].mxu1  ;;  %v9806_v6 = vpop.f32.mrb[42].mxu0  ;;  %10262 = vmatpush3.bf16.msra.mxu0 %v10991_v3  ;;  %v10995_v9 = vld [vmem:[%s15169_s2 + $0x218] sm:$0xff]   ;;  %v15818_v34 = vld [vmem:[#allocation30_spill] sm:$0xff] }
 0x155   : > { %v12840_v59 = vadd.f32 %v1194_v63, %v937_v0  ;;  %v9870_v28 = vpop.f32.mrb[42].mxu1  ;;  %v940_v27 = vpop.f32.mrb[43].mxu0  ;;  %10326 = vmatpush3.bf16.msra.mxu1 %v10992_v30  ;;  %10263 = vmatprep.subr.bf16.mxu0 %v10993_v19  ;;  %v10996_v3 = vld [vmem:[%s15170_s3 + $0x18] sm:$0xff]   ;;  %v15821_v63 = vld [vmem:[#allocation33_spill] sm:$0xff] }
 0x156   : > { %15815 = vst [vmem:[#allocation60_spill] sm:$0xff] %v12838_v56  ;;  %v12842_v15 = vadd.f32 %v9870_v28, %v9806_v6  ;;  %v1197_v32 = vpop.f32.mrb[43].mxu1  ;;  %10327 = vmatprep.subr.bf16.mxu1 %v10994_v50  ;;  %v12854_v27 = vsel %vm578_vm0, %v11198_v5, %v4299_v57  ;;  %v9147_v28 = vld [vmem:[%s12643_s11 + $0x38] sm:$0xff]  }
 0x157   : > { %15816 = vst [vmem:[#allocation24_spill] sm:$0xff] %v12840_v59  ;;  %10152 = vmatmul.mubr.bf16.gmra.mrb[148].mxu0 %v15818_v34  ;;  %15819 = vst [vmem:[#allocation66_spill] sm:$0xff] %v12854_v27  ;;  %v12860_v32 = vsel %vm578_vm0, %v4299_v57, %v15336_v35  ;;  %v11078_v30 = vld [vmem:[%s11235_s28 + $0x18] sm:$0xff]   ;;  %v12867_v6 = vunpack.c.l.bf16 %v9147_v28  ;;  %v12869_v34 = vunpack.c.h.bf16 %v9147_v28  ;;  %v10997_v57 = vld [vmem:[%s15169_s2 + $0x220] sm:$0xff]  }
 0x158   : > { %15817 = vst [vmem:[#allocation26_spill] sm:$0xff] %v12842_v15  ;;  %15820 = vst [vmem:[#allocation65_spill] sm:$0xff] %v12860_v32  ;;  %10216 = vmatmul.mubr.bf16.gmra.mrb[148].mxu1 %v11078_v30  ;;  %10155 = vmatprep.mubr.bf16.mxu0 %v15821_v63  ;;  %v15824_v15 = vld [vmem:[#allocation32_spill] sm:$0xff] }
 0x159   : > { %15822 = vst [vmem:[#allocation52_spill] sm:$0xff] %v12867_v6  ;;  %15823 = vst [vmem:[#allocation54_spill] sm:$0xff] %v12869_v34  ;;  %10219 = vmatprep.mubr.bf16.mxu1 %v15824_v15  ;;  %10264 = vmatpush3.bf16.msra.mxu0 %v10993_v19  ;;  %v10998_v63 = vld [vmem:[%s15170_s3 + $0x20] sm:$0xff]   ;;  %v4303_v0 = vrot.slane %v12869_v34, 7 }
 0x15a   : > { %v9809_v48 = vpop.f32.mrb[44].mxu0  ;;  %10328 = vmatpush3.bf16.msra.mxu1 %v10994_v50  ;;  %10265 = vmatprep.subr.bf16.mxu0 %v10995_v9  ;;  %v15827_v34 = vld [vmem:[#allocation36_spill] sm:$0xff] }
 0x15b   : > { %v9873_v30 = vpop.f32.mrb[44].mxu1  ;;  %v952_v35 = vpop.f32.mrb[45].mxu0  ;;  %10329 = vmatprep.subr.bf16.mxu1 %v10996_v3 }
 0x15c   : > { %v12880_v19 = vadd.f32 %v9873_v30, %v9809_v48  ;;  %v1209_v15 = vpop.f32.mrb[45].mxu1  ;;  %v9810_v50 = vpop.f32.mrb[46].mxu0  ;;  %v10999_v35 = vld [vmem:[%s15169_s2 + $0x228] sm:$0xff]  }
 0x15d   : > { %v9874_v32 = vpop.f32.mrb[46].mxu1  ;;  %v954_v27 = vpop.f32.mrb[47].mxu0  ;;  %10266 = vmatpush3.bf16.msra.mxu0 %v10995_v9  ;;  %v11000_v48 = vld [vmem:[%s15170_s3 + $0x28] sm:$0xff]   ;;  %v15828_v9 = vrot.slane %v12867_v6, 7 }
 0x15e   : > { %15825 = vst [vmem:[#allocation37_spill] sm:$0xff] %v12880_v19  ;;  %v1211_v59 = vpop.f32.mrb[47].mxu1  ;;  %10330 = vmatpush3.bf16.msra.mxu1 %v10996_v3  ;;  %10267 = vmatprep.subr.bf16.mxu0 %v10997_v57  ;;  %v12898_v3 = vld [vmem:[%s12643_s11 + $0x40] sm:$0xff]   ;;  %v12913_v50 = vld [vmem:[%s12643_s11 + $0x48] sm:$0xff]  }
 0x15f   : > { %v12885_v28 = vadd.f32 %v1211_v59, %v954_v27  ;;  %10156 = vmatmul.mubr.bf16.gmra.mrb[152].mxu0 %v15827_v34  ;;  %10331 = vmatprep.subr.bf16.mxu1 %v10998_v63  ;;  %v12895_v32 = vsel %vm578_vm0, %v15828_v9, %v4303_v0  ;;  %15830 = vst [vmem:[#allocation19_spill] sm:$0xff] %v12898_v3  ;;  %v15832_v27 = vld [vmem:[#allocation34_spill] sm:$0xff]  ;;  %v12910_v15 = vunpack.c.h.bf16 %v12898_v3  ;;  %15835 = vst [vmem:[#allocation25_spill] sm:$0xff] %v12913_v50  ;;  %v11079_v9 = vld [vmem:[%s11235_s28 + $0x28] sm:$0xff]  }
 0x160   : > { %15829 = vst [vmem:[#allocation17_spill] sm:$0xff] %v12895_v32  ;;  %v12903_v59 = vsel %vm578_vm0, %v4303_v0, %v11198_v5  ;;  %10220 = vmatmul.mubr.bf16.gmra.mrb[152].mxu1 %v15832_v27  ;;  %v15833_v34 = vld [vmem:[#allocation46_spill] sm:$0xff]  ;;  %v12917_v6 = vunpack.c.l.bf16 %v12913_v50 }
 0x161   : > { %15826 = vst [vmem:[#allocation6_spill] sm:$0xff] %v12885_v28  ;;  %15831 = vst [vmem:[#allocation18_spill] sm:$0xff] %v12903_v59  ;;  %10159 = vmatprep.mubr.bf16.mxu0 %v15833_v34  ;;  %10223 = vmatprep.mubr.bf16.mxu1 %v11079_v9  ;;  %v11001_v27 = vld [vmem:[%s15169_s2 + $0x230] sm:$0xff]   ;;  %v15351_v9 = vrot.slane %v12910_v15, 7 }
 0x162   : > { %15834 = vst [vmem:[#allocation27_spill] sm:$0xff] %v12910_v15  ;;  %10268 = vmatpush3.bf16.msra.mxu0 %v10997_v57  ;;  %15836 = vst [vmem:[#allocation30_spill] sm:$0xff] %v12917_v6  ;;  %v9893_v0 = vpop.f32.mrb[48].mxu0  ;;  %10332 = vmatpush3.bf16.msra.mxu1 %v10998_v63  ;;  %v11002_v59 = vld [vmem:[%s15170_s3 + $0x30] sm:$0xff]   ;;  %v11003_v57 = vld [vmem:[%s15169_s2 + $0x238] sm:$0xff]  }
 0x163   : > { %10269 = vmatprep.subr.bf16.mxu0 %v10999_v35  ;;  %v9957_v34 = vpop.f32.mrb[48].mxu1  ;;  %v1442_v30 = vpop.f32.mrb[49].mxu0  ;;  %10333 = vmatprep.subr.bf16.mxu1 %v11000_v48 }
 0x164   : > { %v1617_v32 = vadd.f32 %v1442_v30, %v12554_v46  ;;  %v1916_v0 = vpop.f32.mrb[49].mxu1  ;;  %v9894_v63 = vpop.f32.mrb[50].mxu0  ;;  %v15838_v30 = vld [vmem:[#allocation47_spill] sm:$0xff] }
 0x165   : > { %v1619_v50 = vadd.f32 %v9894_v63, %v12556_v58  ;;  %v9958_v28 = vpop.f32.mrb[50].mxu1  ;;  %v1445_v19 = vpop.f32.mrb[51].mxu0  ;;  %v11004_v58 = vld [vmem:[%s15170_s3 + $0x38] sm:$0xff]  }
 0x166   : > { %10270 = vmatpush3.bf16.msra.mxu0 %v10999_v35  ;;  %v12929_v34 = vadd.f32 %v1916_v0, %v1617_v32  ;;  %v1618_v3 = vadd.f32 %v1445_v19, %v12561_v1  ;;  %v1919_v56 = vpop.f32.mrb[51].mxu1  ;;  %10334 = vmatpush3.bf16.msra.mxu1 %v11000_v48  ;;  %v12946_v1 = vsel %vm578_vm0, %v15351_v9, %v11198_v5  ;;  %v15840_v19 = vrot.slane %v12917_v6, 7  ;;  %v9150_v35 = vld [vmem:[%s12643_s11 + $0x50] sm:$0xff]   ;;  %v15843_v32 = vld [vmem:[#allocation35_spill] sm:$0xff] }
 0x167   : > { %10271 = vmatprep.subr.bf16.mxu0 %v11001_v27  ;;  %v12935_v46 = vadd.f32 %v9958_v28, %v1619_v50  ;;  %10160 = vmatmul.mubr.bf16.gmra.mrb[156].mxu0 %v15838_v30  ;;  %15839 = vst [vmem:[#allocation32_spill] sm:$0xff] %v12946_v1  ;;  %v15844_v50 = vld [vmem:[#allocation49_spill] sm:$0xff]  ;;  %v12962_v63 = vunpack.c.l.bf16 %v9150_v35  ;;  %v15846_v30 = vld [vmem:[#allocation48_spill] sm:$0xff]  ;;  %v12965_v9 = vunpack.c.h.bf16 %v9150_v35 }
 0x168   : > { %10335 = vmatprep.subr.bf16.mxu1 %v11002_v59  ;;  %v12953_v28 = vsel %vm578_vm0, %v11198_v5, %v15840_v19  ;;  %v12956_v48 = vadd.f32 %v1919_v56, %v1618_v3  ;;  %10224 = vmatmul.mubr.bf16.gmra.mrb[156].mxu1 %v15843_v32  ;;  %v12970_v56 = vld [vmem:[%s15170_s3 + $0x40] sm:$0xff]  }
 0x169   : > { %15837 = vst [vmem:[#allocation33_spill] sm:$0xff] %v12935_v46  ;;  %15841 = vst [vmem:[#allocation36_spill] sm:$0xff] %v12953_v28  ;;  %10163 = vmatprep.mubr.bf16.mxu0 %v15844_v50  ;;  %10227 = vmatprep.mubr.bf16.mxu1 %v15846_v30  ;;  %v12976_v50 = vld [vmem:[%s15170_s3 + $0x80] sm:$0xff]  }
 0x16a   : > { %15842 = vst [vmem:[#allocation34_spill] sm:$0xff] %v12956_v48  ;;  %15845 = vst [vmem:[#allocation46_spill] sm:$0xff] %v12962_v63  ;;  %10272 = vmatpush3.bf16.msra.mxu0 %v11001_v27  ;;  %v9897_v15 = vpop.f32.mrb[52].mxu0  ;;  %10336 = vmatpush3.bf16.msra.mxu1 %v11002_v59  ;;  %v4311_v27 = vrot.slane %v12962_v63, 7 }
 0x16b   : > { %10273 = vmatprep.subr.bf16.mxu0 %v11003_v57  ;;  %v1621_v3 = vadd.f32 %v9897_v15, %v12582_v54  ;;  %v9961_v19 = vpop.f32.mrb[52].mxu1  ;;  %v1457_v32 = vpop.f32.mrb[53].mxu0  ;;  %10337 = vmatprep.subr.bf16.mxu1 %v11004_v58 }
 0x16c   : > { %v1620_v35 = vadd.f32 %v1457_v32, %v12586_v53  ;;  %v1931_v30 = vpop.f32.mrb[53].mxu1  ;;  %v9898_v0 = vpop.f32.mrb[54].mxu0  ;;  %v15848_v53 = vld [vmem:[#allocation50_spill] sm:$0xff] }
 0x16d   : > { %v12981_v28 = vadd.f32 %v9961_v19, %v1621_v3  ;;  %v1622_v54 = vadd.f32 %v9898_v0, %v12590_v36  ;;  %v9962_v15 = vpop.f32.mrb[54].mxu1  ;;  %v1460_v1 = vpop.f32.mrb[55].mxu0  ;;  %v12994_v3 = vsel %vm578_vm0, %v11198_v5, %v4311_v27  ;;  %v15850_v36 = vrot.slane %v12965_v9, 7 }
 0x16e   : > { %10274 = vmatpush3.bf16.msra.mxu0 %v11003_v57  ;;  %v12984_v48 = vadd.f32 %v1931_v30, %v1620_v35  ;;  %v1934_v46 = vpop.f32.mrb[55].mxu1  ;;  %10338 = vmatpush3.bf16.msra.mxu1 %v11004_v58  ;;  %15849 = vst [vmem:[#allocation35_spill] sm:$0xff] %v12994_v3  ;;  %v11080_v58 = vld [vmem:[%s11235_s28 + $0x38] sm:$0xff]   ;;  %v15852_v1 = vld [vmem:[#allocation74_spill] sm:$0xff] }
 0x16f   : > { %10387 = vmatprep.subr.bf16.mxu0 %v12970_v56  ;;  %v12987_v59 = vadd.f32 %v9962_v15, %v1622_v54  ;;  %10164 = vmatmul.mubr.bf16.gmra.mrb[160].mxu0 %v15848_v53  ;;  %v13000_v57 = vsel %vm578_vm0, %v4311_v27, %v15850_v36  ;;  %v9151_v46 = vld [vmem:[%s12643_s11 + $0x58] sm:$0xff]  }
 0x170   : > { %10451 = vmatprep.subr.bf16.mxu1 %v12976_v50  ;;  %15851 = vst [vmem:[#allocation49_spill] sm:$0xff] %v13000_v57  ;;  %10228 = vmatmul.mubr.bf16.gmra.mrb[160].mxu1 %v11080_v58  ;;  %v13007_v19 = vunpack.c.l.bf16 %v9151_v46  ;;  %v13009_v32 = vunpack.c.h.bf16 %v9151_v46  ;;  %v15855_v35 = vld [vmem:[#allocation71_spill] sm:$0xff] }
 0x171   : > { %15847 = vst [vmem:[#allocation47_spill] sm:$0xff] %v12987_v59  ;;  %10167 = vmatprep.mubr.bf16.mxu0 %v15852_v1  ;;  %10231 = vmatprep.mubr.bf16.mxu1 %v15855_v35  ;;  %v15857_v59 = vld [vmem:[#allocation75_spill] sm:$0xff] }
 0x172   : > { %15853 = vst [vmem:[#allocation48_spill] sm:$0xff] %v13007_v19  ;;  %15854 = vst [vmem:[#allocation50_spill] sm:$0xff] %v13009_v32  ;;  %v9901_v30 = vpop.f32.mrb[56].mxu0  ;;  %v15362_v58 = vrot.slane %v13007_v19, 7  ;;  %v4315_v1 = vrot.slane %v13009_v32, 7 }
 0x173   : > { %v1624_v54 = vadd.f32 %v9901_v30, %v12600_v29  ;;  %v9965_v27 = vpop.f32.mrb[56].mxu1  ;;  %v1472_v15 = vpop.f32.mrb[57].mxu0  ;;  %v13020_v29 = vld [vmem:[%s12643_s11 + $0x60] sm:$0xff]  }
 0x174   : > { %v1946_v53 = vpop.f32.mrb[57].mxu1  ;;  %v9902_v36 = vpop.f32.mrb[58].mxu0  ;;  %v15859_v15 = vld [vmem:[#allocation72_spill] sm:$0xff] }
 0x175   : > { %v13015_v0 = vadd.f32 %v9965_v27, %v1624_v54  ;;  %v9966_v46 = vpop.f32.mrb[58].mxu1  ;;  %v1474_v57 = vpop.f32.mrb[59].mxu0  ;;  %v15860_v53 = vld [vmem:[#allocation76_spill] sm:$0xff]  ;;  %v13030_v54 = vsel %vm578_vm0, %v15362_v58, %v4315_v1 }
 0x176   : > { %v1623_v3 = vadd.f32 %v1474_v57, %v12604_v25  ;;  %v1948_v35 = vpop.f32.mrb[59].mxu1  ;;  %15861 = vst [vmem:[#allocation75_spill] sm:$0xff] %v13030_v54  ;;  %v13035_v25 = vsel %vm578_vm0, %v4315_v1, %v11198_v5  ;;  %v11081_v57 = vld [vmem:[%s11235_s28 + $0x48] sm:$0xff]   ;;  %v15866_v54 = vld [vmem:[#allocation78_spill] sm:$0xff] }
 0x177   : > { %15856 = vst [vmem:[#allocation74_spill] sm:$0xff] %v13015_v0  ;;  %10168 = vmatmul.mubr.bf16.gmra.mrb[164].mxu0 %v15857_v59  ;;  %15862 = vst [vmem:[#allocation72_spill] sm:$0xff] %v13035_v25  ;;  %v13038_v59 = vunpack.c.h.bf16 %v13020_v29 }
 0x178   : > { %v13022_v30 = vadd.f32 %v1948_v35, %v1623_v3  ;;  %10232 = vmatmul.mubr.bf16.gmra.mrb[164].mxu1 %v15859_v15  ;;  %10171 = vmatprep.mubr.bf16.mxu0 %v15860_v53  ;;  %v13041_v3 = vld [vmem:[%s12643_s11 + $0x68] sm:$0xff]  }
 0x179   : > { %15863 = vst [vmem:[#allocation76_spill] sm:$0xff] %v13038_v59  ;;  %10235 = vmatprep.mubr.bf16.mxu1 %v11081_v57  ;;  %v13047_v36 = vunpack.c.l.bf16 %v13041_v3  ;;  %v15372_v1 = vrot.slane %v13038_v59, 7 }
 0x17a   : > { %15858 = vst [vmem:[#allocation71_spill] sm:$0xff] %v13022_v30  ;;  %v9905_v46 = vpop.f32.mrb[60].mxu0 }
 0x17b   : > { %15864 = vst [vmem:[#allocation92_spill] sm:$0xff] %v13047_v36  ;;  %v9969_v35 = vpop.f32.mrb[60].mxu1  ;;  %v1486_v15 = vpop.f32.mrb[61].mxu0  ;;  %v15371_v53 = vrot.slane %v13047_v36, 7 }
 0x17c   : > { %v1625_v58 = vadd.f32 %v1486_v15, %v12616_v18  ;;  %v1960_v19 = vpop.f32.mrb[61].mxu1  ;;  %v9906_v30 = vpop.f32.mrb[62].mxu0  ;;  %v13064_v18 = vsel %vm578_vm0, %v15372_v1, %v11198_v5 }
 0x17d   : > { %v1627_v57 = vadd.f32 %v9906_v30, %v12620_v55  ;;  %v9970_v0 = vpop.f32.mrb[62].mxu1  ;;  %v1489_v32 = vpop.f32.mrb[63].mxu0  ;;  %15867 = vst [vmem:[#allocation78_spill] sm:$0xff] %v13064_v18  ;;  %v13071_v55 = vsel %vm578_vm0, %v11198_v5, %v15371_v53 }
 0x17e   : > { %v13053_v27 = vadd.f32 %v1960_v19, %v1625_v58  ;;  %v1626_v25 = vadd.f32 %v1489_v32, %v12622_v62  ;;  %v1963_v46 = vpop.f32.mrb[63].mxu1  ;;  %15868 = vst [vmem:[#allocation94_spill] sm:$0xff] %v13071_v55  ;;  %v9154_v62 = vld [vmem:[%s12643_s11 + $0x70] sm:$0xff]   ;;  %v15871_v32 = vld [vmem:[#allocation80_spill] sm:$0xff] }
 0x17f   : > { %v13056_v35 = vadd.f32 %v9970_v0, %v1627_v57  ;;  %10172 = vmatmul.mubr.bf16.gmra.mrb[168].mxu0 %v15866_v54  ;;  %v15870_v0 = vld [vmem:[#allocation77_spill] sm:$0xff]  ;;  %v13080_v30 = vunpack.c.l.bf16 %v9154_v62  ;;  %v15873_v54 = vld [vmem:[#allocation79_spill] sm:$0xff]  ;;  %v13083_v15 = vunpack.c.h.bf16 %v9154_v62 }
 0x180   : > { %v13074_v19 = vadd.f32 %v1963_v46, %v1626_v25  ;;  %10236 = vmatmul.mubr.bf16.gmra.mrb[168].mxu1 %v15870_v0  ;;  %10175 = vmatprep.mubr.bf16.mxu0 %v15871_v32 }
 0x181   : > { %15865 = vst [vmem:[#allocation93_spill] sm:$0xff] %v13056_v35  ;;  %15872 = vst [vmem:[#allocation77_spill] sm:$0xff] %v13080_v30  ;;  %10239 = vmatprep.mubr.bf16.mxu1 %v15873_v54  ;;  %v4323_v25 = vrot.slane %v13080_v30, 7  ;;  %v15874_v35 = vld [vmem:[#allocation81_spill] sm:$0xff] }
 0x182   : > { %15869 = vst [vmem:[#allocation95_spill] sm:$0xff] %v13074_v19  ;;  %v9909_v57 = vpop.f32.mrb[64].mxu0  ;;  %v15880_v30 = vld [vmem:[#allocation85_spill] sm:$0xff] }
 0x183   : > { %v1629_v53 = vadd.f32 %v9909_v57, %v12624_v44  ;;  %v9973_v1 = vpop.f32.mrb[64].mxu1  ;;  %v1501_v59 = vpop.f32.mrb[65].mxu0  ;;  %v13100_v46 = vsel %vm578_vm0, %v11198_v5, %v4323_v25 }
 0x184   : > { %v1628_v0 = vadd.f32 %v1501_v59, %v12630_v40  ;;  %v1975_v32 = vpop.f32.mrb[65].mxu1  ;;  %v9910_v58 = vpop.f32.mrb[66].mxu0  ;;  %15875 = vst [vmem:[#allocation80_spill] sm:$0xff] %v13100_v46  ;;  %v15876_v40 = vrot.slane %v13083_v15, 7 }
 0x185   : > { %v13089_v55 = vadd.f32 %v9973_v1, %v1629_v53  ;;  %v1630_v54 = vadd.f32 %v9910_v58, %v12634_v31  ;;  %v9974_v62 = vpop.f32.mrb[66].mxu1  ;;  %v1504_v18 = vpop.f32.mrb[67].mxu0  ;;  %v11082_v31 = vld [vmem:[%s11235_s28 + $0x58] sm:$0xff]  }
 0x186   : > { %v13092_v19 = vadd.f32 %v1975_v32, %v1628_v0  ;;  %v1978_v44 = vpop.f32.mrb[67].mxu1  ;;  %v13106_v59 = vsel %vm578_vm0, %v4323_v25, %v15876_v40  ;;  %v15878_v1 = vld [vmem:[#allocation83_spill] sm:$0xff]  ;;  %v15879_v18 = vld [vmem:[#allocation82_spill] sm:$0xff] }
 0x187   : > { %v13094_v57 = vadd.f32 %v9974_v62, %v1630_v54  ;;  %10176 = vmatmul.mubr.bf16.gmra.mrb[172].mxu0 %v15874_v35  ;;  %15877 = vst [vmem:[#allocation79_spill] sm:$0xff] %v13106_v59  ;;  %v15882_v59 = vld [vmem:[#allocation86_spill] sm:$0xff] }
 0x188   : > { %10240 = vmatmul.mubr.bf16.gmra.mrb[172].mxu1 %v11082_v31  ;;  %10179 = vmatprep.mubr.bf16.mxu0 %v15878_v1 }
 0x189   : > { %10243 = vmatprep.mubr.bf16.mxu1 %v15879_v18  ;;  %v15881_v18 = vld [vmem:[#allocation84_spill] sm:$0xff] }
 0x18a   : > { %v9913_v35 = vpop.f32.mrb[68].mxu0 }
 0x18b   : > { %v1632_v58 = vadd.f32 %v9913_v35, %v12645_v60  ;;  %v9977_v0 = vpop.f32.mrb[68].mxu1  ;;  %v1516_v32 = vpop.f32.mrb[69].mxu0  ;;  %v11083_v60 = vld [vmem:[%s11235_s28 + $0x68] sm:$0xff]   ;;  %v13124_v35 = vunpack.c.h.bf16 %v12661_v7 }
 0x18c   : > { %v1990_v54 = vpop.f32.mrb[69].mxu1  ;;  %v9914_v62 = vpop.f32.mrb[70].mxu0 }
 0x18d   : > { %v13114_v44 = vadd.f32 %v9977_v0, %v1632_v58  ;;  %v9978_v25 = vpop.f32.mrb[70].mxu1  ;;  %v1518_v40 = vpop.f32.mrb[71].mxu0  ;;  %15883 = vst [vmem:[#allocation81_spill] sm:$0xff] %v13124_v35  ;;  %v5039_v54 = vrot.slane %v12664_v14, 1 }
 0x18e   : > { %v1631_v31 = vadd.f32 %v1518_v40, %v12651_v8  ;;  %v1992_v1 = vpop.f32.mrb[71].mxu1  ;;  %v15383_v8 = vrot.slane %v13124_v35, 1 }
 0x18f   : > { %10180 = vmatmul.mubr.bf16.gmra.mrb[176].mxu0 %v15880_v30 }
 0x190   : > { %v13118_v53 = vadd.f32 %v1992_v1, %v1631_v31  ;;  %10244 = vmatmul.mubr.bf16.gmra.mrb[176].mxu1 %v15881_v18  ;;  %10183 = vmatprep.mubr.bf16.mxu0 %v15882_v59 }
 0x191   : > { %10247 = vmatprep.mubr.bf16.mxu1 %v11083_v60 }
 0x192   : > { %v9917_v58 = vpop.f32.mrb[72].mxu0 }
 0x193   : > { %v9981_v0 = vpop.f32.mrb[72].mxu1  ;;  %v1530_v32 = vpop.f32.mrb[73].mxu0  ;;  %v15884_v58 = vld [vmem:[#allocation88_spill] sm:$0xff] }
 0x194   : > { %v1633_v30 = vadd.f32 %v1530_v32, %v12674_v42  ;;  %v2004_v62 = vpop.f32.mrb[73].mxu1  ;;  %v9918_v25 = vpop.f32.mrb[74].mxu0  ;;  %v13139_v0 = vsel %vm1270_vm1, %v11384_v10, %v5039_v54  ;;  %v13145_v42 = vsel %vm1270_vm1, %v5039_v54, %v15383_v8  ;;  %v15887_v32 = vld [vmem:[#allocation87_spill] sm:$0xff]  ;;  %v3045_v54 = vpack.c.bf16 %v12475_v4, %v12443_v17 }
 0x195   : > { %v1635_v40 = vadd.f32 %v9918_v25, %v12678_v45  ;;  %v9982_v31 = vpop.f32.mrb[74].mxu1  ;;  %v1533_v59 = vpop.f32.mrb[75].mxu0  ;;  %15885 = vst [vmem:[#allocation83_spill] sm:$0xff] %v13139_v0  ;;  %15886 = vst [vmem:[#allocation82_spill] sm:$0xff] %v13145_v42 }
 0x196   : > { %v13130_v1 = vadd.f32 %v2004_v62, %v1633_v30  ;;  %v1634_v7 = vadd.f32 %v1533_v59, %v12682_v12  ;;  %v2007_v18 = vpop.f32.mrb[75].mxu1  ;;  %v15888_v12 = vld [vmem:[#allocation90_spill] sm:$0xff]  ;;  %v15889_v62 = vld [vmem:[#allocation89_spill] sm:$0xff] }
 0x197   : > { %v13133_v60 = vadd.f32 %v9982_v31, %v1635_v40  ;;  %10184 = vmatmul.mubr.bf16.gmra.mrb[180].mxu0 %v15884_v58 }
 0x198   : > { %v13147_v45 = vadd.f32 %v2007_v18, %v1634_v7  ;;  %10248 = vmatmul.mubr.bf16.gmra.mrb[180].mxu1 %v15887_v32  ;;  %10187 = vmatprep.mubr.bf16.mxu0 %v15888_v12  ;;  %v15386_v7 = vrot.slane %v12701_v26, 1  ;;  %v5043_v18 = vrot.slane %v12703_v11, 1 }
 0x199   : > { %10251 = vmatprep.mubr.bf16.mxu1 %v15889_v62  ;;  %v3046_v62 = vpack.c.bf16 %v11198_v5, %v12471_v47 }
 0x19a   : > { %v9921_v25 = vpop.f32.mrb[76].mxu0  ;;  %v13178_v47 = vsel %vm1270_vm1, %v5043_v18, %v11384_v10 }
 0x19b   : > { %v1637_v40 = vadd.f32 %v9921_v25, %v12716_v49  ;;  %v9985_v31 = vpop.f32.mrb[76].mxu1  ;;  %v1545_v59 = vpop.f32.mrb[77].mxu0  ;;  %15891 = vst [vmem:[#allocation84_spill] sm:$0xff] %v13178_v47  ;;  %v15894_v47 = vld [vmem:[#allocation5_spill] sm:$0xff] }
 0x19c   : > { %v1636_v58 = vadd.f32 %v1545_v59, %v12722_v21  ;;  %v2019_v32 = vpop.f32.mrb[77].mxu1  ;;  %v9922_v12 = vpop.f32.mrb[78].mxu0  ;;  %v13173_v21 = vsel %vm1270_vm1, %v15386_v7, %v5043_v18  ;;  %v13188_v59 = vunpack.c.l.bf16 %v12769_v37 }
 0x19d   : > { %v13162_v30 = vadd.f32 %v9985_v31, %v1637_v40  ;;  %v1638_v49 = vadd.f32 %v9922_v12, %v12726_v24  ;;  %v9986_v25 = vpop.f32.mrb[78].mxu1  ;;  %v1548_v8 = vpop.f32.mrb[79].mxu0  ;;  %15890 = vst [vmem:[#allocation85_spill] sm:$0xff] %v13173_v21  ;;  %v11084_v24 = vld [vmem:[%s11235_s28 + $0x78] sm:$0xff]   ;;  %v15892_v40 = vmov 0.0|0.0   ;;  %v13185_v31 = vunpack.c.l.bf16 %v12654_v2  ;;  %v15914_v21 = vld [vmem:[#allocation26_spill] sm:$0xff] }
 0x19e   : > { %v13165_v42 = vadd.f32 %v2019_v32, %v1636_v58  ;;  %v2022_v17 = vpop.f32.mrb[79].mxu1  ;;  %15893 = vst [vmem:[#allocation86_spill] sm:$0xff] %v13188_v59  ;;  %v15390_v12 = vrot.slane %v12745_v16, 1 }
 0x19f   : > { %v13167_v4 = vadd.f32 %v9986_v25, %v1638_v49  ;;  %10188 = vmatmul.mubr.bf16.gmra.mrb[184].mxu0 %v3045_v54  ;;  %v4281_v2 = vrot.slane %v13185_v31, 7 }
 0x1a0   : > { %10252 = vmatmul.mubr.bf16.gmra.mrb[184].mxu1 %v11084_v24  ;;  %10191 = vmatprep.mubr.bf16.mxu0 %v3046_v62  ;;  %v15389_v62 = vrot.slane %v13188_v59, 1 }
 0x1a1   : > { %10255 = vmatprep.mubr.bf16.mxu1 %v15892_v40 }
 0x1a2   : > { %v9925_v54 = vpop.f32.mrb[80].mxu0 }
 0x1a3   : > { %v1640_v58 = vadd.f32 %v9925_v54, %v12756_v43  ;;  %v9989_v32 = vpop.f32.mrb[80].mxu1  ;;  %v1560_v18 = vpop.f32.mrb[81].mxu0  ;;  %v13203_v43 = vsel %vm1270_vm1, %v15390_v12, %v11384_v10  ;;  %v13210_v54 = vsel %vm1270_vm1, %v11384_v10, %v15389_v62 }
 0x1a4   : > { %v2034_v49 = vpop.f32.mrb[81].mxu1  ;;  %v9926_v25 = vpop.f32.mrb[82].mxu0  ;;  %15895 = vst [vmem:[#allocation88_spill] sm:$0xff] %v13203_v43  ;;  %15896 = vst [vmem:[#allocation87_spill] sm:$0xff] %v13210_v54  ;;  %v13225_v18 = vunpack.c.h.bf16 %v12783_v38 }
 0x1a5   : > { %v13193_v17 = vadd.f32 %v9989_v32, %v1640_v58  ;;  %v9990_v24 = vpop.f32.mrb[82].mxu1  ;;  %v1562_v8 = vpop.f32.mrb[83].mxu0  ;;  %v13222_v32 = vsel %vm578_vm0, %v11198_v5, %v4281_v2 }
 0x1a6   : > { %v1639_v37 = vadd.f32 %v1562_v8, %v12760_v41  ;;  %v2036_v7 = vpop.f32.mrb[83].mxu1  ;;  %v15897_v41 = vld [vmem:[#allocation10_spill] sm:$0xff]  ;;  %15898 = vst [vmem:[#allocation90_spill] sm:$0xff] %v13222_v32  ;;  %15899 = vst [vmem:[#allocation89_spill] sm:$0xff] %v13225_v18  ;;  %v5051_v24 = vrot.slane %v12787_v22, 1  ;;  %v4375_v38 = vpack.c.bf16 %v13222_v32, %v11198_v5 }
 0x1a7   : > { %10192 = vmatmul.mubr.bf16.gmra.mrb[188].mxu0 %v15894_v47 }
 0x1a8   : > { %v13212_v58 = vadd.f32 %v2036_v7, %v1639_v37  ;;  %10256 = vmatmul.mubr.bf16.gmra.mrb[188].mxu1 %v15892_v40  ;;  %10275 = vmatprep.mubr.bf16.mxu0 %v15897_v41  ;;  %v15900_v7 = vrot.slane %v12658_v51, 7 }
 0x1a9   : > { %10339 = vmatprep.mubr.bf16.mxu1 %v15894_v47 }
 0x1aa   : > { %v9929_v49 = vpop.f32.mrb[84].mxu0  ;;  %v13231_v25 = vsel %vm578_vm0, %v4281_v2, %v15900_v7  ;;  %v4285_v7 = vrot.slane %v13124_v35, 7 }
 0x1ab   : > { %15901 = vst [vmem:[#allocation10_spill] sm:$0xff] %v13231_v25  ;;  %v9993_v37 = vpop.f32.mrb[84].mxu1  ;;  %v1574_v41 = vpop.f32.mrb[85].mxu0  ;;  %v4376_v2 = vpack.c.bf16 %v12689_v39, %v13231_v25 }
 0x1ac   : > { %v1641_v62 = vadd.f32 %v1574_v41, %v12791_v23  ;;  %v2048_v12 = vpop.f32.mrb[85].mxu1  ;;  %v9930_v47 = vpop.f32.mrb[86].mxu0  ;;  %v11007_v23 = vld [vmem:[%s15170_s3 + $0x48] sm:$0xff]   ;;  %v15902_v41 = vrot.slane %v13225_v18, 1 }
 0x1ad   : > { %v1643_v49 = vadd.f32 %v9930_v47, %v12793_v61  ;;  %v9994_v54 = vpop.f32.mrb[86].mxu1  ;;  %v1577_v43 = vpop.f32.mrb[87].mxu0  ;;  %v13257_v47 = vsel %vm1270_vm1, %v11384_v10, %v5051_v24 }
 0x1ae   : > { %v13242_v37 = vadd.f32 %v2048_v12, %v1641_v62  ;;  %v1642_v8 = vadd.f32 %v1577_v43, %v12798_v52  ;;  %v2051_v16 = vpop.f32.mrb[87].mxu1  ;;  %v13252_v61 = vsel %vm1270_vm1, %v5051_v24, %v15902_v41  ;;  %15904 = vst [vmem:[#allocation97_spill] sm:$0xff] %v13257_v47  ;;  %v15905_v62 = vld [vmem:[#allocation58_spill] sm:$0xff]  ;;  %v11008_v52 = vld [vmem:[%s15170_s3 + $0x88] sm:$0xff]  }
 0x1af   : > { %15903 = vst [vmem:[#allocation96_spill] sm:$0xff] %v13252_v61  ;;  %v13259_v12 = vadd.f32 %v9994_v54, %v1643_v49  ;;  %10276 = vmatmul.mubr.bf16.vlgmr.msra.gmra.mrb[192].mxu0 %v15905_v62  ;;  %v15906_v24 = vld [vmem:[#allocation9_spill] sm:$0xff]  ;;  %v15907_v54 = vrot.slane %v12664_v14, 7  ;;  %v11009_v41 = vld [vmem:[%s15170_s3 + $0x50] sm:$0xff]   ;;  %v15912_v61 = vld [vmem:[#allocation43_spill] sm:$0xff] }
 0x1b0   : > { %v13267_v39 = vadd.f32 %v2051_v16, %v1642_v8  ;;  %10340 = vmatmul.mubr.bf16.vlgmr.msra.gmra.mrb[192].mxu1 %v4375_v38  ;;  %10388 = vmatpush3.bf16.msra.mxu0 %v12970_v56  ;;  %v13284_v16 = vsel %vm578_vm0, %v4285_v7, %v11198_v5  ;;  %v11010_v56 = vld [vmem:[%s15170_s3 + $0x90] sm:$0xff]   ;;  %v5055_v8 = vrot.slane %v12830_v33, 1  ;;  %v15910_v38 = vld [vmem:[#allocation60_spill] sm:$0xff] }
 0x1b1   : > { %10452 = vmatpush3.bf16.msra.mxu1 %v12976_v50  ;;  %10279 = vmatprep.mubr.bf16.mxu0 %v15906_v24  ;;  %v13276_v49 = vsel %vm578_vm0, %v15907_v54, %v4285_v7  ;;  %15909 = vst [vmem:[#allocation9_spill] sm:$0xff] %v13284_v16 }
 0x1b2   : > { %15908 = vst [vmem:[#allocation58_spill] sm:$0xff] %v13276_v49  ;;  %v9933_v62 = vpop.f32.mrb[88].mxu0  ;;  %10343 = vmatprep.mubr.bf16.mxu1 %v4376_v2  ;;  %10389 = vmatprep.subr.bf16.mxu0 %v11007_v23  ;;  %v15911_v2 = vld [vmem:[#allocation24_spill] sm:$0xff]  ;;  %v13295_v7 = vpack.c.bf16 %v13276_v49, %v15912_v61 }
 0x1b3   : > { %v1645_v24 = vadd.f32 %v9933_v62, %v15910_v38  ;;  %v9997_v54 = vpop.f32.mrb[88].mxu1  ;;  %v1589_v43 = vpop.f32.mrb[89].mxu0  ;;  %10453 = vmatprep.subr.bf16.mxu1 %v11008_v52  ;;  %v15915_v62 = vld [vmem:[#allocation62_spill] sm:$0xff] }
 0x1b4   : > { %v1644_v14 = vadd.f32 %v1589_v43, %v15911_v2  ;;  %v2063_v25 = vpop.f32.mrb[89].mxu1  ;;  %v9934_v32 = vpop.f32.mrb[90].mxu0  ;;  %15913 = vst [vmem:[#allocation60_spill] sm:$0xff] %v13295_v7  ;;  %10390 = vmatpush3.bf16.msra.mxu0 %v11007_v23  ;;  %v13302_v38 = vpack.c.bf16 %v15915_v62, %v13284_v16  ;;  %v11011_v23 = vld [vmem:[%s15170_s3 + $0x58] sm:$0xff]   ;;  %v11014_v16 = vld [vmem:[%s15170_s3 + $0xa0] sm:$0xff]  }
 0x1b5   : > { %v13297_v47 = vadd.f32 %v9997_v54, %v1645_v24  ;;  %v1646_v50 = vadd.f32 %v9934_v32, %v15914_v21  ;;  %v9998_v26 = vpop.f32.mrb[90].mxu1  ;;  %v1592_v35 = vpop.f32.mrb[91].mxu0  ;;  %10454 = vmatpush3.bf16.msra.mxu1 %v11008_v52  ;;  %10391 = vmatprep.subr.bf16.mxu0 %v11009_v41  ;;  %v13312_v21 = vsel %vm1270_vm1, %v5055_v8, %v11384_v10  ;;  %v15921_v54 = vld [vmem:[#allocation61_spill] sm:$0xff] }
 0x1b6   : > { %15916 = vst [vmem:[#allocation24_spill] sm:$0xff] %v13302_v38  ;;  %v13304_v43 = vadd.f32 %v2063_v25, %v1644_v14  ;;  %v2066_v2 = vpop.f32.mrb[91].mxu1  ;;  %10455 = vmatprep.subr.bf16.mxu1 %v11010_v56  ;;  %15917 = vst [vmem:[#allocation26_spill] sm:$0xff] %v13312_v21  ;;  %v15918_v35 = vrot.slane %v12823_v13, 1  ;;  %v15920_v14 = vld [vmem:[#allocation8_spill] sm:$0xff]  ;;  %v11012_v25 = vld [vmem:[%s15170_s3 + $0x98] sm:$0xff]  }
 0x1b7   : > { %v13320_v52 = vadd.f32 %v9998_v26, %v1646_v50  ;;  %10280 = vmatmul.mubr.bf16.gmra.mrb[196].mxu0 %v15920_v14  ;;  %v15924_v50 = vld [vmem:[#allocation19_spill] sm:$0xff]  ;;  %v15926_v14 = vld [vmem:[#allocation57_spill] sm:$0xff]  ;;  %v4293_v13 = vrot.slane %v13188_v59, 7 }
 0x1b8   : > { %v13318_v32 = vsel %vm1270_vm1, %v15918_v35, %v5055_v8  ;;  %10344 = vmatmul.mubr.bf16.gmra.mrb[196].mxu1 %v13295_v7  ;;  %10283 = vmatprep.mubr.bf16.mxu0 %v15921_v54  ;;  %v15922_v8 = vrot.slane %v12703_v11, 7  ;;  %v13339_v2 = vunpack.c.l.bf16 %v15924_v50  ;;  %v15927_v24 = vrot.slane %v15926_v14, 7  ;;  %v15931_v21 = vld [vmem:[#allocation73_spill] sm:$0xff] }
 0x1b9   : > { %15919 = vst [vmem:[#allocation98_spill] sm:$0xff] %v13318_v32  ;;  %10347 = vmatprep.mubr.bf16.mxu1 %v13302_v38  ;;  %10392 = vmatpush3.bf16.msra.mxu0 %v11009_v41  ;;  %v11013_v38 = vld [vmem:[%s15170_s3 + $0x60] sm:$0xff]   ;;  %v15930_v41 = vld [vmem:[#allocation37_spill] sm:$0xff]  ;;  %v4297_v14 = vrot.slane %v13225_v18, 7 }
 0x1ba   : > { %v13336_v26 = vsel %vm578_vm0, %v15922_v8, %v11198_v5  ;;  %15925 = vst [vmem:[#allocation61_spill] sm:$0xff] %v13339_v2  ;;  %v9937_v35 = vpop.f32.mrb[92].mxu0  ;;  %v13346_v54 = vsel %vm578_vm0, %v11198_v5, %v15927_v24  ;;  %10456 = vmatpush3.bf16.msra.mxu1 %v11010_v56  ;;  %10393 = vmatprep.subr.bf16.mxu0 %v11011_v23  ;;  %v15929_v8 = vld [vmem:[#allocation54_spill] sm:$0xff]  ;;  %v15423_v24 = vrot.slane %v13339_v2, 1 }
 0x1bb   : > { %15923 = vst [vmem:[#allocation8_spill] sm:$0xff] %v13336_v26  ;;  %15928 = vst [vmem:[#allocation19_spill] sm:$0xff] %v13346_v54  ;;  %v1648_v62 = vadd.f32 %v9937_v35, %v15930_v41  ;;  %v10001_v50 = vpop.f32.mrb[92].mxu1  ;;  %v1604_v61 = vpop.f32.mrb[93].mxu0  ;;  %10457 = vmatprep.subr.bf16.mxu1 %v11012_v25  ;;  %v13359_v32 = vpack.c.bf16 %v13336_v26, %v15931_v21  ;;  %v15946_v26 = vld [vmem:[#allocation55_spill] sm:$0xff] }
 0x1bc   : > { %v2078_v49 = vpop.f32.mrb[93].mxu1  ;;  %v9938_v56 = vpop.f32.mrb[94].mxu0  ;;  %v15934_v61 = vld [vmem:[#allocation69_spill] sm:$0xff] }
 0x1bd   : > { %15932 = vst [vmem:[#allocation37_spill] sm:$0xff] %v13359_v32  ;;  %v13362_v7 = vadd.f32 %v10001_v50, %v1648_v62  ;;  %v10002_v35 = vpop.f32.mrb[94].mxu1  ;;  %v1606_v41 = vpop.f32.mrb[95].mxu0  ;;  %v13366_v11 = vpack.c.bf16 %v15934_v61, %v13346_v54  ;;  %10394 = vmatpush3.bf16.msra.mxu0 %v11011_v23  ;;  %v13373_v49 = vsel %vm1270_vm1, %v11384_v10, %v15423_v24  ;;  %v15937_v56 = vrot.slane %v15929_v8, 1  ;;  %v15939_v50 = vld [vmem:[#allocation6_spill] sm:$0xff]  ;;  %v11015_v23 = vld [vmem:[%s15170_s3 + $0x68] sm:$0xff]  }
 0x1be   : > { %15936 = vst [vmem:[#allocation101_spill] sm:$0xff] %v13373_v49  ;;  %v1647_v35 = vadd.f32 %v1606_v41, %v15939_v50  ;;  %v2080_v21 = vpop.f32.mrb[95].mxu1  ;;  %10458 = vmatpush3.bf16.msra.mxu1 %v11012_v25  ;;  %10395 = vmatprep.subr.bf16.mxu0 %v11013_v38  ;;  %v15940_v61 = vld [vmem:[#allocation29_spill] sm:$0xff]  ;;  %v15942_v25 = vld [vmem:[#allocation14_spill] sm:$0xff]  ;;  %v13400_v41 = vsel %vm578_vm0, %v11198_v5, %v4293_v13  ;;  %v15947_v49 = vrot.slane %v15946_v26, 7 }
 0x1bf   : > { %15933 = vst [vmem:[#allocation99_spill] sm:$0xff] %v13362_v7  ;;  %15935 = vst [vmem:[#allocation100_spill] sm:$0xff] %v13366_v11  ;;  %v13380_v62 = vsel %vm1270_vm1, %v15937_v56, %v11384_v10  ;;  %10284 = vmatmul.mubr.bf16.gmra.mrb[200].mxu0 %v15940_v61  ;;  %10459 = vmatprep.subr.bf16.mxu1 %v11014_v16  ;;  %v11016_v56 = vld [vmem:[%s15170_s3 + $0xa8] sm:$0xff]  }
 0x1c0   : > { %15938 = vst [vmem:[#allocation102_spill] sm:$0xff] %v13380_v62  ;;  %v13392_v54 = vadd.f32 %v2080_v21, %v1647_v35  ;;  %10348 = vmatmul.mubr.bf16.gmra.mrb[200].mxu1 %v13359_v32  ;;  %10287 = vmatprep.mubr.bf16.mxu0 %v15942_v25  ;;  %15943 = vst [vmem:[#allocation29_spill] sm:$0xff] %v13400_v41  ;;  %v15944_v61 = vld [vmem:[#allocation25_spill] sm:$0xff]  ;;  %v13409_v21 = vsel %vm578_vm0, %v4293_v13, %v15947_v49  ;;  %v11017_v35 = vld [vmem:[%s15170_s3 + $0x70] sm:$0xff]   ;;  %v5063_v25 = vrot.slane %v12917_v6, 1 }
 0x1c1   : > { %10351 = vmatprep.mubr.bf16.mxu1 %v13366_v11  ;;  %10396 = vmatpush3.bf16.msra.mxu0 %v11013_v38  ;;  %v13403_v50 = vunpack.c.h.bf16 %v15944_v61  ;;  %15948 = vst [vmem:[#allocation25_spill] sm:$0xff] %v13409_v21  ;;  %v15949_v32 = vld [vmem:[#allocation7_spill] sm:$0xff]  ;;  %v15951_v8 = vld [vmem:[#allocation33_spill] sm:$0xff]  ;;  %v15955_v61 = vld [vmem:[#allocation34_spill] sm:$0xff] }
 0x1c2   : > { %15941 = vst [vmem:[#allocation6_spill] sm:$0xff] %v13392_v54  ;;  %v10021_v24 = vpop.f32.mrb[96].mxu0  ;;  %10460 = vmatpush3.bf16.msra.mxu1 %v11014_v16  ;;  %10397 = vmatprep.subr.bf16.mxu0 %v11015_v23  ;;  %v13422_v62 = vpack.c.bf16 %v13400_v41, %v15949_v32  ;;  %v15952_v26 = vld [vmem:[#allocation53_spill] sm:$0xff] }
 0x1c3   : > { %15945 = vst [vmem:[#allocation14_spill] sm:$0xff] %v13403_v50  ;;  %v10085_v11 = vpop.f32.mrb[96].mxu1  ;;  %v2246_v38 = vpop.f32.mrb[97].mxu0  ;;  %10461 = vmatprep.subr.bf16.mxu1 %v11016_v56  ;;  %v11018_v24 = vld [vmem:[%s15170_s3 + $0xb0] sm:$0xff]   ;;  %v13427_v7 = vpack.c.bf16 %v15952_v26, %v13409_v21  ;;  %v15958_v21 = vld [vmem:[#allocation67_spill] sm:$0xff] }
 0x1c4   : > { %v2421_v13 = vadd.f32 %v2246_v38, %v12929_v34  ;;  %v2672_v49 = vpop.f32.mrb[97].mxu1  ;;  %v10022_v16 = vpop.f32.mrb[98].mxu0  ;;  %15950 = vst [vmem:[#allocation103_spill] sm:$0xff] %v13422_v62  ;;  %v13433_v34 = vsel %vm1270_vm1, %v11384_v10, %v5063_v25 }
 0x1c5   : > { %v2423_v59 = vadd.f32 %v10022_v16, %v15951_v8  ;;  %v10086_v54 = vpop.f32.mrb[98].mxu1  ;;  %v2249_v11 = vpop.f32.mrb[99].mxu0  ;;  %15953 = vst [vmem:[#allocation33_spill] sm:$0xff] %v13427_v7  ;;  %10398 = vmatpush3.bf16.msra.mxu0 %v11015_v23  ;;  %15954 = vst [vmem:[#allocation104_spill] sm:$0xff] %v13433_v34  ;;  %v11019_v8 = vld [vmem:[%s15170_s3 + $0x78] sm:$0xff]   ;;  %v15956_v16 = vrot.slane %v13403_v50, 1 }
 0x1c6   : > { %v13435_v38 = vadd.f32 %v2672_v49, %v2421_v13  ;;  %v2422_v32 = vadd.f32 %v2249_v11, %v15955_v61  ;;  %v2675_v41 = vpop.f32.mrb[99].mxu1  ;;  %10462 = vmatpush3.bf16.msra.mxu1 %v11016_v56  ;;  %10399 = vmatprep.subr.bf16.mxu0 %v11017_v35  ;;  %v11020_v56 = vld [vmem:[%s15170_s3 + $0xb8] sm:$0xff]   ;;  %v15960_v49 = vld [vmem:[#allocation12_spill] sm:$0xff]  ;;  %v5067_v11 = vrot.slane %v12965_v9, 1  ;;  %v15967_v34 = vld [vmem:[#allocation66_spill] sm:$0xff] }
 0x1c7   : > { %v13445_v23 = vsel %vm1270_vm1, %v5063_v25, %v15956_v16  ;;  %v13447_v26 = vadd.f32 %v10086_v54, %v2423_v59  ;;  %10288 = vmatmul.mubr.bf16.gmra.mrb[204].mxu0 %v15958_v21  ;;  %10463 = vmatprep.subr.bf16.mxu1 %v11018_v24  ;;  %v15961_v59 = vrot.slane %v12787_v22, 7  ;;  %v13469_v25 = vsel %vm578_vm0, %v4297_v14, %v11198_v5  ;;  %v15966_v22 = vld [vmem:[#allocation47_spill] sm:$0xff] }
 0x1c8   : > { %15957 = vst [vmem:[#allocation34_spill] sm:$0xff] %v13445_v23  ;;  %v13455_v13 = vadd.f32 %v2675_v41, %v2422_v32  ;;  %10352 = vmatmul.mubr.bf16.gmra.mrb[204].mxu1 %v13422_v62  ;;  %10291 = vmatprep.mubr.bf16.mxu0 %v15960_v49  ;;  %15963 = vst [vmem:[#allocation105_spill] sm:$0xff] %v13469_v25  ;;  %v13474_v32 = vld [vmem:[%s15170_s3 + $0xc0] sm:$0xff]   ;;  %v13494_v18 = vpack.c.bf16 %v15967_v34, %v13469_v25 }
 0x1c9   : > { %10355 = vmatprep.mubr.bf16.mxu1 %v13427_v7  ;;  %v13464_v54 = vsel %vm578_vm0, %v15961_v59, %v4297_v14  ;;  %10400 = vmatpush3.bf16.msra.mxu0 %v11017_v35  ;;  %v13482_v14 = vld [vmem:[%s15170_s3 + $0x100] sm:$0xff]  }
 0x1ca   : > { %15959 = vst [vmem:[#allocation67_spill] sm:$0xff] %v13455_v13  ;;  %15962 = vst [vmem:[#allocation12_spill] sm:$0xff] %v13464_v54  ;;  %v10025_v21 = vpop.f32.mrb[100].mxu0  ;;  %10464 = vmatpush3.bf16.msra.mxu1 %v11018_v24  ;;  %10401 = vmatprep.subr.bf16.mxu0 %v11019_v8  ;;  %v15964_v7 = vld [vmem:[#allocation16_spill] sm:$0xff] }
 0x1cb   : > { %v2425_v16 = vadd.f32 %v10025_v21, %v12981_v28  ;;  %v10089_v35 = vpop.f32.mrb[100].mxu1  ;;  %v2261_v49 = vpop.f32.mrb[101].mxu0  ;;  %10465 = vmatprep.subr.bf16.mxu1 %v11020_v56  ;;  %v13487_v62 = vpack.c.bf16 %v13464_v54, %v15964_v7  ;;  %15968 = vst [vmem:[#allocation47_spill] sm:$0xff] %v13494_v18  ;;  %v4305_v54 = vrot.slane %v13339_v2, 7 }
 0x1cc   : > { %v2424_v24 = vadd.f32 %v2261_v49, %v12984_v48  ;;  %v2687_v59 = vpop.f32.mrb[101].mxu1  ;;  %v10026_v61 = vpop.f32.mrb[102].mxu0  ;;  %v15974_v49 = vrot.slane %v12830_v33, 7 }
 0x1cd   : > { %15965 = vst [vmem:[#allocation106_spill] sm:$0xff] %v13487_v62  ;;  %v13489_v41 = vadd.f32 %v10089_v35, %v2425_v16  ;;  %v2426_v28 = vadd.f32 %v10026_v61, %v15966_v22  ;;  %v10090_v21 = vpop.f32.mrb[102].mxu1  ;;  %v2264_v23 = vpop.f32.mrb[103].mxu0  ;;  %10402 = vmatpush3.bf16.msra.mxu0 %v11019_v8  ;;  %v13502_v16 = vsel %vm1270_vm1, %v5067_v11, %v11384_v10  ;;  %v15970_v22 = vrot.slane %v12962_v63, 1  ;;  %v15972_v8 = vld [vmem:[#allocation21_spill] sm:$0xff] }
 0x1ce   : > { %v13496_v13 = vadd.f32 %v2687_v59, %v2424_v24  ;;  %v2690_v48 = vpop.f32.mrb[103].mxu1  ;;  %10466 = vmatpush3.bf16.msra.mxu1 %v11020_v56  ;;  %10515 = vmatprep.subr.bf16.mxu0 %v13474_v32  ;;  %15969 = vst [vmem:[#allocation107_spill] sm:$0xff] %v13502_v16  ;;  %v15973_v35 = vld [vmem:[#allocation13_spill] sm:$0xff]  ;;  %v13527_v24 = vunpack.c.l.bf16 %v13020_v29 }
 0x1cf   : > { %v13508_v23 = vsel %vm1270_vm1, %v15970_v22, %v5067_v11  ;;  %v13510_v61 = vadd.f32 %v10090_v21, %v2426_v28  ;;  %10292 = vmatmul.mubr.bf16.gmra.mrb[208].mxu0 %v15972_v8  ;;  %10579 = vmatprep.subr.bf16.mxu1 %v13482_v14  ;;  %v13524_v11 = vsel %vm578_vm0, %v15974_v49, %v11198_v5  ;;  %v15977_v28 = vld [vmem:[#allocation52_spill] sm:$0xff]  ;;  %v15980_v22 = vld [vmem:[#allocation50_spill] sm:$0xff]  ;;  %v15982_v29 = vld [vmem:[#allocation65_spill] sm:$0xff] }
 0x1d0   : > { %15971 = vst [vmem:[#allocation108_spill] sm:$0xff] %v13508_v23  ;;  %10356 = vmatmul.mubr.bf16.gmra.mrb[208].mxu1 %v13487_v62  ;;  %10295 = vmatprep.mubr.bf16.mxu0 %v15973_v35  ;;  %15975 = vst [vmem:[#allocation21_spill] sm:$0xff] %v13524_v11  ;;  %v15978_v21 = vrot.slane %v15977_v28, 7  ;;  %v15981_v35 = vld [vmem:[#allocation74_spill] sm:$0xff]  ;;  %v15456_v49 = vrot.slane %v13527_v24, 1  ;;  %v13541_v25 = vpack.c.bf16 %v13524_v11, %v15982_v29  ;;  %v15984_v8 = vld [vmem:[#allocation17_spill] sm:$0xff] }
 0x1d1   : > { %10359 = vmatprep.mubr.bf16.mxu1 %v13494_v18  ;;  %15976 = vst [vmem:[#allocation13_spill] sm:$0xff] %v13527_v24 }
 0x1d2   : > { %v10029_v59 = vpop.f32.mrb[104].mxu0  ;;  %v13534_v48 = vsel %vm578_vm0, %v11198_v5, %v15978_v21  ;;  %15983 = vst [vmem:[#allocation74_spill] sm:$0xff] %v13541_v25 }
 0x1d3   : > { %15979 = vst [vmem:[#allocation52_spill] sm:$0xff] %v13534_v48  ;;  %v2428_v56 = vadd.f32 %v10029_v59, %v15981_v35  ;;  %v10093_v18 = vpop.f32.mrb[104].mxu1  ;;  %v2276_v62 = vpop.f32.mrb[105].mxu0  ;;  %v13548_v63 = vpack.c.bf16 %v15984_v8, %v13534_v48  ;;  %v15994_v35 = vld [vmem:[#allocation27_spill] sm:$0xff] }
 0x1d4   : > { %v2702_v34 = vpop.f32.mrb[105].mxu1  ;;  %v10030_v7 = vpop.f32.mrb[106].mxu0  ;;  %v15987_v62 = vrot.slane %v15980_v22, 1  ;;  %v15995_v29 = vrot.slane %v15994_v35, 7 }
 0x1d5   : > { %v13544_v16 = vadd.f32 %v10093_v18, %v2428_v56  ;;  %v10094_v21 = vpop.f32.mrb[106].mxu1  ;;  %v2278_v23 = vpop.f32.mrb[107].mxu0  ;;  %15985 = vst [vmem:[#allocation109_spill] sm:$0xff] %v13548_v63  ;;  %v13555_v7 = vsel %vm1270_vm1, %v11384_v10, %v15456_v49  ;;  %v15989_v34 = vld [vmem:[#allocation71_spill] sm:$0xff]  ;;  %v15992_v49 = vld [vmem:[#allocation20_spill] sm:$0xff] }
 0x1d6   : > { %15986 = vst [vmem:[#allocation110_spill] sm:$0xff] %v13555_v7  ;;  %v13562_v18 = vsel %vm1270_vm1, %v15987_v62, %v11384_v10  ;;  %v2427_v56 = vadd.f32 %v2278_v23, %v15989_v34  ;;  %v2704_v59 = vpop.f32.mrb[107].mxu1  ;;  %v15990_v21 = vld [vmem:[#allocation23_spill] sm:$0xff]  ;;  %v13576_v62 = vsel %vm578_vm0, %v11198_v5, %v4305_v54  ;;  %v13579_v23 = vunpack.c.h.bf16 %v13041_v3  ;;  %v15997_v7 = vld [vmem:[#allocation18_spill] sm:$0xff] }
 0x1d7   : > { %15988 = vst [vmem:[#allocation111_spill] sm:$0xff] %v13562_v18  ;;  %10296 = vmatmul.mubr.bf16.gmra.mrb[212].mxu0 %v15990_v21  ;;  %15993 = vst [vmem:[#allocation23_spill] sm:$0xff] %v13576_v62  ;;  %v13592_v3 = vpack.c.bf16 %v13576_v62, %v15997_v7 }
 0x1d8   : > { %v13568_v8 = vadd.f32 %v2704_v59, %v2427_v56  ;;  %10360 = vmatmul.mubr.bf16.gmra.mrb[212].mxu1 %v13541_v25  ;;  %10299 = vmatprep.mubr.bf16.mxu0 %v15992_v49  ;;  %v13585_v56 = vsel %vm578_vm0, %v4305_v54, %v15995_v29  ;;  %v5075_v59 = vrot.slane %v13047_v36, 1  ;;  %v16000_v54 = vld [vmem:[#allocation32_spill] sm:$0xff]  ;;  %v16003_v35 = vrot.slane %v13579_v23, 1 }
 0x1d9   : > { %10363 = vmatprep.mubr.bf16.mxu1 %v13548_v63  ;;  %15996 = vst [vmem:[#allocation20_spill] sm:$0xff] %v13585_v56  ;;  %15998 = vst [vmem:[#allocation112_spill] sm:$0xff] %v13592_v3  ;;  %v13597_v29 = vpack.c.bf16 %v16000_v54, %v13585_v56  ;;  %v16002_v63 = vld [vmem:[#allocation95_spill] sm:$0xff]  ;;  %v16006_v54 = vld [vmem:[#allocation22_spill] sm:$0xff] }
 0x1da   : > { %15991 = vst [vmem:[#allocation71_spill] sm:$0xff] %v13568_v8  ;;  %v10033_v34 = vpop.f32.mrb[108].mxu0  ;;  %v13607_v7 = vsel %vm1270_vm1, %v5075_v59, %v16003_v35 }
 0x1db   : > { %v10097_v49 = vpop.f32.mrb[108].mxu1  ;;  %v2290_v21 = vpop.f32.mrb[109].mxu0  ;;  %v15999_v34 = vld [vmem:[#allocation93_spill] sm:$0xff]  ;;  %16004 = vst [vmem:[#allocation95_spill] sm:$0xff] %v13607_v7 }
 0x1dc   : > { %v2429_v25 = vadd.f32 %v2290_v21, %v13053_v27  ;;  %v2716_v48 = vpop.f32.mrb[109].mxu1  ;;  %v10034_v11 = vpop.f32.mrb[110].mxu0  ;;  %16001 = vst [vmem:[#allocation93_spill] sm:$0xff] %v13597_v29  ;;  %v4309_v49 = vrot.slane %v13403_v50, 7 }
 0x1dd   : > { %v2431_v18 = vadd.f32 %v10034_v11, %v15999_v34  ;;  %v10098_v22 = vpop.f32.mrb[110].mxu1  ;;  %v2293_v2 = vpop.f32.mrb[111].mxu0  ;;  %v13612_v11 = vsel %vm1270_vm1, %v11384_v10, %v5075_v59 }
 0x1de   : > { %v13600_v8 = vadd.f32 %v2716_v48, %v2429_v25  ;;  %v2430_v27 = vadd.f32 %v2293_v2, %v16002_v63  ;;  %v2719_v21 = vpop.f32.mrb[111].mxu1  ;;  %16005 = vst [vmem:[#allocation113_spill] sm:$0xff] %v13612_v11  ;;  %v16007_v2 = vld [vmem:[#allocation31_spill] sm:$0xff]  ;;  %v16008_v48 = vrot.slane %v12917_v6, 7 }
 0x1df   : > { %v13614_v34 = vadd.f32 %v10098_v22, %v2431_v18  ;;  %10300 = vmatmul.mubr.bf16.gmra.mrb[216].mxu0 %v16006_v54  ;;  %v13633_v18 = vsel %vm578_vm0, %v4309_v49, %v11198_v5 }
 0x1e0   : > { %v13619_v63 = vadd.f32 %v2719_v21, %v2430_v27  ;;  %10364 = vmatmul.mubr.bf16.gmra.mrb[216].mxu1 %v13592_v3  ;;  %10303 = vmatprep.mubr.bf16.mxu0 %v16007_v2  ;;  %v13628_v35 = vsel %vm578_vm0, %v16008_v48, %v4309_v49  ;;  %16010 = vst [vmem:[#allocation31_spill] sm:$0xff] %v13633_v18  ;;  %v16013_v49 = vld [vmem:[#allocation35_spill] sm:$0xff] }
 0x1e1   : > { %10367 = vmatprep.mubr.bf16.mxu1 %v13597_v29  ;;  %16009 = vst [vmem:[#allocation22_spill] sm:$0xff] %v13628_v35  ;;  %v16011_v29 = vld [vmem:[#allocation36_spill] sm:$0xff]  ;;  %v13646_v7 = vpack.c.bf16 %v16013_v49, %v13633_v18  ;;  %v16024_v18 = vld [vmem:[#allocation75_spill] sm:$0xff] }
 0x1e2   : > { %v10037_v22 = vpop.f32.mrb[112].mxu0  ;;  %v13639_v3 = vpack.c.bf16 %v13628_v35, %v16011_v29  ;;  %v16016_v29 = vld [vmem:[#allocation28_spill] sm:$0xff] }
 0x1e3   : > { %v2433_v59 = vadd.f32 %v10037_v22, %v13089_v55  ;;  %v10101_v54 = vpop.f32.mrb[112].mxu1  ;;  %v2305_v27 = vpop.f32.mrb[113].mxu0  ;;  %16014 = vst [vmem:[#allocation115_spill] sm:$0xff] %v13646_v7 }
 0x1e4   : > { %v2432_v21 = vadd.f32 %v2305_v27, %v13092_v19  ;;  %v2731_v2 = vpop.f32.mrb[113].mxu1  ;;  %v10038_v25 = vpop.f32.mrb[114].mxu0  ;;  %16012 = vst [vmem:[#allocation114_spill] sm:$0xff] %v13639_v3  ;;  %v16015_v27 = vld [vmem:[#allocation39_spill] sm:$0xff] }
 0x1e5   : > { %v13641_v48 = vadd.f32 %v10101_v54, %v2433_v59  ;;  %v2434_v6 = vadd.f32 %v10038_v25, %v13094_v57  ;;  %v10102_v56 = vpop.f32.mrb[114].mxu1  ;;  %v2308_v62 = vpop.f32.mrb[115].mxu0  ;;  %v16017_v57 = vrot.slane %v12965_v9, 7  ;;  %v16019_v59 = vld [vmem:[#allocation48_spill] sm:$0xff] }
 0x1e6   : > { %v13648_v55 = vadd.f32 %v2731_v2, %v2432_v21  ;;  %v2734_v22 = vpop.f32.mrb[115].mxu1  ;;  %v16020_v54 = vrot.slane %v16019_v59, 7 }
 0x1e7   : > { %v13650_v19 = vadd.f32 %v10102_v56, %v2434_v6  ;;  %10304 = vmatmul.mubr.bf16.gmra.mrb[220].mxu0 %v16015_v27  ;;  %v13661_v62 = vsel %vm578_vm0, %v16017_v57, %v11198_v5  ;;  %v16022_v27 = vld [vmem:[#allocation49_spill] sm:$0xff] }
 0x1e8   : > { %10368 = vmatmul.mubr.bf16.gmra.mrb[220].mxu1 %v13639_v3  ;;  %10307 = vmatprep.mubr.bf16.mxu0 %v16016_v29  ;;  %16018 = vst [vmem:[#allocation39_spill] sm:$0xff] %v13661_v62  ;;  %v13668_v6 = vsel %vm578_vm0, %v11198_v5, %v16020_v54  ;;  %v4317_v54 = vrot.slane %v13527_v24, 7 }
 0x1e9   : > { %10371 = vmatprep.mubr.bf16.mxu1 %v13646_v7  ;;  %16021 = vst [vmem:[#allocation28_spill] sm:$0xff] %v13668_v6  ;;  %v13673_v7 = vpack.c.bf16 %v13661_v62, %v16022_v27  ;;  %v13679_v35 = vpack.c.bf16 %v16024_v18, %v13668_v6  ;;  %v16035_v27 = vld [vmem:[#allocation40_spill] sm:$0xff]  ;;  %v16036_v6 = vld [vmem:[#allocation70_spill] sm:$0xff] }
 0x1ea   : > { %v10041_v25 = vpop.f32.mrb[116].mxu0  ;;  %v3800_v62 = vpack.c.bf16 %v16036_v6, %v16035_v27 }
 0x1eb   : > { %v2436_v56 = vadd.f32 %v10041_v25, %v13114_v44  ;;  %v10105_v29 = vpop.f32.mrb[116].mxu1  ;;  %v2320_v21 = vpop.f32.mrb[117].mxu0  ;;  %16023 = vst [vmem:[#allocation48_spill] sm:$0xff] %v13673_v7  ;;  %16025 = vst [vmem:[#allocation116_spill] sm:$0xff] %v13679_v35 }
 0x1ec   : > { %v2746_v2 = vpop.f32.mrb[117].mxu1  ;;  %v10042_v22 = vpop.f32.mrb[118].mxu0  ;;  %v16026_v21 = vld [vmem:[#allocation41_spill] sm:$0xff] }
 0x1ed   : > { %v13675_v57 = vadd.f32 %v10105_v29, %v2436_v56  ;;  %v10106_v3 = vpop.f32.mrb[118].mxu1  ;;  %v2322_v49 = vpop.f32.mrb[119].mxu0  ;;  %v16028_v22 = vld [vmem:[#allocation38_spill] sm:$0xff]  ;;  %v16030_v29 = vld [vmem:[#allocation76_spill] sm:$0xff] }
 0x1ee   : > { %v2435_v44 = vadd.f32 %v2322_v49, %v13118_v53  ;;  %v2748_v25 = vpop.f32.mrb[119].mxu1  ;;  %v13692_v3 = vsel %vm578_vm0, %v11198_v5, %v4317_v54  ;;  %v16031_v18 = vrot.slane %v16030_v29, 7 }
 0x1ef   : > { %10308 = vmatmul.mubr.bf16.gmra.mrb[224].mxu0 %v16026_v21  ;;  %16029 = vst [vmem:[#allocation38_spill] sm:$0xff] %v13692_v3 }
 0x1f0   : > { %v13684_v2 = vadd.f32 %v2748_v25, %v2435_v44  ;;  %10372 = vmatmul.mubr.bf16.gmra.mrb[224].mxu1 %v13673_v7  ;;  %10311 = vmatprep.mubr.bf16.mxu0 %v16028_v22  ;;  %v13698_v53 = vsel %vm578_vm0, %v4317_v54, %v16031_v18  ;;  %v16033_v7 = vld [vmem:[#allocation72_spill] sm:$0xff]  ;;  %v16037_v18 = vld [vmem:[#allocation78_spill] sm:$0xff] }
 0x1f1   : > { %10375 = vmatprep.mubr.bf16.mxu1 %v13679_v35  ;;  %16032 = vst [vmem:[#allocation76_spill] sm:$0xff] %v13698_v53  ;;  %v13703_v35 = vpack.c.bf16 %v13692_v3, %v16033_v7  ;;  %v13710_v54 = vpack.c.bf16 %v16037_v18, %v13698_v53  ;;  %v16039_v3 = vld [vmem:[#allocation44_spill] sm:$0xff] }
 0x1f2   : > { %16027 = vst [vmem:[#allocation41_spill] sm:$0xff] %v13684_v2  ;;  %v10045_v56 = vpop.f32.mrb[120].mxu0 }
 0x1f3   : > { %v10109_v49 = vpop.f32.mrb[120].mxu1  ;;  %v2334_v44 = vpop.f32.mrb[121].mxu0  ;;  %16034 = vst [vmem:[#allocation117_spill] sm:$0xff] %v13703_v35  ;;  %16038 = vst [vmem:[#allocation40_spill] sm:$0xff] %v13710_v54 }
 0x1f4   : > { %v2437_v25 = vadd.f32 %v2334_v44, %v13130_v1  ;;  %v2760_v21 = vpop.f32.mrb[121].mxu1  ;;  %v10046_v22 = vpop.f32.mrb[122].mxu0  ;;  %v4321_v49 = vrot.slane %v13579_v23, 7 }
 0x1f5   : > { %v2439_v56 = vadd.f32 %v10046_v22, %v13133_v60  ;;  %v10110_v11 = vpop.f32.mrb[122].mxu1  ;;  %v2337_v24 = vpop.f32.mrb[123].mxu0  ;;  %v16040_v60 = vrot.slane %v13047_v36, 7 }
 0x1f6   : > { %v13713_v1 = vadd.f32 %v2760_v21, %v2437_v25  ;;  %v2438_v44 = vadd.f32 %v2337_v24, %v13147_v45  ;;  %v2763_v2 = vpop.f32.mrb[123].mxu1  ;;  %v13732_v45 = vsel %vm578_vm0, %v4321_v49, %v11198_v5 }
 0x1f7   : > { %v13716_v7 = vadd.f32 %v10110_v11, %v2439_v56  ;;  %10312 = vmatmul.mubr.bf16.gmra.mrb[228].mxu0 %v16039_v3  ;;  %v13727_v27 = vsel %vm578_vm0, %v16040_v60, %v4321_v49  ;;  %16042 = vst [vmem:[#allocation44_spill] sm:$0xff] %v13732_v45  ;;  %v16043_v3 = vld [vmem:[#allocation42_spill] sm:$0xff] }
 0x1f8   : > { %v13719_v6 = vadd.f32 %v2763_v2, %v2438_v44  ;;  %10376 = vmatmul.mubr.bf16.gmra.mrb[228].mxu1 %v13703_v35  ;;  %10315 = vmatprep.mubr.bf16.mxu0 %v3800_v62  ;;  %16041 = vst [vmem:[#allocation70_spill] sm:$0xff] %v13727_v27  ;;  %v16044_v62 = vld [vmem:[#allocation68_spill] sm:$0xff] }
 0x1f9   : > { %10379 = vmatprep.mubr.bf16.mxu1 %v13710_v54  ;;  %v3801_v21 = vpack.c.bf16 %v16044_v62, %v16043_v3  ;;  %v16045_v54 = vld [vmem:[#allocation94_spill] sm:$0xff] }
 0x1fa   : > { %v10049_v25 = vpop.f32.mrb[124].mxu0  ;;  %v13740_v60 = vpack.c.bf16 %v13727_v27, %v16045_v54  ;;  %v16082_v27 = vld [vmem:[#allocation6_spill] sm:$0xff] }
 0x1fb   : > { %v2441_v24 = vadd.f32 %v10049_v25, %v13162_v30  ;;  %v10113_v11 = vpop.f32.mrb[124].mxu1  ;;  %v2349_v2 = vpop.f32.mrb[125].mxu0  ;;  %v13747_v30 = vpack.c.bf16 %v13100_v46, %v13732_v45  ;;  %v5036_v46 = vrot.slane %v13185_v31, 1 }
 0x1fc   : > { %v2440_v22 = vadd.f32 %v2349_v2, %v13165_v42  ;;  %v2775_v56 = vpop.f32.mrb[125].mxu1  ;;  %v10050_v44 = vpop.f32.mrb[126].mxu0  ;;  %16046 = vst [vmem:[#allocation42_spill] sm:$0xff] %v13740_v60  ;;  %v16048_v2 = vld [vmem:[#allocation91_spill] sm:$0xff] }
 0x1fd   : > { %v13742_v35 = vadd.f32 %v10113_v11, %v2441_v24  ;;  %v2442_v49 = vadd.f32 %v10050_v44, %v13167_v4  ;;  %v10114_v18 = vpop.f32.mrb[126].mxu1  ;;  %v2352_v36 = vpop.f32.mrb[127].mxu0  ;;  %16047 = vst [vmem:[#allocation68_spill] sm:$0xff] %v13747_v30  ;;  %v16049_v4 = vrot.slane %v13083_v15, 7 }
 0x1fe   : > { %v13749_v25 = vadd.f32 %v2775_v56, %v2440_v22  ;;  %v2778_v3 = vpop.f32.mrb[127].mxu1 }
 0x1ff   : > { %v13751_v42 = vadd.f32 %v10114_v18, %v2442_v49  ;;  %10316 = vmatmul.mubr.bf16.gmra.mrb[232].mxu0 %v3801_v21  ;;  %v13761_v36 = vsel %vm578_vm0, %v16049_v4, %v11198_v5  ;;  %v16051_v21 = vld [vmem:[#allocation11_spill] sm:$0xff]  ;;  %v5037_v4 = vrot.slane %v12658_v51, 1 }
 0x200   : > { %10380 = vmatmul.mubr.bf16.gmra.mrb[232].mxu1 %v13740_v60  ;;  %10319 = vmatprep.mubr.bf16.mxu0 %v16048_v2  ;;  %16050 = vst [vmem:[#allocation118_spill] sm:$0xff] %v13761_v36  ;;  %v3803_v22 = vpack.c.bf16 %v16051_v21, %v11384_v10  ;;  %v16052_v49 = vld [vmem:[#allocation79_spill] sm:$0xff]  ;;  %v16056_v21 = vmov 0.0  }
 0x201   : > { %10383 = vmatprep.mubr.bf16.mxu1 %v13747_v30  ;;  %v13768_v3 = vpack.c.bf16 %v13761_v36, %v16052_v49 }
 0x202   : > { %v10053_v24 = vpop.f32.mrb[128].mxu0 }
 0x203   : > { %v2444_v11 = vadd.f32 %v10053_v24, %v13193_v17  ;;  %v10117_v62 = vpop.f32.mrb[128].mxu1  ;;  %v2364_v18 = vpop.f32.mrb[129].mxu0  ;;  %16053 = vst [vmem:[#allocation11_spill] sm:$0xff] %v13768_v3 }
 0x204   : > { %v2790_v56 = vpop.f32.mrb[129].mxu1  ;;  %v10054_v44 = vpop.f32.mrb[130].mxu0 }
 0x205   : > { %v10118_v30 = vpop.f32.mrb[130].mxu1  ;;  %v2366_v60 = vpop.f32.mrb[131].mxu0  ;;  %v13772_v54 = vadd.f32 %v10117_v62, %v2444_v11  ;;  %v13787_v11 = vsel %vm1270_vm1, %v11384_v10, %v5036_v46  ;;  %v13794_v56 = vsel %vm1270_vm1, %v5037_v4, %v11384_v10 }
 0x206   : > { %v2443_v17 = vadd.f32 %v2366_v60, %v13212_v58  ;;  %v2792_v24 = vpop.f32.mrb[131].mxu1  ;;  %v13782_v30 = vsel %vm1270_vm1, %v5036_v46, %v5037_v4  ;;  %16055 = vst [vmem:[#allocation120_spill] sm:$0xff] %v13787_v11  ;;  %16057 = vst [vmem:[#allocation121_spill] sm:$0xff] %v13794_v56  ;;  %v5131_v4 = vpack.c.bf16 %v13139_v0, %v13794_v56 }
 0x207   : > { %10320 = vmatmul.mubr.bf16.gmra.mrb[236].mxu0 %v3803_v22  ;;  %16054 = vst [vmem:[#allocation119_spill] sm:$0xff] %v13782_v30  ;;  %v4704_v22 = vpack.c.bf16 %v13185_v31, %v16056_v21 }
 0x208   : > { %10384 = vmatmul.mubr.bf16.gmra.mrb[236].mxu1 %v13768_v3  ;;  %10403 = vmatprep.mubr.bf16.mxu0 %v15892_v40  ;;  %v13777_v18 = vadd.f32 %v2792_v24, %v2443_v17  ;;  %v4705_v40 = vpack.c.bf16 %v16056_v21, %v12658_v51 }
 0x209   : > { %10467 = vmatprep.mubr.bf16.mxu1 %v16048_v2  ;;  %v5130_v2 = vpack.c.bf16 %v13782_v30, %v13787_v11  ;;  %v16064_v11 = vld [vmem:[#allocation82_spill] sm:$0xff]  ;;  %v16067_v30 = vld [vmem:[#allocation85_spill] sm:$0xff] }
 0x20a   : > { %v10057_v58 = vpop.f32.mrb[132].mxu0 }
 0x20b   : > { %v10121_v60 = vpop.f32.mrb[132].mxu1  ;;  %v2378_v62 = vpop.f32.mrb[133].mxu0 }
 0x20c   : > { %v2445_v44 = vadd.f32 %v2378_v62, %v13242_v37  ;;  %v2804_v17 = vpop.f32.mrb[133].mxu1  ;;  %v10058_v24 = vpop.f32.mrb[134].mxu0  ;;  %v11023_v37 = vld [vmem:[%s15170_s3 + $0xc8] sm:$0xff]  }
 0x20d   : > { %v2447_v46 = vadd.f32 %v10058_v24, %v13259_v12  ;;  %v10122_v58 = vpop.f32.mrb[134].mxu1  ;;  %v2381_v60 = vpop.f32.mrb[135].mxu0  ;;  %v11024_v12 = vld [vmem:[%s15170_s3 + $0x108] sm:$0xff]  }
 0x20e   : > { %v2446_v31 = vadd.f32 %v2381_v60, %v13267_v39  ;;  %v2807_v3 = vpop.f32.mrb[135].mxu1  ;;  %v13808_v62 = vadd.f32 %v2804_v17, %v2445_v44  ;;  %v16058_v39 = vld [vmem:[#allocation81_spill] sm:$0xff]  ;;  %v11025_v44 = vld [vmem:[%s15170_s3 + $0xd0] sm:$0xff]  }
 0x20f   : > { %10404 = vmatmul.mubr.bf16.vlgmr.msra.gmra.mrb[240].mxu0 %v4704_v22  ;;  %v13813_v24 = vadd.f32 %v10122_v58, %v2447_v46  ;;  %v16059_v60 = vrot.slane %v16058_v39, 1 }
 0x210   : > { %10468 = vmatmul.mubr.bf16.vlgmr.msra.gmra.mrb[240].mxu1 %v5130_v2  ;;  %10516 = vmatpush3.bf16.msra.mxu0 %v13474_v32  ;;  %v13816_v51 = vadd.f32 %v2807_v3, %v2446_v31  ;;  %v16061_v32 = vld [vmem:[#allocation63_spill] sm:$0xff] }
 0x211   : > { %10580 = vmatpush3.bf16.msra.mxu1 %v13482_v14  ;;  %10407 = vmatprep.mubr.bf16.mxu0 %v4705_v40  ;;  %v13824_v22 = vsel %vm1270_vm1, %v16059_v60, %v11384_v10  ;;  %v16062_v2 = vrot.slane %v16061_v32, 1  ;;  %v11026_v14 = vld [vmem:[%s15170_s3 + $0x110] sm:$0xff]  }
 0x212   : > { %16060 = vst [vmem:[#allocation81_spill] sm:$0xff] %v13824_v22  ;;  %v10061_v17 = vpop.f32.mrb[136].mxu0  ;;  %10471 = vmatprep.mubr.bf16.mxu1 %v5131_v4  ;;  %10517 = vmatprep.subr.bf16.mxu0 %v11023_v37  ;;  %v13843_v0 = vpack.c.bf16 %v13824_v22, %v16064_v11 }
 0x213   : > { %v13834_v40 = vsel %vm1270_vm1, %v11384_v10, %v16062_v2  ;;  %v2449_v3 = vadd.f32 %v10061_v17, %v13297_v47  ;;  %v10125_v46 = vpop.f32.mrb[136].mxu1  ;;  %v2393_v58 = vpop.f32.mrb[137].mxu0  ;;  %10581 = vmatprep.subr.bf16.mxu1 %v11024_v12  ;;  %v13847_v2 = vpack.c.bf16 %v16061_v32, %v16056_v21 }
 0x214   : > { %16063 = vst [vmem:[#allocation63_spill] sm:$0xff] %v13834_v40  ;;  %v2448_v31 = vadd.f32 %v2393_v58, %v13304_v43  ;;  %v2819_v4 = vpop.f32.mrb[137].mxu1  ;;  %v10062_v60 = vpop.f32.mrb[138].mxu0  ;;  %16065 = vst [vmem:[#allocation122_spill] sm:$0xff] %v13843_v0  ;;  %10518 = vmatpush3.bf16.msra.mxu0 %v11023_v37  ;;  %v13852_v49 = vpack.c.bf16 %v16067_v30, %v13834_v40  ;;  %v16069_v43 = vld [vmem:[#allocation57_spill] sm:$0xff]  ;;  %v11027_v37 = vld [vmem:[%s15170_s3 + $0xd8] sm:$0xff]  }
 0x215   : > { %16066 = vst [vmem:[#allocation123_spill] sm:$0xff] %v13847_v2  ;;  %v2450_v56 = vadd.f32 %v10062_v60, %v13320_v52  ;;  %v10126_v47 = vpop.f32.mrb[138].mxu1  ;;  %v2396_v17 = vpop.f32.mrb[139].mxu0  ;;  %10582 = vmatpush3.bf16.msra.mxu1 %v11024_v12  ;;  %v5045_v58 = vrot.slane %v16069_v43, 1  ;;  %10519 = vmatprep.subr.bf16.mxu0 %v11025_v44  ;;  %v13855_v36 = vadd.f32 %v10125_v46, %v2449_v3  ;;  %v11085_v52 = vld [vmem:[%s12643_s11 + $0x8] sm:$0xff]   ;;  %v11028_v60 = vld [vmem:[%s15170_s3 + $0x118] sm:$0xff]  }
 0x216   : > { %16068 = vst [vmem:[#allocation124_spill] sm:$0xff] %v13852_v49  ;;  %v2822_v11 = vpop.f32.mrb[139].mxu1  ;;  %10583 = vmatprep.subr.bf16.mxu1 %v11026_v14  ;;  %v13860_v32 = vadd.f32 %v2819_v4, %v2448_v31  ;;  %v16071_v46 = vld [vmem:[#allocation64_spill] sm:$0xff] }
 0x217   : > { %10408 = vmatmul.mubr.bf16.gmra.mrb[244].mxu0 %v11085_v52  ;;  %v13866_v12 = vadd.f32 %v10126_v47, %v2450_v56  ;;  %v13874_v11 = vsel %vm1270_vm1, %v11384_v10, %v5045_v58  ;;  %v16072_v31 = vrot.slane %v16071_v46, 1  ;;  %v11029_v56 = vld [vmem:[%s15170_s3 + $0xe0] sm:$0xff]   ;;  %v16074_v47 = vld [vmem:[#allocation99_spill] sm:$0xff] }
 0x218   : > { %10472 = vmatmul.mubr.bf16.gmra.mrb[244].mxu1 %v13843_v0  ;;  %10411 = vmatprep.mubr.bf16.mxu0 %v13847_v2  ;;  %16070 = vst [vmem:[#allocation57_spill] sm:$0xff] %v13874_v11  ;;  %v16075_v2 = vld [vmem:[#allocation56_spill] sm:$0xff] }
 0x219   : > { %10475 = vmatprep.mubr.bf16.mxu1 %v13852_v49  ;;  %10520 = vmatpush3.bf16.msra.mxu0 %v11025_v44  ;;  %v13880_v4 = vsel %vm1270_vm1, %v5045_v58, %v16072_v31  ;;  %v13888_v44 = vpack.c.bf16 %v16056_v21, %v16075_v2  ;;  %v11030_v58 = vld [vmem:[%s15170_s3 + $0x120] sm:$0xff]   ;;  %v16081_v2 = vld [vmem:[#allocation55_spill] sm:$0xff] }
 0x21a   : > { %v10065_v3 = vpop.f32.mrb[140].mxu0  ;;  %16073 = vst [vmem:[#allocation64_spill] sm:$0xff] %v13880_v4  ;;  %10584 = vmatpush3.bf16.msra.mxu1 %v11026_v14  ;;  %10521 = vmatprep.subr.bf16.mxu0 %v11027_v37  ;;  %v16077_v0 = vld [vmem:[#allocation84_spill] sm:$0xff]  ;;  %v5049_v22 = vrot.slane %v16081_v2, 1 }
 0x21b   : > { %v2452_v17 = vadd.f32 %v10065_v3, %v16074_v47  ;;  %v10129_v52 = vpop.f32.mrb[140].mxu1  ;;  %v2408_v49 = vpop.f32.mrb[141].mxu0  ;;  %16076 = vst [vmem:[#allocation99_spill] sm:$0xff] %v13888_v44  ;;  %10585 = vmatprep.subr.bf16.mxu1 %v11028_v60  ;;  %v13895_v30 = vpack.c.bf16 %v13874_v11, %v16077_v0 }
 0x21c   : > { %v2834_v31 = vpop.f32.mrb[141].mxu1  ;;  %v10066_v14 = vpop.f32.mrb[142].mxu0  ;;  %v16079_v49 = vld [vmem:[#allocation88_spill] sm:$0xff] }
 0x21d   : > { %16078 = vst [vmem:[#allocation56_spill] sm:$0xff] %v13895_v30  ;;  %v10130_v40 = vpop.f32.mrb[142].mxu1  ;;  %v2410_v3 = vpop.f32.mrb[143].mxu0  ;;  %v13899_v47 = vpack.c.bf16 %v16079_v49, %v13880_v4  ;;  %10522 = vmatpush3.bf16.msra.mxu0 %v11027_v37  ;;  %v13902_v45 = vadd.f32 %v10129_v52, %v2452_v17  ;;  %v11031_v14 = vld [vmem:[%s15170_s3 + $0xe8] sm:$0xff]   ;;  %v11086_v37 = vld [vmem:[%s12643_s11 + $0x18] sm:$0xff]  }
 0x21e   : > { %v2451_v53 = vadd.f32 %v2410_v3, %v16082_v27  ;;  %v2836_v31 = vpop.f32.mrb[143].mxu1  ;;  %10586 = vmatpush3.bf16.msra.mxu1 %v11028_v60  ;;  %10523 = vmatprep.subr.bf16.mxu0 %v11029_v56  ;;  %v11032_v40 = vld [vmem:[%s15170_s3 + $0x128] sm:$0xff]   ;;  %v16084_v27 = vld [vmem:[#allocation86_spill] sm:$0xff] }
 0x21f   : > { %16080 = vst [vmem:[#allocation125_spill] sm:$0xff] %v13899_v47  ;;  %10412 = vmatmul.mubr.bf16.gmra.mrb[248].mxu0 %v13888_v44  ;;  %10587 = vmatprep.subr.bf16.mxu1 %v11030_v58  ;;  %v16085_v60 = vrot.slane %v16084_v27, 1  ;;  %v13926_v44 = vsel %vm1270_vm1, %v5049_v22, %v11384_v10  ;;  %v16092_v4 = vld [vmem:[#allocation97_spill] sm:$0xff] }
 0x220   : > { %10476 = vmatmul.mubr.bf16.gmra.mrb[248].mxu1 %v13895_v30  ;;  %10415 = vmatprep.mubr.bf16.mxu0 %v11086_v37  ;;  %v13914_v17 = vadd.f32 %v2836_v31, %v2451_v53  ;;  %16087 = vst [vmem:[#allocation86_spill] sm:$0xff] %v13926_v44  ;;  %v11033_v53 = vld [vmem:[%s15170_s3 + $0xf0] sm:$0xff]   ;;  %v13950_v11 = vpack.c.bf16 %v16092_v4, %v13926_v44 }
 0x221   : > { %10479 = vmatprep.mubr.bf16.mxu1 %v13899_v47  ;;  %v13921_v52 = vsel %vm1270_vm1, %v16085_v60, %v5049_v22  ;;  %10524 = vmatpush3.bf16.msra.mxu0 %v11029_v56  ;;  %v13933_v47 = vpack.c.bf16 %v16084_v27, %v16056_v21  ;;  %v11034_v56 = vld [vmem:[%s15170_s3 + $0x130] sm:$0xff]  }
 0x222   : > { %16083 = vst [vmem:[#allocation55_spill] sm:$0xff] %v13914_v17  ;;  %16086 = vst [vmem:[#allocation6_spill] sm:$0xff] %v13921_v52  ;;  %v10149_v3 = vpop.f32.mrb[144].mxu0  ;;  %10588 = vmatpush3.bf16.msra.mxu1 %v11030_v58  ;;  %10525 = vmatprep.subr.bf16.mxu0 %v11031_v14 }
 0x223   : > { %v10213_v31 = vpop.f32.mrb[144].mxu1  ;;  %v3147_v37 = vpop.f32.mrb[145].mxu0  ;;  %16088 = vst [vmem:[#allocation126_spill] sm:$0xff] %v13933_v47  ;;  %10589 = vmatprep.subr.bf16.mxu1 %v11032_v40  ;;  %v16089_v3 = vld [vmem:[#allocation87_spill] sm:$0xff]  ;;  %16093 = vst [vmem:[#allocation129_spill] sm:$0xff] %v13950_v11 }
 0x224   : > { %v3322_v22 = vadd.f32 %v3147_v37, %v13435_v38  ;;  %v3477_v60 = vpop.f32.mrb[145].mxu1  ;;  %v10150_v58 = vpop.f32.mrb[146].mxu0  ;;  %v13941_v30 = vpack.c.bf16 %v13921_v52, %v16089_v3  ;;  %v13945_v31 = vpack.c.bf16 %v16056_v21, %v16081_v2  ;;  %v16094_v38 = vld [vmem:[#allocation67_spill] sm:$0xff]  ;;  %v5057_v52 = vrot.slane %v15977_v28, 1 }
 0x225   : > { %v3324_v27 = vadd.f32 %v10150_v58, %v13447_v26  ;;  %v10214_v49 = vpop.f32.mrb[146].mxu1  ;;  %v3150_v0 = vpop.f32.mrb[147].mxu0  ;;  %10526 = vmatpush3.bf16.msra.mxu0 %v11031_v14  ;;  %v11035_v3 = vld [vmem:[%s15170_s3 + $0xf8] sm:$0xff]   ;;  %v16096_v14 = vld [vmem:[#allocation89_spill] sm:$0xff] }
 0x226   : > { %16090 = vst [vmem:[#allocation127_spill] sm:$0xff] %v13941_v30  ;;  %16091 = vst [vmem:[#allocation128_spill] sm:$0xff] %v13945_v31  ;;  %v3323_v37 = vadd.f32 %v3150_v0, %v16094_v38  ;;  %v3480_v17 = vpop.f32.mrb[147].mxu1  ;;  %10590 = vmatpush3.bf16.msra.mxu1 %v11032_v40  ;;  %10527 = vmatprep.subr.bf16.mxu0 %v11033_v53  ;;  %v13956_v2 = vadd.f32 %v3477_v60, %v3322_v22  ;;  %v11036_v26 = vld [vmem:[%s15170_s3 + $0x138] sm:$0xff]   ;;  %v16097_v40 = vrot.slane %v16096_v14, 1 }
 0x227   : > { %10416 = vmatmul.mubr.bf16.gmra.mrb[252].mxu0 %v13933_v47  ;;  %10591 = vmatprep.subr.bf16.mxu1 %v11034_v56  ;;  %v13962_v58 = vadd.f32 %v10214_v49, %v3324_v27  ;;  %v16099_v38 = vld [vmem:[#allocation59_spill] sm:$0xff] }
 0x228   : > { %10480 = vmatmul.mubr.bf16.gmra.mrb[252].mxu1 %v13941_v30  ;;  %10419 = vmatprep.mubr.bf16.mxu0 %v13945_v31  ;;  %v13966_v0 = vadd.f32 %v3480_v17, %v3323_v37  ;;  %v13973_v22 = vsel %vm1270_vm1, %v16097_v40, %v11384_v10  ;;  %v16100_v49 = vrot.slane %v16099_v38, 1  ;;  %v13986_v17 = vld [vmem:[%s15170_s3 + $0x140] sm:$0xff]  }
 0x229   : > { %16098 = vst [vmem:[#allocation130_spill] sm:$0xff] %v13973_v22  ;;  %10483 = vmatprep.mubr.bf16.mxu1 %v13950_v11  ;;  %10528 = vmatpush3.bf16.msra.mxu0 %v11033_v53  ;;  %v13992_v53 = vld [vmem:[%s15170_s3 + $0x180] sm:$0xff]  }
 0x22a   : > { %16095 = vst [vmem:[#allocation67_spill] sm:$0xff] %v13966_v0  ;;  %v10153_v60 = vpop.f32.mrb[148].mxu0  ;;  %v13981_v27 = vsel %vm1270_vm1, %v11384_v10, %v16100_v49  ;;  %10592 = vmatpush3.bf16.msra.mxu1 %v11034_v56  ;;  %10529 = vmatprep.subr.bf16.mxu0 %v11035_v3  ;;  %v16102_v30 = vld [vmem:[#allocation96_spill] sm:$0xff]  ;;  %v16105_v0 = vld [vmem:[#allocation98_spill] sm:$0xff] }
 0x22b   : > { %16101 = vst [vmem:[#allocation59_spill] sm:$0xff] %v13981_v27  ;;  %v3326_v37 = vadd.f32 %v10153_v60, %v13489_v41  ;;  %v10217_v40 = vpop.f32.mrb[148].mxu1  ;;  %v3162_v11 = vpop.f32.mrb[149].mxu0  ;;  %10593 = vmatprep.subr.bf16.mxu1 %v11036_v26  ;;  %v13997_v47 = vpack.c.bf16 %v13973_v22, %v16102_v30  ;;  %v14001_v41 = vpack.c.bf16 %v16099_v38, %v16056_v21  ;;  %v11087_v38 = vld [vmem:[%s12643_s11 + $0x28] sm:$0xff]   ;;  %v16117_v22 = vld [vmem:[#allocation71_spill] sm:$0xff] }
 0x22c   : > { %v3325_v49 = vadd.f32 %v3162_v11, %v13496_v13  ;;  %v3492_v56 = vpop.f32.mrb[149].mxu1  ;;  %v10154_v31 = vpop.f32.mrb[150].mxu0  ;;  %v14007_v13 = vpack.c.bf16 %v16105_v0, %v13981_v27  ;;  %v16114_v0 = vld [vmem:[#allocation27_spill] sm:$0xff] }
 0x22d   : > { %16103 = vst [vmem:[#allocation131_spill] sm:$0xff] %v13997_v47  ;;  %16104 = vst [vmem:[#allocation132_spill] sm:$0xff] %v14001_v41  ;;  %v3327_v60 = vadd.f32 %v10154_v31, %v13510_v61  ;;  %v10218_v4 = vpop.f32.mrb[150].mxu1  ;;  %v3165_v44 = vpop.f32.mrb[151].mxu0  ;;  %10530 = vmatpush3.bf16.msra.mxu0 %v11035_v3  ;;  %v14009_v11 = vadd.f32 %v10217_v40, %v3326_v37  ;;  %v16108_v31 = vld [vmem:[#allocation54_spill] sm:$0xff] }
 0x22e   : > { %16106 = vst [vmem:[#allocation133_spill] sm:$0xff] %v14007_v13  ;;  %v3495_v14 = vpop.f32.mrb[151].mxu1  ;;  %10594 = vmatpush3.bf16.msra.mxu1 %v11036_v26  ;;  %10643 = vmatprep.subr.bf16.mxu0 %v13986_v17  ;;  %v14012_v30 = vadd.f32 %v3492_v56, %v3325_v49  ;;  %v14023_v44 = vsel %vm1270_vm1, %v11384_v10, %v5057_v52  ;;  %v16109_v26 = vrot.slane %v16108_v31, 1 }
 0x22f   : > { %10420 = vmatmul.mubr.bf16.gmra.mrb[0].mxu0 %v11087_v38  ;;  %10707 = vmatprep.subr.bf16.mxu1 %v13992_v53  ;;  %v14016_v61 = vadd.f32 %v10218_v4, %v3327_v60  ;;  %16107 = vst [vmem:[#allocation134_spill] sm:$0xff] %v14023_v44  ;;  %v14034_v4 = vpack.c.bf16 %v16056_v21, %v12830_v33  ;;  %v16112_v38 = vld [vmem:[#allocation26_spill] sm:$0xff] }
 0x230   : > { %10484 = vmatmul.mubr.bf16.gmra.mrb[0].mxu1 %v13997_v47  ;;  %10423 = vmatprep.mubr.bf16.mxu0 %v14001_v41  ;;  %v14030_v14 = vsel %vm1270_vm1, %v5057_v52, %v16109_v26  ;;  %v5061_v52 = vrot.slane %v16114_v0, 1  ;;  %v16115_v26 = vld [vmem:[#allocation102_spill] sm:$0xff] }
 0x231   : > { %10487 = vmatprep.mubr.bf16.mxu1 %v14007_v13  ;;  %16110 = vst [vmem:[#allocation54_spill] sm:$0xff] %v14030_v14  ;;  %16111 = vst [vmem:[#allocation135_spill] sm:$0xff] %v14034_v4  ;;  %v14039_v13 = vpack.c.bf16 %v14023_v44, %v16112_v38  ;;  %v14044_v27 = vpack.c.bf16 %v16115_v26, %v14030_v14 }
 0x232   : > { %v10157_v3 = vpop.f32.mrb[152].mxu0 }
 0x233   : > { %v3329_v37 = vadd.f32 %v10157_v3, %v13544_v16  ;;  %v10221_v40 = vpop.f32.mrb[152].mxu1  ;;  %v3177_v49 = vpop.f32.mrb[153].mxu0  ;;  %16113 = vst [vmem:[#allocation136_spill] sm:$0xff] %v14039_v13  ;;  %16116 = vst [vmem:[#allocation27_spill] sm:$0xff] %v14044_v27 }
 0x234   : > { %v3507_v56 = vpop.f32.mrb[153].mxu1  ;;  %v10158_v60 = vpop.f32.mrb[154].mxu0  ;;  %v11088_v49 = vld [vmem:[%s12643_s11 + $0x38] sm:$0xff]  }
 0x235   : > { %v10222_v41 = vpop.f32.mrb[154].mxu1  ;;  %v3179_v47 = vpop.f32.mrb[155].mxu0  ;;  %v14046_v33 = vadd.f32 %v10221_v40, %v3329_v37 }
 0x236   : > { %v3328_v16 = vadd.f32 %v3179_v47, %v16117_v22  ;;  %v3509_v3 = vpop.f32.mrb[155].mxu1  ;;  %v16118_v41 = vld [vmem:[#allocation61_spill] sm:$0xff]  ;;  %v14064_v47 = vsel %vm1270_vm1, %v5061_v52, %v11384_v10 }
 0x237   : > { %10424 = vmatmul.mubr.bf16.gmra.mrb[4].mxu0 %v14034_v4  ;;  %v16119_v60 = vrot.slane %v16118_v41, 1  ;;  %16121 = vst [vmem:[#allocation61_spill] sm:$0xff] %v14064_v47  ;;  %v14068_v22 = vpack.c.bf16 %v16118_v41, %v16056_v21 }
 0x238   : > { %10488 = vmatmul.mubr.bf16.gmra.mrb[4].mxu1 %v14039_v13  ;;  %10427 = vmatprep.mubr.bf16.mxu0 %v11088_v49  ;;  %v14052_v56 = vadd.f32 %v3509_v3, %v3328_v16  ;;  %v16123_v13 = vld [vmem:[#allocation101_spill] sm:$0xff] }
 0x239   : > { %v14058_v38 = vsel %vm1270_vm1, %v16119_v60, %v5061_v52  ;;  %10491 = vmatprep.mubr.bf16.mxu1 %v14044_v27  ;;  %16122 = vst [vmem:[#allocation137_spill] sm:$0xff] %v14068_v22 }
 0x23a   : > { %16120 = vst [vmem:[#allocation71_spill] sm:$0xff] %v14058_v38  ;;  %v10161_v37 = vpop.f32.mrb[156].mxu0  ;;  %v14073_v27 = vpack.c.bf16 %v14058_v38, %v16123_v13  ;;  %v9155_v38 = vld [vmem:[%s12643_s11 + $0x78] sm:$0xff]  }
 0x23b   : > { %v10225_v40 = vpop.f32.mrb[156].mxu1  ;;  %v3191_v16 = vpop.f32.mrb[157].mxu0  ;;  %v14077_v37 = vpack.c.bf16 %v16056_v21, %v16114_v0  ;;  %v14095_v0 = vunpack.c.l.bf16 %v9155_v38 }
 0x23c   : > { %v3330_v3 = vadd.f32 %v3191_v16, %v13600_v8  ;;  %v3521_v49 = vpop.f32.mrb[157].mxu1  ;;  %v10162_v60 = vpop.f32.mrb[158].mxu0  ;;  %16124 = vst [vmem:[#allocation138_spill] sm:$0xff] %v14073_v27  ;;  %v16126_v40 = vld [vmem:[#allocation104_spill] sm:$0xff] }
 0x23d   : > { %16125 = vst [vmem:[#allocation139_spill] sm:$0xff] %v14077_v37  ;;  %v3332_v52 = vadd.f32 %v10162_v60, %v13614_v34  ;;  %v10226_v4 = vpop.f32.mrb[158].mxu1  ;;  %v3194_v41 = vpop.f32.mrb[159].mxu0  ;;  %v14082_v26 = vpack.c.bf16 %v16126_v40, %v14064_v47  ;;  %16129 = vst [vmem:[#allocation142_spill] sm:$0xff] %v14095_v0  ;;  %v16130_v60 = vrot.slane %v13403_v50, 1  ;;  %v16135_v40 = vld [vmem:[#allocation34_spill] sm:$0xff] }
 0x23e   : > { %v3331_v8 = vadd.f32 %v3194_v41, %v13619_v63  ;;  %v3524_v16 = vpop.f32.mrb[159].mxu1  ;;  %v14085_v14 = vadd.f32 %v3521_v49, %v3330_v3  ;;  %v16132_v49 = vld [vmem:[#allocation46_spill] sm:$0xff] }
 0x23f   : > { %16127 = vst [vmem:[#allocation140_spill] sm:$0xff] %v14082_v26  ;;  %10428 = vmatmul.mubr.bf16.gmra.mrb[8].mxu0 %v14068_v22  ;;  %v14088_v13 = vadd.f32 %v10226_v4, %v3332_v52  ;;  %v14102_v63 = vsel %vm1270_vm1, %v16130_v60, %v11384_v10  ;;  %v14105_v4 = vunpack.c.h.bf16 %v9155_v38  ;;  %v16133_v52 = vrot.slane %v16132_v49, 1 }
 0x240   : > { %10492 = vmatmul.mubr.bf16.gmra.mrb[8].mxu1 %v14073_v27  ;;  %10431 = vmatprep.mubr.bf16.mxu0 %v14077_v37  ;;  %v14093_v34 = vadd.f32 %v3524_v16, %v3331_v8  ;;  %16131 = vst [vmem:[#allocation143_spill] sm:$0xff] %v14102_v63  ;;  %v5552_v60 = vrot.slane %v14095_v0, 7  ;;  %v14120_v47 = vpack.c.bf16 %v14102_v63, %v16135_v40  ;;  %v5069_v0 = vrot.slane %v16019_v59, 1  ;;  %v16138_v27 = vld [vmem:[#allocation108_spill] sm:$0xff]  ;;  %v11089_v40 = vld [vmem:[%s12643_s11 + $0x48] sm:$0xff]  }
 0x241   : > { %10495 = vmatprep.mubr.bf16.mxu1 %v14082_v26  ;;  %v14112_v41 = vsel %vm1270_vm1, %v11384_v10, %v16133_v52  ;;  %v14124_v52 = vpack.c.bf16 %v16132_v49, %v16056_v21  ;;  %v16140_v49 = vrot.slane %v14105_v4, 7 }
 0x242   : > { %16128 = vst [vmem:[#allocation141_spill] sm:$0xff] %v14093_v34  ;;  %v10165_v3 = vpop.f32.mrb[160].mxu0  ;;  %16134 = vst [vmem:[#allocation46_spill] sm:$0xff] %v14112_v41  ;;  %v14130_v34 = vpack.c.bf16 %v16138_v27, %v14112_v41 }
 0x243   : > { %v3334_v8 = vadd.f32 %v10165_v3, %v13641_v48  ;;  %v10229_v16 = vpop.f32.mrb[160].mxu1  ;;  %v3206_v37 = vpop.f32.mrb[161].mxu0  ;;  %16136 = vst [vmem:[#allocation144_spill] sm:$0xff] %v14120_v47  ;;  %16137 = vst [vmem:[#allocation145_spill] sm:$0xff] %v14124_v52 }
 0x244   : > { %v3333_v38 = vadd.f32 %v3206_v37, %v13648_v55  ;;  %v3536_v26 = vpop.f32.mrb[161].mxu1  ;;  %v10166_v22 = vpop.f32.mrb[162].mxu0  ;;  %16139 = vst [vmem:[#allocation146_spill] sm:$0xff] %v14130_v34 }
 0x245   : > { %v3335_v48 = vadd.f32 %v10166_v22, %v13650_v19  ;;  %v10230_v3 = vpop.f32.mrb[162].mxu1  ;;  %v3209_v44 = vpop.f32.mrb[163].mxu0  ;;  %v14132_v55 = vadd.f32 %v10229_v16, %v3334_v8  ;;  %v14143_v19 = vsel %vm578_vm0, %v5552_v60, %v16140_v49  ;;  %v14157_v22 = vsel %vm1270_vm1, %v11384_v10, %v5069_v0  ;;  %v16143_v8 = vld [vmem:[#allocation50_spill] sm:$0xff] }
 0x246   : > { %v3539_v37 = vpop.f32.mrb[163].mxu1  ;;  %v14134_v50 = vadd.f32 %v3536_v26, %v3333_v38  ;;  %16141 = vst [vmem:[#allocation147_spill] sm:$0xff] %v14143_v19  ;;  %v14148_v44 = vsel %vm578_vm0, %v11198_v5, %v5552_v60  ;;  %16142 = vst [vmem:[#allocation148_spill] sm:$0xff] %v14157_v22  ;;  %v16144_v16 = vrot.slane %v16143_v8, 1  ;;  %v14168_v38 = vpack.c.bf16 %v16056_v21, %v12965_v9  ;;  %v16151_v19 = vld [vmem:[#allocation41_spill] sm:$0xff] }
 0x247   : > { %10432 = vmatmul.mubr.bf16.gmra.mrb[12].mxu0 %v11089_v40  ;;  %v14137_v63 = vadd.f32 %v10230_v3, %v3335_v48  ;;  %v11091_v5 = vld [vmem:[%s12643_s11 + $0x68] sm:$0xff]  }
 0x248   : > { %10496 = vmatmul.mubr.bf16.gmra.mrb[12].mxu1 %v14120_v47  ;;  %10435 = vmatprep.mubr.bf16.mxu0 %v14124_v52  ;;  %v14164_v60 = vsel %vm1270_vm1, %v5069_v0, %v16144_v16  ;;  %16146 = vst [vmem:[#allocation149_spill] sm:$0xff] %v14168_v38  ;;  %v16147_v52 = vld [vmem:[#allocation107_spill] sm:$0xff]  ;;  %v5073_v0 = vrot.slane %v16030_v29, 1 }
 0x249   : > { %10499 = vmatprep.mubr.bf16.mxu1 %v14130_v34  ;;  %16145 = vst [vmem:[#allocation50_spill] sm:$0xff] %v14164_v60  ;;  %v14173_v34 = vpack.c.bf16 %v14157_v22, %v16147_v52  ;;  %v16149_v16 = vld [vmem:[#allocation111_spill] sm:$0xff] }
 0x24a   : > { %v10169_v40 = vpop.f32.mrb[164].mxu0  ;;  %v14178_v41 = vpack.c.bf16 %v16149_v16, %v14164_v60  ;;  %v16162_v60 = vld [vmem:[#allocation77_spill] sm:$0xff] }
 0x24b   : > { %v3337_v48 = vadd.f32 %v10169_v40, %v13675_v57  ;;  %v10233_v3 = vpop.f32.mrb[164].mxu1  ;;  %v3221_v37 = vpop.f32.mrb[165].mxu0  ;;  %16148 = vst [vmem:[#allocation150_spill] sm:$0xff] %v14173_v34  ;;  %v5078_v22 = vrot.slane %v16162_v60, 1 }
 0x24c   : > { %v3551_v49 = vpop.f32.mrb[165].mxu1  ;;  %v10170_v26 = vpop.f32.mrb[166].mxu0  ;;  %16150 = vst [vmem:[#allocation151_spill] sm:$0xff] %v14178_v41 }
 0x24d   : > { %v10234_v47 = vpop.f32.mrb[166].mxu1  ;;  %v3223_v27 = vpop.f32.mrb[167].mxu0  ;;  %v14180_v9 = vadd.f32 %v10233_v3, %v3337_v48  ;;  %v11090_v26 = vld [vmem:[%s12643_s11 + $0x58] sm:$0xff]  }
 0x24e   : > { %v3336_v57 = vadd.f32 %v3223_v27, %v16151_v19  ;;  %v3553_v40 = vpop.f32.mrb[167].mxu1  ;;  %v16152_v47 = vld [vmem:[#allocation13_spill] sm:$0xff]  ;;  %v14198_v27 = vsel %vm1270_vm1, %v5073_v0, %v11384_v10 }
 0x24f   : > { %10436 = vmatmul.mubr.bf16.gmra.mrb[16].mxu0 %v14168_v38  ;;  %v16153_v49 = vrot.slane %v16152_v47, 1  ;;  %16155 = vst [vmem:[#allocation13_spill] sm:$0xff] %v14198_v27  ;;  %v14202_v19 = vpack.c.bf16 %v16152_v47, %v16056_v21  ;;  %v16160_v47 = vld [vmem:[#allocation113_spill] sm:$0xff] }
 0x250   : > { %10500 = vmatmul.mubr.bf16.gmra.mrb[16].mxu1 %v14173_v34  ;;  %10439 = vmatprep.mubr.bf16.mxu0 %v11090_v26  ;;  %v14186_v37 = vadd.f32 %v3553_v40, %v3336_v57 }
 0x251   : > { %v14192_v52 = vsel %vm1270_vm1, %v16153_v49, %v5073_v0  ;;  %10503 = vmatprep.mubr.bf16.mxu1 %v14178_v41  ;;  %16156 = vst [vmem:[#allocation152_spill] sm:$0xff] %v14202_v19  ;;  %v16157_v49 = vld [vmem:[#allocation110_spill] sm:$0xff] }
 0x252   : > { %16154 = vst [vmem:[#allocation41_spill] sm:$0xff] %v14192_v52  ;;  %v10173_v48 = vpop.f32.mrb[168].mxu0  ;;  %v14207_v38 = vpack.c.bf16 %v14192_v52, %v16157_v49  ;;  %v5079_v49 = vrot.slane %v13083_v15, 1 }
 0x253   : > { %v10237_v3 = vpop.f32.mrb[168].mxu1  ;;  %v3235_v57 = vpop.f32.mrb[169].mxu0  ;;  %v14211_v48 = vpack.c.bf16 %v16056_v21, %v16030_v29 }
 0x254   : > { %v3338_v40 = vadd.f32 %v3235_v57, %v13713_v1  ;;  %v3565_v26 = vpop.f32.mrb[169].mxu1  ;;  %v10174_v34 = vpop.f32.mrb[170].mxu0  ;;  %16158 = vst [vmem:[#allocation153_spill] sm:$0xff] %v14207_v38  ;;  %v14216_v3 = vpack.c.bf16 %v16160_v47, %v14198_v27 }
 0x255   : > { %16159 = vst [vmem:[#allocation154_spill] sm:$0xff] %v14211_v48  ;;  %v3340_v0 = vadd.f32 %v10174_v34, %v13716_v7  ;;  %v10238_v41 = vpop.f32.mrb[170].mxu1  ;;  %v3238_v16 = vpop.f32.mrb[171].mxu0 }
 0x256   : > { %16161 = vst [vmem:[#allocation155_spill] sm:$0xff] %v14216_v3  ;;  %v3339_v1 = vadd.f32 %v3238_v16, %v13719_v6  ;;  %v3568_v57 = vpop.f32.mrb[171].mxu1  ;;  %v14221_v52 = vadd.f32 %v3565_v26, %v3338_v40  ;;  %v16163_v6 = vrot.slane %v13579_v23, 1  ;;  %v14245_v40 = vsel %vm1270_vm1, %v11384_v10, %v5078_v22 }
 0x257   : > { %10440 = vmatmul.mubr.bf16.gmra.mrb[20].mxu0 %v14202_v19  ;;  %v14224_v29 = vadd.f32 %v10238_v41, %v3340_v0  ;;  %v14240_v41 = vsel %vm1270_vm1, %v5078_v22, %v5079_v49  ;;  %v14255_v19 = vpack.c.bf16 %v16162_v60, %v16056_v21 }
 0x258   : > { %10504 = vmatmul.mubr.bf16.gmra.mrb[20].mxu1 %v14207_v38  ;;  %10443 = vmatprep.mubr.bf16.mxu0 %v14211_v48  ;;  %v14228_v7 = vadd.f32 %v3568_v57, %v3339_v1  ;;  %v14235_v34 = vsel %vm1270_vm1, %v16163_v6, %v11384_v10 }
 0x259   : > { %10507 = vmatprep.mubr.bf16.mxu1 %v14216_v3  ;;  %v16164_v3 = vld [vmem:[#allocation95_spill] sm:$0xff]  ;;  %16166 = vst [vmem:[#allocation156_spill] sm:$0xff] %v14255_v19 }
 0x25a   : > { %v10177_v16 = vpop.f32.mrb[172].mxu0  ;;  %v14251_v38 = vpack.c.bf16 %v14235_v34, %v16164_v3 }
 0x25b   : > { %v3342_v26 = vadd.f32 %v10177_v16, %v13742_v35  ;;  %v10241_v0 = vpop.f32.mrb[172].mxu1  ;;  %v3250_v1 = vpop.f32.mrb[173].mxu0  ;;  %v14260_v35 = vpack.c.bf16 %v14240_v41, %v14245_v40 }
 0x25c   : > { %v3341_v57 = vadd.f32 %v3250_v1, %v13749_v25  ;;  %v3580_v6 = vpop.f32.mrb[173].mxu1  ;;  %v10178_v48 = vpop.f32.mrb[174].mxu0  ;;  %16165 = vst [vmem:[#allocation77_spill] sm:$0xff] %v14251_v38 }
 0x25d   : > { %v3343_v22 = vadd.f32 %v10178_v48, %v13751_v42  ;;  %v10242_v47 = vpop.f32.mrb[174].mxu1  ;;  %v3253_v27 = vpop.f32.mrb[175].mxu0  ;;  %16167 = vst [vmem:[#allocation157_spill] sm:$0xff] %v14260_v35  ;;  %v14262_v16 = vadd.f32 %v10241_v0, %v3342_v26  ;;  %v14274_v42 = vsel %vm1270_vm1, %v5079_v49, %v11384_v10  ;;  %v16171_v49 = vld [vmem:[#allocation10_spill] sm:$0xff] }
 0x25e   : > { %v3583_v25 = vpop.f32.mrb[175].mxu1  ;;  %v14264_v1 = vadd.f32 %v3580_v6, %v3341_v57  ;;  %16168 = vst [vmem:[#allocation158_spill] sm:$0xff] %v14274_v42  ;;  %v14279_v27 = vpack.c.bf16 %v16056_v21, %v13083_v15  ;;  %v5152_v57 = vpack.c.bf16 %v11384_v10, %v14274_v42  ;;  %v16170_v6 = vld [vmem:[#allocation90_spill] sm:$0xff] }
 0x25f   : > { %10444 = vmatmul.mubr.bf16.gmra.mrb[24].mxu0 %v11091_v5  ;;  %v14267_v3 = vadd.f32 %v10242_v47, %v3343_v22  ;;  %v5603_v22 = vpack.c.bf16 %v16171_v49, %v16170_v6  ;;  %v16172_v6 = vld [vmem:[#allocation45_spill] sm:$0xff] }
 0x260   : > { %10508 = vmatmul.mubr.bf16.gmra.mrb[24].mxu1 %v14251_v38  ;;  %10447 = vmatprep.mubr.bf16.mxu0 %v14255_v19  ;;  %16169 = vst [vmem:[#allocation159_spill] sm:$0xff] %v14279_v27 }
 0x261   : > { %10511 = vmatprep.mubr.bf16.mxu1 %v14260_v35 }
 0x262   : > { %v10181_v60 = vpop.f32.mrb[176].mxu0 }
 0x263   : > { %v3345_v5 = vadd.f32 %v10181_v60, %v13772_v54  ;;  %v10245_v48 = vpop.f32.mrb[176].mxu1  ;;  %v3265_v47 = vpop.f32.mrb[177].mxu0  ;;  %v11092_v60 = vld [vmem:[%s12643_s11] sm:$0xff]  }
 0x264   : > { %v3595_v26 = vpop.f32.mrb[177].mxu1  ;;  %v10182_v0 = vpop.f32.mrb[178].mxu0 }
 0x265   : > { %v14286_v25 = vadd.f32 %v10245_v48, %v3345_v5  ;;  %v10246_v35 = vpop.f32.mrb[178].mxu1  ;;  %v3267_v19 = vpop.f32.mrb[179].mxu0  ;;  %v5934_v5 = vpack.c.bf16 %v16172_v6, %v16056_v21  ;;  %v16176_v6 = vld [vmem:[#allocation51_spill] sm:$0xff] }
 0x266   : > { %v3344_v15 = vadd.f32 %v3267_v19, %v13777_v18  ;;  %v3597_v38 = vpop.f32.mrb[179].mxu1 }
 0x267   : > { %10448 = vmatmul.mubr.bf16.gmra.mrb[28].mxu0 %v14279_v27 }
 0x268   : > { %v14290_v54 = vadd.f32 %v3597_v38, %v3344_v15  ;;  %10512 = vmatmul.mubr.bf16.gmra.mrb[28].mxu1 %v5152_v57  ;;  %10531 = vmatprep.mubr.bf16.mxu0 %v5603_v22  ;;  %v16173_v38 = vld [vmem:[#allocation58_spill] sm:$0xff]  ;;  %v16174_v15 = vld [vmem:[#allocation9_spill] sm:$0xff] }
 0x269   : > { %10595 = vmatprep.mubr.bf16.mxu1 %v11092_v60  ;;  %v5605_v57 = vpack.c.bf16 %v16174_v15, %v16173_v38  ;;  %v16178_v15 = vld [vmem:[#allocation8_spill] sm:$0xff] }
 0x26a   : > { %v10185_v47 = vpop.f32.mrb[180].mxu0 }
 0x26b   : > { %v10249_v26 = vpop.f32.mrb[180].mxu1  ;;  %v3279_v0 = vpop.f32.mrb[181].mxu0 }
 0x26c   : > { %v3346_v35 = vadd.f32 %v3279_v0, %v13808_v62  ;;  %v3609_v48 = vpop.f32.mrb[181].mxu1  ;;  %v10186_v49 = vpop.f32.mrb[182].mxu0  ;;  %v5935_v26 = vpack.c.bf16 %v16056_v21, %v16058_v39  ;;  %v11039_v62 = vld [vmem:[%s15170_s3 + $0x148] sm:$0xff]  }
 0x26d   : > { %v3348_v18 = vadd.f32 %v10186_v49, %v13813_v24  ;;  %v10250_v19 = vpop.f32.mrb[182].mxu1  ;;  %v3282_v27 = vpop.f32.mrb[183].mxu0  ;;  %v16175_v24 = vld [vmem:[#allocation43_spill] sm:$0xff] }
 0x26e   : > { %v14299_v22 = vadd.f32 %v3609_v48, %v3346_v35  ;;  %v3347_v60 = vadd.f32 %v3282_v27, %v13816_v51  ;;  %v3612_v47 = vpop.f32.mrb[183].mxu1  ;;  %v16177_v49 = vpack.c.bf16 %v16175_v24, %v16176_v6  ;;  %v11040_v35 = vld [vmem:[%s15170_s3 + $0x188] sm:$0xff]   ;;  %v11041_v51 = vld [vmem:[%s15170_s3 + $0x150] sm:$0xff]  }
 0x26f   : > { %v14307_v0 = vadd.f32 %v10250_v19, %v3348_v18  ;;  %v11042_v27 = vld [vmem:[%s15170_s3 + $0x190] sm:$0xff]  }
 0x270   : > { %10532 = vmatmul.mubr.bf16.vlgmr.msra.gmra.mrb[32].mxu0 %v16177_v49  ;;  %v14315_v48 = vadd.f32 %v3612_v47, %v3347_v60  ;;  %10596 = vmatmul.mubr.bf16.vlgmr.msra.gmra.mrb[32].mxu1 %v5934_v5 }
 0x271   : > { %10644 = vmatpush3.bf16.msra.mxu0 %v13986_v17  ;;  %10708 = vmatpush3.bf16.msra.mxu1 %v13992_v53 }
 0x272   : > { %10535 = vmatprep.mubr.bf16.mxu0 %v5605_v57  ;;  %v10189_v39 = vpop.f32.mrb[184].mxu0  ;;  %10599 = vmatprep.mubr.bf16.mxu1 %v5935_v26  ;;  %v16179_v57 = vld [vmem:[#allocation19_spill] sm:$0xff] }
 0x273   : > { %10645 = vmatprep.subr.bf16.mxu0 %v11039_v62  ;;  %v3350_v18 = vadd.f32 %v10189_v39, %v13855_v36  ;;  %v10253_v19 = vpop.f32.mrb[184].mxu1  ;;  %v3294_v5 = vpop.f32.mrb[185].mxu0  ;;  %10709 = vmatprep.subr.bf16.mxu1 %v11040_v35  ;;  %v5607_v60 = vpack.c.bf16 %v16179_v57, %v16178_v15  ;;  %v5937_v36 = vpack.c.bf16 %v16069_v43, %v16056_v21  ;;  %v11044_v43 = vld [vmem:[%s15170_s3 + $0x198] sm:$0xff]   ;;  %v11046_v57 = vld [vmem:[%s15170_s3 + $0x1a0] sm:$0xff]  }
 0x274   : > { %v3349_v17 = vadd.f32 %v3294_v5, %v13860_v32  ;;  %v3624_v53 = vpop.f32.mrb[185].mxu1  ;;  %v10190_v38 = vpop.f32.mrb[186].mxu0 }
 0x275   : > { %10646 = vmatpush3.bf16.msra.mxu0 %v11039_v62  ;;  %v14329_v47 = vadd.f32 %v10253_v19, %v3350_v18  ;;  %v3351_v26 = vadd.f32 %v10190_v38, %v13866_v12  ;;  %v10254_v24 = vpop.f32.mrb[186].mxu1  ;;  %v3297_v6 = vpop.f32.mrb[187].mxu0  ;;  %10710 = vmatpush3.bf16.msra.mxu1 %v11040_v35  ;;  %v11043_v62 = vld [vmem:[%s15170_s3 + $0x158] sm:$0xff]   ;;  %v16180_v18 = vld [vmem:[#allocation73_spill] sm:$0xff]  ;;  %v16181_v19 = vld [vmem:[#allocation62_spill] sm:$0xff] }
 0x276   : > { %10647 = vmatprep.subr.bf16.mxu0 %v11041_v51  ;;  %v14334_v49 = vadd.f32 %v3624_v53, %v3349_v17  ;;  %v3627_v32 = vpop.f32.mrb[187].mxu1  ;;  %10711 = vmatprep.subr.bf16.mxu1 %v11042_v27  ;;  %v16182_v12 = vpack.c.bf16 %v16180_v18, %v16181_v19  ;;  %v11093_v35 = vld [vmem:[%s12643_s11 + $0x10] sm:$0xff]   ;;  %v11045_v17 = vld [vmem:[%s15170_s3 + $0x160] sm:$0xff]   ;;  %v16185_v18 = vld [vmem:[#allocation55_spill] sm:$0xff] }
 0x277   : > { %v14339_v39 = vadd.f32 %v10254_v24, %v3351_v26  ;;  %v16184_v24 = vld [vmem:[#allocation25_spill] sm:$0xff] }
 0x278   : > { %10536 = vmatmul.mubr.bf16.gmra.mrb[36].mxu0 %v16182_v12  ;;  %10600 = vmatmul.mubr.bf16.gmra.mrb[36].mxu1 %v11093_v35  ;;  %v16186_v35 = vld [vmem:[#allocation7_spill] sm:$0xff] }
 0x279   : > { %10539 = vmatprep.mubr.bf16.mxu0 %v5607_v60  ;;  %10603 = vmatprep.mubr.bf16.mxu1 %v5937_v36  ;;  %v5938_v60 = vpack.c.bf16 %v16056_v21, %v16071_v46  ;;  %v11047_v46 = vld [vmem:[%s15170_s3 + $0x168] sm:$0xff]  }
 0x27a   : > { %10648 = vmatpush3.bf16.msra.mxu0 %v11041_v51  ;;  %v10193_v5 = vpop.f32.mrb[188].mxu0  ;;  %10712 = vmatpush3.bf16.msra.mxu1 %v11042_v27  ;;  %v16183_v27 = vld [vmem:[#allocation29_spill] sm:$0xff] }
 0x27b   : > { %10649 = vmatprep.subr.bf16.mxu0 %v11043_v62  ;;  %v3353_v53 = vadd.f32 %v10193_v5, %v13902_v45  ;;  %v10257_v38 = vpop.f32.mrb[188].mxu1  ;;  %v3309_v15 = vpop.f32.mrb[189].mxu0  ;;  %10713 = vmatprep.subr.bf16.mxu1 %v11044_v43  ;;  %v5609_v6 = vpack.c.bf16 %v16184_v24, %v16183_v27  ;;  %v16187_v5 = vld [vmem:[#allocation69_spill] sm:$0xff]  ;;  %v11050_v24 = vld [vmem:[%s15170_s3 + $0x1b0] sm:$0xff]  }
 0x27c   : > { %v3639_v51 = vpop.f32.mrb[189].mxu1  ;;  %v10194_v26 = vpop.f32.mrb[190].mxu0  ;;  %v16188_v15 = vpack.c.bf16 %v16186_v35, %v16187_v5 }
 0x27d   : > { %v14359_v36 = vadd.f32 %v10257_v38, %v3353_v53  ;;  %v10258_v32 = vpop.f32.mrb[190].mxu1  ;;  %v3311_v45 = vpop.f32.mrb[191].mxu0  ;;  %v11048_v53 = vld [vmem:[%s15170_s3 + $0x1a8] sm:$0xff]   ;;  %v11049_v51 = vld [vmem:[%s15170_s3 + $0x170] sm:$0xff]  }
 0x27e   : > { %10650 = vmatpush3.bf16.msra.mxu0 %v11043_v62  ;;  %v3352_v19 = vadd.f32 %v3311_v45, %v16185_v18  ;;  %v3641_v12 = vpop.f32.mrb[191].mxu1  ;;  %10714 = vmatpush3.bf16.msra.mxu1 %v11044_v43  ;;  %v11094_v62 = vld [vmem:[%s12643_s11 + $0x20] sm:$0xff]   ;;  %v16191_v18 = vld [vmem:[#allocation105_spill] sm:$0xff] }
 0x27f   : > { %10651 = vmatprep.subr.bf16.mxu0 %v11045_v17  ;;  %10715 = vmatprep.subr.bf16.mxu1 %v11046_v57 }
 0x280   : > { %10540 = vmatmul.mubr.bf16.gmra.mrb[40].mxu0 %v16188_v15  ;;  %v14371_v38 = vadd.f32 %v3641_v12, %v3352_v19  ;;  %10604 = vmatmul.mubr.bf16.gmra.mrb[40].mxu1 %v5938_v60  ;;  %v16189_v60 = vld [vmem:[#allocation15_spill] sm:$0xff]  ;;  %v16192_v15 = vld [vmem:[#allocation89_spill] sm:$0xff] }
 0x281   : > { %10543 = vmatprep.mubr.bf16.mxu0 %v5609_v6  ;;  %10607 = vmatprep.mubr.bf16.mxu1 %v11094_v62  ;;  %v5940_v6 = vpack.c.bf16 %v16189_v60, %v16056_v21  ;;  %v5941_v62 = vpack.c.bf16 %v16056_v21, %v16192_v15 }
 0x282   : > { %10652 = vmatpush3.bf16.msra.mxu0 %v11045_v17  ;;  %v10277_v43 = vpop.f32.mrb[192].mxu0  ;;  %10716 = vmatpush3.bf16.msra.mxu1 %v11046_v57  ;;  %v16190_v57 = vld [vmem:[#allocation12_spill] sm:$0xff] }
 0x283   : > { %10653 = vmatprep.subr.bf16.mxu0 %v11047_v46  ;;  %v10341_v26 = vpop.f32.mrb[192].mxu1  ;;  %v3903_v27 = vpop.f32.mrb[193].mxu0  ;;  %10717 = vmatprep.subr.bf16.mxu1 %v11048_v53  ;;  %v5611_v19 = vpack.c.bf16 %v16191_v18, %v16190_v57 }
 0x284   : > { %v4078_v32 = vadd.f32 %v3903_v27, %v13956_v2  ;;  %v4496_v17 = vpop.f32.mrb[193].mxu1  ;;  %v10278_v45 = vpop.f32.mrb[194].mxu0  ;;  %v16193_v26 = vld [vmem:[#allocation67_spill] sm:$0xff] }
 0x285   : > { %v4080_v12 = vadd.f32 %v10278_v45, %v13962_v58  ;;  %v10342_v35 = vpop.f32.mrb[194].mxu1  ;;  %v3906_v5 = vpop.f32.mrb[195].mxu0  ;;  %v11051_v2 = vld [vmem:[%s15170_s3 + $0x178] sm:$0xff]   ;;  %v16194_v58 = vld [vmem:[#allocation16_spill] sm:$0xff]  ;;  %v16195_v45 = vld [vmem:[#allocation53_spill] sm:$0xff] }
 0x286   : > { %10654 = vmatpush3.bf16.msra.mxu0 %v11047_v46  ;;  %v14388_v43 = vadd.f32 %v4496_v17, %v4078_v32  ;;  %v4079_v42 = vadd.f32 %v3906_v5, %v16193_v26  ;;  %v4499_v60 = vpop.f32.mrb[195].mxu1  ;;  %10718 = vmatpush3.bf16.msra.mxu1 %v11048_v53  ;;  %v16196_v57 = vpack.c.bf16 %v16194_v58, %v16195_v45  ;;  %v11052_v46 = vld [vmem:[%s15170_s3 + $0x1b8] sm:$0xff]   ;;  %v14407_v17 = vld [vmem:[%s15170_s3 + $0x1c0] sm:$0xff]  }
 0x287   : > { %10655 = vmatprep.subr.bf16.mxu0 %v11049_v51  ;;  %v14394_v27 = vadd.f32 %v10342_v35, %v4080_v12  ;;  %10719 = vmatprep.subr.bf16.mxu1 %v11050_v24  ;;  %v16198_v5 = vld [vmem:[#allocation52_spill] sm:$0xff]  ;;  %v5943_v58 = vpack.c.bf16 %v15977_v28, %v16056_v21 }
 0x288   : > { %10544 = vmatmul.mubr.bf16.gmra.mrb[44].mxu0 %v16196_v57  ;;  %v14402_v32 = vadd.f32 %v4499_v60, %v4079_v42  ;;  %10608 = vmatmul.mubr.bf16.gmra.mrb[44].mxu1 %v5940_v6  ;;  %v14413_v42 = vld [vmem:[%s15170_s3 + $0x200] sm:$0xff]  }
 0x289   : > { %10547 = vmatprep.mubr.bf16.mxu0 %v5611_v19  ;;  %10611 = vmatprep.mubr.bf16.mxu1 %v5941_v62  ;;  %v16197_v19 = vld [vmem:[#allocation21_spill] sm:$0xff] }
 0x28a   : > { %10656 = vmatpush3.bf16.msra.mxu0 %v11049_v51  ;;  %v10281_v53 = vpop.f32.mrb[196].mxu0  ;;  %10720 = vmatpush3.bf16.msra.mxu1 %v11050_v24  ;;  %v5613_v15 = vpack.c.bf16 %v16198_v5, %v16197_v19  ;;  %v16202_v19 = vld [vmem:[#allocation23_spill] sm:$0xff]  ;;  %v16203_v5 = vld [vmem:[#allocation20_spill] sm:$0xff] }
 0x28b   : > { %10657 = vmatprep.subr.bf16.mxu0 %v11051_v2  ;;  %v4082_v18 = vadd.f32 %v10281_v53, %v14009_v11  ;;  %v10345_v12 = vpop.f32.mrb[196].mxu1  ;;  %v3918_v35 = vpop.f32.mrb[197].mxu0  ;;  %10721 = vmatprep.subr.bf16.mxu1 %v11052_v46  ;;  %v16199_v53 = vld [vmem:[#allocation65_spill] sm:$0xff] }
 0x28c   : > { %v4081_v51 = vadd.f32 %v3918_v35, %v14012_v30  ;;  %v4511_v6 = vpop.f32.mrb[197].mxu1  ;;  %v10282_v24 = vpop.f32.mrb[198].mxu0  ;;  %v16200_v35 = vld [vmem:[#allocation66_spill] sm:$0xff] }
 0x28d   : > { %v14418_v62 = vadd.f32 %v10345_v12, %v4082_v18  ;;  %v4083_v11 = vadd.f32 %v10282_v24, %v14016_v61  ;;  %v10346_v26 = vpop.f32.mrb[198].mxu1  ;;  %v3921_v60 = vpop.f32.mrb[199].mxu0  ;;  %v16201_v18 = vpack.c.bf16 %v16199_v53, %v16200_v35  ;;  %v11095_v61 = vld [vmem:[%s12643_s11 + $0x30] sm:$0xff]  }
 0x28e   : > { %10658 = vmatpush3.bf16.msra.mxu0 %v11051_v2  ;;  %v14423_v45 = vadd.f32 %v4511_v6, %v4081_v51  ;;  %v4514_v57 = vpop.f32.mrb[199].mxu1  ;;  %10722 = vmatpush3.bf16.msra.mxu1 %v11052_v46  ;;  %v5944_v51 = vpack.c.bf16 %v16056_v21, %v16108_v31  ;;  %v16204_v53 = vld [vmem:[#allocation18_spill] sm:$0xff]  ;;  %v11096_v31 = vld [vmem:[%s12643_s11 + $0x40] sm:$0xff]  }
 0x28f   : > { %10771 = vmatprep.subr.bf16.mxu0 %v14407_v17  ;;  %v14426_v30 = vadd.f32 %v10346_v26, %v4083_v11  ;;  %10835 = vmatprep.subr.bf16.mxu1 %v14413_v42  ;;  %v5615_v11 = vpack.c.bf16 %v16203_v5, %v16202_v19  ;;  %v16208_v19 = vld [vmem:[#allocation22_spill] sm:$0xff]  ;;  %v16209_v5 = vld [vmem:[#allocation31_spill] sm:$0xff] }
 0x290   : > { %10548 = vmatmul.mubr.bf16.gmra.mrb[48].mxu0 %v16201_v18  ;;  %10612 = vmatmul.mubr.bf16.gmra.mrb[48].mxu1 %v11095_v61 }
 0x291   : > { %10551 = vmatprep.mubr.bf16.mxu0 %v5613_v15  ;;  %10615 = vmatprep.mubr.bf16.mxu1 %v5943_v58 }
 0x292   : > { %v10285_v28 = vpop.f32.mrb[200].mxu0 }
 0x293   : > { %v4085_v2 = vadd.f32 %v10285_v28, %v14046_v33  ;;  %v10349_v12 = vpop.f32.mrb[200].mxu1  ;;  %v3933_v46 = vpop.f32.mrb[201].mxu0  ;;  %v16205_v33 = vld [vmem:[#allocation17_spill] sm:$0xff] }
 0x294   : > { %v4526_v6 = vpop.f32.mrb[201].mxu1  ;;  %v10286_v24 = vpop.f32.mrb[202].mxu0  ;;  %v16206_v35 = vpack.c.bf16 %v16204_v53, %v16205_v33  ;;  %v16211_v33 = vld [vmem:[#allocation141_spill] sm:$0xff] }
 0x295   : > { %v14438_v26 = vadd.f32 %v10349_v12, %v4085_v2  ;;  %v10350_v60 = vpop.f32.mrb[202].mxu1  ;;  %v3935_v57 = vpop.f32.mrb[203].mxu0  ;;  %v16207_v2 = vld [vmem:[#allocation30_spill] sm:$0xff] }
 0x296   : > { %v4084_v15 = vadd.f32 %v3935_v57, %v14052_v56  ;;  %v4528_v58 = vpop.f32.mrb[203].mxu1  ;;  %v5946_v12 = vpack.c.bf16 %v16207_v2, %v16056_v21  ;;  %v5617_v60 = vpack.c.bf16 %v16209_v5, %v16208_v19 }
 0x298   : > { %10552 = vmatmul.mubr.bf16.gmra.mrb[52].mxu0 %v16206_v35  ;;  %v14444_v18 = vadd.f32 %v4528_v58, %v4084_v15  ;;  %10616 = vmatmul.mubr.bf16.gmra.mrb[52].mxu1 %v5944_v51 }
 0x299   : > { %10555 = vmatprep.mubr.bf16.mxu0 %v5615_v11  ;;  %10619 = vmatprep.mubr.bf16.mxu1 %v11096_v31  ;;  %v16210_v11 = vld [vmem:[#allocation14_spill] sm:$0xff] }
 0x29a   : > { %v10289_v61 = vpop.f32.mrb[204].mxu0  ;;  %v5947_v58 = vpack.c.bf16 %v16056_v21, %v16210_v11 }
 0x29b   : > { %v10353_v28 = vpop.f32.mrb[204].mxu1  ;;  %v3947_v46 = vpop.f32.mrb[205].mxu0 }
 0x29c   : > { %v4086_v6 = vadd.f32 %v3947_v46, %v14085_v14  ;;  %v4540_v56 = vpop.f32.mrb[205].mxu1  ;;  %v10290_v24 = vpop.f32.mrb[206].mxu0  ;;  %v16212_v14 = vld [vmem:[#allocation36_spill] sm:$0xff] }
 0x29d   : > { %v4088_v57 = vadd.f32 %v10290_v24, %v14088_v13  ;;  %v10354_v15 = vpop.f32.mrb[206].mxu1  ;;  %v3950_v51 = vpop.f32.mrb[207].mxu0  ;;  %v16213_v28 = vld [vmem:[#allocation32_spill] sm:$0xff] }
 0x29e   : > { %v14455_v53 = vadd.f32 %v4540_v56, %v4086_v6  ;;  %v4087_v35 = vadd.f32 %v3950_v51, %v16211_v33  ;;  %v4543_v31 = vpop.f32.mrb[207].mxu1  ;;  %v16214_v46 = vpack.c.bf16 %v16212_v14, %v16213_v28  ;;  %v16215_v56 = vld [vmem:[#allocation142_spill] sm:$0xff]  ;;  %v6309_v51 = vrot.slane %v14105_v4, 1  ;;  %v16216_v33 = vld [vmem:[#allocation39_spill] sm:$0xff] }
 0x29f   : > { %v14458_v61 = vadd.f32 %v10354_v15, %v4088_v57  ;;  %v5949_v14 = vpack.c.bf16 %v16019_v59, %v16056_v21  ;;  %v11097_v59 = vld [vmem:[%s12643_s11 + $0x50] sm:$0xff]  }
 0x2a0   : > { %10556 = vmatmul.mubr.bf16.gmra.mrb[56].mxu0 %v16214_v46  ;;  %v14463_v2 = vadd.f32 %v4543_v31, %v4087_v35  ;;  %10620 = vmatmul.mubr.bf16.gmra.mrb[56].mxu1 %v5946_v12  ;;  %v16217_v35 = vld [vmem:[#allocation28_spill] sm:$0xff] }
 0x2a1   : > { %10559 = vmatprep.mubr.bf16.mxu0 %v5617_v60  ;;  %10623 = vmatprep.mubr.bf16.mxu1 %v5947_v58  ;;  %v5619_v31 = vpack.c.bf16 %v16217_v35, %v16216_v33  ;;  %v5950_v35 = vpack.c.bf16 %v16056_v21, %v16143_v8  ;;  %v11098_v8 = vld [vmem:[%s12643_s11 + $0x60] sm:$0xff]  }
 0x2a2   : > { %v10293_v13 = vpop.f32.mrb[208].mxu0 }
 0x2a3   : > { %v4090_v24 = vadd.f32 %v10293_v13, %v14132_v55  ;;  %v10357_v19 = vpop.f32.mrb[208].mxu1  ;;  %v3962_v6 = vpop.f32.mrb[209].mxu0 }
 0x2a4   : > { %v4089_v57 = vadd.f32 %v3962_v6, %v14134_v50  ;;  %v4555_v15 = vpop.f32.mrb[209].mxu1  ;;  %v10294_v11 = vpop.f32.mrb[210].mxu0  ;;  %v16218_v50 = vld [vmem:[#allocation49_spill] sm:$0xff]  ;;  %v16219_v6 = vld [vmem:[#allocation35_spill] sm:$0xff] }
 0x2a5   : > { %v14471_v12 = vadd.f32 %v10357_v19, %v4090_v24  ;;  %v4091_v60 = vadd.f32 %v10294_v11, %v14137_v63  ;;  %v10358_v58 = vpop.f32.mrb[210].mxu1  ;;  %v3965_v55 = vpop.f32.mrb[211].mxu0  ;;  %v16220_v5 = vpack.c.bf16 %v16218_v50, %v16219_v6  ;;  %v14486_v24 = vsel %vm1270_vm1, %v6309_v51, %v11384_v10 }
 0x2a6   : > { %v14476_v28 = vadd.f32 %v4555_v15, %v4089_v57  ;;  %v4558_v46 = vpop.f32.mrb[211].mxu1  ;;  %v16221_v63 = vrot.slane %v16215_v56, 1  ;;  %v16223_v55 = vld [vmem:[#allocation76_spill] sm:$0xff] }
 0x2a7   : > { %v14478_v13 = vadd.f32 %v10358_v58, %v4091_v60  ;;  %v16229_v57 = vld [vmem:[#allocation44_spill] sm:$0xff] }
 0x2a8   : > { %10560 = vmatmul.mubr.bf16.gmra.mrb[60].mxu0 %v16220_v5  ;;  %v14492_v19 = vsel %vm1270_vm1, %v16221_v63, %v6309_v51  ;;  %10624 = vmatmul.mubr.bf16.gmra.mrb[60].mxu1 %v11097_v59  ;;  %v16222_v51 = vld [vmem:[#allocation38_spill] sm:$0xff]  ;;  %v16224_v59 = vld [vmem:[#allocation72_spill] sm:$0xff] }
 0x2a9   : > { %10563 = vmatprep.mubr.bf16.mxu0 %v5619_v31  ;;  %10627 = vmatprep.mubr.bf16.mxu1 %v5949_v14  ;;  %v5621_v46 = vpack.c.bf16 %v16223_v55, %v16222_v51 }
 0x2aa   : > { %v10297_v15 = vpop.f32.mrb[212].mxu0 }
 0x2ab   : > { %v4093_v5 = vadd.f32 %v10297_v15, %v14180_v9  ;;  %v10361_v11 = vpop.f32.mrb[212].mxu1  ;;  %v3977_v33 = vpop.f32.mrb[213].mxu0  ;;  %v16225_v9 = vld [vmem:[#allocation75_spill] sm:$0xff] }
 0x2ac   : > { %v4570_v60 = vpop.f32.mrb[213].mxu1  ;;  %v10298_v58 = vpop.f32.mrb[214].mxu0  ;;  %v16226_v15 = vpack.c.bf16 %v16224_v59, %v16225_v9 }
 0x2ad   : > { %v14502_v50 = vadd.f32 %v10361_v11, %v4093_v5  ;;  %v10362_v31 = vpop.f32.mrb[214].mxu1  ;;  %v3979_v6 = vpop.f32.mrb[215].mxu0  ;;  %v16227_v5 = vld [vmem:[#allocation92_spill] sm:$0xff] }
 0x2ae   : > { %v4092_v14 = vadd.f32 %v3979_v6, %v14186_v37  ;;  %v4572_v63 = vpop.f32.mrb[215].mxu1  ;;  %v5952_v11 = vpack.c.bf16 %v16227_v5, %v16056_v21  ;;  %v16228_v6 = vld [vmem:[#allocation70_spill] sm:$0xff] }
 0x2af   : > { %v5623_v59 = vpack.c.bf16 %v16229_v57, %v16228_v6  ;;  %v16233_v6 = vld [vmem:[#allocation118_spill] sm:$0xff] }
 0x2b0   : > { %10564 = vmatmul.mubr.bf16.gmra.mrb[64].mxu0 %v16226_v15  ;;  %v14508_v33 = vadd.f32 %v4572_v63, %v4092_v14  ;;  %10628 = vmatmul.mubr.bf16.gmra.mrb[64].mxu1 %v5950_v35 }
 0x2b1   : > { %10567 = vmatprep.mubr.bf16.mxu0 %v5621_v46  ;;  %10631 = vmatprep.mubr.bf16.mxu1 %v11098_v8  ;;  %v5953_v46 = vpack.c.bf16 %v16056_v21, %v13579_v23 }
 0x2b2   : > { %v10301_v60 = vpop.f32.mrb[216].mxu0 }
 0x2b3   : > { %v10365_v58 = vpop.f32.mrb[216].mxu1  ;;  %v3991_v51 = vpop.f32.mrb[217].mxu0 }
 0x2b4   : > { %v4094_v55 = vadd.f32 %v3991_v51, %v14221_v52  ;;  %v4584_v37 = vpop.f32.mrb[217].mxu1  ;;  %v10302_v31 = vpop.f32.mrb[218].mxu0  ;;  %v16230_v52 = vld [vmem:[#allocation94_spill] sm:$0xff] }
 0x2b5   : > { %v4096_v14 = vadd.f32 %v10302_v31, %v14224_v29  ;;  %v10366_v63 = vpop.f32.mrb[218].mxu1  ;;  %v3994_v35 = vpop.f32.mrb[219].mxu0  ;;  %v16231_v58 = vld [vmem:[#allocation78_spill] sm:$0xff] }
 0x2b6   : > { %v14519_v9 = vadd.f32 %v4584_v37, %v4094_v55  ;;  %v4095_v15 = vadd.f32 %v3994_v35, %v14228_v7  ;;  %v4587_v8 = vpop.f32.mrb[219].mxu1  ;;  %v16232_v51 = vpack.c.bf16 %v16230_v52, %v16231_v58  ;;  %v16235_v52 = vld [vmem:[#allocation80_spill] sm:$0xff] }
 0x2b7   : > { %v14522_v60 = vadd.f32 %v10366_v63, %v4096_v14  ;;  %v5625_v14 = vpack.c.bf16 %v14148_v44, %v16233_v6 }
 0x2b8   : > { %10568 = vmatmul.mubr.bf16.gmra.mrb[68].mxu0 %v16232_v51  ;;  %v14527_v5 = vadd.f32 %v4587_v8, %v4095_v15  ;;  %10632 = vmatmul.mubr.bf16.gmra.mrb[68].mxu1 %v5952_v11  ;;  %v11099_v51 = vld [vmem:[%s12643_s11 + $0x70] sm:$0xff]  }
 0x2b9   : > { %10571 = vmatprep.mubr.bf16.mxu0 %v5623_v59  ;;  %10635 = vmatprep.mubr.bf16.mxu1 %v5953_v46  ;;  %v5955_v46 = vpack.c.bf16 %v16215_v56, %v16056_v21 }
 0x2ba   : > { %v10305_v29 = vpop.f32.mrb[220].mxu0 }
 0x2bb   : > { %v4098_v57 = vadd.f32 %v10305_v29, %v14262_v16  ;;  %v10369_v23 = vpop.f32.mrb[220].mxu1  ;;  %v4006_v55 = vpop.f32.mrb[221].mxu0  ;;  %v16237_v29 = vld [vmem:[#allocation4_spill] sm:$0xff] }
 0x2bc   : > { %v4097_v7 = vadd.f32 %v4006_v55, %v14264_v1  ;;  %v4599_v37 = vpop.f32.mrb[221].mxu1  ;;  %v10306_v31 = vpop.f32.mrb[222].mxu0  ;;  %v16234_v1 = vld [vmem:[#allocation79_spill] sm:$0xff] }
 0x2bd   : > { %v14533_v63 = vadd.f32 %v10369_v23, %v4098_v57  ;;  %v4099_v35 = vadd.f32 %v10306_v31, %v14267_v3  ;;  %v10370_v11 = vpop.f32.mrb[222].mxu1  ;;  %v4009_v59 = vpop.f32.mrb[223].mxu0  ;;  %v16236_v58 = vpack.c.bf16 %v16234_v1, %v16235_v52  ;;  %v16238_v57 = vrot.slane %v14105_v4, 7  ;;  %v16239_v31 = vld [vmem:[#allocation147_spill] sm:$0xff]  ;;  %v16241_v1 = vld [vmem:[#allocation121_spill] sm:$0xff] }
 0x2be   : > { %v14538_v16 = vadd.f32 %v4599_v37, %v4097_v7  ;;  %v4602_v15 = vpop.f32.mrb[223].mxu1  ;;  %v5956_v59 = vpack.c.bf16 %v16056_v21, %v14105_v4 }
 0x2bf   : > { %v14540_v8 = vadd.f32 %v10370_v11, %v4099_v35  ;;  %v14551_v3 = vsel %vm578_vm0, %v16238_v57, %v16237_v29  ;;  %v16240_v15 = vld [vmem:[#allocation119_spill] sm:$0xff] }
 0x2c0   : > { %10572 = vmatmul.mubr.bf16.gmra.mrb[72].mxu0 %v16236_v58  ;;  %10636 = vmatmul.mubr.bf16.gmra.mrb[72].mxu1 %v11099_v51  ;;  %v5626_v6 = vpack.c.bf16 %v14551_v3, %v16239_v31  ;;  %v6359_v52 = vpack.c.bf16 %v16241_v1, %v16240_v15 }
 0x2c1   : > { %10575 = vmatprep.mubr.bf16.mxu0 %v5625_v14  ;;  %10639 = vmatprep.mubr.bf16.mxu1 %v5955_v46 }
 0x2c2   : > { %v10309_v23 = vpop.f32.mrb[224].mxu0 }
 0x2c3   : > { %v4101_v55 = vadd.f32 %v10309_v23, %v14286_v25  ;;  %v10373_v7 = vpop.f32.mrb[224].mxu1  ;;  %v4021_v37 = vpop.f32.mrb[225].mxu0  ;;  %v16242_v23 = vld [vmem:[#allocation60_spill] sm:$0xff] }
 0x2c4   : > { %v4614_v35 = vpop.f32.mrb[225].mxu1  ;;  %v10310_v11 = vpop.f32.mrb[226].mxu0 }
 0x2c5   : > { %v14560_v58 = vadd.f32 %v10373_v7, %v4101_v55  ;;  %v10374_v14 = vpop.f32.mrb[226].mxu1  ;;  %v4023_v46 = vpop.f32.mrb[227].mxu0 }
 0x2c6   : > { %v4100_v51 = vadd.f32 %v4023_v46, %v14290_v54  ;;  %v4616_v25 = vpop.f32.mrb[227].mxu1  ;;  %v16243_v54 = vld [vmem:[#allocation81_spill] sm:$0xff]  ;;  %v16244_v14 = vld [vmem:[#allocation63_spill] sm:$0xff] }
 0x2c8   : > { %10576 = vmatmul.mubr.bf16.gmra.mrb[76].mxu0 %v5626_v6  ;;  %v14563_v57 = vadd.f32 %v4616_v25, %v4100_v51  ;;  %10640 = vmatmul.mubr.bf16.gmra.mrb[76].mxu1 %v5956_v59  ;;  %v6361_v6 = vpack.c.bf16 %v16244_v14, %v16243_v54  ;;  %v11055_v51 = vld [vmem:[%s15170_s3 + $0x1c8] sm:$0xff]  }
 0x2c9   : > { %10659 = vmatprep.mubr.bf16.mxu0 %v6359_v52  ;;  %10723 = vmatprep.mubr.bf16.mxu1 %v16242_v23  ;;  %v16246_v23 = vld [vmem:[#allocation83_spill] sm:$0xff]  ;;  %v16250_v14 = vld [vmem:[#allocation57_spill] sm:$0xff] }
 0x2ca   : > { %v10313_v37 = vpop.f32.mrb[228].mxu0 }
 0x2cb   : > { %v10377_v35 = vpop.f32.mrb[228].mxu1  ;;  %v4035_v21 = vpop.f32.mrb[229].mxu0 }
 0x2cc   : > { %v4102_v4 = vadd.f32 %v4035_v21, %v14299_v22  ;;  %v4628_v11 = vpop.f32.mrb[229].mxu1  ;;  %v10314_v55 = vpop.f32.mrb[230].mxu0  ;;  %v16245_v22 = vld [vmem:[#allocation82_spill] sm:$0xff]  ;;  %v16248_v21 = vld [vmem:[#allocation24_spill] sm:$0xff] }
 0x2cd   : > { %v4104_v7 = vadd.f32 %v10314_v55, %v14307_v0  ;;  %v10378_v15 = vpop.f32.mrb[230].mxu1  ;;  %v4038_v1 = vpop.f32.mrb[231].mxu0  ;;  %v16247_v37 = vpack.c.bf16 %v16245_v22, %v16246_v23  ;;  %v11056_v0 = vld [vmem:[%s15170_s3 + $0x208] sm:$0xff]   ;;  %v11058_v55 = vld [vmem:[%s15170_s3 + $0x210] sm:$0xff]  }
 0x2ce   : > { %v14570_v46 = vadd.f32 %v4628_v11, %v4102_v4  ;;  %v4103_v59 = vadd.f32 %v4038_v1, %v14315_v48  ;;  %v4631_v52 = vpop.f32.mrb[231].mxu1  ;;  %v11057_v48 = vld [vmem:[%s15170_s3 + $0x1d0] sm:$0xff]   ;;  %v16249_v11 = vld [vmem:[#allocation37_spill] sm:$0xff] }
 0x2cf   : > { %v14576_v25 = vadd.f32 %v10378_v15, %v4104_v7 }
 0x2d0   : > { %10660 = vmatmul.mubr.bf16.vlgmr.msra.gmra.mrb[80].mxu0 %v16247_v37  ;;  %v14584_v35 = vadd.f32 %v4631_v52, %v4103_v59  ;;  %10724 = vmatmul.mubr.bf16.vlgmr.msra.gmra.mrb[80].mxu1 %v16248_v21 }
 0x2d1   : > { %10772 = vmatpush3.bf16.msra.mxu0 %v14407_v17  ;;  %10836 = vmatpush3.bf16.msra.mxu1 %v14413_v42 }
 0x2d2   : > { %10663 = vmatprep.mubr.bf16.mxu0 %v6361_v6  ;;  %v10317_v4 = vpop.f32.mrb[232].mxu0  ;;  %10727 = vmatprep.mubr.bf16.mxu1 %v16249_v11  ;;  %v16251_v6 = vld [vmem:[#allocation64_spill] sm:$0xff] }
 0x2d3   : > { %10773 = vmatprep.subr.bf16.mxu0 %v11055_v51  ;;  %v4106_v7 = vadd.f32 %v10317_v4, %v14329_v47  ;;  %v10381_v15 = vpop.f32.mrb[232].mxu1  ;;  %v4050_v1 = vpop.f32.mrb[233].mxu0  ;;  %10837 = vmatprep.subr.bf16.mxu1 %v11056_v0  ;;  %v6363_v59 = vpack.c.bf16 %v16251_v6, %v16250_v14  ;;  %v16252_v11 = vld [vmem:[#allocation84_spill] sm:$0xff] }
 0x2d4   : > { %v4105_v17 = vadd.f32 %v4050_v1, %v14334_v49  ;;  %v4643_v42 = vpop.f32.mrb[233].mxu1  ;;  %v10318_v54 = vpop.f32.mrb[234].mxu0  ;;  %v11059_v49 = vld [vmem:[%s15170_s3 + $0x1d8] sm:$0xff]   ;;  %v16253_v1 = vld [vmem:[#allocation85_spill] sm:$0xff] }
 0x2d5   : > { %10774 = vmatpush3.bf16.msra.mxu0 %v11055_v51  ;;  %v14600_v52 = vadd.f32 %v10381_v15, %v4106_v7  ;;  %v4107_v22 = vadd.f32 %v10318_v54, %v14339_v39  ;;  %v10382_v37 = vpop.f32.mrb[234].mxu1  ;;  %v4053_v21 = vpop.f32.mrb[235].mxu0  ;;  %10838 = vmatpush3.bf16.msra.mxu1 %v11056_v0  ;;  %v16254_v7 = vpack.c.bf16 %v16252_v11, %v16253_v1  ;;  %v11060_v39 = vld [vmem:[%s15170_s3 + $0x218] sm:$0xff]   ;;  %v16255_v0 = vld [vmem:[#allocation100_spill] sm:$0xff] }
 0x2d6   : > { %10775 = vmatprep.subr.bf16.mxu0 %v11057_v48  ;;  %v14603_v47 = vadd.f32 %v4643_v42, %v4105_v17  ;;  %v4646_v4 = vpop.f32.mrb[235].mxu1  ;;  %10839 = vmatprep.subr.bf16.mxu1 %v11058_v55  ;;  %v16256_v15 = vld [vmem:[#allocation103_spill] sm:$0xff]  ;;  %v11061_v42 = vld [vmem:[%s15170_s3 + $0x1e0] sm:$0xff]   ;;  %v16257_v21 = vld [vmem:[#allocation6_spill] sm:$0xff] }
 0x2d7   : > { %v14608_v51 = vadd.f32 %v10382_v37, %v4107_v22  ;;  %v11062_v22 = vld [vmem:[%s15170_s3 + $0x220] sm:$0xff]  }
 0x2d8   : > { %10664 = vmatmul.mubr.bf16.gmra.mrb[84].mxu0 %v16254_v7  ;;  %10728 = vmatmul.mubr.bf16.gmra.mrb[84].mxu1 %v16255_v0  ;;  %v11063_v0 = vld [vmem:[%s15170_s3 + $0x1e8] sm:$0xff]  }
 0x2d9   : > { %10667 = vmatprep.mubr.bf16.mxu0 %v6363_v59  ;;  %10731 = vmatprep.mubr.bf16.mxu1 %v16256_v15  ;;  %v16259_v15 = vld [vmem:[#allocation87_spill] sm:$0xff] }
 0x2da   : > { %10776 = vmatpush3.bf16.msra.mxu0 %v11057_v48  ;;  %v10321_v17 = vpop.f32.mrb[236].mxu0  ;;  %10840 = vmatpush3.bf16.msra.mxu1 %v11058_v55  ;;  %v16258_v48 = vld [vmem:[#allocation86_spill] sm:$0xff] }
 0x2db   : > { %10777 = vmatprep.subr.bf16.mxu0 %v11059_v49  ;;  %v4109_v54 = vadd.f32 %v10321_v17, %v14359_v36  ;;  %v10385_v14 = vpop.f32.mrb[236].mxu1  ;;  %v4065_v6 = vpop.f32.mrb[237].mxu0  ;;  %10841 = vmatprep.subr.bf16.mxu1 %v11060_v39  ;;  %v6365_v4 = vpack.c.bf16 %v16258_v48, %v16257_v21  ;;  %v16260_v17 = vld [vmem:[#allocation88_spill] sm:$0xff]  ;;  %v11066_v48 = vld [vmem:[%s15170_s3 + $0x230] sm:$0xff]  }
 0x2dc   : > { %v4658_v59 = vpop.f32.mrb[237].mxu1  ;;  %v10322_v37 = vpop.f32.mrb[238].mxu0  ;;  %v16261_v6 = vpack.c.bf16 %v16259_v15, %v16260_v17 }
 0x2dd   : > { %v14627_v55 = vadd.f32 %v10385_v14, %v4109_v54  ;;  %v10386_v11 = vpop.f32.mrb[238].mxu1  ;;  %v4067_v1 = vpop.f32.mrb[239].mxu0  ;;  %v11064_v54 = vld [vmem:[%s15170_s3 + $0x228] sm:$0xff]   ;;  %v11065_v59 = vld [vmem:[%s15170_s3 + $0x1f0] sm:$0xff]  }
 0x2de   : > { %10778 = vmatpush3.bf16.msra.mxu0 %v11059_v49  ;;  %v4108_v7 = vadd.f32 %v4067_v1, %v14371_v38  ;;  %v4660_v36 = vpop.f32.mrb[239].mxu1  ;;  %10842 = vmatpush3.bf16.msra.mxu1 %v11060_v39  ;;  %v16262_v49 = vld [vmem:[#allocation33_spill] sm:$0xff]  ;;  %v16263_v38 = vld [vmem:[#allocation106_spill] sm:$0xff] }
 0x2df   : > { %10779 = vmatprep.subr.bf16.mxu0 %v11061_v42  ;;  %10843 = vmatprep.subr.bf16.mxu1 %v11062_v22 }
 0x2e0   : > { %10668 = vmatmul.mubr.bf16.gmra.mrb[88].mxu0 %v16261_v6  ;;  %v14639_v14 = vadd.f32 %v4660_v36, %v4108_v7  ;;  %10732 = vmatmul.mubr.bf16.gmra.mrb[88].mxu1 %v16262_v49  ;;  %v16264_v7 = vld [vmem:[#allocation130_spill] sm:$0xff] }
 0x2e1   : > { %10671 = vmatprep.mubr.bf16.mxu0 %v6365_v4  ;;  %10735 = vmatprep.mubr.bf16.mxu1 %v16263_v38 }
 0x2e2   : > { %10780 = vmatpush3.bf16.msra.mxu0 %v11061_v42  ;;  %v10405_v39 = vpop.f32.mrb[240].mxu0  ;;  %10844 = vmatpush3.bf16.msra.mxu1 %v11062_v22  ;;  %v16265_v42 = vld [vmem:[#allocation59_spill] sm:$0xff] }
 0x2e3   : > { %10781 = vmatprep.subr.bf16.mxu0 %v11063_v0  ;;  %v10469_v37 = vpop.f32.mrb[240].mxu1  ;;  %v4826_v21 = vpop.f32.mrb[241].mxu0  ;;  %10845 = vmatprep.subr.bf16.mxu1 %v11064_v54  ;;  %v6367_v36 = vpack.c.bf16 %v16265_v42, %v16264_v7 }
 0x2e4   : > { %v5001_v11 = vadd.f32 %v4826_v21, %v14388_v43  ;;  %v5252_v4 = vpop.f32.mrb[241].mxu1  ;;  %v10406_v1 = vpop.f32.mrb[242].mxu0  ;;  %v11067_v43 = vld [vmem:[%s15170_s3 + $0x1f8] sm:$0xff]   ;;  %v16266_v37 = vld [vmem:[#allocation96_spill] sm:$0xff]  ;;  %v16267_v21 = vld [vmem:[#allocation97_spill] sm:$0xff] }
 0x2e5   : > { %v5003_v22 = vadd.f32 %v10406_v1, %v14394_v27  ;;  %v10470_v15 = vpop.f32.mrb[242].mxu1  ;;  %v4829_v17 = vpop.f32.mrb[243].mxu0  ;;  %v16268_v7 = vpack.c.bf16 %v16266_v37, %v16267_v21  ;;  %v11068_v27 = vld [vmem:[%s15170_s3 + $0x238] sm:$0xff]  }
 0x2e6   : > { %10782 = vmatpush3.bf16.msra.mxu0 %v11063_v0  ;;  %v14653_v6 = vadd.f32 %v5252_v4, %v5001_v11  ;;  %v5002_v49 = vadd.f32 %v4829_v17, %v14402_v32  ;;  %v5255_v38 = vpop.f32.mrb[243].mxu1  ;;  %10846 = vmatpush3.bf16.msra.mxu1 %v11064_v54  ;;  %v16269_v32 = vld [vmem:[#allocation47_spill] sm:$0xff]  ;;  %v16270_v54 = vld [vmem:[#allocation74_spill] sm:$0xff] }
 0x2e7   : > { %10783 = vmatprep.subr.bf16.mxu0 %v11065_v59  ;;  %v14659_v39 = vadd.f32 %v10470_v15, %v5003_v22  ;;  %10847 = vmatprep.subr.bf16.mxu1 %v11066_v48 }
 0x2e8   : > { %10672 = vmatmul.mubr.bf16.gmra.mrb[92].mxu0 %v16268_v7  ;;  %v14667_v0 = vadd.f32 %v5255_v38, %v5002_v49  ;;  %10736 = vmatmul.mubr.bf16.gmra.mrb[92].mxu1 %v16269_v32  ;;  %v16271_v49 = vld [vmem:[#allocation134_spill] sm:$0xff] }
 0x2e9   : > { %10675 = vmatprep.mubr.bf16.mxu0 %v6367_v36  ;;  %10739 = vmatprep.mubr.bf16.mxu1 %v16270_v54  ;;  %v16272_v38 = vld [vmem:[#allocation54_spill] sm:$0xff] }
 0x2ea   : > { %10784 = vmatpush3.bf16.msra.mxu0 %v11065_v59  ;;  %v10409_v11 = vpop.f32.mrb[244].mxu0  ;;  %10848 = vmatpush3.bf16.msra.mxu1 %v11066_v48  ;;  %v6369_v37 = vpack.c.bf16 %v16272_v38, %v16271_v49  ;;  %v16273_v54 = vld [vmem:[#allocation26_spill] sm:$0xff]  ;;  %v16278_v49 = vld [vmem:[#allocation71_spill] sm:$0xff] }
 0x2eb   : > { %10785 = vmatprep.subr.bf16.mxu0 %v11067_v43  ;;  %v5005_v4 = vadd.f32 %v10409_v11, %v14418_v62  ;;  %v10473_v1 = vpop.f32.mrb[244].mxu1  ;;  %v4841_v42 = vpop.f32.mrb[245].mxu0  ;;  %10849 = vmatprep.subr.bf16.mxu1 %v11068_v27 }
 0x2ec   : > { %v5004_v22 = vadd.f32 %v4841_v42, %v14423_v45  ;;  %v5267_v15 = vpop.f32.mrb[245].mxu1  ;;  %v10410_v17 = vpop.f32.mrb[246].mxu0  ;;  %v16274_v45 = vld [vmem:[#allocation98_spill] sm:$0xff]  ;;  %v16276_v42 = vld [vmem:[#allocation109_spill] sm:$0xff] }
 0x2ed   : > { %v14675_v21 = vadd.f32 %v10473_v1, %v5005_v4  ;;  %v5006_v36 = vadd.f32 %v10410_v17, %v14426_v30  ;;  %v10474_v59 = vpop.f32.mrb[246].mxu1  ;;  %v4844_v7 = vpop.f32.mrb[247].mxu0  ;;  %v16275_v11 = vpack.c.bf16 %v16273_v54, %v16274_v45  ;;  %v16277_v4 = vld [vmem:[#allocation112_spill] sm:$0xff]  ;;  %v16281_v45 = vld [vmem:[#allocation102_spill] sm:$0xff] }
 0x2ee   : > { %10786 = vmatpush3.bf16.msra.mxu0 %v11067_v43  ;;  %v14678_v48 = vadd.f32 %v5267_v15, %v5004_v22  ;;  %v5270_v62 = vpop.f32.mrb[247].mxu1  ;;  %10850 = vmatpush3.bf16.msra.mxu1 %v11068_v27  ;;  %v16279_v27 = vld [vmem:[#allocation61_spill] sm:$0xff] }
 0x2ef   : > { %v14680_v32 = vadd.f32 %v10474_v59, %v5006_v36  ;;  %v6371_v38 = vpack.c.bf16 %v16279_v27, %v16278_v49  ;;  %v16286_v49 = vld [vmem:[#allocation46_spill] sm:$0xff] }
 0x2f0   : > { %10676 = vmatmul.mubr.bf16.gmra.mrb[96].mxu0 %v16275_v11  ;;  %10740 = vmatmul.mubr.bf16.gmra.mrb[96].mxu1 %v16276_v42 }
 0x2f1   : > { %10679 = vmatprep.mubr.bf16.mxu0 %v6369_v37  ;;  %10743 = vmatprep.mubr.bf16.mxu1 %v16277_v4  ;;  %v16280_v37 = vld [vmem:[#allocation101_spill] sm:$0xff]  ;;  %v16284_v4 = vld [vmem:[#allocation114_spill] sm:$0xff] }
 0x2f2   : > { %v10413_v1 = vpop.f32.mrb[248].mxu0  ;;  %v16282_v11 = vpack.c.bf16 %v16280_v37, %v16281_v45 }
 0x2f3   : > { %v5008_v30 = vadd.f32 %v10413_v1, %v14438_v26  ;;  %v10477_v17 = vpop.f32.mrb[248].mxu1  ;;  %v4856_v43 = vpop.f32.mrb[249].mxu0  ;;  %v16283_v26 = vld [vmem:[#allocation93_spill] sm:$0xff] }
 0x2f4   : > { %v5282_v22 = vpop.f32.mrb[249].mxu1  ;;  %v10414_v15 = vpop.f32.mrb[250].mxu0 }
 0x2f5   : > { %v14690_v36 = vadd.f32 %v10477_v17, %v5008_v30  ;;  %v10478_v59 = vpop.f32.mrb[250].mxu1  ;;  %v4858_v7 = vpop.f32.mrb[251].mxu0 }
 0x2f6   : > { %v5007_v62 = vadd.f32 %v4858_v7, %v14444_v18  ;;  %v5284_v54 = vpop.f32.mrb[251].mxu1  ;;  %v16285_v18 = vld [vmem:[#allocation143_spill] sm:$0xff] }
 0x2f7   : > { %v6373_v27 = vpack.c.bf16 %v16286_v49, %v16285_v18  ;;  %v16292_v49 = vld [vmem:[#allocation148_spill] sm:$0xff] }
 0x2f8   : > { %10680 = vmatmul.mubr.bf16.gmra.mrb[100].mxu0 %v16282_v11  ;;  %v14696_v42 = vadd.f32 %v5284_v54, %v5007_v62  ;;  %10744 = vmatmul.mubr.bf16.gmra.mrb[100].mxu1 %v16283_v26  ;;  %v16287_v11 = vld [vmem:[#allocation34_spill] sm:$0xff]  ;;  %v16288_v26 = vld [vmem:[#allocation104_spill] sm:$0xff] }
 0x2f9   : > { %10683 = vmatprep.mubr.bf16.mxu0 %v6371_v38  ;;  %10747 = vmatprep.mubr.bf16.mxu1 %v16284_v4  ;;  %v16289_v4 = vpack.c.bf16 %v16287_v11, %v16288_v26 }
 0x2fa   : > { %v10417_v1 = vpop.f32.mrb[252].mxu0 }
 0x2fb   : > { %v10481_v43 = vpop.f32.mrb[252].mxu1  ;;  %v4870_v30 = vpop.f32.mrb[253].mxu0  ;;  %v16290_v1 = vld [vmem:[#allocation115_spill] sm:$0xff] }
 0x2fc   : > { %v5009_v17 = vadd.f32 %v4870_v30, %v14455_v53  ;;  %v5296_v22 = vpop.f32.mrb[253].mxu1  ;;  %v10418_v15 = vpop.f32.mrb[254].mxu0  ;;  %v16291_v43 = vld [vmem:[#allocation48_spill] sm:$0xff] }
 0x2fd   : > { %v5011_v59 = vadd.f32 %v10418_v15, %v14458_v61  ;;  %v10482_v7 = vpop.f32.mrb[254].mxu1  ;;  %v4873_v62 = vpop.f32.mrb[255].mxu0 }
 0x2fe   : > { %v14704_v54 = vadd.f32 %v5296_v22, %v5009_v17  ;;  %v5010_v38 = vadd.f32 %v4873_v62, %v14463_v2  ;;  %v5299_v37 = vpop.f32.mrb[255].mxu1 }
 0x2ff   : > { %v14707_v45 = vadd.f32 %v10482_v7, %v5011_v59  ;;  %v16293_v59 = vld [vmem:[#allocation50_spill] sm:$0xff] }
 0x300   : > { %10684 = vmatmul.mubr.bf16.gmra.mrb[104].mxu0 %v16289_v4  ;;  %v14712_v53 = vadd.f32 %v5299_v37, %v5010_v38  ;;  %10748 = vmatmul.mubr.bf16.gmra.mrb[104].mxu1 %v16290_v1  ;;  %v6375_v7 = vpack.c.bf16 %v16293_v59, %v16292_v49  ;;  %v16295_v1 = vld [vmem:[#allocation108_spill] sm:$0xff]  ;;  %v16300_v49 = vld [vmem:[#allocation13_spill] sm:$0xff] }
 0x301   : > { %10687 = vmatprep.mubr.bf16.mxu0 %v6373_v27  ;;  %10751 = vmatprep.mubr.bf16.mxu1 %v16291_v43 }
 0x302   : > { %v10421_v61 = vpop.f32.mrb[0].mxu0 }
 0x303   : > { %v5013_v30 = vadd.f32 %v10421_v61, %v14471_v12  ;;  %v10485_v17 = vpop.f32.mrb[0].mxu1  ;;  %v4885_v22 = vpop.f32.mrb[1].mxu0  ;;  %v16294_v12 = vld [vmem:[#allocation107_spill] sm:$0xff]  ;;  %v16298_v61 = vld [vmem:[#allocation117_spill] sm:$0xff] }
 0x304   : > { %v5012_v2 = vadd.f32 %v4885_v22, %v14476_v28  ;;  %v5311_v15 = vpop.f32.mrb[1].mxu1  ;;  %v10422_v18 = vpop.f32.mrb[2].mxu0  ;;  %v16296_v43 = vpack.c.bf16 %v16294_v12, %v16295_v1  ;;  %v16297_v28 = vld [vmem:[#allocation116_spill] sm:$0xff]  ;;  %v16302_v1 = vld [vmem:[#allocation111_spill] sm:$0xff] }
 0x305   : > { %v14720_v62 = vadd.f32 %v10485_v17, %v5013_v30  ;;  %v5014_v38 = vadd.f32 %v10422_v18, %v14478_v13  ;;  %v10486_v37 = vpop.f32.mrb[2].mxu1  ;;  %v4888_v27 = vpop.f32.mrb[3].mxu0 }
 0x306   : > { %v14723_v11 = vadd.f32 %v5311_v15, %v5012_v2  ;;  %v5314_v26 = vpop.f32.mrb[3].mxu1  ;;  %v16299_v15 = vld [vmem:[#allocation41_spill] sm:$0xff] }
 0x307   : > { %v14725_v4 = vadd.f32 %v10486_v37, %v5014_v38  ;;  %v6377_v59 = vpack.c.bf16 %v16300_v49, %v16299_v15 }
 0x308   : > { %10688 = vmatmul.mubr.bf16.gmra.mrb[108].mxu0 %v16296_v43  ;;  %10752 = vmatmul.mubr.bf16.gmra.mrb[108].mxu1 %v16297_v28 }
 0x309   : > { %10691 = vmatprep.mubr.bf16.mxu0 %v6375_v7  ;;  %10755 = vmatprep.mubr.bf16.mxu1 %v16298_v61  ;;  %v16301_v7 = vld [vmem:[#allocation110_spill] sm:$0xff] }
 0x30a   : > { %v10425_v30 = vpop.f32.mrb[4].mxu0  ;;  %v16303_v43 = vpack.c.bf16 %v16301_v7, %v16302_v1  ;;  %v16305_v61 = vld [vmem:[#allocation42_spill] sm:$0xff]  ;;  %v16306_v7 = vld [vmem:[#allocation95_spill] sm:$0xff]  ;;  %v16307_v1 = vld [vmem:[#allocation113_spill] sm:$0xff] }
 0x30b   : > { %v5016_v17 = vadd.f32 %v10425_v30, %v14502_v50  ;;  %v10489_v13 = vpop.f32.mrb[4].mxu1  ;;  %v4900_v22 = vpop.f32.mrb[5].mxu0  ;;  %v16304_v50 = vld [vmem:[#allocation40_spill] sm:$0xff] }
 0x30c   : > { %v5326_v18 = vpop.f32.mrb[5].mxu1  ;;  %v10426_v2 = vpop.f32.mrb[6].mxu0 }
 0x30d   : > { %v14735_v38 = vadd.f32 %v10489_v13, %v5016_v17  ;;  %v10490_v37 = vpop.f32.mrb[6].mxu1  ;;  %v4902_v27 = vpop.f32.mrb[7].mxu0 }
 0x30e   : > { %v5015_v26 = vadd.f32 %v4902_v27, %v14508_v33  ;;  %v5328_v12 = vpop.f32.mrb[7].mxu1  ;;  %v6379_v33 = vpack.c.bf16 %v14245_v40, %v14235_v34  ;;  %v16310_v34 = vld [vmem:[#allocation11_spill] sm:$0xff]  ;;  %v16311_v40 = vrot.slane %v16215_v56, 1 }
 0x310   : > { %10692 = vmatmul.mubr.bf16.gmra.mrb[112].mxu0 %v16303_v43  ;;  %v14741_v28 = vadd.f32 %v5328_v12, %v5015_v26  ;;  %10756 = vmatmul.mubr.bf16.gmra.mrb[112].mxu1 %v16304_v50  ;;  %v16308_v43 = vpack.c.bf16 %v16306_v7, %v16307_v1  ;;  %v16309_v50 = vld [vmem:[#allocation68_spill] sm:$0xff] }
 0x311   : > { %10695 = vmatprep.mubr.bf16.mxu0 %v6377_v59  ;;  %10759 = vmatprep.mubr.bf16.mxu1 %v16305_v61  ;;  %v16312_v61 = vld [vmem:[#allocation158_spill] sm:$0xff] }
 0x312   : > { %v10429_v30 = vpop.f32.mrb[8].mxu0 }
 0x313   : > { %v10493_v22 = vpop.f32.mrb[8].mxu1  ;;  %v4914_v17 = vpop.f32.mrb[9].mxu0  ;;  %v6380_v30 = vpack.c.bf16 %v16312_v61, %v14240_v41  ;;  %v6856_v41 = vpack.c.bf16 %v16237_v29, %v14551_v3  ;;  %v16314_v29 = vld [vmem:[#allocation120_spill] sm:$0xff] }
 0x314   : > { %v5017_v13 = vadd.f32 %v4914_v17, %v14519_v9  ;;  %v5340_v18 = vpop.f32.mrb[9].mxu1  ;;  %v10430_v2 = vpop.f32.mrb[10].mxu0  ;;  %v6382_v3 = vpack.c.bf16 %v16314_v29, %v14486_v24  ;;  %v16318_v29 = vld [vmem:[#allocation124_spill] sm:$0xff] }
 0x315   : > { %v5019_v15 = vadd.f32 %v10430_v2, %v14522_v60  ;;  %v10494_v49 = vpop.f32.mrb[10].mxu1  ;;  %v4917_v37 = vpop.f32.mrb[11].mxu0  ;;  %v14766_v60 = vsel %vm1270_vm1, %v11384_v10, %v16311_v40 }
 0x316   : > { %v14749_v27 = vadd.f32 %v5340_v18, %v5017_v13  ;;  %v5018_v59 = vadd.f32 %v4917_v37, %v14527_v5  ;;  %v5343_v26 = vpop.f32.mrb[11].mxu1  ;;  %v6381_v56 = vpack.c.bf16 %v14492_v19, %v14766_v60 }
 0x317   : > { %v14752_v12 = vadd.f32 %v10494_v49, %v5019_v15 }
 0x318   : > { %10696 = vmatmul.mubr.bf16.gmra.mrb[116].mxu0 %v16308_v43  ;;  %v14757_v9 = vadd.f32 %v5343_v26, %v5018_v59  ;;  %10760 = vmatmul.mubr.bf16.gmra.mrb[116].mxu1 %v16309_v50 }
 0x319   : > { %10699 = vmatprep.mubr.bf16.mxu0 %v6379_v33  ;;  %10763 = vmatprep.mubr.bf16.mxu1 %v16310_v34 }
 0x31a   : > { %v10433_v5 = vpop.f32.mrb[12].mxu0 }
 0x31b   : > { %v5021_v22 = vadd.f32 %v10433_v5, %v14533_v63  ;;  %v10497_v17 = vpop.f32.mrb[12].mxu1  ;;  %v4929_v13 = vpop.f32.mrb[13].mxu0 }
 0x31c   : > { %v5020_v18 = vadd.f32 %v4929_v13, %v14538_v16  ;;  %v5355_v2 = vpop.f32.mrb[13].mxu1  ;;  %v10434_v33 = vpop.f32.mrb[14].mxu0  ;;  %v16313_v16 = vpack.c.bf16 %v16239_v31, %v14148_v44  ;;  %v16316_v13 = vld [vmem:[#allocation122_spill] sm:$0xff] }
 0x31d   : > { %v14774_v15 = vadd.f32 %v10497_v17, %v5021_v22  ;;  %v5022_v20 = vadd.f32 %v10434_v33, %v14540_v8  ;;  %v10498_v49 = vpop.f32.mrb[14].mxu1  ;;  %v4932_v37 = vpop.f32.mrb[15].mxu0  ;;  %v16315_v17 = vld [vmem:[#allocation5_spill] sm:$0xff] }
 0x31e   : > { %v14779_v59 = vadd.f32 %v5355_v2, %v5020_v18  ;;  %v5358_v63 = vpop.f32.mrb[15].mxu1 }
 0x31f   : > { %v14781_v26 = vadd.f32 %v10498_v49, %v5022_v20 }
 0x320   : > { %10700 = vmatmul.mubr.bf16.gmra.mrb[120].mxu0 %v6380_v30  ;;  %10764 = vmatmul.mubr.bf16.gmra.mrb[120].mxu1 %v16313_v16 }
 0x321   : > { %10703 = vmatprep.mubr.bf16.mxu0 %v6381_v56  ;;  %10767 = vmatprep.mubr.bf16.mxu1 %v6856_v41 }
 0x322   : > { %v10437_v7 = vpop.f32.mrb[16].mxu0 }
 0x323   : > { %v5024_v8 = vadd.f32 %v10437_v7, %v14560_v58  ;;  %v10501_v1 = vpop.f32.mrb[16].mxu1  ;;  %v4944_v43 = vpop.f32.mrb[17].mxu0  ;;  %v11100_v58 = vld [vmem:[%s12643_s11 + $0x8] sm:$0xff]  }
 0x324   : > { %v5370_v50 = vpop.f32.mrb[17].mxu1  ;;  %v10438_v34 = vpop.f32.mrb[18].mxu0 }
 0x325   : > { %v14789_v40 = vadd.f32 %v10501_v1, %v5024_v8  ;;  %v10502_v5 = vpop.f32.mrb[18].mxu1  ;;  %v4946_v30 = vpop.f32.mrb[19].mxu0  ;;  %v16317_v1 = vld [vmem:[#allocation123_spill] sm:$0xff] }
 0x326   : > { %v5023_v44 = vadd.f32 %v4946_v30, %v14563_v57  ;;  %v5372_v31 = vpop.f32.mrb[19].mxu1 }
 0x328   : > { %10704 = vmatmul.mubr.bf16.gmra.mrb[124].mxu0 %v6382_v3  ;;  %v14792_v22 = vadd.f32 %v5372_v31, %v5023_v44  ;;  %10768 = vmatmul.mubr.bf16.gmra.mrb[124].mxu1 %v16315_v17  ;;  %v16320_v3 = vld [vmem:[#allocation56_spill] sm:$0xff] }
 0x329   : > { %10787 = vmatprep.mubr.bf16.mxu0 %v11100_v58  ;;  %10851 = vmatprep.mubr.bf16.mxu1 %v16316_v13 }
 0x32a   : > { %v10441_v18 = vpop.f32.mrb[20].mxu0 }
 0x32b   : > { %v10505_v2 = vpop.f32.mrb[20].mxu1  ;;  %v4958_v33 = vpop.f32.mrb[21].mxu0 }
 0x32c   : > { %v5025_v56 = vadd.f32 %v4958_v33, %v14570_v46  ;;  %v5384_v20 = vpop.f32.mrb[21].mxu1  ;;  %v10442_v49 = vpop.f32.mrb[22].mxu0  ;;  %v16319_v46 = vld [vmem:[#allocation99_spill] sm:$0xff] }
 0x32d   : > { %v5027_v37 = vadd.f32 %v10442_v49, %v14576_v25  ;;  %v10506_v57 = vpop.f32.mrb[22].mxu1  ;;  %v4961_v41 = vpop.f32.mrb[23].mxu0 }
 0x32e   : > { %v14799_v63 = vadd.f32 %v5384_v20, %v5025_v56  ;;  %v5026_v16 = vadd.f32 %v4961_v41, %v14584_v35  ;;  %v5387_v7 = vpop.f32.mrb[23].mxu1  ;;  %v11101_v56 = vld [vmem:[%s12643_s11 + $0x18] sm:$0xff]   ;;  %v16322_v20 = vld [vmem:[#allocation126_spill] sm:$0xff] }
 0x32f   : > { %v14802_v8 = vadd.f32 %v10506_v57, %v5027_v37 }
 0x330   : > { %10788 = vmatmul.mubr.bf16.vlgmr.msra.gmra.mrb[128].mxu0 %v16317_v1  ;;  %v14805_v43 = vadd.f32 %v5387_v7, %v5026_v16  ;;  %10852 = vmatmul.mubr.bf16.vlgmr.msra.gmra.mrb[128].mxu1 %v16318_v29 }
 0x331   : > { %10791 = vmatprep.mubr.bf16.mxu0 %v16319_v46  ;;  %10855 = vmatprep.mubr.bf16.mxu1 %v16320_v3 }
 0x332   : > { %v10445_v25 = vpop.f32.mrb[24].mxu0 }
 0x333   : > { %v5029_v50 = vadd.f32 %v10445_v25, %v14600_v52  ;;  %v10509_v34 = vpop.f32.mrb[24].mxu1  ;;  %v4973_v5 = vpop.f32.mrb[25].mxu0  ;;  %v16321_v52 = vld [vmem:[#allocation125_spill] sm:$0xff]  ;;  %v16324_v25 = vld [vmem:[#allocation128_spill] sm:$0xff] }
 0x334   : > { %v5028_v35 = vadd.f32 %v4973_v5, %v14603_v47  ;;  %v5399_v30 = vpop.f32.mrb[25].mxu1  ;;  %v10446_v44 = vpop.f32.mrb[26].mxu0  ;;  %v16323_v47 = vld [vmem:[#allocation127_spill] sm:$0xff]  ;;  %v11102_v5 = vld [vmem:[%s12643_s11 + $0x28] sm:$0xff]  }
 0x335   : > { %v14812_v31 = vadd.f32 %v10509_v34, %v5029_v50  ;;  %v5030_v17 = vadd.f32 %v10446_v44, %v14608_v51  ;;  %v10510_v58 = vpop.f32.mrb[26].mxu1  ;;  %v4976_v13 = vpop.f32.mrb[27].mxu0  ;;  %v16325_v34 = vld [vmem:[#allocation129_spill] sm:$0xff] }
 0x336   : > { %v14815_v18 = vadd.f32 %v5399_v30, %v5028_v35  ;;  %v5402_v2 = vpop.f32.mrb[27].mxu1 }
 0x337   : > { %v14817_v33 = vadd.f32 %v10510_v58, %v5030_v17 }
 0x338   : > { %10792 = vmatmul.mubr.bf16.gmra.mrb[132].mxu0 %v11101_v56  ;;  %10856 = vmatmul.mubr.bf16.gmra.mrb[132].mxu1 %v16321_v52 }
 0x339   : > { %10795 = vmatprep.mubr.bf16.mxu0 %v16322_v20  ;;  %10859 = vmatprep.mubr.bf16.mxu1 %v16323_v47 }
 0x33a   : > { %v10449_v49 = vpop.f32.mrb[28].mxu0 }
 0x33b   : > { %v5032_v37 = vadd.f32 %v10449_v49, %v14627_v55  ;;  %v10513_v51 = vpop.f32.mrb[28].mxu1  ;;  %v4988_v57 = vpop.f32.mrb[29].mxu0  ;;  %v16326_v55 = vld [vmem:[#allocation131_spill] sm:$0xff] }
 0x33c   : > { %v5414_v41 = vpop.f32.mrb[29].mxu1  ;;  %v10450_v16 = vpop.f32.mrb[30].mxu0  ;;  %v16328_v57 = vld [vmem:[#allocation133_spill] sm:$0xff] }
 0x33d   : > { %v14824_v7 = vadd.f32 %v10513_v51, %v5032_v37  ;;  %v10514_v1 = vpop.f32.mrb[30].mxu1  ;;  %v4990_v29 = vpop.f32.mrb[31].mxu0  ;;  %v16327_v37 = vld [vmem:[#allocation132_spill] sm:$0xff] }
 0x33e   : > { %v5031_v46 = vadd.f32 %v4990_v29, %v14639_v14  ;;  %v5416_v3 = vpop.f32.mrb[31].mxu1  ;;  %v16330_v41 = vld [vmem:[#allocation136_spill] sm:$0xff] }
 0x340   : > { %10796 = vmatmul.mubr.bf16.gmra.mrb[136].mxu0 %v16324_v25  ;;  %v14828_v50 = vadd.f32 %v5416_v3, %v5031_v46  ;;  %10860 = vmatmul.mubr.bf16.gmra.mrb[136].mxu1 %v16325_v34 }
 0x341   : > { %10799 = vmatprep.mubr.bf16.mxu0 %v11102_v5  ;;  %10863 = vmatprep.mubr.bf16.mxu1 %v16326_v55 }
 0x343   : > { %v10533_v35 = vpop.f32.mrb[32].mxu0  ;;  %v10597_v30 = vpop.f32.mrb[32].mxu1 }
 0x344   : > { %v5726_v44 = vpop.f32.mrb[33].mxu0  ;;  %v6056_v58 = vpop.f32.mrb[33].mxu1 }
 0x345   : > { %v5901_v17 = vadd.f32 %v5726_v44, %v14653_v6  ;;  %v10534_v13 = vpop.f32.mrb[34].mxu0  ;;  %v10598_v2 = vpop.f32.mrb[34].mxu1  ;;  %v16329_v6 = vld [vmem:[#allocation135_spill] sm:$0xff] }
 0x346   : > { %v5903_v14 = vadd.f32 %v10534_v13, %v14659_v39  ;;  %v5729_v56 = vpop.f32.mrb[35].mxu0  ;;  %v6059_v47 = vpop.f32.mrb[35].mxu1 }
 0x347   : > { %v14835_v52 = vadd.f32 %v6056_v58, %v5901_v17  ;;  %v5902_v20 = vadd.f32 %v5729_v56, %v14667_v0  ;;  %v11103_v17 = vld [vmem:[%s12643_s11 + $0x38] sm:$0xff]   ;;  %v16332_v58 = vld [vmem:[#allocation137_spill] sm:$0xff] }
 0x348   : > { %v14838_v49 = vadd.f32 %v10598_v2, %v5903_v14  ;;  %10800 = vmatmul.mubr.bf16.gmra.mrb[140].mxu0 %v16327_v37  ;;  %10864 = vmatmul.mubr.bf16.gmra.mrb[140].mxu1 %v16328_v57 }
 0x349   : > { %v14841_v51 = vadd.f32 %v6059_v47, %v5902_v20  ;;  %10803 = vmatprep.mubr.bf16.mxu0 %v16329_v6  ;;  %10867 = vmatprep.mubr.bf16.mxu1 %v16330_v41 }
 0x34b   : > { %v10537_v39 = vpop.f32.mrb[36].mxu0  ;;  %v10601_v1 = vpop.f32.mrb[36].mxu1 }
 0x34c   : > { %v5905_v16 = vadd.f32 %v10537_v39, %v14675_v21  ;;  %v5741_v29 = vpop.f32.mrb[37].mxu0  ;;  %v6071_v46 = vpop.f32.mrb[37].mxu1  ;;  %v16331_v21 = vld [vmem:[#allocation27_spill] sm:$0xff] }
 0x34d   : > { %v5904_v0 = vadd.f32 %v5741_v29, %v14678_v48  ;;  %v10538_v3 = vpop.f32.mrb[38].mxu0  ;;  %v10602_v5 = vpop.f32.mrb[38].mxu1  ;;  %v16333_v48 = vld [vmem:[#allocation138_spill] sm:$0xff]  ;;  %v16334_v39 = vld [vmem:[#allocation139_spill] sm:$0xff]  ;;  %v11104_v29 = vld [vmem:[%s12643_s11 + $0x48] sm:$0xff]  }
 0x34e   : > { %v14848_v25 = vadd.f32 %v10601_v1, %v5905_v16  ;;  %v5906_v34 = vadd.f32 %v10538_v3, %v14680_v32  ;;  %v5744_v55 = vpop.f32.mrb[39].mxu0  ;;  %v6074_v30 = vpop.f32.mrb[39].mxu1  ;;  %v16335_v1 = vld [vmem:[#allocation140_spill] sm:$0xff] }
 0x34f   : > { %v14851_v35 = vadd.f32 %v6071_v46, %v5904_v0 }
 0x350   : > { %v14853_v44 = vadd.f32 %v10602_v5, %v5906_v34  ;;  %10804 = vmatmul.mubr.bf16.gmra.mrb[144].mxu0 %v11103_v17  ;;  %10868 = vmatmul.mubr.bf16.gmra.mrb[144].mxu1 %v16331_v21 }
 0x351   : > { %10807 = vmatprep.mubr.bf16.mxu0 %v16332_v58  ;;  %10871 = vmatprep.mubr.bf16.mxu1 %v16333_v48 }
 0x353   : > { %v10541_v13 = vpop.f32.mrb[40].mxu0  ;;  %v10605_v32 = vpop.f32.mrb[40].mxu1 }
 0x354   : > { %v5908_v14 = vadd.f32 %v10541_v13, %v14690_v36  ;;  %v5756_v2 = vpop.f32.mrb[41].mxu0  ;;  %v6086_v56 = vpop.f32.mrb[41].mxu1  ;;  %v16336_v36 = vld [vmem:[#allocation144_spill] sm:$0xff] }
 0x355   : > { %v10542_v20 = vpop.f32.mrb[42].mxu0  ;;  %v10606_v37 = vpop.f32.mrb[42].mxu1  ;;  %v16338_v2 = vld [vmem:[#allocation146_spill] sm:$0xff] }
 0x356   : > { %v14860_v47 = vadd.f32 %v10605_v32, %v5908_v14  ;;  %v5758_v57 = vpop.f32.mrb[43].mxu0  ;;  %v6088_v41 = vpop.f32.mrb[43].mxu1  ;;  %v16337_v14 = vld [vmem:[#allocation145_spill] sm:$0xff]  ;;  %v16340_v56 = vld [vmem:[#allocation150_spill] sm:$0xff] }
 0x357   : > { %v5907_v6 = vadd.f32 %v5758_v57, %v14696_v42 }
 0x358   : > { %10808 = vmatmul.mubr.bf16.gmra.mrb[148].mxu0 %v16334_v39  ;;  %10872 = vmatmul.mubr.bf16.gmra.mrb[148].mxu1 %v16335_v1 }
 0x359   : > { %v14864_v16 = vadd.f32 %v6088_v41, %v5907_v6  ;;  %10811 = vmatprep.mubr.bf16.mxu0 %v11104_v29  ;;  %10875 = vmatprep.mubr.bf16.mxu1 %v16336_v36 }
 0x35b   : > { %v10545_v0 = vpop.f32.mrb[44].mxu0  ;;  %v10609_v46 = vpop.f32.mrb[44].mxu1 }
 0x35c   : > { %v5770_v3 = vpop.f32.mrb[45].mxu0  ;;  %v6100_v5 = vpop.f32.mrb[45].mxu1 }
 0x35d   : > { %v5909_v34 = vadd.f32 %v5770_v3, %v14704_v54  ;;  %v10546_v55 = vpop.f32.mrb[46].mxu0  ;;  %v10610_v30 = vpop.f32.mrb[46].mxu1  ;;  %v16339_v54 = vld [vmem:[#allocation149_spill] sm:$0xff] }
 0x35e   : > { %v5911_v42 = vadd.f32 %v10546_v55, %v14707_v45  ;;  %v5773_v17 = vpop.f32.mrb[47].mxu0  ;;  %v6103_v48 = vpop.f32.mrb[47].mxu1 }
 0x35f   : > { %v14871_v21 = vadd.f32 %v6100_v5, %v5909_v34  ;;  %v5910_v58 = vadd.f32 %v5773_v17, %v14712_v53  ;;  %v11105_v34 = vld [vmem:[%s12643_s11 + $0x58] sm:$0xff]   ;;  %v16342_v5 = vld [vmem:[#allocation152_spill] sm:$0xff] }
 0x360   : > { %v14874_v13 = vadd.f32 %v10610_v30, %v5911_v42  ;;  %10812 = vmatmul.mubr.bf16.gmra.mrb[152].mxu0 %v16337_v14  ;;  %10876 = vmatmul.mubr.bf16.gmra.mrb[152].mxu1 %v16338_v2 }
 0x361   : > { %v14877_v32 = vadd.f32 %v6103_v48, %v5910_v58  ;;  %10815 = vmatprep.mubr.bf16.mxu0 %v16339_v54  ;;  %10879 = vmatprep.mubr.bf16.mxu1 %v16340_v56 }
 0x363   : > { %v10549_v45 = vpop.f32.mrb[48].mxu0  ;;  %v10613_v37 = vpop.f32.mrb[48].mxu1 }
 0x364   : > { %v5913_v20 = vadd.f32 %v10549_v45, %v14720_v62  ;;  %v5785_v57 = vpop.f32.mrb[49].mxu0  ;;  %v6115_v6 = vpop.f32.mrb[49].mxu1  ;;  %v16341_v62 = vld [vmem:[#allocation151_spill] sm:$0xff]  ;;  %v16344_v45 = vld [vmem:[#allocation154_spill] sm:$0xff] }
 0x365   : > { %v5912_v53 = vadd.f32 %v5785_v57, %v14723_v11  ;;  %v10550_v41 = vpop.f32.mrb[50].mxu0  ;;  %v10614_v29 = vpop.f32.mrb[50].mxu1  ;;  %v16343_v11 = vld [vmem:[#allocation153_spill] sm:$0xff] }
 0x366   : > { %v14884_v39 = vadd.f32 %v10613_v37, %v5913_v20  ;;  %v5914_v1 = vadd.f32 %v10550_v41, %v14725_v4  ;;  %v5788_v36 = vpop.f32.mrb[51].mxu0  ;;  %v6118_v46 = vpop.f32.mrb[51].mxu1  ;;  %v16345_v37 = vld [vmem:[#allocation155_spill] sm:$0xff]  ;;  %v11106_v57 = vld [vmem:[%s12643_s11 + $0x68] sm:$0xff]  }
 0x367   : > { %v14887_v0 = vadd.f32 %v6115_v6, %v5912_v53 }
 0x368   : > { %v14889_v3 = vadd.f32 %v10614_v29, %v5914_v1  ;;  %10816 = vmatmul.mubr.bf16.gmra.mrb[156].mxu0 %v11105_v34  ;;  %10880 = vmatmul.mubr.bf16.gmra.mrb[156].mxu1 %v16341_v62  ;;  %v7610_v62 = vpack.c.bf16 %v14766_v60, %v16312_v61 }
 0x369   : > { %10819 = vmatprep.mubr.bf16.mxu0 %v16342_v5  ;;  %10883 = vmatprep.mubr.bf16.mxu1 %v16343_v11 }
 0x36b   : > { %v10553_v55 = vpop.f32.mrb[52].mxu0  ;;  %v10617_v4 = vpop.f32.mrb[52].mxu1 }
 0x36c   : > { %v5916_v42 = vadd.f32 %v10553_v55, %v14735_v38  ;;  %v5800_v30 = vpop.f32.mrb[53].mxu0  ;;  %v6130_v17 = vpop.f32.mrb[53].mxu1  ;;  %v16346_v38 = vld [vmem:[#allocation77_spill] sm:$0xff] }
 0x36d   : > { %v10554_v58 = vpop.f32.mrb[54].mxu0  ;;  %v10618_v14 = vpop.f32.mrb[54].mxu1  ;;  %v16349_v17 = vld [vmem:[#allocation159_spill] sm:$0xff] }
 0x36e   : > { %v14896_v48 = vadd.f32 %v10617_v4, %v5916_v42  ;;  %v5802_v2 = vpop.f32.mrb[55].mxu0  ;;  %v6132_v56 = vpop.f32.mrb[55].mxu1  ;;  %v16347_v4 = vld [vmem:[#allocation156_spill] sm:$0xff] }
 0x36f   : > { %v5915_v54 = vadd.f32 %v5802_v2, %v14741_v28 }
 0x370   : > { %10820 = vmatmul.mubr.bf16.gmra.mrb[160].mxu0 %v16344_v45  ;;  %10884 = vmatmul.mubr.bf16.gmra.mrb[160].mxu1 %v16345_v37 }
 0x371   : > { %v14900_v20 = vadd.f32 %v6132_v56, %v5915_v54  ;;  %10823 = vmatprep.mubr.bf16.mxu0 %v11106_v57  ;;  %10887 = vmatprep.mubr.bf16.mxu1 %v16346_v38 }
 0x373   : > { %v10557_v53 = vpop.f32.mrb[56].mxu0  ;;  %v10621_v6 = vpop.f32.mrb[56].mxu1 }
 0x374   : > { %v5814_v41 = vpop.f32.mrb[57].mxu0  ;;  %v6144_v29 = vpop.f32.mrb[57].mxu1  ;;  %v11107_v6 = vld [vmem:[%s12643_s11 + $0x78] sm:$0xff]  }
 0x375   : > { %v5917_v1 = vadd.f32 %v5814_v41, %v14749_v27  ;;  %v10558_v36 = vpop.f32.mrb[58].mxu0  ;;  %v10622_v46 = vpop.f32.mrb[58].mxu1  ;;  %v16348_v27 = vld [vmem:[#allocation157_spill] sm:$0xff]  ;;  %v16352_v41 = vld [vmem:[#allocation91_spill] sm:$0xff] }
 0x376   : > { %v5919_v28 = vadd.f32 %v10558_v36, %v14752_v12  ;;  %v5817_v34 = vpop.f32.mrb[59].mxu0  ;;  %v6147_v55 = vpop.f32.mrb[59].mxu1 }
 0x377   : > { %v14909_v5 = vadd.f32 %v6144_v29, %v5917_v1  ;;  %v5918_v11 = vadd.f32 %v5817_v34, %v14757_v9 }
 0x378   : > { %v14912_v42 = vadd.f32 %v10622_v46, %v5919_v28  ;;  %10824 = vmatmul.mubr.bf16.gmra.mrb[164].mxu0 %v16347_v4  ;;  %10888 = vmatmul.mubr.bf16.gmra.mrb[164].mxu1 %v16348_v27  ;;  %v7613_v28 = vpack.c.bf16 %v16246_v23, %v11384_v10 }
 0x379   : > { %v14915_v30 = vadd.f32 %v6147_v55, %v5918_v11  ;;  %10827 = vmatprep.mubr.bf16.mxu0 %v16349_v17  ;;  %10891 = vmatprep.mubr.bf16.mxu1 %v7610_v62 }
 0x37b   : > { %v10561_v12 = vpop.f32.mrb[60].mxu0  ;;  %v10625_v61 = vpop.f32.mrb[60].mxu1 }
 0x37c   : > { %v5921_v60 = vadd.f32 %v10561_v12, %v14774_v15  ;;  %v5829_v58 = vpop.f32.mrb[61].mxu0  ;;  %v6159_v14 = vpop.f32.mrb[61].mxu1  ;;  %v16350_v15 = vpack.c.bf16 %v14486_v24, %v14492_v19 }
 0x37d   : > { %v5920_v9 = vadd.f32 %v5829_v58, %v14779_v59  ;;  %v10562_v2 = vpop.f32.mrb[62].mxu0  ;;  %v10626_v45 = vpop.f32.mrb[62].mxu1  ;;  %v16351_v59 = vmov 0.0|0.0  }
 0x37e   : > { %v14921_v54 = vadd.f32 %v10625_v61, %v5921_v60  ;;  %v5922_v56 = vadd.f32 %v10562_v2, %v14781_v26  ;;  %v5832_v37 = vpop.f32.mrb[63].mxu0  ;;  %v6162_v38 = vpop.f32.mrb[63].mxu1 }
 0x37f   : > { %v14924_v57 = vadd.f32 %v6159_v14, %v5920_v9 }
 0x380   : > { %v14926_v53 = vadd.f32 %v10626_v45, %v5922_v56  ;;  %10828 = vmatmul.mubr.bf16.gmra.mrb[168].mxu0 %v11107_v6  ;;  %10892 = vmatmul.mubr.bf16.gmra.mrb[168].mxu1 %v16350_v15 }
 0x381   : > { %10831 = vmatprep.mubr.bf16.mxu0 %v16351_v59  ;;  %10895 = vmatprep.mubr.bf16.mxu1 %v16352_v41 }
 0x383   : > { %v10565_v1 = vpop.f32.mrb[64].mxu0  ;;  %v10629_v29 = vpop.f32.mrb[64].mxu1 }
 0x384   : > { %v5924_v26 = vadd.f32 %v10565_v1, %v14789_v40  ;;  %v5844_v36 = vpop.f32.mrb[65].mxu0  ;;  %v6174_v46 = vpop.f32.mrb[65].mxu1 }
 0x385   : > { %v10566_v34 = vpop.f32.mrb[66].mxu0  ;;  %v10630_v11 = vpop.f32.mrb[66].mxu1 }
 0x386   : > { %v14937_v62 = vadd.f32 %v10629_v29, %v5924_v26  ;;  %v5846_v55 = vpop.f32.mrb[67].mxu0  ;;  %v6176_v19 = vpop.f32.mrb[67].mxu1 }
 0x387   : > { %v5923_v24 = vadd.f32 %v5846_v55, %v14792_v22 }
 0x388   : > { %10832 = vmatmul.mubr.bf16.gmra.mrb[172].mxu0 %v16351_v59  ;;  %10896 = vmatmul.mubr.bf16.gmra.mrb[172].mxu1 %v7613_v28 }
 0x389   : > { %v14941_v4 = vadd.f32 %v6176_v19, %v5923_v24 }
 0x38b   : > { %v10569_v40 = vpop.f32.mrb[68].mxu0  ;;  %v10633_v27 = vpop.f32.mrb[68].mxu1 }
 0x38c   : > { %v5858_v17 = vpop.f32.mrb[69].mxu0  ;;  %v6188_v10 = vpop.f32.mrb[69].mxu1 }
 0x38d   : > { %v5925_v12 = vadd.f32 %v5858_v17, %v14799_v63  ;;  %v10570_v23 = vpop.f32.mrb[70].mxu0  ;;  %v10634_v61 = vpop.f32.mrb[70].mxu1 }
 0x38e   : > { %v5927_v60 = vadd.f32 %v10570_v23, %v14802_v8  ;;  %v5861_v58 = vpop.f32.mrb[71].mxu0  ;;  %v6191_v14 = vpop.f32.mrb[71].mxu1 }
 0x38f   : > { %v14945_v9 = vadd.f32 %v6188_v10, %v5925_v12  ;;  %v5926_v22 = vadd.f32 %v5861_v58, %v14805_v43 }
 0x390   : > { %v14948_v2 = vadd.f32 %v10634_v61, %v5927_v60 }
 0x391   : > { %v14950_v56 = vadd.f32 %v6191_v14, %v5926_v22 }
 0x393   : > { %v10573_v45 = vpop.f32.mrb[72].mxu0  ;;  %v10637_v38 = vpop.f32.mrb[72].mxu1 }
 0x394   : > { %v5929_v37 = vadd.f32 %v10573_v45, %v14812_v31  ;;  %v5873_v63 = vpop.f32.mrb[73].mxu0  ;;  %v6203_v15 = vpop.f32.mrb[73].mxu1 }
 0x395   : > { %v5928_v6 = vadd.f32 %v5873_v63, %v14815_v18  ;;  %v10574_v8 = vpop.f32.mrb[74].mxu0  ;;  %v10638_v1 = vpop.f32.mrb[74].mxu1 }
 0x396   : > { %v14954_v59 = vadd.f32 %v10637_v38, %v5929_v37  ;;  %v5930_v41 = vadd.f32 %v10574_v8, %v14817_v33  ;;  %v5876_v43 = vpop.f32.mrb[75].mxu0  ;;  %v6206_v29 = vpop.f32.mrb[75].mxu1 }
 0x397   : > { %v14957_v26 = vadd.f32 %v6203_v15, %v5928_v6 }
 0x398   : > { %v14959_v36 = vadd.f32 %v10638_v1, %v5930_v41 }
 0x39b   : > { %v10577_v28 = vpop.f32.mrb[76].mxu0  ;;  %v10641_v46 = vpop.f32.mrb[76].mxu1 }
 0x39c   : > { %v5932_v31 = vadd.f32 %v10577_v28, %v14824_v7  ;;  %v5888_v34 = vpop.f32.mrb[77].mxu0  ;;  %v6218_v11 = vpop.f32.mrb[77].mxu1 }
 0x39d   : > { %v10578_v18 = vpop.f32.mrb[78].mxu0  ;;  %v10642_v24 = vpop.f32.mrb[78].mxu1 }
 0x39e   : > { %v14962_v55 = vadd.f32 %v10641_v46, %v5932_v31  ;;  %v5890_v19 = vpop.f32.mrb[79].mxu0  ;;  %v6220_v40 = vpop.f32.mrb[79].mxu1 }
 0x39f   : > { %v5931_v33 = vadd.f32 %v5890_v19, %v14828_v50 }
 0x3a1   : > { %v14965_v27 = vadd.f32 %v6220_v40, %v5931_v33 }
 0x3a3   : > { %v10661_v17 = vpop.f32.mrb[80].mxu0  ;;  %v10725_v12 = vpop.f32.mrb[80].mxu1 }
 0x3a4   : > { %v6482_v10 = vpop.f32.mrb[81].mxu0  ;;  %v6957_v60 = vpop.f32.mrb[81].mxu1 }
 0x3a5   : > { %v6657_v23 = vadd.f32 %v6482_v10, %v14835_v52  ;;  %v10662_v7 = vpop.f32.mrb[82].mxu0  ;;  %v10726_v58 = vpop.f32.mrb[82].mxu1 }
 0x3a6   : > { %v6659_v61 = vadd.f32 %v10662_v7, %v14838_v49  ;;  %v6485_v22 = vpop.f32.mrb[83].mxu0  ;;  %v6960_v37 = vpop.f32.mrb[83].mxu1 }
 0x3a7   : > { %v14969_v14 = vadd.f32 %v6957_v60, %v6657_v23  ;;  %v6658_v45 = vadd.f32 %v6485_v22, %v14841_v51 }
 0x3a8   : > { %v14972_v50 = vadd.f32 %v10726_v58, %v6659_v61 }
 0x3a9   : > { %v14974_v38 = vadd.f32 %v6960_v37, %v6658_v45 }
 0x3ab   : > { %v10665_v63 = vpop.f32.mrb[84].mxu0  ;;  %v10729_v15 = vpop.f32.mrb[84].mxu1 }
 0x3ac   : > { %v6661_v6 = vadd.f32 %v10665_v63, %v14848_v25  ;;  %v6497_v52 = vpop.f32.mrb[85].mxu0  ;;  %v6972_v41 = vpop.f32.mrb[85].mxu1 }
 0x3ad   : > { %v6660_v8 = vadd.f32 %v6497_v52, %v14851_v35  ;;  %v10666_v49 = vpop.f32.mrb[86].mxu0  ;;  %v10730_v29 = vpop.f32.mrb[86].mxu1 }
 0x3ae   : > { %v14978_v1 = vadd.f32 %v10729_v15, %v6661_v6  ;;  %v6662_v43 = vadd.f32 %v10666_v49, %v14853_v44  ;;  %v6500_v51 = vpop.f32.mrb[87].mxu0  ;;  %v6975_v31 = vpop.f32.mrb[87].mxu1 }
 0x3af   : > { %v14981_v28 = vadd.f32 %v6972_v41, %v6660_v8 }
 0x3b0   : > { %v14983_v46 = vadd.f32 %v10730_v29, %v6662_v43 }
 0x3b3   : > { %v10669_v34 = vpop.f32.mrb[88].mxu0  ;;  %v10733_v11 = vpop.f32.mrb[88].mxu1 }
 0x3b4   : > { %v6664_v25 = vadd.f32 %v10669_v34, %v14860_v47  ;;  %v6512_v18 = vpop.f32.mrb[89].mxu0  ;;  %v6987_v24 = vpop.f32.mrb[89].mxu1 }
 0x3b5   : > { %v10670_v35 = vpop.f32.mrb[90].mxu0  ;;  %v10734_v33 = vpop.f32.mrb[90].mxu1 }
 0x3b6   : > { %v14986_v19 = vadd.f32 %v10733_v11, %v6664_v25  ;;  %v6514_v40 = vpop.f32.mrb[91].mxu0  ;;  %v6989_v17 = vpop.f32.mrb[91].mxu1 }
 0x3b7   : > { %v6663_v44 = vadd.f32 %v6514_v40, %v14864_v16 }
 0x3b9   : > { %v14989_v12 = vadd.f32 %v6989_v17, %v6663_v44 }
 0x3bb   : > { %v10673_v10 = vpop.f32.mrb[92].mxu0  ;;  %v10737_v23 = vpop.f32.mrb[92].mxu1 }
 0x3bc   : > { %v6526_v60 = vpop.f32.mrb[93].mxu0  ;;  %v7001_v61 = vpop.f32.mrb[93].mxu1 }
 0x3bd   : > { %v6665_v7 = vadd.f32 %v6526_v60, %v14871_v21  ;;  %v10674_v47 = vpop.f32.mrb[94].mxu0  ;;  %v10738_v22 = vpop.f32.mrb[94].mxu1 }
 0x3be   : > { %v6667_v58 = vadd.f32 %v10674_v47, %v14874_v13  ;;  %v6529_v45 = vpop.f32.mrb[95].mxu0  ;;  %v7004_v6 = vpop.f32.mrb[95].mxu1 }
 0x3bf   : > { %v14993_v37 = vadd.f32 %v7001_v61, %v6665_v7  ;;  %v6666_v63 = vadd.f32 %v6529_v45, %v14877_v32 }
 0x3c0   : > { %v14996_v16 = vadd.f32 %v10738_v22, %v6667_v58 }
 0x3c1   : > { %v14998_v15 = vadd.f32 %v7004_v6, %v6666_v63 }
 0x3c3   : > { %v10677_v52 = vpop.f32.mrb[96].mxu0  ;;  %v10741_v41 = vpop.f32.mrb[96].mxu1 }
 0x3c4   : > { %v6669_v8 = vadd.f32 %v10677_v52, %v14884_v39  ;;  %v6541_v21 = vpop.f32.mrb[97].mxu0  ;;  %v7016_v43 = vpop.f32.mrb[97].mxu1 }
 0x3c5   : > { %v6668_v49 = vadd.f32 %v6541_v21, %v14887_v0  ;;  %v10678_v13 = vpop.f32.mrb[98].mxu0  ;;  %v10742_v31 = vpop.f32.mrb[98].mxu1 }
 0x3c6   : > { %v15002_v29 = vadd.f32 %v10741_v41, %v6669_v8  ;;  %v6670_v51 = vadd.f32 %v10678_v13, %v14889_v3  ;;  %v6544_v32 = vpop.f32.mrb[99].mxu0  ;;  %v7019_v25 = vpop.f32.mrb[99].mxu1 }
 0x3c7   : > { %v15005_v34 = vadd.f32 %v7016_v43, %v6668_v49 }
 0x3c8   : > { %v15007_v11 = vadd.f32 %v10742_v31, %v6670_v51 }
 0x3cb   : > { %v10681_v18 = vpop.f32.mrb[100].mxu0  ;;  %v10745_v24 = vpop.f32.mrb[100].mxu1 }
 0x3cc   : > { %v6672_v39 = vadd.f32 %v10681_v18, %v14896_v48  ;;  %v6556_v35 = vpop.f32.mrb[101].mxu0  ;;  %v7031_v33 = vpop.f32.mrb[101].mxu1 }
 0x3cd   : > { %v10682_v0 = vpop.f32.mrb[102].mxu0  ;;  %v10746_v44 = vpop.f32.mrb[102].mxu1 }
 0x3ce   : > { %v15010_v40 = vadd.f32 %v10745_v24, %v6672_v39  ;;  %v6558_v17 = vpop.f32.mrb[103].mxu0  ;;  %v7033_v10 = vpop.f32.mrb[103].mxu1 }
 0x3cf   : > { %v6671_v3 = vadd.f32 %v6558_v17, %v14900_v20 }
 0x3d1   : > { %v15013_v23 = vadd.f32 %v7033_v10, %v6671_v3 }
 0x3d3   : > { %v10685_v60 = vpop.f32.mrb[104].mxu0  ;;  %v10749_v7 = vpop.f32.mrb[104].mxu1 }
 0x3d4   : > { %v6570_v61 = vpop.f32.mrb[105].mxu0  ;;  %v7045_v58 = vpop.f32.mrb[105].mxu1 }
 0x3d5   : > { %v6673_v47 = vadd.f32 %v6570_v61, %v14909_v5  ;;  %v10686_v48 = vpop.f32.mrb[106].mxu0  ;;  %v10750_v45 = vpop.f32.mrb[106].mxu1 }
 0x3d6   : > { %v6675_v22 = vadd.f32 %v10686_v48, %v14912_v42  ;;  %v6573_v63 = vpop.f32.mrb[107].mxu0  ;;  %v7048_v8 = vpop.f32.mrb[107].mxu1 }
 0x3d7   : > { %v15017_v6 = vadd.f32 %v7045_v58, %v6673_v47  ;;  %v6674_v52 = vadd.f32 %v6573_v63, %v14915_v30 }
 0x3d8   : > { %v15020_v20 = vadd.f32 %v10750_v45, %v6675_v22 }
 0x3d9   : > { %v15022_v41 = vadd.f32 %v7048_v8, %v6674_v52 }
 0x3db   : > { %v10689_v21 = vpop.f32.mrb[108].mxu0  ;;  %v10753_v43 = vpop.f32.mrb[108].mxu1 }
 0x3dc   : > { %v6677_v49 = vadd.f32 %v10689_v21, %v14921_v54  ;;  %v6585_v5 = vpop.f32.mrb[109].mxu0  ;;  %v7060_v51 = vpop.f32.mrb[109].mxu1 }
 0x3dd   : > { %v6676_v13 = vadd.f32 %v6585_v5, %v14924_v57  ;;  %v10690_v42 = vpop.f32.mrb[110].mxu0  ;;  %v10754_v25 = vpop.f32.mrb[110].mxu1 }
 0x3de   : > { %v15026_v31 = vadd.f32 %v10753_v43, %v6677_v49  ;;  %v6678_v32 = vadd.f32 %v10690_v42, %v14926_v53  ;;  %v6588_v30 = vpop.f32.mrb[111].mxu0  ;;  %v7063_v39 = vpop.f32.mrb[111].mxu1 }
 0x3df   : > { %v15029_v18 = vadd.f32 %v7060_v51, %v6676_v13 }
 0x3e0   : > { %v15031_v24 = vadd.f32 %v10754_v25, %v6678_v32 }
 0x3e3   : > { %v10693_v35 = vpop.f32.mrb[112].mxu0  ;;  %v10757_v33 = vpop.f32.mrb[112].mxu1 }
 0x3e4   : > { %v6680_v54 = vadd.f32 %v10693_v35, %v14937_v62  ;;  %v6600_v0 = vpop.f32.mrb[113].mxu0  ;;  %v7075_v44 = vpop.f32.mrb[113].mxu1 }
 0x3e5   : > { %v10694_v57 = vpop.f32.mrb[114].mxu0  ;;  %v10758_v3 = vpop.f32.mrb[114].mxu1 }
 0x3e6   : > { %v15034_v17 = vadd.f32 %v10757_v33, %v6680_v54  ;;  %v6602_v10 = vpop.f32.mrb[115].mxu0  ;;  %v7077_v60 = vpop.f32.mrb[115].mxu1 }
 0x3e7   : > { %v6679_v53 = vadd.f32 %v6602_v10, %v14941_v4 }
 0x3e9   : > { %v15037_v7 = vadd.f32 %v7077_v60, %v6679_v53 }
 0x3eb   : > { %v10697_v61 = vpop.f32.mrb[116].mxu0  ;;  %v10761_v47 = vpop.f32.mrb[116].mxu1 }
 0x3ec   : > { %v6614_v58 = vpop.f32.mrb[117].mxu0  ;;  %v7089_v22 = vpop.f32.mrb[117].mxu1 }
 0x3ed   : > { %v6681_v48 = vadd.f32 %v6614_v58, %v14945_v9  ;;  %v10698_v62 = vpop.f32.mrb[118].mxu0  ;;  %v10762_v63 = vpop.f32.mrb[118].mxu1 }
 0x3ee   : > { %v6683_v45 = vadd.f32 %v10698_v62, %v14948_v2  ;;  %v6617_v52 = vpop.f32.mrb[119].mxu0  ;;  %v7092_v49 = vpop.f32.mrb[119].mxu1 }
 0x3ef   : > { %v15041_v8 = vadd.f32 %v7089_v22, %v6681_v48  ;;  %v6682_v21 = vadd.f32 %v6617_v52, %v14950_v56 }
 0x3f0   : > { %v15044_v4 = vadd.f32 %v10762_v63, %v6683_v45 }
 0x3f1   : > { %v15046_v43 = vadd.f32 %v7092_v49, %v6682_v21 }
 0x3f3   : > { %v10701_v5 = vpop.f32.mrb[120].mxu0  ;;  %v10765_v51 = vpop.f32.mrb[120].mxu1 }
 0x3f4   : > { %v6685_v13 = vadd.f32 %v10701_v5, %v14954_v59  ;;  %v6629_v9 = vpop.f32.mrb[121].mxu0  ;;  %v7104_v32 = vpop.f32.mrb[121].mxu1 }
 0x3f5   : > { %v6684_v42 = vadd.f32 %v6629_v9, %v14957_v26  ;;  %v10702_v2 = vpop.f32.mrb[122].mxu0  ;;  %v10766_v39 = vpop.f32.mrb[122].mxu1 }
 0x3f6   : > { %v15050_v25 = vadd.f32 %v10765_v51, %v6685_v13  ;;  %v6686_v30 = vadd.f32 %v10702_v2, %v14959_v36  ;;  %v6632_v56 = vpop.f32.mrb[123].mxu0  ;;  %v7107_v54 = vpop.f32.mrb[123].mxu1 }
 0x3f7   : > { %v15053_v35 = vadd.f32 %v7104_v32, %v6684_v42 }
 0x3f8   : > { %v15055_v33 = vadd.f32 %v10766_v39, %v6686_v30 }
 0x3fb   : > { %v10705_v0 = vpop.f32.mrb[124].mxu0  ;;  %v10769_v44 = vpop.f32.mrb[124].mxu1 }
 0x3fc   : > { %v6688_v59 = vadd.f32 %v10705_v0, %v14962_v55  ;;  %v6644_v57 = vpop.f32.mrb[125].mxu0  ;;  %v7119_v3 = vpop.f32.mrb[125].mxu1 }
 0x3fd   : > { %v10706_v26 = vpop.f32.mrb[126].mxu0  ;;  %v10770_v53 = vpop.f32.mrb[126].mxu1 }
 0x3fe   : > { %v15058_v10 = vadd.f32 %v10769_v44, %v6688_v59  ;;  %v6646_v60 = vpop.f32.mrb[127].mxu0  ;;  %v7121_v61 = vpop.f32.mrb[127].mxu1 }
 0x3ff   : > { %v6687_v36 = vadd.f32 %v6646_v60, %v14965_v27  ;;  %v15069_v27 = vld [vmem:[%s15171_s4] ss:$0 sm:$0xff] }
 0x401   : > { %v15061_v47 = vadd.f32 %v7121_v61, %v6687_v36 }
 0x403   : > { %v10789_v58 = vpop.f32.mrb[128].mxu0  ;;  %v10853_v48 = vpop.f32.mrb[128].mxu1 }
 0x404   : > { %v7287_v22 = vpop.f32.mrb[129].mxu0  ;;  %v7713_v55 = vpop.f32.mrb[129].mxu1 }
 0x405   : > { %v7462_v62 = vadd.f32 %v7287_v22, %v14969_v14  ;;  %v10790_v45 = vpop.f32.mrb[130].mxu0  ;;  %v10854_v52 = vpop.f32.mrb[130].mxu1 }
 0x406   : > { %v7464_v63 = vadd.f32 %v10790_v45, %v14972_v50  ;;  %v7290_v21 = vpop.f32.mrb[131].mxu0  ;;  %v7716_v13 = vpop.f32.mrb[131].mxu1 }
 0x407   : > { %v7888_v49 = vadd.f32 %v7713_v55, %v7462_v62  ;;  %v7463_v5 = vadd.f32 %v7290_v21, %v14974_v38 }
 0x408   : > { %v7890_v51 = vadd.f32 %v10854_v52, %v7464_v63 }
 0x409   : > { %v7889_v9 = vadd.f32 %v7716_v13, %v7463_v5  ;;  %v7927_v42 = vadd.f32 %v15069_v27, %v7888_v49 }
 0x40b   : > { %v7928_v14 = vadd.f32 %v15069_v27, %v7889_v9  ;;  %v10793_v32 = vpop.f32.mrb[132].mxu0  ;;  %v10857_v38 = vpop.f32.mrb[132].mxu1 }
 0x40c   : > { %v7466_v50 = vadd.f32 %v10793_v32, %v14978_v1  ;;  %v7302_v2 = vpop.f32.mrb[133].mxu0  ;;  %v7728_v56 = vpop.f32.mrb[133].mxu1  ;;  %v7929_v1 = vadd.f32 %v15069_v27, %v7890_v51 }
 0x40d   : > { %v7959_v30 = vpack.c.bf16 %v7928_v14, %v7927_v42  ;;  %v7465_v39 = vadd.f32 %v7302_v2, %v14981_v28  ;;  %v10794_v54 = vpop.f32.mrb[134].mxu0  ;;  %v10858_v44 = vpop.f32.mrb[134].mxu1 }
 0x40e   : > { %v7892_v0 = vadd.f32 %v10857_v38, %v7466_v50  ;;  %v7467_v59 = vadd.f32 %v10794_v54, %v14983_v46  ;;  %v7305_v57 = vpop.f32.mrb[135].mxu0  ;;  %v7731_v60 = vpop.f32.mrb[135].mxu1 }
 0x40f   : > { %9050 = vst [vmem:[%s15077_s9] sm:$0xff] %v7959_v30   ;;  %v8119_v3 = vunpack.c.l.bf16 %v7959_v30  ;;  %v8120_v26 = vunpack.c.h.bf16 %v7959_v30  ;;  %v7891_v53 = vadd.f32 %v7728_v56, %v7465_v39 }
 0x410   : > { %v7893_v36 = vadd.f32 %v10858_v44, %v7467_v59  ;;  %v7931_v28 = vadd.f32 %v15069_v27, %v7892_v0 }
 0x411   : > { %v7930_v61 = vadd.f32 %v15069_v27, %v7891_v53  ;;  %v8188_v48 = vmul.f32 %v8119_v3, %v8119_v3  ;;  %v8189_v46 = vmul.f32 %v8120_v26, %v8120_v26  ;;  %v8151_v21 = vadd.f32 %v8120_v26, %v8119_v3 }
 0x412   : > { %v7932_v58 = vadd.f32 %v15069_v27, %v7893_v36 }
 0x413   : > { %v7960_v22 = vpack.c.bf16 %v7930_v61, %v7929_v1  ;;  %v10797_v62 = vpop.f32.mrb[136].mxu0  ;;  %v10861_v63 = vpop.f32.mrb[136].mxu1  ;;  %v8220_v50 = vadd.f32 %v8189_v46, %v8188_v48 }
 0x414   : > { %v7961_v55 = vpack.c.bf16 %v7932_v58, %v7931_v28  ;;  %v7469_v45 = vadd.f32 %v10797_v62, %v14986_v19  ;;  %v7317_v52 = vpop.f32.mrb[137].mxu0  ;;  %v7743_v13 = vpop.f32.mrb[137].mxu1 }
 0x415   : > { %9156 = vst [vmem:[%s15077_s9 + $0x8] sm:$0xff] %v7960_v22   ;;  %v8121_v49 = vunpack.c.l.bf16 %v7960_v22  ;;  %v8122_v5 = vunpack.c.h.bf16 %v7960_v22  ;;  %v10798_v51 = vpop.f32.mrb[138].mxu0  ;;  %v10862_v14 = vpop.f32.mrb[138].mxu1 }
 0x416   : > { %9157 = vst [vmem:[%s15077_s9 + $0x10] sm:$0xff] %v7961_v55   ;;  %v8123_v9 = vunpack.c.l.bf16 %v7961_v55  ;;  %v7895_v42 = vadd.f32 %v10861_v63, %v7469_v45  ;;  %v7319_v32 = vpop.f32.mrb[139].mxu0  ;;  %v7745_v39 = vpop.f32.mrb[139].mxu1  ;;  %v8124_v19 = vunpack.c.h.bf16 %v7961_v55 }
 0x417   : > { %v8152_v38 = vadd.f32 %v8151_v21, %v8121_v49  ;;  %v8190_v2 = vmul.f32 %v8121_v49, %v8121_v49  ;;  %v7468_v30 = vadd.f32 %v7319_v32, %v14989_v12  ;;  %v8191_v54 = vmul.f32 %v8122_v5, %v8122_v5 }
 0x418   : > { %v8192_v44 = vmul.f32 %v8123_v9, %v8123_v9  ;;  %v7934_v26 = vadd.f32 %v15069_v27, %v7895_v42  ;;  %v8193_v36 = vmul.f32 %v8124_v19, %v8124_v19 }
 0x419   : > { %v8153_v56 = vadd.f32 %v8152_v38, %v8122_v5  ;;  %v8221_v0 = vadd.f32 %v8220_v50, %v8190_v2  ;;  %v7894_v59 = vadd.f32 %v7745_v39, %v7468_v30 }
 0x41b   : > { %v8222_v57 = vadd.f32 %v8221_v0, %v8191_v54  ;;  %v8154_v3 = vadd.f32 %v8153_v56, %v8123_v9  ;;  %v7933_v53 = vadd.f32 %v15069_v27, %v7894_v59  ;;  %v10801_v60 = vpop.f32.mrb[140].mxu0  ;;  %v10865_v1 = vpop.f32.mrb[140].mxu1 }
 0x41c   : > { %v7331_v61 = vpop.f32.mrb[141].mxu0  ;;  %v7757_v46 = vpop.f32.mrb[141].mxu1 }
 0x41d   : > { %v8155_v28 = vadd.f32 %v8154_v3, %v8124_v19  ;;  %v8223_v12 = vadd.f32 %v8222_v57, %v8192_v44  ;;  %v7962_v58 = vpack.c.bf16 %v7934_v26, %v7933_v53  ;;  %v7470_v48 = vadd.f32 %v7331_v61, %v14993_v37  ;;  %v10802_v22 = vpop.f32.mrb[142].mxu0  ;;  %v10866_v55 = vpop.f32.mrb[142].mxu1 }
 0x41e   : > { %v7472_v62 = vadd.f32 %v10802_v22, %v14996_v16  ;;  %v7334_v45 = vpop.f32.mrb[143].mxu0  ;;  %v7760_v5 = vpop.f32.mrb[143].mxu1 }
 0x41f   : > { %v8224_v63 = vadd.f32 %v8223_v12, %v8193_v36  ;;  %9158 = vst [vmem:[%s15077_s9 + $0x18] sm:$0xff] %v7962_v58   ;;  %v8125_v52 = vunpack.c.l.bf16 %v7962_v58  ;;  %v8126_v21 = vunpack.c.h.bf16 %v7962_v58  ;;  %v7896_v49 = vadd.f32 %v7757_v46, %v7470_v48 }
 0x420   : > { %v7898_v13 = vadd.f32 %v10866_v55, %v7472_v62  ;;  %v7471_v51 = vadd.f32 %v7334_v45, %v14998_v15 }
 0x421   : > { %v8156_v9 = vadd.f32 %v8155_v28, %v8125_v52  ;;  %v8194_v42 = vmul.f32 %v8125_v52, %v8125_v52  ;;  %v8195_v37 = vmul.f32 %v8126_v21, %v8126_v21  ;;  %v7935_v16 = vadd.f32 %v15069_v27, %v7896_v49 }
 0x422   : > { %v7897_v14 = vadd.f32 %v7760_v5, %v7471_v51 }
 0x423   : > { %v8157_v32 = vadd.f32 %v8156_v9, %v8126_v21  ;;  %v8225_v50 = vadd.f32 %v8224_v63, %v8194_v42  ;;  %v10805_v38 = vpop.f32.mrb[144].mxu0  ;;  %v10869_v39 = vpop.f32.mrb[144].mxu1 }
 0x424   : > { %v7936_v2 = vadd.f32 %v15069_v27, %v7897_v14  ;;  %v7474_v30 = vadd.f32 %v10805_v38, %v15002_v29  ;;  %v7346_v19 = vpop.f32.mrb[145].mxu0  ;;  %v7772_v15 = vpop.f32.mrb[145].mxu1  ;;  %v7937_v29 = vadd.f32 %v15069_v27, %v7898_v13 }
 0x425   : > { %v8226_v56 = vadd.f32 %v8225_v50, %v8195_v37  ;;  %v7473_v54 = vadd.f32 %v7346_v19, %v15005_v34  ;;  %v10806_v0 = vpop.f32.mrb[146].mxu0  ;;  %v10870_v3 = vpop.f32.mrb[146].mxu1 }
 0x426   : > { %v7963_v59 = vpack.c.bf16 %v7936_v2, %v7935_v16  ;;  %v7900_v44 = vadd.f32 %v10869_v39, %v7474_v30  ;;  %v7475_v57 = vadd.f32 %v10806_v0, %v15007_v11  ;;  %v7349_v26 = vpop.f32.mrb[147].mxu0  ;;  %v7775_v60 = vpop.f32.mrb[147].mxu1 }
 0x427   : > { %v7899_v53 = vadd.f32 %v7772_v15, %v7473_v54 }
 0x428   : > { %9159 = vst [vmem:[%s15077_s9 + $0x20] sm:$0xff] %v7963_v59   ;;  %v8127_v36 = vunpack.c.l.bf16 %v7963_v59  ;;  %v8128_v1 = vunpack.c.h.bf16 %v7963_v59  ;;  %v7901_v61 = vadd.f32 %v10870_v3, %v7475_v57  ;;  %v7939_v58 = vadd.f32 %v15069_v27, %v7900_v44 }
 0x429   : > { %v7938_v28 = vadd.f32 %v15069_v27, %v7899_v53 }
 0x42a   : > { %v8158_v34 = vadd.f32 %v8157_v32, %v8127_v36  ;;  %v8196_v12 = vmul.f32 %v8127_v36, %v8127_v36  ;;  %v7940_v48 = vadd.f32 %v15069_v27, %v7901_v61  ;;  %v8197_v11 = vmul.f32 %v8128_v1, %v8128_v1 }
 0x42b   : > { %v7964_v46 = vpack.c.bf16 %v7938_v28, %v7937_v29  ;;  %v10809_v22 = vpop.f32.mrb[148].mxu0  ;;  %v10873_v52 = vpop.f32.mrb[148].mxu1 }
 0x42c   : > { %v8159_v62 = vadd.f32 %v8158_v34, %v8128_v1  ;;  %v8227_v55 = vadd.f32 %v8226_v56, %v8196_v12  ;;  %v7965_v45 = vpack.c.bf16 %v7940_v48, %v7939_v58  ;;  %v7477_v63 = vadd.f32 %v10809_v22, %v15010_v40  ;;  %v7361_v21 = vpop.f32.mrb[149].mxu0  ;;  %v7787_v13 = vpop.f32.mrb[149].mxu1 }
 0x42d   : > { %9160 = vst [vmem:[%s15077_s9 + $0x28] sm:$0xff] %v7964_v46   ;;  %v8129_v49 = vunpack.c.l.bf16 %v7964_v46  ;;  %v8130_v5 = vunpack.c.h.bf16 %v7964_v46  ;;  %v10810_v51 = vpop.f32.mrb[150].mxu0  ;;  %v10874_v32 = vpop.f32.mrb[150].mxu1 }
 0x42e   : > { %v8228_v9 = vadd.f32 %v8227_v55, %v8197_v11  ;;  %9161 = vst [vmem:[%s15077_s9 + $0x30] sm:$0xff] %v7965_v45   ;;  %v8131_v42 = vunpack.c.l.bf16 %v7965_v45  ;;  %v7903_v14 = vadd.f32 %v10873_v52, %v7477_v63  ;;  %v7363_v37 = vpop.f32.mrb[151].mxu0  ;;  %v7789_v2 = vpop.f32.mrb[151].mxu1  ;;  %v8132_v30 = vunpack.c.h.bf16 %v7965_v45 }
 0x42f   : > { %v8160_v50 = vadd.f32 %v8159_v62, %v8129_v49  ;;  %v8198_v38 = vmul.f32 %v8129_v49, %v8129_v49  ;;  %v7476_v16 = vadd.f32 %v7363_v37, %v15013_v23  ;;  %v8199_v39 = vmul.f32 %v8130_v5, %v8130_v5 }
 0x430   : > { %v8200_v54 = vmul.f32 %v8131_v42, %v8131_v42  ;;  %v7942_v59 = vadd.f32 %v15069_v27, %v7903_v14  ;;  %v8201_v3 = vmul.f32 %v8132_v30, %v8132_v30 }
 0x431   : > { %v8161_v40 = vadd.f32 %v8160_v50, %v8130_v5  ;;  %v8229_v19 = vadd.f32 %v8228_v9, %v8198_v38  ;;  %v7902_v56 = vadd.f32 %v7789_v2, %v7476_v16 }
 0x433   : > { %v8230_v15 = vadd.f32 %v8229_v19, %v8199_v39  ;;  %v8162_v0 = vadd.f32 %v8161_v40, %v8131_v42  ;;  %v7941_v44 = vadd.f32 %v15069_v27, %v7902_v56  ;;  %v10813_v57 = vpop.f32.mrb[152].mxu0  ;;  %v10877_v26 = vpop.f32.mrb[152].mxu1 }
 0x434   : > { %v7375_v53 = vpop.f32.mrb[153].mxu0  ;;  %v7801_v61 = vpop.f32.mrb[153].mxu1 }
 0x435   : > { %v8163_v60 = vadd.f32 %v8162_v0, %v8132_v30  ;;  %v8231_v23 = vadd.f32 %v8230_v15, %v8200_v54  ;;  %v7966_v36 = vpack.c.bf16 %v7942_v59, %v7941_v44  ;;  %v7478_v1 = vadd.f32 %v7375_v53, %v15017_v6  ;;  %v10814_v29 = vpop.f32.mrb[154].mxu0  ;;  %v10878_v34 = vpop.f32.mrb[154].mxu1 }
 0x436   : > { %v7480_v28 = vadd.f32 %v10814_v29, %v15020_v20  ;;  %v7378_v12 = vpop.f32.mrb[155].mxu0  ;;  %v7804_v22 = vpop.f32.mrb[155].mxu1 }
 0x437   : > { %v8232_v58 = vadd.f32 %v8231_v23, %v8201_v3  ;;  %9162 = vst [vmem:[%s15077_s9 + $0x38] sm:$0xff] %v7966_v36   ;;  %v8133_v48 = vunpack.c.l.bf16 %v7966_v36  ;;  %v8134_v11 = vunpack.c.h.bf16 %v7966_v36  ;;  %v7904_v46 = vadd.f32 %v7801_v61, %v7478_v1 }
 0x438   : > { %v7906_v62 = vadd.f32 %v10878_v34, %v7480_v28  ;;  %v7479_v55 = vadd.f32 %v7378_v12, %v15022_v41 }
 0x439   : > { %v8164_v45 = vadd.f32 %v8163_v60, %v8133_v48  ;;  %v8202_v63 = vmul.f32 %v8133_v48, %v8133_v48  ;;  %v8203_v6 = vmul.f32 %v8134_v11, %v8134_v11  ;;  %v7943_v20 = vadd.f32 %v15069_v27, %v7904_v46 }
 0x43a   : > { %v7905_v52 = vadd.f32 %v7804_v22, %v7479_v55 }
 0x43b   : > { %v8165_v21 = vadd.f32 %v8164_v45, %v8134_v11  ;;  %v8233_v49 = vadd.f32 %v8232_v58, %v8202_v63  ;;  %v10817_v5 = vpop.f32.mrb[156].mxu0  ;;  %v10881_v9 = vpop.f32.mrb[156].mxu1 }
 0x43c   : > { %v7944_v13 = vadd.f32 %v15069_v27, %v7905_v52  ;;  %v7482_v51 = vadd.f32 %v10817_v5, %v15026_v31  ;;  %v7390_v42 = vpop.f32.mrb[157].mxu0  ;;  %v7816_v41 = vpop.f32.mrb[157].mxu1  ;;  %v7945_v31 = vadd.f32 %v15069_v27, %v7906_v62 }
 0x43d   : > { %v8234_v14 = vadd.f32 %v8233_v49, %v8203_v6  ;;  %v7481_v32 = vadd.f32 %v7390_v42, %v15029_v18  ;;  %v10818_v37 = vpop.f32.mrb[158].mxu0  ;;  %v10882_v2 = vpop.f32.mrb[158].mxu1 }
 0x43e   : > { %v7967_v50 = vpack.c.bf16 %v7944_v13, %v7943_v20  ;;  %v7908_v38 = vadd.f32 %v10881_v9, %v7482_v51  ;;  %v7483_v16 = vadd.f32 %v10818_v37, %v15031_v24  ;;  %v7393_v30 = vpop.f32.mrb[159].mxu0  ;;  %v7819_v39 = vpop.f32.mrb[159].mxu1 }
 0x43f   : > { %v7907_v40 = vadd.f32 %v7816_v41, %v7481_v32 }
 0x440   : > { %9163 = vst [vmem:[%s15077_s9 + $0x40] sm:$0xff] %v7967_v50   ;;  %v8135_v19 = vunpack.c.l.bf16 %v7967_v50  ;;  %v8136_v56 = vunpack.c.h.bf16 %v7967_v50  ;;  %v7909_v54 = vadd.f32 %v10882_v2, %v7483_v16  ;;  %v7947_v59 = vadd.f32 %v15069_v27, %v7908_v38 }
 0x441   : > { %v7946_v15 = vadd.f32 %v15069_v27, %v7907_v40 }
 0x442   : > { %v8166_v18 = vadd.f32 %v8165_v21, %v8135_v19  ;;  %v8204_v0 = vmul.f32 %v8135_v19, %v8135_v19  ;;  %v7948_v44 = vadd.f32 %v15069_v27, %v7909_v54  ;;  %v8205_v24 = vmul.f32 %v8136_v56, %v8136_v56 }
 0x443   : > { %v7968_v57 = vpack.c.bf16 %v7946_v15, %v7945_v31  ;;  %v10821_v3 = vpop.f32.mrb[160].mxu0  ;;  %v10885_v36 = vpop.f32.mrb[160].mxu1 }
 0x444   : > { %v8167_v26 = vadd.f32 %v8166_v18, %v8136_v56  ;;  %v8235_v53 = vadd.f32 %v8234_v14, %v8204_v0  ;;  %v7969_v60 = vpack.c.bf16 %v7948_v44, %v7947_v59  ;;  %v7485_v23 = vadd.f32 %v10821_v3, %v15034_v17  ;;  %v7405_v1 = vpop.f32.mrb[161].mxu0  ;;  %v7831_v28 = vpop.f32.mrb[161].mxu1 }
 0x445   : > { %9164 = vst [vmem:[%s15077_s9 + $0x48] sm:$0xff] %v7968_v57   ;;  %v8137_v61 = vunpack.c.l.bf16 %v7968_v57  ;;  %v8138_v29 = vunpack.c.h.bf16 %v7968_v57  ;;  %v10822_v34 = vpop.f32.mrb[162].mxu0  ;;  %v10886_v11 = vpop.f32.mrb[162].mxu1 }
 0x446   : > { %v8236_v12 = vadd.f32 %v8235_v53, %v8205_v24  ;;  %9165 = vst [vmem:[%s15077_s9 + $0x50] sm:$0xff] %v7969_v60   ;;  %v8139_v58 = vunpack.c.l.bf16 %v7969_v60  ;;  %v7911_v48 = vadd.f32 %v10885_v36, %v7485_v23  ;;  %v7407_v46 = vpop.f32.mrb[163].mxu0  ;;  %v7833_v45 = vpop.f32.mrb[163].mxu1  ;;  %v8140_v63 = vunpack.c.h.bf16 %v7969_v60 }
 0x447   : > { %v8168_v22 = vadd.f32 %v8167_v26, %v8137_v61  ;;  %v8206_v62 = vmul.f32 %v8137_v61, %v8137_v61  ;;  %v7484_v55 = vadd.f32 %v7407_v46, %v15037_v7  ;;  %v8207_v52 = vmul.f32 %v8138_v29, %v8138_v29 }
 0x448   : > { %v8208_v49 = vmul.f32 %v8139_v58, %v8139_v58  ;;  %v7950_v13 = vadd.f32 %v15069_v27, %v7911_v48  ;;  %v8209_v42 = vmul.f32 %v8140_v63, %v8140_v63 }
 0x449   : > { %v8169_v17 = vadd.f32 %v8168_v22, %v8138_v29  ;;  %v8237_v21 = vadd.f32 %v8236_v12, %v8206_v62  ;;  %v7910_v6 = vadd.f32 %v7833_v45, %v7484_v55 }
 0x44b   : > { %v8238_v5 = vadd.f32 %v8237_v21, %v8207_v52  ;;  %v8170_v20 = vadd.f32 %v8169_v17, %v8139_v58  ;;  %v7949_v51 = vadd.f32 %v15069_v27, %v7910_v6  ;;  %v10825_v9 = vpop.f32.mrb[164].mxu0  ;;  %v10889_v14 = vpop.f32.mrb[164].mxu1 }
 0x44c   : > { %v7419_v32 = vpop.f32.mrb[165].mxu0  ;;  %v7845_v38 = vpop.f32.mrb[165].mxu1 }
 0x44d   : > { %v8171_v41 = vadd.f32 %v8170_v20, %v8140_v63  ;;  %v8239_v7 = vadd.f32 %v8238_v5, %v8208_v49  ;;  %v7970_v37 = vpack.c.bf16 %v7950_v13, %v7949_v51  ;;  %v7486_v50 = vadd.f32 %v7419_v32, %v15041_v8  ;;  %v10826_v16 = vpop.f32.mrb[166].mxu0  ;;  %v10890_v30 = vpop.f32.mrb[166].mxu1 }
 0x44e   : > { %v7488_v2 = vadd.f32 %v10826_v16, %v15044_v4  ;;  %v7422_v40 = vpop.f32.mrb[167].mxu0  ;;  %v7848_v31 = vpop.f32.mrb[167].mxu1 }
 0x44f   : > { %v8240_v39 = vadd.f32 %v8239_v7, %v8209_v42  ;;  %9166 = vst [vmem:[%s15077_s9 + $0x58] sm:$0xff] %v7970_v37   ;;  %v8141_v19 = vunpack.c.l.bf16 %v7970_v37  ;;  %v8142_v56 = vunpack.c.h.bf16 %v7970_v37  ;;  %v7912_v54 = vadd.f32 %v7845_v38, %v7486_v50 }
 0x450   : > { %v7914_v15 = vadd.f32 %v10890_v30, %v7488_v2  ;;  %v7487_v18 = vadd.f32 %v7422_v40, %v15046_v43 }
 0x451   : > { %v8172_v0 = vadd.f32 %v8171_v41, %v8141_v19  ;;  %v8210_v59 = vmul.f32 %v8141_v19, %v8141_v19  ;;  %v8211_v8 = vmul.f32 %v8142_v56, %v8142_v56  ;;  %v7951_v4 = vadd.f32 %v15069_v27, %v7912_v54 }
 0x452   : > { %v7913_v44 = vadd.f32 %v7848_v31, %v7487_v18 }
 0x453   : > { %v8173_v24 = vadd.f32 %v8172_v0, %v8142_v56  ;;  %v8241_v57 = vadd.f32 %v8240_v39, %v8210_v59  ;;  %v10829_v3 = vpop.f32.mrb[168].mxu0  ;;  %v10893_v60 = vpop.f32.mrb[168].mxu1 }
 0x454   : > { %v7952_v26 = vadd.f32 %v15069_v27, %v7913_v44  ;;  %v7490_v53 = vadd.f32 %v10829_v3, %v15050_v25  ;;  %v7434_v23 = vpop.f32.mrb[169].mxu0  ;;  %v7860_v43 = vpop.f32.mrb[169].mxu1  ;;  %v7953_v25 = vadd.f32 %v15069_v27, %v7914_v15 }
 0x455   : > { %v8242_v36 = vadd.f32 %v8241_v57, %v8211_v8  ;;  %v7489_v1 = vadd.f32 %v7434_v23, %v15053_v35  ;;  %v10830_v61 = vpop.f32.mrb[170].mxu0  ;;  %v10894_v12 = vpop.f32.mrb[170].mxu1 }
 0x456   : > { %v7971_v29 = vpack.c.bf16 %v7952_v26, %v7951_v4  ;;  %v7916_v28 = vadd.f32 %v10893_v60, %v7490_v53  ;;  %v7491_v34 = vadd.f32 %v10830_v61, %v15055_v33  ;;  %v7437_v58 = vpop.f32.mrb[171].mxu0  ;;  %v7863_v11 = vpop.f32.mrb[171].mxu1 }
 0x457   : > { %v7915_v48 = vadd.f32 %v7860_v43, %v7489_v1 }
 0x458   : > { %9167 = vst [vmem:[%s15077_s9 + $0x60] sm:$0xff] %v7971_v29   ;;  %v8143_v46 = vunpack.c.l.bf16 %v7971_v29  ;;  %v8144_v22 = vunpack.c.h.bf16 %v7971_v29  ;;  %v7917_v62 = vadd.f32 %v10894_v12, %v7491_v34  ;;  %v7955_v63 = vadd.f32 %v15069_v27, %v7916_v28 }
 0x459   : > { %v7954_v55 = vadd.f32 %v15069_v27, %v7915_v48 }
 0x45a   : > { %v8174_v35 = vadd.f32 %v8173_v24, %v8143_v46  ;;  %v8212_v45 = vmul.f32 %v8143_v46, %v8143_v46  ;;  %v7956_v17 = vadd.f32 %v15069_v27, %v7917_v62  ;;  %v8213_v33 = vmul.f32 %v8144_v22, %v8144_v22 }
 0x45b   : > { %v7972_v52 = vpack.c.bf16 %v7954_v55, %v7953_v25  ;;  %v10833_v21 = vpop.f32.mrb[172].mxu0  ;;  %v10897_v13 = vpop.f32.mrb[172].mxu1 }
 0x45c   : > { %v8175_v6 = vadd.f32 %v8174_v35, %v8144_v22  ;;  %v8243_v49 = vadd.f32 %v8242_v36, %v8212_v45  ;;  %v7973_v5 = vpack.c.bf16 %v7956_v17, %v7955_v63  ;;  %v7493_v20 = vadd.f32 %v10833_v21, %v15058_v10  ;;  %v7449_v51 = vpop.f32.mrb[173].mxu0  ;;  %v7875_v14 = vpop.f32.mrb[173].mxu1 }
 0x45d   : > { %9168 = vst [vmem:[%s15077_s9 + $0x68] sm:$0xff] %v7972_v52   ;;  %v8145_v9 = vunpack.c.l.bf16 %v7972_v52  ;;  %v8146_v42 = vunpack.c.h.bf16 %v7972_v52  ;;  %v10834_v32 = vpop.f32.mrb[174].mxu0  ;;  %v10898_v50 = vpop.f32.mrb[174].mxu1 }
 0x45e   : > { %v8244_v41 = vadd.f32 %v8243_v49, %v8213_v33  ;;  %9169 = vst [vmem:[%s15077_s9 + $0x70] sm:$0xff] %v7973_v5   ;;  %v8147_v7 = vunpack.c.l.bf16 %v7973_v5  ;;  %v7919_v37 = vadd.f32 %v10897_v13, %v7493_v20  ;;  %v7451_v38 = vpop.f32.mrb[175].mxu0  ;;  %v7877_v40 = vpop.f32.mrb[175].mxu1  ;;  %v8148_v10 = vunpack.c.h.bf16 %v7973_v5 }
 0x45f   : > { %v8176_v16 = vadd.f32 %v8175_v6, %v8145_v9  ;;  %v8214_v2 = vmul.f32 %v8145_v9, %v8145_v9  ;;  %v7492_v30 = vadd.f32 %v7451_v38, %v15061_v47  ;;  %v8215_v19 = vmul.f32 %v8146_v42, %v8146_v42 }
 0x460   : > { %v8216_v31 = vmul.f32 %v8147_v7, %v8147_v7  ;;  %v7958_v0 = vadd.f32 %v15069_v27, %v7919_v37  ;;  %v8217_v24 = vmul.f32 %v8148_v10, %v8148_v10 }
 0x461   : > { %v8177_v39 = vadd.f32 %v8176_v16, %v8146_v42  ;;  %v8245_v56 = vadd.f32 %v8244_v41, %v8214_v2  ;;  %v7918_v54 = vadd.f32 %v7877_v40, %v7492_v30 }
 0x463   : > { %v8246_v15 = vadd.f32 %v8245_v56, %v8215_v19  ;;  %v8178_v18 = vadd.f32 %v8177_v39, %v8147_v7  ;;  %v7957_v59 = vadd.f32 %v15069_v27, %v7918_v54 }
 0x465   : > { %v8179_v44 = vadd.f32 %v8178_v18, %v8148_v10  ;;  %v8247_v8 = vadd.f32 %v8246_v15, %v8216_v31  ;;  %v7974_v57 = vpack.c.bf16 %v7958_v0, %v7957_v59 }
 0x467   : > { %v8248_v3 = vadd.f32 %v8247_v8, %v8217_v24  ;;  %9170 = vst [vmem:[%s15077_s9 + $0x78] sm:$0xff] %v7974_v57   ;;  %v8149_v47 = vunpack.c.l.bf16 %v7974_v57  ;;  %v8150_v4 = vunpack.c.h.bf16 %v7974_v57 }
 0x469   : > { %v8180_v26 = vadd.f32 %v8179_v44, %v8149_v47  ;;  %v8218_v53 = vmul.f32 %v8149_v47, %v8149_v47  ;;  %v8219_v23 = vmul.f32 %v8150_v4, %v8150_v4 }
 0x46b   : > { %v8181_v60 = vadd.f32 %v8180_v26, %v8150_v4  ;;  %v8249_v36 = vadd.f32 %v8248_v3, %v8218_v53 }
 0x46d   : > { %v8182_v1 = vrot.slane %v8181_v60, 4  ;;  %v8250_v43 = vadd.f32 %v8249_v36, %v8219_v23 }
 0x46f   : > { %v8183_v61 = vadd.f32 %v8182_v1, %v8181_v60  ;;  %v8251_v29 = vrot.slane %v8250_v43, 4 }
 0x471   : > { %v8184_v28 = vrot.slane %v8183_v61, 2  ;;  %v8252_v27 = vadd.f32 %v8251_v29, %v8250_v43 }
 0x473   : > { %v8185_v34 = vadd.f32 %v8184_v28, %v8183_v61  ;;  %v8253_v12 = vrot.slane %v8252_v27, 2 }
 0x475   : > { %v8186_v58 = vrot.slane %v8185_v34, 1  ;;  %v8254_v48 = vadd.f32 %v8253_v12, %v8252_v27 }
 0x477   : > { %v8255_v11 = vrot.slane %v8254_v48, 1  ;;  %v8187_v46 = vadd.f32 %v8186_v58, %v8185_v34 }
 0x479   : > { %v8256_v22 = vadd.f32 %v8255_v11, %v8254_v48 }
 0x47b   : > { %v8258_v62 = vsel %vm8257_vm2, %v8187_v46, %v8256_v22 }
 0x47c   : > { %8259 = vst [vmem:[%s358_s13] sm:$0x3] %v8258_v62 }
 0x47d PF: > { %s17_s23 = sadd.s32 1, %s11130_s23   ;;  %s16353_s21 = smov %s11126_s22 }
 0x47e   : > { %p14_p5 = scmp.ge.s32.totalorder %s17_s23, 4   ;;  %s16354_s22 = smov %s16356_s24 }
 0x480   :  { %16 = sbr.rel (!%p14_p5) target bundleno = 2 (0x2), region = 116 }

</bundles_post_ra>
